<compile_context>
chip_gen: v7x
topology: tpu7x:2x2x1
jax: 0.10.0
libtpu: 0.0.40
codegen_flags: <defaults>
</compile_context>

<pallas_src>
import math

import jax
import jax.numpy as jnp
from jax.experimental import pallas as pl
from jax.experimental.pallas import tpu as pltpu


def _round_up(x, m):
    return (x + m - 1) // m * m


def _lane_roll(v, d, n):
    """dest lane m <- source lane (m + d) mod n, via a 32-bit XLU lane rotate."""
    if d % n == 0:
        return v
    shift = (-d) % n                      # jnp.roll semantics: out[m]=in[m-shift]
    if v.dtype.itemsize == 4:
        return pltpu.roll(v, shift=shift, axis=1)
    # roll sub-32-bit data through a 32-bit reinterpretation (lanes unchanged)
    u = pltpu.bitcast(v, jnp.uint32)
    return pltpu.bitcast(pltpu.roll(u, shift=shift, axis=1), v.dtype)


def _make_kernel(Tt, C_out, CPx, CPh, Mh, shifts):
    """Tt: time steps / grid iter;  CPx/CPh: padded in/hidden channel rows;
    Mh: lanes per time step (batch * halo-padded H*W, multiple of 128);
    shifts: static per-tap lane offsets (dest lane m reads source lane m+d)."""
    NT = Tt * Mh

    def kernel(x_ref, wx_ref, wh_ref, b_ref, m_ref,
               out_ref, cn_ref,
               ax_scr, gx_scr, ah_scr, h_scr):
        # ---- first time block: reset recurrent state (hx=None -> zeros) ----
        @pl.when(pl.program_id(0) == 0)
        def _init():
            h_scr[...] = jnp.zeros(h_scr.shape, h_scr.dtype)
            cn_ref[...] = jnp.zeros(cn_ref.shape, cn_ref.dtype)

        # ---- phase 1 (off the recurrent critical path): input-conv gates ----
        # x_ref is (CPx, Tt*Mh) bf16 with time folded into lanes; each image
        # carries its own zero halo, so a lane roll by a tap offset never
        # crosses a (time, batch) boundary for any real output lane.
        xb = x_ref[...]
        for tap, d in enumerate(shifts):
            ax_scr[tap * CPx:(tap + 1) * CPx, :] = _lane_roll(xb, d, NT)
        gx_scr[...] = (
            jnp.dot(wx_ref[...], ax_scr[...],
                    preferred_element_type=jnp.float32)
            + b_ref[...])                                  # (G, Tt*Mh) f32

        hmask = m_ref[...]                                 # (C_out, Mh) f32

        # ---- phase 2: serial LSTM recurrence over the Tt steps -------------
        for tt in range(Tt):
            # hidden-conv im2col slab: ntaps rolled copies of the bf16 h slab
            hb = h_scr[...]                                # (CPh, Mh) bf16
            for tap, d in enumerate(shifts):
                ah_scr[tap * CPh:(tap + 1) * CPh, :] = _lane_roll(hb, d, Mh)

            gates = (jnp.dot(wh_ref[...], ah_scr[...],
                             preferred_element_type=jnp.float32)
                     + gx_scr[:, tt * Mh:(tt + 1) * Mh])   # (4*C_out, Mh) f32

            i_g = jax.nn.sigmoid(gates[0 * C_out:1 * C_out])
            f_g = jax.nn.sigmoid(gates[1 * C_out:2 * C_out])
            g_g = jnp.tanh(gates[2 * C_out:3 * C_out])
            o_g = jax.nn.sigmoid(gates[3 * C_out:4 * C_out])

            c_new = f_g * cn_ref[...] + i_g * g_g
            h_new = o_g * jnp.tanh(c_new) * hmask          # keep halo lanes 0
            h_b16 = h_new.astype(jnp.bfloat16)

            cn_ref[...] = c_new                            # resident f32 cell
            h_scr[0:C_out, :] = h_b16                      # bf16 recirculation
            out_ref[tt] = h_b16                            # lane-dense bf16 out

    return kernel


def conv_lstm_forward(x, w_ih, w_hh, b_ih, b_hh, *, time_block=8):
    """ConvLSTM ("same" padding, stride=1, dilation=1, groups=1), hx=None.

    x:    (T, B, C_in, H, W) float32   (seq-major NCHW)
    w_ih: (4*C_out, C_in, kh, kw), w_hh: (4*C_out, C_out, kh, kw)
    b_ih, b_hh: (4*C_out,)
    returns: output (T, B, C_out, H, W), (h_n, c_n) each (1, B, C_out, H, W)
    """
    T, B, C_in, H, W = (int(s) for s in x.shape)
    G = int(w_ih.shape[0])
    C_out = G // 4
    kh, kw = int(w_ih.shape[2]), int(w_ih.shape[3])
    # "same" padding exactly as ConvNdWithSamePadding (stride=1, dilation=1)
    pt, pb = (kh - 1) // 2, kh // 2
    pwl, pwr = (kw - 1) // 2, kw // 2
    Hp, Wp = H + pt + pb, W + pwl + pwr
    ntaps = kh * kw

    # halo lane layout: lane = b*Hp*Wp + (y+pt)*Wp + (x+pwl); real pixels sit
    # inside a zero border, so conv taps are plain lane shifts (no masks).
    Sp = Hp * Wp
    Mreal = B * Sp
    Mh = _round_up(Mreal, 128)            # lanes per time step (lane-dense)

    Tt = max(1, min(time_block, T))
    while T % Tt:
        Tt -= 1
    NT = Tt * Mh

    CPx = _round_up(C_in, 16)             # bf16 sublane tile
    CPh = _round_up(C_out, 16)
    Kx, Kh = ntaps * CPx, ntaps * CPh

    # static per-tap lane shift: dest lane m reads source lane m + d
    shifts = tuple((ky - pt) * Wp + (kx - pwl)
                   for ky in range(kh) for kx in range(kw))

    # ---- weights: (G, ntaps*CP) slabs, bf16; bias applied post-matmul ----
    wx = jnp.zeros((G, Kx), jnp.float32)
    wh = jnp.zeros((G, Kh), jnp.float32)
    for ky in range(kh):
        for kx in range(kw):
            tap = ky * kw + kx
            wx = wx.at[:, tap * CPx:tap * CPx + C_in].set(
                w_ih[:, :, ky, kx].astype(jnp.float32))
            wh = wh.at[:, tap * CPh:tap * CPh + C_out].set(
                w_hh[:, :, ky, kx].astype(jnp.float32))
    wx = wx.astype(jnp.bfloat16)
    wh = wh.astype(jnp.bfloat16)
    bias = (b_ih + b_hh).astype(jnp.float32).reshape(G, 1)

    # ---- input: halo-padded, channel rows padded, time folded into lanes ----
    xp = jnp.zeros((T, CPx, B, Hp, Wp), jnp.bfloat16)
    xp = xp.at[:, :C_in, :, pt:pt + H, pwl:pwl + W].set(
        jnp.transpose(x, (0, 2, 1, 3, 4)).astype(jnp.bfloat16))
    xp = xp.reshape(T, CPx, Mreal)
    if Mh > Mreal:
        xp = jnp.pad(xp, ((0, 0), (0, 0), (0, Mh - Mreal)))
    xt = jnp.transpose(xp, (1, 0, 2)).reshape(CPx, T * Mh)

    # ---- mask of real (non-halo, non-pad) lanes, pre-broadcast (host side) ----
    lane = jnp.arange(Mh)
    r = lane % Sp
    yy, xx = r // Wp, r % Wp
    real = ((lane < Mreal) & (yy >= pt) & (yy < pt + H)
            & (xx >= pwl) & (xx < pwl + W))
    hmask = jnp.broadcast_to(real.astype(jnp.float32)[None, :], (C_out, Mh))

    kernel = _make_kernel(Tt, C_out, CPx, CPh, Mh, shifts)

    # explicit VMEM budget (double-buffered I/O blocks + scratch), clamped so it
    # also fits v7x's smaller (64 MiB physical) VMEM.
    nbytes = (2 * CPx * NT * 2                         # x block (bf16, 2 bufs)
              + 2 * G * (Kx + Kh) * 2 + 2 * G * 4      # weights + bias
              + 2 * C_out * Mh * 4                     # mask
              + 2 * Tt * C_out * Mh * 2                # out block (bf16, 2 bufs)
              + 2 * C_out * Mh * 4                     # c_n block
              + Kx * NT * 2                            # a_x slab
              + G * NT * 4                             # gates_x scratch
              + Kh * Mh * 2 + CPh * Mh * 2)            # a_h slab + h state
    vmem_limit = int(min(64 * 2 ** 20, max(32 * 2 ** 20, 2 * nbytes)))

    out_flat, c_flat = pl.pallas_call(
        kernel,
        out_shape=(
            jax.ShapeDtypeStruct((T, C_out, Mh), jnp.bfloat16),
            jax.ShapeDtypeStruct((C_out, Mh), jnp.float32),
        ),
        grid_spec=pltpu.PrefetchScalarGridSpec(
            num_scalar_prefetch=0,
            grid=(T // Tt,),                            # serial time-block axis
            in_specs=[
                pl.BlockSpec((CPx, NT), lambda t: (0, t)),
                pl.BlockSpec((G, Kx), lambda t: (0, 0)),
                pl.BlockSpec((G, Kh), lambda t: (0, 0)),
                pl.BlockSpec((G, 1), lambda t: (0, 0)),
                pl.BlockSpec((C_out, Mh), lambda t: (0, 0)),
            ],
            out_specs=[
                pl.BlockSpec((Tt, C_out, Mh), lambda t: (t, 0, 0)),
                pl.BlockSpec((C_out, Mh), lambda t: (0, 0)),
            ],
            scratch_shapes=[
                pltpu.VMEM((Kx, NT), jnp.bfloat16),     # x im2col slab
                pltpu.VMEM((G, NT), jnp.float32),       # precomputed x gates
                pltpu.VMEM((Kh, Mh), jnp.bfloat16),     # h im2col slab
                pltpu.VMEM((CPh, Mh), jnp.bfloat16),    # recirculated hidden
            ],
        ),
        compiler_params=pltpu.CompilerParams(
            dimension_semantics=("arbitrary",),
            vmem_limit_bytes=vmem_limit),
    )(xt, wx, wh, bias, hmask)

    # strip halo / lane padding, back to PyTorch layout
    out = out_flat[:, :, :Mreal].reshape(T, C_out, B, Hp, Wp)
    out = out[:, :, :, pt:pt + H, pwl:pwl + W]
    out = jnp.transpose(out, (0, 2, 1, 3, 4)).astype(jnp.float32)
    c_n = c_flat[:, :Mreal].reshape(C_out, B, Hp, Wp)
    c_n = c_n[:, :, pt:pt + H, pwl:pwl + W]
    c_n = jnp.transpose(c_n, (1, 0, 2, 3))[None]
    h_n = out[-1][None]
    return out, (h_n, c_n)


def conv_lstm_reference(x, w_ih, w_hh, b_ih, b_hh):
    """Pure-JAX f32 reference mirroring the PyTorch module (for verification)."""
    T, B, C_in, H, W = x.shape
    G = w_ih.shape[0]
    C_out = G // 4
    kh, kw = int(w_ih.shape[2]), int(w_ih.shape[3])
    pads = [((kh - 1) // 2, kh // 2), ((kw - 1) // 2, kw // 2)]
    w_ih_hwio = jnp.transpose(w_ih, (2, 3, 1, 0))
    w_hh_hwio = jnp.transpose(w_hh, (2, 3, 1, 0))

    def conv(inp_nhwc, w_hwio, b):
        y = jax.lax.conv_general_dilated(
            inp_nhwc, w_hwio, (1, 1), pads,
            dimension_numbers=('NHWC', 'HWIO', 'NHWC'))
        return y + b.reshape(1, 1, 1, -1)

    x_nhwc = jnp.transpose(x, (0, 1, 3, 4, 2))
    h = jnp.zeros((B, H, W, C_out), jnp.float32)
    c = jnp.zeros_like(h)
    outs = []
    for t in range(T):
        gates = conv(x_nhwc[t], w_ih_hwio, b_ih) + conv(h, w_hh_hwio, b_hh)
        i, f, g, o = jnp.split(gates, 4, axis=-1)
        i = jax.nn.sigmoid(i)
        f = jax.nn.sigmoid(f)
        g = jnp.tanh(g)
        o = jax.nn.sigmoid(o)
        c = f * c + i * g
        h = o * jnp.tanh(c)
        outs.append(jnp.transpose(h, (0, 3, 1, 2)))
    output = jnp.stack(outs, 0)
    h_n = jnp.transpose(h, (0, 3, 1, 2))[None]
    c_n = jnp.transpose(c, (0, 3, 1, 2))[None]
    return output, (h_n, c_n)


if __name__ == "__main__":
    # ConvNdRNNBase('LSTM', in_channels=4, out_channels=8, kernel_size=3,
    #               num_layers=1, bias=True, batch_first=False, convndim=2)
    T, B, C_in, C_out, H, W, ksz = 8, 2, 4, 8, 16, 16, 3
    G = 4 * C_out

    key = jax.random.PRNGKey(0)
    kxin, k1, k2, k3, k4 = jax.random.split(key, 5)

    stdv = 1.0 / math.sqrt(C_out)  # matches reset_parameters()
    w_ih = jax.random.uniform(k1, (G, C_in, ksz, ksz), jnp.float32, -stdv, stdv)
    w_hh = jax.random.uniform(k2, (G, C_out, ksz, ksz), jnp.float32, -stdv, stdv)
    b_ih = jax.random.uniform(k3, (G,), jnp.float32, -stdv, stdv)
    b_hh = jax.random.uniform(k4, (G,), jnp.float32, -stdv, stdv)

    x = jax.random.normal(kxin, (T, B, C_in, H, W), jnp.float32)

    out, (h_n, c_n) = jax.jit(conv_lstm_forward)(x, w_ih, w_hh, b_ih, b_hh)
    jax.block_until_ready((out, h_n, c_n))

    out_r, (h_r, c_r) = conv_lstm_reference(x, w_ih, w_hh, b_ih, b_hh)
    assert out.shape == (T, B, C_out, H, W)
    assert h_n.shape == (1, B, C_out, H, W) and c_n.shape == (1, B, C_out, H, W)
    # bf16 matmul inputs / bf16 h recirculation / bf16 output stream
    # (f32 MXU accumulation and f32 gating) -> looser tolerance than pure f32
    assert jnp.allclose(out, out_r, rtol=5e-2, atol=5e-2)
    assert jnp.allclose(h_n, h_r, rtol=5e-2, atol=5e-2)
    assert jnp.allclose(c_n, c_r, rtol=5e-2, atol=8e-2)

    print("KERNEL_OK")
</pallas_src>

<mosaic_0001>
module attributes {stable_mosaic.version = 11 : i64} {
  func.func @kernel(%arg0: i32, %arg1: memref<16x6144xbf16, #tpu.memory_space<vmem>>, %arg2: memref<32x144xbf16, #tpu.memory_space<vmem>>, %arg3: memref<32x144xbf16, #tpu.memory_space<vmem>>, %arg4: memref<32x1xf32, #tpu.memory_space<vmem>>, %arg5: memref<8x768xf32, #tpu.memory_space<vmem>>, %arg6: memref<8x8x768xbf16, #tpu.memory_space<vmem>>, %arg7: memref<8x768xf32, #tpu.memory_space<vmem>>, %arg8: memref<144x6144xbf16, #tpu.memory_space<vmem>>, %arg9: memref<32x6144xf32, #tpu.memory_space<vmem>>, %arg10: memref<144x768xbf16, #tpu.memory_space<vmem>>, %arg11: memref<16x768xbf16, #tpu.memory_space<vmem>>) attributes {dimension_semantics = [#tpu.dimension_semantics<arbitrary>], iteration_bounds = array<i64: 1>, scalar_prefetch = 0 : i64, scratch_operands = 4 : i64, tpu.core_type = #tpu.core_type<tc>, window_params = [{transform_indices = @transform_0, window_bounds = array<i64: 16, 6144>}, {pipeline_mode = #tpu.pipeline_mode<synchronous>, transform_indices = @transform_1, window_bounds = array<i64: 32, 144>}, {pipeline_mode = #tpu.pipeline_mode<synchronous>, transform_indices = @transform_2, window_bounds = array<i64: 32, 144>}, {pipeline_mode = #tpu.pipeline_mode<synchronous>, transform_indices = @transform_3, window_bounds = array<i64: 32, 1>}, {pipeline_mode = #tpu.pipeline_mode<synchronous>, transform_indices = @transform_4, window_bounds = array<i64: 8, 768>}, {transform_indices = @transform_5, window_bounds = array<i64: 8, 8, 768>}, {pipeline_mode = #tpu.pipeline_mode<synchronous>, transform_indices = @transform_6, window_bounds = array<i64: 8, 768>}]} {
    %c0_i32 = arith.constant 0 : i32
    %0 = arith.cmpi eq, %arg0, %c0_i32 : i32
    %1 = arith.extui %0 : i1 to i32
    %c0_i32_0 = arith.constant 0 : i32
    %2 = arith.cmpi ne, %1, %c0_i32_0 : i32
    scf.if %2 {
      %cst_380 = arith.constant 0.000000e+00 : bf16
      %621 = vector.broadcast %cst_380 : bf16 to vector<16x768xbf16>
      %c0_381 = arith.constant 0 : index
      %c0_382 = arith.constant 0 : index
      %622 = vector.load %arg11[%c0_381, %c0_382] : memref<16x768xbf16, #tpu.memory_space<vmem>>, vector<16x768xbf16>
      tpu.vector_store %arg11[%c0_381, %c0_382], %621 {strides = array<i32>} : memref<16x768xbf16, #tpu.memory_space<vmem>>, vector<16x768xbf16>,
      %cst_383 = arith.constant 0.000000e+00 : f32
      %623 = vector.broadcast %cst_383 : f32 to vector<8x768xf32>
      %c0_384 = arith.constant 0 : index
      %c0_385 = arith.constant 0 : index
      %624 = vector.load %arg7[%c0_384, %c0_385] : memref<8x768xf32, #tpu.memory_space<vmem>>, vector<8x768xf32>
      tpu.vector_store %arg7[%c0_384, %c0_385], %623 {strides = array<i32>} : memref<8x768xf32, #tpu.memory_space<vmem>>, vector<8x768xf32>,
    } else {
    }
    %c0 = arith.constant 0 : index
    %c0_1 = arith.constant 0 : index
    %3 = vector.load %arg1[%c0, %c0_1] : memref<16x6144xbf16, #tpu.memory_space<vmem>>, vector<16x6144xbf16>
    %4 = tpu.bitcast %3 : vector<16x6144xbf16> -> vector<8x6144xi32>
    %c19_i32 = arith.constant 19 : i32
    %5 = tpu.dynamic_rotate %4 by %c19_i32 dim 1 : vector<8x6144xi32>, i32 -> vector<8x6144xi32>
    %6 = tpu.bitcast %5 : vector<8x6144xi32> -> vector<16x6144xbf16>
    %c0_2 = arith.constant 0 : index
    %c0_3 = arith.constant 0 : index
    %7 = vector.load %arg8[%c0_2, %c0_3] : memref<144x6144xbf16, #tpu.memory_space<vmem>>, vector<16x6144xbf16>
    tpu.vector_store %arg8[%c0_2, %c0_3], %6 {strides = array<i32>} : memref<144x6144xbf16, #tpu.memory_space<vmem>>, vector<16x6144xbf16>,
    %8 = tpu.bitcast %3 : vector<16x6144xbf16> -> vector<8x6144xi32>
    %c18_i32 = arith.constant 18 : i32
    %9 = tpu.dynamic_rotate %8 by %c18_i32 dim 1 : vector<8x6144xi32>, i32 -> vector<8x6144xi32>
    %10 = tpu.bitcast %9 : vector<8x6144xi32> -> vector<16x6144xbf16>
    %c16 = arith.constant 16 : index
    %c0_4 = arith.constant 0 : index
    %11 = vector.load %arg8[%c16, %c0_4] : memref<144x6144xbf16, #tpu.memory_space<vmem>>, vector<16x6144xbf16>
    tpu.vector_store %arg8[%c16, %c0_4], %10 {strides = array<i32>} : memref<144x6144xbf16, #tpu.memory_space<vmem>>, vector<16x6144xbf16>,
    %12 = tpu.bitcast %3 : vector<16x6144xbf16> -> vector<8x6144xi32>
    %c17_i32 = arith.constant 17 : i32
    %13 = tpu.dynamic_rotate %12 by %c17_i32 dim 1 : vector<8x6144xi32>, i32 -> vector<8x6144xi32>
    %14 = tpu.bitcast %13 : vector<8x6144xi32> -> vector<16x6144xbf16>
    %c32 = arith.constant 32 : index
    %c0_5 = arith.constant 0 : index
    %15 = vector.load %arg8[%c32, %c0_5] : memref<144x6144xbf16, #tpu.memory_space<vmem>>, vector<16x6144xbf16>
    tpu.vector_store %arg8[%c32, %c0_5], %14 {strides = array<i32>} : memref<144x6144xbf16, #tpu.memory_space<vmem>>, vector<16x6144xbf16>,
    %16 = tpu.bitcast %3 : vector<16x6144xbf16> -> vector<8x6144xi32>
    %c1_i32 = arith.constant 1 : i32
    %17 = tpu.dynamic_rotate %16 by %c1_i32 dim 1 : vector<8x6144xi32>, i32 -> vector<8x6144xi32>
    %18 = tpu.bitcast %17 : vector<8x6144xi32> -> vector<16x6144xbf16>
    %c48 = arith.constant 48 : index
    %c0_6 = arith.constant 0 : index
    %19 = vector.load %arg8[%c48, %c0_6] : memref<144x6144xbf16, #tpu.memory_space<vmem>>, vector<16x6144xbf16>
    tpu.vector_store %arg8[%c48, %c0_6], %18 {strides = array<i32>} : memref<144x6144xbf16, #tpu.memory_space<vmem>>, vector<16x6144xbf16>,
    %c64 = arith.constant 64 : index
    %c0_7 = arith.constant 0 : index
    %20 = vector.load %arg8[%c64, %c0_7] : memref<144x6144xbf16, #tpu.memory_space<vmem>>, vector<16x6144xbf16>
    tpu.vector_store %arg8[%c64, %c0_7], %3 {strides = array<i32>} : memref<144x6144xbf16, #tpu.memory_space<vmem>>, vector<16x6144xbf16>,
    %21 = tpu.bitcast %3 : vector<16x6144xbf16> -> vector<8x6144xi32>
    %c6143_i32 = arith.constant 6143 : i32
    %22 = tpu.dynamic_rotate %21 by %c6143_i32 dim 1 : vector<8x6144xi32>, i32 -> vector<8x6144xi32>
    %23 = tpu.bitcast %22 : vector<8x6144xi32> -> vector<16x6144xbf16>
    %c80 = arith.constant 80 : index
    %c0_8 = arith.constant 0 : index
    %24 = vector.load %arg8[%c80, %c0_8] : memref<144x6144xbf16, #tpu.memory_space<vmem>>, vector<16x6144xbf16>
    tpu.vector_store %arg8[%c80, %c0_8], %23 {strides = array<i32>} : memref<144x6144xbf16, #tpu.memory_space<vmem>>, vector<16x6144xbf16>,
    %25 = tpu.bitcast %3 : vector<16x6144xbf16> -> vector<8x6144xi32>
    %c6127_i32 = arith.constant 6127 : i32
    %26 = tpu.dynamic_rotate %25 by %c6127_i32 dim 1 : vector<8x6144xi32>, i32 -> vector<8x6144xi32>
    %27 = tpu.bitcast %26 : vector<8x6144xi32> -> vector<16x6144xbf16>
    %c96 = arith.constant 96 : index
    %c0_9 = arith.constant 0 : index
    %28 = vector.load %arg8[%c96, %c0_9] : memref<144x6144xbf16, #tpu.memory_space<vmem>>, vector<16x6144xbf16>
    tpu.vector_store %arg8[%c96, %c0_9], %27 {strides = array<i32>} : memref<144x6144xbf16, #tpu.memory_space<vmem>>, vector<16x6144xbf16>,
    %29 = tpu.bitcast %3 : vector<16x6144xbf16> -> vector<8x6144xi32>
    %c6126_i32 = arith.constant 6126 : i32
    %30 = tpu.dynamic_rotate %29 by %c6126_i32 dim 1 : vector<8x6144xi32>, i32 -> vector<8x6144xi32>
    %31 = tpu.bitcast %30 : vector<8x6144xi32> -> vector<16x6144xbf16>
    %c112 = arith.constant 112 : index
    %c0_10 = arith.constant 0 : index
    %32 = vector.load %arg8[%c112, %c0_10] : memref<144x6144xbf16, #tpu.memory_space<vmem>>, vector<16x6144xbf16>
    tpu.vector_store %arg8[%c112, %c0_10], %31 {strides = array<i32>} : memref<144x6144xbf16, #tpu.memory_space<vmem>>, vector<16x6144xbf16>,
    %33 = tpu.bitcast %3 : vector<16x6144xbf16> -> vector<8x6144xi32>
    %c6125_i32 = arith.constant 6125 : i32
    %34 = tpu.dynamic_rotate %33 by %c6125_i32 dim 1 : vector<8x6144xi32>, i32 -> vector<8x6144xi32>
    %35 = tpu.bitcast %34 : vector<8x6144xi32> -> vector<16x6144xbf16>
    %c128 = arith.constant 128 : index
    %c0_11 = arith.constant 0 : index
    %36 = vector.load %arg8[%c128, %c0_11] : memref<144x6144xbf16, #tpu.memory_space<vmem>>, vector<16x6144xbf16>
    tpu.vector_store %arg8[%c128, %c0_11], %35 {strides = array<i32>} : memref<144x6144xbf16, #tpu.memory_space<vmem>>, vector<16x6144xbf16>,
    %c0_12 = arith.constant 0 : index
    %c0_13 = arith.constant 0 : index
    %37 = vector.load %arg2[%c0_12, %c0_13] : memref<32x144xbf16, #tpu.memory_space<vmem>>, vector<32x144xbf16>
    %c0_14 = arith.constant 0 : index
    %c0_15 = arith.constant 0 : index
    %38 = vector.load %arg8[%c0_14, %c0_15] : memref<144x6144xbf16, #tpu.memory_space<vmem>>, vector<144x6144xbf16>
    %cst = arith.constant dense<0.000000e+00> : vector<32x6144xf32>
    %39 = tpu.matmul %37, %38, %cst {dimension_numbers = #tpu.dot_dimension_numbers<[1], [0], [0], [1], [0, 0, 1, 1], [], []>} : vector<32x144xbf16>, vector<144x6144xbf16>, vector<32x6144xf32> -> vector<32x6144xf32>
    %c0_16 = arith.constant 0 : index
    %c0_17 = arith.constant 0 : index
    %40 = vector.load %arg4[%c0_16, %c0_17] : memref<32x1xf32, #tpu.memory_space<vmem>>, vector<32x1xf32>
    %41 = vector.broadcast %40 : vector<32x1xf32> to vector<32x6144xf32>
    %42 = arith.addf %39, %41 : vector<32x6144xf32>
    %c0_18 = arith.constant 0 : index
    %c0_19 = arith.constant 0 : index
    %43 = vector.load %arg9[%c0_18, %c0_19] : memref<32x6144xf32, #tpu.memory_space<vmem>>, vector<32x6144xf32>
    tpu.vector_store %arg9[%c0_18, %c0_19], %42 {strides = array<i32>} : memref<32x6144xf32, #tpu.memory_space<vmem>>, vector<32x6144xf32>,
    %c0_20 = arith.constant 0 : index
    %c0_21 = arith.constant 0 : index
    %44 = vector.load %arg5[%c0_20, %c0_21] : memref<8x768xf32, #tpu.memory_space<vmem>>, vector<8x768xf32>
    %c0_22 = arith.constant 0 : index
    %c0_23 = arith.constant 0 : index
    %45 = vector.load %arg11[%c0_22, %c0_23] : memref<16x768xbf16, #tpu.memory_space<vmem>>, vector<16x768xbf16>
    %46 = tpu.bitcast %45 : vector<16x768xbf16> -> vector<8x768xi32>
    %c19_i32_24 = arith.constant 19 : i32
    %47 = tpu.dynamic_rotate %46 by %c19_i32_24 dim 1 : vector<8x768xi32>, i32 -> vector<8x768xi32>
    %48 = tpu.bitcast %47 : vector<8x768xi32> -> vector<16x768xbf16>
    %c0_25 = arith.constant 0 : index
    %c0_26 = arith.constant 0 : index
    %49 = vector.load %arg10[%c0_25, %c0_26] : memref<144x768xbf16, #tpu.memory_space<vmem>>, vector<16x768xbf16>
    tpu.vector_store %arg10[%c0_25, %c0_26], %48 {strides = array<i32>} : memref<144x768xbf16, #tpu.memory_space<vmem>>, vector<16x768xbf16>,
    %50 = tpu.bitcast %45 : vector<16x768xbf16> -> vector<8x768xi32>
    %c18_i32_27 = arith.constant 18 : i32
    %51 = tpu.dynamic_rotate %50 by %c18_i32_27 dim 1 : vector<8x768xi32>, i32 -> vector<8x768xi32>
    %52 = tpu.bitcast %51 : vector<8x768xi32> -> vector<16x768xbf16>
    %c16_28 = arith.constant 16 : index
    %c0_29 = arith.constant 0 : index
    %53 = vector.load %arg10[%c16_28, %c0_29] : memref<144x768xbf16, #tpu.memory_space<vmem>>, vector<16x768xbf16>
    tpu.vector_store %arg10[%c16_28, %c0_29], %52 {strides = array<i32>} : memref<144x768xbf16, #tpu.memory_space<vmem>>, vector<16x768xbf16>,
    %54 = tpu.bitcast %45 : vector<16x768xbf16> -> vector<8x768xi32>
    %c17_i32_30 = arith.constant 17 : i32
    %55 = tpu.dynamic_rotate %54 by %c17_i32_30 dim 1 : vector<8x768xi32>, i32 -> vector<8x768xi32>
    %56 = tpu.bitcast %55 : vector<8x768xi32> -> vector<16x768xbf16>
    %c32_31 = arith.constant 32 : index
    %c0_32 = arith.constant 0 : index
    %57 = vector.load %arg10[%c32_31, %c0_32] : memref<144x768xbf16, #tpu.memory_space<vmem>>, vector<16x768xbf16>
    tpu.vector_store %arg10[%c32_31, %c0_32], %56 {strides = array<i32>} : memref<144x768xbf16, #tpu.memory_space<vmem>>, vector<16x768xbf16>,
    %58 = tpu.bitcast %45 : vector<16x768xbf16> -> vector<8x768xi32>
    %c1_i32_33 = arith.constant 1 : i32
    %59 = tpu.dynamic_rotate %58 by %c1_i32_33 dim 1 : vector<8x768xi32>, i32 -> vector<8x768xi32>
    %60 = tpu.bitcast %59 : vector<8x768xi32> -> vector<16x768xbf16>
    %c48_34 = arith.constant 48 : index
    %c0_35 = arith.constant 0 : index
    %61 = vector.load %arg10[%c48_34, %c0_35] : memref<144x768xbf16, #tpu.memory_space<vmem>>, vector<16x768xbf16>
    tpu.vector_store %arg10[%c48_34, %c0_35], %60 {strides = array<i32>} : memref<144x768xbf16, #tpu.memory_space<vmem>>, vector<16x768xbf16>,
    %c64_36 = arith.constant 64 : index
    %c0_37 = arith.constant 0 : index
    %62 = vector.load %arg10[%c64_36, %c0_37] : memref<144x768xbf16, #tpu.memory_space<vmem>>, vector<16x768xbf16>
    tpu.vector_store %arg10[%c64_36, %c0_37], %45 {strides = array<i32>} : memref<144x768xbf16, #tpu.memory_space<vmem>>, vector<16x768xbf16>,
    %63 = tpu.bitcast %45 : vector<16x768xbf16> -> vector<8x768xi32>
    %c767_i32 = arith.constant 767 : i32
    %64 = tpu.dynamic_rotate %63 by %c767_i32 dim 1 : vector<8x768xi32>, i32 -> vector<8x768xi32>
    %65 = tpu.bitcast %64 : vector<8x768xi32> -> vector<16x768xbf16>
    %c80_38 = arith.constant 80 : index
    %c0_39 = arith.constant 0 : index
    %66 = vector.load %arg10[%c80_38, %c0_39] : memref<144x768xbf16, #tpu.memory_space<vmem>>, vector<16x768xbf16>
    tpu.vector_store %arg10[%c80_38, %c0_39], %65 {strides = array<i32>} : memref<144x768xbf16, #tpu.memory_space<vmem>>, vector<16x768xbf16>,
    %67 = tpu.bitcast %45 : vector<16x768xbf16> -> vector<8x768xi32>
    %c751_i32 = arith.constant 751 : i32
    %68 = tpu.dynamic_rotate %67 by %c751_i32 dim 1 : vector<8x768xi32>, i32 -> vector<8x768xi32>
    %69 = tpu.bitcast %68 : vector<8x768xi32> -> vector<16x768xbf16>
    %c96_40 = arith.constant 96 : index
    %c0_41 = arith.constant 0 : index
    %70 = vector.load %arg10[%c96_40, %c0_41] : memref<144x768xbf16, #tpu.memory_space<vmem>>, vector<16x768xbf16>
    tpu.vector_store %arg10[%c96_40, %c0_41], %69 {strides = array<i32>} : memref<144x768xbf16, #tpu.memory_space<vmem>>, vector<16x768xbf16>,
    %71 = tpu.bitcast %45 : vector<16x768xbf16> -> vector<8x768xi32>
    %c750_i32 = arith.constant 750 : i32
    %72 = tpu.dynamic_rotate %71 by %c750_i32 dim 1 : vector<8x768xi32>, i32 -> vector<8x768xi32>
    %73 = tpu.bitcast %72 : vector<8x768xi32> -> vector<16x768xbf16>
    %c112_42 = arith.constant 112 : index
    %c0_43 = arith.constant 0 : index
    %74 = vector.load %arg10[%c112_42, %c0_43] : memref<144x768xbf16, #tpu.memory_space<vmem>>, vector<16x768xbf16>
    tpu.vector_store %arg10[%c112_42, %c0_43], %73 {strides = array<i32>} : memref<144x768xbf16, #tpu.memory_space<vmem>>, vector<16x768xbf16>,
    %75 = tpu.bitcast %45 : vector<16x768xbf16> -> vector<8x768xi32>
    %c749_i32 = arith.constant 749 : i32
    %76 = tpu.dynamic_rotate %75 by %c749_i32 dim 1 : vector<8x768xi32>, i32 -> vector<8x768xi32>
    %77 = tpu.bitcast %76 : vector<8x768xi32> -> vector<16x768xbf16>
    %c128_44 = arith.constant 128 : index
    %c0_45 = arith.constant 0 : index
    %78 = vector.load %arg10[%c128_44, %c0_45] : memref<144x768xbf16, #tpu.memory_space<vmem>>, vector<16x768xbf16>
    tpu.vector_store %arg10[%c128_44, %c0_45], %77 {strides = array<i32>} : memref<144x768xbf16, #tpu.memory_space<vmem>>, vector<16x768xbf16>,
    %c0_46 = arith.constant 0 : index
    %c0_47 = arith.constant 0 : index
    %79 = vector.load %arg3[%c0_46, %c0_47] : memref<32x144xbf16, #tpu.memory_space<vmem>>, vector<32x144xbf16>
    %c0_48 = arith.constant 0 : index
    %c0_49 = arith.constant 0 : index
    %80 = vector.load %arg10[%c0_48, %c0_49] : memref<144x768xbf16, #tpu.memory_space<vmem>>, vector<144x768xbf16>
    %cst_50 = arith.constant dense<0.000000e+00> : vector<32x768xf32>
    %81 = tpu.matmul %79, %80, %cst_50 {dimension_numbers = #tpu.dot_dimension_numbers<[1], [0], [0], [1], [0, 0, 1, 1], [], []>} : vector<32x144xbf16>, vector<144x768xbf16>, vector<32x768xf32> -> vector<32x768xf32>
    %c0_51 = arith.constant 0 : index
    %c0_52 = arith.constant 0 : index
    %82 = vector.load %arg9[%c0_51, %c0_52] : memref<32x6144xf32, #tpu.memory_space<vmem>>, vector<32x768xf32>
    %83 = arith.addf %81, %82 : vector<32x768xf32>
    %84 = vector.extract_strided_slice %83 {offsets = [0, 0], sizes = [8, 768], strides = [1, 1]} : vector<32x768xf32> to vector<8x768xf32>
    %85 = arith.negf %84 : vector<8x768xf32>
    %86 = math.exp %85 : vector<8x768xf32>
    %cst_53 = arith.constant 1.000000e+00 : f32
    %87 = vector.broadcast %cst_53 : f32 to vector<8x768xf32>
    %88 = arith.addf %87, %86 : vector<8x768xf32>
    %89 = arith.divf %87, %88 : vector<8x768xf32>
    %90 = vector.extract_strided_slice %83 {offsets = [8, 0], sizes = [8, 768], strides = [1, 1]} : vector<32x768xf32> to vector<8x768xf32>
    %91 = arith.negf %90 : vector<8x768xf32>
    %92 = math.exp %91 : vector<8x768xf32>
    %cst_54 = arith.constant 1.000000e+00 : f32
    %93 = vector.broadcast %cst_54 : f32 to vector<8x768xf32>
    %94 = arith.addf %93, %92 : vector<8x768xf32>
    %95 = arith.divf %93, %94 : vector<8x768xf32>
    %96 = vector.extract_strided_slice %83 {offsets = [16, 0], sizes = [8, 768], strides = [1, 1]} : vector<32x768xf32> to vector<8x768xf32>
    %97 = math.tanh %96 : vector<8x768xf32>
    %98 = vector.extract_strided_slice %83 {offsets = [24, 0], sizes = [8, 768], strides = [1, 1]} : vector<32x768xf32> to vector<8x768xf32>
    %99 = arith.negf %98 : vector<8x768xf32>
    %100 = math.exp %99 : vector<8x768xf32>
    %cst_55 = arith.constant 1.000000e+00 : f32
    %101 = vector.broadcast %cst_55 : f32 to vector<8x768xf32>
    %102 = arith.addf %101, %100 : vector<8x768xf32>
    %103 = arith.divf %101, %102 : vector<8x768xf32>
    %c0_56 = arith.constant 0 : index
    %c0_57 = arith.constant 0 : index
    %104 = vector.load %arg7[%c0_56, %c0_57] : memref<8x768xf32, #tpu.memory_space<vmem>>, vector<8x768xf32>
    %105 = arith.mulf %95, %104 : vector<8x768xf32>
    %106 = arith.mulf %89, %97 : vector<8x768xf32>
    %107 = arith.addf %105, %106 : vector<8x768xf32>
    %108 = math.tanh %107 : vector<8x768xf32>
    %109 = arith.mulf %103, %108 : vector<8x768xf32>
    %110 = arith.mulf %109, %44 : vector<8x768xf32>
    %111 = arith.truncf %110 : vector<8x768xf32> to vector<8x768xbf16>
    %c0_58 = arith.constant 0 : index
    %c0_59 = arith.constant 0 : index
    %112 = vector.load %arg7[%c0_58, %c0_59] : memref<8x768xf32, #tpu.memory_space<vmem>>, vector<8x768xf32>
    tpu.vector_store %arg7[%c0_58, %c0_59], %107 {strides = array<i32>} : memref<8x768xf32, #tpu.memory_space<vmem>>, vector<8x768xf32>,
    %c0_60 = arith.constant 0 : index
    %c0_61 = arith.constant 0 : index
    %113 = vector.load %arg11[%c0_60, %c0_61] : memref<16x768xbf16, #tpu.memory_space<vmem>>, vector<8x768xbf16>
    tpu.vector_store %arg11[%c0_60, %c0_61], %111 {strides = array<i32>} : memref<16x768xbf16, #tpu.memory_space<vmem>>, vector<8x768xbf16>,
    %c0_62 = arith.constant 0 : index
    %c0_63 = arith.constant 0 : index
    %c0_64 = arith.constant 0 : index
    %114 = vector.load %arg6[%c0_62, %c0_63, %c0_64] : memref<8x8x768xbf16, #tpu.memory_space<vmem>>, vector<1x8x768xbf16>
    %115 = vector.shape_cast %114 : vector<1x8x768xbf16> to vector<8x768xbf16>
    %116 = vector.shape_cast %111 : vector<8x768xbf16> to vector<1x8x768xbf16>
    tpu.vector_store %arg6[%c0_62, %c0_63, %c0_64], %116 {strides = array<i32>} : memref<8x8x768xbf16, #tpu.memory_space<vmem>>, vector<1x8x768xbf16>,
    %c0_65 = arith.constant 0 : index
    %c0_66 = arith.constant 0 : index
    %117 = vector.load %arg11[%c0_65, %c0_66] : memref<16x768xbf16, #tpu.memory_space<vmem>>, vector<16x768xbf16>
    %118 = tpu.bitcast %117 : vector<16x768xbf16> -> vector<8x768xi32>
    %c19_i32_67 = arith.constant 19 : i32
    %119 = tpu.dynamic_rotate %118 by %c19_i32_67 dim 1 : vector<8x768xi32>, i32 -> vector<8x768xi32>
    %120 = tpu.bitcast %119 : vector<8x768xi32> -> vector<16x768xbf16>
    %c0_68 = arith.constant 0 : index
    %c0_69 = arith.constant 0 : index
    %121 = vector.load %arg10[%c0_68, %c0_69] : memref<144x768xbf16, #tpu.memory_space<vmem>>, vector<16x768xbf16>
    tpu.vector_store %arg10[%c0_68, %c0_69], %120 {strides = array<i32>} : memref<144x768xbf16, #tpu.memory_space<vmem>>, vector<16x768xbf16>,
    %122 = tpu.bitcast %117 : vector<16x768xbf16> -> vector<8x768xi32>
    %c18_i32_70 = arith.constant 18 : i32
    %123 = tpu.dynamic_rotate %122 by %c18_i32_70 dim 1 : vector<8x768xi32>, i32 -> vector<8x768xi32>
    %124 = tpu.bitcast %123 : vector<8x768xi32> -> vector<16x768xbf16>
    %c16_71 = arith.constant 16 : index
    %c0_72 = arith.constant 0 : index
    %125 = vector.load %arg10[%c16_71, %c0_72] : memref<144x768xbf16, #tpu.memory_space<vmem>>, vector<16x768xbf16>
    tpu.vector_store %arg10[%c16_71, %c0_72], %124 {strides = array<i32>} : memref<144x768xbf16, #tpu.memory_space<vmem>>, vector<16x768xbf16>,
    %126 = tpu.bitcast %117 : vector<16x768xbf16> -> vector<8x768xi32>
    %c17_i32_73 = arith.constant 17 : i32
    %127 = tpu.dynamic_rotate %126 by %c17_i32_73 dim 1 : vector<8x768xi32>, i32 -> vector<8x768xi32>
    %128 = tpu.bitcast %127 : vector<8x768xi32> -> vector<16x768xbf16>
    %c32_74 = arith.constant 32 : index
    %c0_75 = arith.constant 0 : index
    %129 = vector.load %arg10[%c32_74, %c0_75] : memref<144x768xbf16, #tpu.memory_space<vmem>>, vector<16x768xbf16>
    tpu.vector_store %arg10[%c32_74, %c0_75], %128 {strides = array<i32>} : memref<144x768xbf16, #tpu.memory_space<vmem>>, vector<16x768xbf16>,
    %130 = tpu.bitcast %117 : vector<16x768xbf16> -> vector<8x768xi32>
    %c1_i32_76 = arith.constant 1 : i32
    %131 = tpu.dynamic_rotate %130 by %c1_i32_76 dim 1 : vector<8x768xi32>, i32 -> vector<8x768xi32>
    %132 = tpu.bitcast %131 : vector<8x768xi32> -> vector<16x768xbf16>
    %c48_77 = arith.constant 48 : index
    %c0_78 = arith.constant 0 : index
    %133 = vector.load %arg10[%c48_77, %c0_78] : memref<144x768xbf16, #tpu.memory_space<vmem>>, vector<16x768xbf16>
    tpu.vector_store %arg10[%c48_77, %c0_78], %132 {strides = array<i32>} : memref<144x768xbf16, #tpu.memory_space<vmem>>, vector<16x768xbf16>,
    %c64_79 = arith.constant 64 : index
    %c0_80 = arith.constant 0 : index
    %134 = vector.load %arg10[%c64_79, %c0_80] : memref<144x768xbf16, #tpu.memory_space<vmem>>, vector<16x768xbf16>
    tpu.vector_store %arg10[%c64_79, %c0_80], %117 {strides = array<i32>} : memref<144x768xbf16, #tpu.memory_space<vmem>>, vector<16x768xbf16>,
    %135 = tpu.bitcast %117 : vector<16x768xbf16> -> vector<8x768xi32>
    %c767_i32_81 = arith.constant 767 : i32
    %136 = tpu.dynamic_rotate %135 by %c767_i32_81 dim 1 : vector<8x768xi32>, i32 -> vector<8x768xi32>
    %137 = tpu.bitcast %136 : vector<8x768xi32> -> vector<16x768xbf16>
    %c80_82 = arith.constant 80 : index
    %c0_83 = arith.constant 0 : index
    %138 = vector.load %arg10[%c80_82, %c0_83] : memref<144x768xbf16, #tpu.memory_space<vmem>>, vector<16x768xbf16>
    tpu.vector_store %arg10[%c80_82, %c0_83], %137 {strides = array<i32>} : memref<144x768xbf16, #tpu.memory_space<vmem>>, vector<16x768xbf16>,
    %139 = tpu.bitcast %117 : vector<16x768xbf16> -> vector<8x768xi32>
    %c751_i32_84 = arith.constant 751 : i32
    %140 = tpu.dynamic_rotate %139 by %c751_i32_84 dim 1 : vector<8x768xi32>, i32 -> vector<8x768xi32>
    %141 = tpu.bitcast %140 : vector<8x768xi32> -> vector<16x768xbf16>
    %c96_85 = arith.constant 96 : index
    %c0_86 = arith.constant 0 : index
    %142 = vector.load %arg10[%c96_85, %c0_86] : memref<144x768xbf16, #tpu.memory_space<vmem>>, vector<16x768xbf16>
    tpu.vector_store %arg10[%c96_85, %c0_86], %141 {strides = array<i32>} : memref<144x768xbf16, #tpu.memory_space<vmem>>, vector<16x768xbf16>,
    %143 = tpu.bitcast %117 : vector<16x768xbf16> -> vector<8x768xi32>
    %c750_i32_87 = arith.constant 750 : i32
    %144 = tpu.dynamic_rotate %143 by %c750_i32_87 dim 1 : vector<8x768xi32>, i32 -> vector<8x768xi32>
    %145 = tpu.bitcast %144 : vector<8x768xi32> -> vector<16x768xbf16>
    %c112_88 = arith.constant 112 : index
    %c0_89 = arith.constant 0 : index
    %146 = vector.load %arg10[%c112_88, %c0_89] : memref<144x768xbf16, #tpu.memory_space<vmem>>, vector<16x768xbf16>
    tpu.vector_store %arg10[%c112_88, %c0_89], %145 {strides = array<i32>} : memref<144x768xbf16, #tpu.memory_space<vmem>>, vector<16x768xbf16>,
    %147 = tpu.bitcast %117 : vector<16x768xbf16> -> vector<8x768xi32>
    %c749_i32_90 = arith.constant 749 : i32
    %148 = tpu.dynamic_rotate %147 by %c749_i32_90 dim 1 : vector<8x768xi32>, i32 -> vector<8x768xi32>
    %149 = tpu.bitcast %148 : vector<8x768xi32> -> vector<16x768xbf16>
    %c128_91 = arith.constant 128 : index
    %c0_92 = arith.constant 0 : index
    %150 = vector.load %arg10[%c128_91, %c0_92] : memref<144x768xbf16, #tpu.memory_space<vmem>>, vector<16x768xbf16>
    tpu.vector_store %arg10[%c128_91, %c0_92], %149 {strides = array<i32>} : memref<144x768xbf16, #tpu.memory_space<vmem>>, vector<16x768xbf16>,
    %c0_93 = arith.constant 0 : index
    %c0_94 = arith.constant 0 : index
    %151 = vector.load %arg3[%c0_93, %c0_94] : memref<32x144xbf16, #tpu.memory_space<vmem>>, vector<32x144xbf16>
    %c0_95 = arith.constant 0 : index
    %c0_96 = arith.constant 0 : index
    %152 = vector.load %arg10[%c0_95, %c0_96] : memref<144x768xbf16, #tpu.memory_space<vmem>>, vector<144x768xbf16>
    %cst_97 = arith.constant dense<0.000000e+00> : vector<32x768xf32>
    %153 = tpu.matmul %151, %152, %cst_97 {dimension_numbers = #tpu.dot_dimension_numbers<[1], [0], [0], [1], [0, 0, 1, 1], [], []>} : vector<32x144xbf16>, vector<144x768xbf16>, vector<32x768xf32> -> vector<32x768xf32>
    %c0_98 = arith.constant 0 : index
    %c768 = arith.constant 768 : index
    %154 = vector.load %arg9[%c0_98, %c768] : memref<32x6144xf32, #tpu.memory_space<vmem>>, vector<32x768xf32>
    %155 = arith.addf %153, %154 : vector<32x768xf32>
    %156 = vector.extract_strided_slice %155 {offsets = [0, 0], sizes = [8, 768], strides = [1, 1]} : vector<32x768xf32> to vector<8x768xf32>
    %157 = arith.negf %156 : vector<8x768xf32>
    %158 = math.exp %157 : vector<8x768xf32>
    %cst_99 = arith.constant 1.000000e+00 : f32
    %159 = vector.broadcast %cst_99 : f32 to vector<8x768xf32>
    %160 = arith.addf %159, %158 : vector<8x768xf32>
    %161 = arith.divf %159, %160 : vector<8x768xf32>
    %162 = vector.extract_strided_slice %155 {offsets = [8, 0], sizes = [8, 768], strides = [1, 1]} : vector<32x768xf32> to vector<8x768xf32>
    %163 = arith.negf %162 : vector<8x768xf32>
    %164 = math.exp %163 : vector<8x768xf32>
    %cst_100 = arith.constant 1.000000e+00 : f32
    %165 = vector.broadcast %cst_100 : f32 to vector<8x768xf32>
    %166 = arith.addf %165, %164 : vector<8x768xf32>
    %167 = arith.divf %165, %166 : vector<8x768xf32>
    %168 = vector.extract_strided_slice %155 {offsets = [16, 0], sizes = [8, 768], strides = [1, 1]} : vector<32x768xf32> to vector<8x768xf32>
    %169 = math.tanh %168 : vector<8x768xf32>
    %170 = vector.extract_strided_slice %155 {offsets = [24, 0], sizes = [8, 768], strides = [1, 1]} : vector<32x768xf32> to vector<8x768xf32>
    %171 = arith.negf %170 : vector<8x768xf32>
    %172 = math.exp %171 : vector<8x768xf32>
    %cst_101 = arith.constant 1.000000e+00 : f32
    %173 = vector.broadcast %cst_101 : f32 to vector<8x768xf32>
    %174 = arith.addf %173, %172 : vector<8x768xf32>
    %175 = arith.divf %173, %174 : vector<8x768xf32>
    %c0_102 = arith.constant 0 : index
    %c0_103 = arith.constant 0 : index
    %176 = vector.load %arg7[%c0_102, %c0_103] : memref<8x768xf32, #tpu.memory_space<vmem>>, vector<8x768xf32>
    %177 = arith.mulf %167, %176 : vector<8x768xf32>
    %178 = arith.mulf %161, %169 : vector<8x768xf32>
    %179 = arith.addf %177, %178 : vector<8x768xf32>
    %180 = math.tanh %179 : vector<8x768xf32>
    %181 = arith.mulf %175, %180 : vector<8x768xf32>
    %182 = arith.mulf %181, %44 : vector<8x768xf32>
    %183 = arith.truncf %182 : vector<8x768xf32> to vector<8x768xbf16>
    %c0_104 = arith.constant 0 : index
    %c0_105 = arith.constant 0 : index
    %184 = vector.load %arg7[%c0_104, %c0_105] : memref<8x768xf32, #tpu.memory_space<vmem>>, vector<8x768xf32>
    tpu.vector_store %arg7[%c0_104, %c0_105], %179 {strides = array<i32>} : memref<8x768xf32, #tpu.memory_space<vmem>>, vector<8x768xf32>,
    %c0_106 = arith.constant 0 : index
    %c0_107 = arith.constant 0 : index
    %185 = vector.load %arg11[%c0_106, %c0_107] : memref<16x768xbf16, #tpu.memory_space<vmem>>, vector<8x768xbf16>
    tpu.vector_store %arg11[%c0_106, %c0_107], %183 {strides = array<i32>} : memref<16x768xbf16, #tpu.memory_space<vmem>>, vector<8x768xbf16>,
    %c1 = arith.constant 1 : index
    %c0_108 = arith.constant 0 : index
    %c0_109 = arith.constant 0 : index
    %186 = vector.load %arg6[%c1, %c0_108, %c0_109] : memref<8x8x768xbf16, #tpu.memory_space<vmem>>, vector<1x8x768xbf16>
    %187 = vector.shape_cast %186 : vector<1x8x768xbf16> to vector<8x768xbf16>
    %188 = vector.shape_cast %183 : vector<8x768xbf16> to vector<1x8x768xbf16>
    tpu.vector_store %arg6[%c1, %c0_108, %c0_109], %188 {strides = array<i32>} : memref<8x8x768xbf16, #tpu.memory_space<vmem>>, vector<1x8x768xbf16>,
    %c0_110 = arith.constant 0 : index
    %c0_111 = arith.constant 0 : index
    %189 = vector.load %arg11[%c0_110, %c0_111] : memref<16x768xbf16, #tpu.memory_space<vmem>>, vector<16x768xbf16>
    %190 = tpu.bitcast %189 : vector<16x768xbf16> -> vector<8x768xi32>
    %c19_i32_112 = arith.constant 19 : i32
    %191 = tpu.dynamic_rotate %190 by %c19_i32_112 dim 1 : vector<8x768xi32>, i32 -> vector<8x768xi32>
    %192 = tpu.bitcast %191 : vector<8x768xi32> -> vector<16x768xbf16>
    %c0_113 = arith.constant 0 : index
    %c0_114 = arith.constant 0 : index
    %193 = vector.load %arg10[%c0_113, %c0_114] : memref<144x768xbf16, #tpu.memory_space<vmem>>, vector<16x768xbf16>
    tpu.vector_store %arg10[%c0_113, %c0_114], %192 {strides = array<i32>} : memref<144x768xbf16, #tpu.memory_space<vmem>>, vector<16x768xbf16>,
    %194 = tpu.bitcast %189 : vector<16x768xbf16> -> vector<8x768xi32>
    %c18_i32_115 = arith.constant 18 : i32
    %195 = tpu.dynamic_rotate %194 by %c18_i32_115 dim 1 : vector<8x768xi32>, i32 -> vector<8x768xi32>
    %196 = tpu.bitcast %195 : vector<8x768xi32> -> vector<16x768xbf16>
    %c16_116 = arith.constant 16 : index
    %c0_117 = arith.constant 0 : index
    %197 = vector.load %arg10[%c16_116, %c0_117] : memref<144x768xbf16, #tpu.memory_space<vmem>>, vector<16x768xbf16>
    tpu.vector_store %arg10[%c16_116, %c0_117], %196 {strides = array<i32>} : memref<144x768xbf16, #tpu.memory_space<vmem>>, vector<16x768xbf16>,
    %198 = tpu.bitcast %189 : vector<16x768xbf16> -> vector<8x768xi32>
    %c17_i32_118 = arith.constant 17 : i32
    %199 = tpu.dynamic_rotate %198 by %c17_i32_118 dim 1 : vector<8x768xi32>, i32 -> vector<8x768xi32>
    %200 = tpu.bitcast %199 : vector<8x768xi32> -> vector<16x768xbf16>
    %c32_119 = arith.constant 32 : index
    %c0_120 = arith.constant 0 : index
    %201 = vector.load %arg10[%c32_119, %c0_120] : memref<144x768xbf16, #tpu.memory_space<vmem>>, vector<16x768xbf16>
    tpu.vector_store %arg10[%c32_119, %c0_120], %200 {strides = array<i32>} : memref<144x768xbf16, #tpu.memory_space<vmem>>, vector<16x768xbf16>,
    %202 = tpu.bitcast %189 : vector<16x768xbf16> -> vector<8x768xi32>
    %c1_i32_121 = arith.constant 1 : i32
    %203 = tpu.dynamic_rotate %202 by %c1_i32_121 dim 1 : vector<8x768xi32>, i32 -> vector<8x768xi32>
    %204 = tpu.bitcast %203 : vector<8x768xi32> -> vector<16x768xbf16>
    %c48_122 = arith.constant 48 : index
    %c0_123 = arith.constant 0 : index
    %205 = vector.load %arg10[%c48_122, %c0_123] : memref<144x768xbf16, #tpu.memory_space<vmem>>, vector<16x768xbf16>
    tpu.vector_store %arg10[%c48_122, %c0_123], %204 {strides = array<i32>} : memref<144x768xbf16, #tpu.memory_space<vmem>>, vector<16x768xbf16>,
    %c64_124 = arith.constant 64 : index
    %c0_125 = arith.constant 0 : index
    %206 = vector.load %arg10[%c64_124, %c0_125] : memref<144x768xbf16, #tpu.memory_space<vmem>>, vector<16x768xbf16>
    tpu.vector_store %arg10[%c64_124, %c0_125], %189 {strides = array<i32>} : memref<144x768xbf16, #tpu.memory_space<vmem>>, vector<16x768xbf16>,
    %207 = tpu.bitcast %189 : vector<16x768xbf16> -> vector<8x768xi32>
    %c767_i32_126 = arith.constant 767 : i32
    %208 = tpu.dynamic_rotate %207 by %c767_i32_126 dim 1 : vector<8x768xi32>, i32 -> vector<8x768xi32>
    %209 = tpu.bitcast %208 : vector<8x768xi32> -> vector<16x768xbf16>
    %c80_127 = arith.constant 80 : index
    %c0_128 = arith.constant 0 : index
    %210 = vector.load %arg10[%c80_127, %c0_128] : memref<144x768xbf16, #tpu.memory_space<vmem>>, vector<16x768xbf16>
    tpu.vector_store %arg10[%c80_127, %c0_128], %209 {strides = array<i32>} : memref<144x768xbf16, #tpu.memory_space<vmem>>, vector<16x768xbf16>,
    %211 = tpu.bitcast %189 : vector<16x768xbf16> -> vector<8x768xi32>
    %c751_i32_129 = arith.constant 751 : i32
    %212 = tpu.dynamic_rotate %211 by %c751_i32_129 dim 1 : vector<8x768xi32>, i32 -> vector<8x768xi32>
    %213 = tpu.bitcast %212 : vector<8x768xi32> -> vector<16x768xbf16>
    %c96_130 = arith.constant 96 : index
    %c0_131 = arith.constant 0 : index
    %214 = vector.load %arg10[%c96_130, %c0_131] : memref<144x768xbf16, #tpu.memory_space<vmem>>, vector<16x768xbf16>
    tpu.vector_store %arg10[%c96_130, %c0_131], %213 {strides = array<i32>} : memref<144x768xbf16, #tpu.memory_space<vmem>>, vector<16x768xbf16>,
    %215 = tpu.bitcast %189 : vector<16x768xbf16> -> vector<8x768xi32>
    %c750_i32_132 = arith.constant 750 : i32
    %216 = tpu.dynamic_rotate %215 by %c750_i32_132 dim 1 : vector<8x768xi32>, i32 -> vector<8x768xi32>
    %217 = tpu.bitcast %216 : vector<8x768xi32> -> vector<16x768xbf16>
    %c112_133 = arith.constant 112 : index
    %c0_134 = arith.constant 0 : index
    %218 = vector.load %arg10[%c112_133, %c0_134] : memref<144x768xbf16, #tpu.memory_space<vmem>>, vector<16x768xbf16>
    tpu.vector_store %arg10[%c112_133, %c0_134], %217 {strides = array<i32>} : memref<144x768xbf16, #tpu.memory_space<vmem>>, vector<16x768xbf16>,
    %219 = tpu.bitcast %189 : vector<16x768xbf16> -> vector<8x768xi32>
    %c749_i32_135 = arith.constant 749 : i32
    %220 = tpu.dynamic_rotate %219 by %c749_i32_135 dim 1 : vector<8x768xi32>, i32 -> vector<8x768xi32>
    %221 = tpu.bitcast %220 : vector<8x768xi32> -> vector<16x768xbf16>
    %c128_136 = arith.constant 128 : index
    %c0_137 = arith.constant 0 : index
    %222 = vector.load %arg10[%c128_136, %c0_137] : memref<144x768xbf16, #tpu.memory_space<vmem>>, vector<16x768xbf16>
    tpu.vector_store %arg10[%c128_136, %c0_137], %221 {strides = array<i32>} : memref<144x768xbf16, #tpu.memory_space<vmem>>, vector<16x768xbf16>,
    %c0_138 = arith.constant 0 : index
    %c0_139 = arith.constant 0 : index
    %223 = vector.load %arg3[%c0_138, %c0_139] : memref<32x144xbf16, #tpu.memory_space<vmem>>, vector<32x144xbf16>
    %c0_140 = arith.constant 0 : index
    %c0_141 = arith.constant 0 : index
    %224 = vector.load %arg10[%c0_140, %c0_141] : memref<144x768xbf16, #tpu.memory_space<vmem>>, vector<144x768xbf16>
    %cst_142 = arith.constant dense<0.000000e+00> : vector<32x768xf32>
    %225 = tpu.matmul %223, %224, %cst_142 {dimension_numbers = #tpu.dot_dimension_numbers<[1], [0], [0], [1], [0, 0, 1, 1], [], []>} : vector<32x144xbf16>, vector<144x768xbf16>, vector<32x768xf32> -> vector<32x768xf32>
    %c0_143 = arith.constant 0 : index
    %c1536 = arith.constant 1536 : index
    %226 = vector.load %arg9[%c0_143, %c1536] : memref<32x6144xf32, #tpu.memory_space<vmem>>, vector<32x768xf32>
    %227 = arith.addf %225, %226 : vector<32x768xf32>
    %228 = vector.extract_strided_slice %227 {offsets = [0, 0], sizes = [8, 768], strides = [1, 1]} : vector<32x768xf32> to vector<8x768xf32>
    %229 = arith.negf %228 : vector<8x768xf32>
    %230 = math.exp %229 : vector<8x768xf32>
    %cst_144 = arith.constant 1.000000e+00 : f32
    %231 = vector.broadcast %cst_144 : f32 to vector<8x768xf32>
    %232 = arith.addf %231, %230 : vector<8x768xf32>
    %233 = arith.divf %231, %232 : vector<8x768xf32>
    %234 = vector.extract_strided_slice %227 {offsets = [8, 0], sizes = [8, 768], strides = [1, 1]} : vector<32x768xf32> to vector<8x768xf32>
    %235 = arith.negf %234 : vector<8x768xf32>
    %236 = math.exp %235 : vector<8x768xf32>
    %cst_145 = arith.constant 1.000000e+00 : f32
    %237 = vector.broadcast %cst_145 : f32 to vector<8x768xf32>
    %238 = arith.addf %237, %236 : vector<8x768xf32>
    %239 = arith.divf %237, %238 : vector<8x768xf32>
    %240 = vector.extract_strided_slice %227 {offsets = [16, 0], sizes = [8, 768], strides = [1, 1]} : vector<32x768xf32> to vector<8x768xf32>
    %241 = math.tanh %240 : vector<8x768xf32>
    %242 = vector.extract_strided_slice %227 {offsets = [24, 0], sizes = [8, 768], strides = [1, 1]} : vector<32x768xf32> to vector<8x768xf32>
    %243 = arith.negf %242 : vector<8x768xf32>
    %244 = math.exp %243 : vector<8x768xf32>
    %cst_146 = arith.constant 1.000000e+00 : f32
    %245 = vector.broadcast %cst_146 : f32 to vector<8x768xf32>
    %246 = arith.addf %245, %244 : vector<8x768xf32>
    %247 = arith.divf %245, %246 : vector<8x768xf32>
    %c0_147 = arith.constant 0 : index
    %c0_148 = arith.constant 0 : index
    %248 = vector.load %arg7[%c0_147, %c0_148] : memref<8x768xf32, #tpu.memory_space<vmem>>, vector<8x768xf32>
    %249 = arith.mulf %239, %248 : vector<8x768xf32>
    %250 = arith.mulf %233, %241 : vector<8x768xf32>
    %251 = arith.addf %249, %250 : vector<8x768xf32>
    %252 = math.tanh %251 : vector<8x768xf32>
    %253 = arith.mulf %247, %252 : vector<8x768xf32>
    %254 = arith.mulf %253, %44 : vector<8x768xf32>
    %255 = arith.truncf %254 : vector<8x768xf32> to vector<8x768xbf16>
    %c0_149 = arith.constant 0 : index
    %c0_150 = arith.constant 0 : index
    %256 = vector.load %arg7[%c0_149, %c0_150] : memref<8x768xf32, #tpu.memory_space<vmem>>, vector<8x768xf32>
    tpu.vector_store %arg7[%c0_149, %c0_150], %251 {strides = array<i32>} : memref<8x768xf32, #tpu.memory_space<vmem>>, vector<8x768xf32>,
    %c0_151 = arith.constant 0 : index
    %c0_152 = arith.constant 0 : index
    %257 = vector.load %arg11[%c0_151, %c0_152] : memref<16x768xbf16, #tpu.memory_space<vmem>>, vector<8x768xbf16>
    tpu.vector_store %arg11[%c0_151, %c0_152], %255 {strides = array<i32>} : memref<16x768xbf16, #tpu.memory_space<vmem>>, vector<8x768xbf16>,
    %c2 = arith.constant 2 : index
    %c0_153 = arith.constant 0 : index
    %c0_154 = arith.constant 0 : index
    %258 = vector.load %arg6[%c2, %c0_153, %c0_154] : memref<8x8x768xbf16, #tpu.memory_space<vmem>>, vector<1x8x768xbf16>
    %259 = vector.shape_cast %258 : vector<1x8x768xbf16> to vector<8x768xbf16>
    %260 = vector.shape_cast %255 : vector<8x768xbf16> to vector<1x8x768xbf16>
    tpu.vector_store %arg6[%c2, %c0_153, %c0_154], %260 {strides = array<i32>} : memref<8x8x768xbf16, #tpu.memory_space<vmem>>, vector<1x8x768xbf16>,
    %c0_155 = arith.constant 0 : index
    %c0_156 = arith.constant 0 : index
    %261 = vector.load %arg11[%c0_155, %c0_156] : memref<16x768xbf16, #tpu.memory_space<vmem>>, vector<16x768xbf16>
    %262 = tpu.bitcast %261 : vector<16x768xbf16> -> vector<8x768xi32>
    %c19_i32_157 = arith.constant 19 : i32
    %263 = tpu.dynamic_rotate %262 by %c19_i32_157 dim 1 : vector<8x768xi32>, i32 -> vector<8x768xi32>
    %264 = tpu.bitcast %263 : vector<8x768xi32> -> vector<16x768xbf16>
    %c0_158 = arith.constant 0 : index
    %c0_159 = arith.constant 0 : index
    %265 = vector.load %arg10[%c0_158, %c0_159] : memref<144x768xbf16, #tpu.memory_space<vmem>>, vector<16x768xbf16>
    tpu.vector_store %arg10[%c0_158, %c0_159], %264 {strides = array<i32>} : memref<144x768xbf16, #tpu.memory_space<vmem>>, vector<16x768xbf16>,
    %266 = tpu.bitcast %261 : vector<16x768xbf16> -> vector<8x768xi32>
    %c18_i32_160 = arith.constant 18 : i32
    %267 = tpu.dynamic_rotate %266 by %c18_i32_160 dim 1 : vector<8x768xi32>, i32 -> vector<8x768xi32>
    %268 = tpu.bitcast %267 : vector<8x768xi32> -> vector<16x768xbf16>
    %c16_161 = arith.constant 16 : index
    %c0_162 = arith.constant 0 : index
    %269 = vector.load %arg10[%c16_161, %c0_162] : memref<144x768xbf16, #tpu.memory_space<vmem>>, vector<16x768xbf16>
    tpu.vector_store %arg10[%c16_161, %c0_162], %268 {strides = array<i32>} : memref<144x768xbf16, #tpu.memory_space<vmem>>, vector<16x768xbf16>,
    %270 = tpu.bitcast %261 : vector<16x768xbf16> -> vector<8x768xi32>
    %c17_i32_163 = arith.constant 17 : i32
    %271 = tpu.dynamic_rotate %270 by %c17_i32_163 dim 1 : vector<8x768xi32>, i32 -> vector<8x768xi32>
    %272 = tpu.bitcast %271 : vector<8x768xi32> -> vector<16x768xbf16>
    %c32_164 = arith.constant 32 : index
    %c0_165 = arith.constant 0 : index
    %273 = vector.load %arg10[%c32_164, %c0_165] : memref<144x768xbf16, #tpu.memory_space<vmem>>, vector<16x768xbf16>
    tpu.vector_store %arg10[%c32_164, %c0_165], %272 {strides = array<i32>} : memref<144x768xbf16, #tpu.memory_space<vmem>>, vector<16x768xbf16>,
    %274 = tpu.bitcast %261 : vector<16x768xbf16> -> vector<8x768xi32>
    %c1_i32_166 = arith.constant 1 : i32
    %275 = tpu.dynamic_rotate %274 by %c1_i32_166 dim 1 : vector<8x768xi32>, i32 -> vector<8x768xi32>
    %276 = tpu.bitcast %275 : vector<8x768xi32> -> vector<16x768xbf16>
    %c48_167 = arith.constant 48 : index
    %c0_168 = arith.constant 0 : index
    %277 = vector.load %arg10[%c48_167, %c0_168] : memref<144x768xbf16, #tpu.memory_space<vmem>>, vector<16x768xbf16>
    tpu.vector_store %arg10[%c48_167, %c0_168], %276 {strides = array<i32>} : memref<144x768xbf16, #tpu.memory_space<vmem>>, vector<16x768xbf16>,
    %c64_169 = arith.constant 64 : index
    %c0_170 = arith.constant 0 : index
    %278 = vector.load %arg10[%c64_169, %c0_170] : memref<144x768xbf16, #tpu.memory_space<vmem>>, vector<16x768xbf16>
    tpu.vector_store %arg10[%c64_169, %c0_170], %261 {strides = array<i32>} : memref<144x768xbf16, #tpu.memory_space<vmem>>, vector<16x768xbf16>,
    %279 = tpu.bitcast %261 : vector<16x768xbf16> -> vector<8x768xi32>
    %c767_i32_171 = arith.constant 767 : i32
    %280 = tpu.dynamic_rotate %279 by %c767_i32_171 dim 1 : vector<8x768xi32>, i32 -> vector<8x768xi32>
    %281 = tpu.bitcast %280 : vector<8x768xi32> -> vector<16x768xbf16>
    %c80_172 = arith.constant 80 : index
    %c0_173 = arith.constant 0 : index
    %282 = vector.load %arg10[%c80_172, %c0_173] : memref<144x768xbf16, #tpu.memory_space<vmem>>, vector<16x768xbf16>
    tpu.vector_store %arg10[%c80_172, %c0_173], %281 {strides = array<i32>} : memref<144x768xbf16, #tpu.memory_space<vmem>>, vector<16x768xbf16>,
    %283 = tpu.bitcast %261 : vector<16x768xbf16> -> vector<8x768xi32>
    %c751_i32_174 = arith.constant 751 : i32
    %284 = tpu.dynamic_rotate %283 by %c751_i32_174 dim 1 : vector<8x768xi32>, i32 -> vector<8x768xi32>
    %285 = tpu.bitcast %284 : vector<8x768xi32> -> vector<16x768xbf16>
    %c96_175 = arith.constant 96 : index
    %c0_176 = arith.constant 0 : index
    %286 = vector.load %arg10[%c96_175, %c0_176] : memref<144x768xbf16, #tpu.memory_space<vmem>>, vector<16x768xbf16>
    tpu.vector_store %arg10[%c96_175, %c0_176], %285 {strides = array<i32>} : memref<144x768xbf16, #tpu.memory_space<vmem>>, vector<16x768xbf16>,
    %287 = tpu.bitcast %261 : vector<16x768xbf16> -> vector<8x768xi32>
    %c750_i32_177 = arith.constant 750 : i32
    %288 = tpu.dynamic_rotate %287 by %c750_i32_177 dim 1 : vector<8x768xi32>, i32 -> vector<8x768xi32>
    %289 = tpu.bitcast %288 : vector<8x768xi32> -> vector<16x768xbf16>
    %c112_178 = arith.constant 112 : index
    %c0_179 = arith.constant 0 : index
    %290 = vector.load %arg10[%c112_178, %c0_179] : memref<144x768xbf16, #tpu.memory_space<vmem>>, vector<16x768xbf16>
    tpu.vector_store %arg10[%c112_178, %c0_179], %289 {strides = array<i32>} : memref<144x768xbf16, #tpu.memory_space<vmem>>, vector<16x768xbf16>,
    %291 = tpu.bitcast %261 : vector<16x768xbf16> -> vector<8x768xi32>
    %c749_i32_180 = arith.constant 749 : i32
    %292 = tpu.dynamic_rotate %291 by %c749_i32_180 dim 1 : vector<8x768xi32>, i32 -> vector<8x768xi32>
    %293 = tpu.bitcast %292 : vector<8x768xi32> -> vector<16x768xbf16>
    %c128_181 = arith.constant 128 : index
    %c0_182 = arith.constant 0 : index
    %294 = vector.load %arg10[%c128_181, %c0_182] : memref<144x768xbf16, #tpu.memory_space<vmem>>, vector<16x768xbf16>
    tpu.vector_store %arg10[%c128_181, %c0_182], %293 {strides = array<i32>} : memref<144x768xbf16, #tpu.memory_space<vmem>>, vector<16x768xbf16>,
    %c0_183 = arith.constant 0 : index
    %c0_184 = arith.constant 0 : index
    %295 = vector.load %arg3[%c0_183, %c0_184] : memref<32x144xbf16, #tpu.memory_space<vmem>>, vector<32x144xbf16>
    %c0_185 = arith.constant 0 : index
    %c0_186 = arith.constant 0 : index
    %296 = vector.load %arg10[%c0_185, %c0_186] : memref<144x768xbf16, #tpu.memory_space<vmem>>, vector<144x768xbf16>
    %cst_187 = arith.constant dense<0.000000e+00> : vector<32x768xf32>
    %297 = tpu.matmul %295, %296, %cst_187 {dimension_numbers = #tpu.dot_dimension_numbers<[1], [0], [0], [1], [0, 0, 1, 1], [], []>} : vector<32x144xbf16>, vector<144x768xbf16>, vector<32x768xf32> -> vector<32x768xf32>
    %c0_188 = arith.constant 0 : index
    %c2304 = arith.constant 2304 : index
    %298 = vector.load %arg9[%c0_188, %c2304] : memref<32x6144xf32, #tpu.memory_space<vmem>>, vector<32x768xf32>
    %299 = arith.addf %297, %298 : vector<32x768xf32>
    %300 = vector.extract_strided_slice %299 {offsets = [0, 0], sizes = [8, 768], strides = [1, 1]} : vector<32x768xf32> to vector<8x768xf32>
    %301 = arith.negf %300 : vector<8x768xf32>
    %302 = math.exp %301 : vector<8x768xf32>
    %cst_189 = arith.constant 1.000000e+00 : f32
    %303 = vector.broadcast %cst_189 : f32 to vector<8x768xf32>
    %304 = arith.addf %303, %302 : vector<8x768xf32>
    %305 = arith.divf %303, %304 : vector<8x768xf32>
    %306 = vector.extract_strided_slice %299 {offsets = [8, 0], sizes = [8, 768], strides = [1, 1]} : vector<32x768xf32> to vector<8x768xf32>
    %307 = arith.negf %306 : vector<8x768xf32>
    %308 = math.exp %307 : vector<8x768xf32>
    %cst_190 = arith.constant 1.000000e+00 : f32
    %309 = vector.broadcast %cst_190 : f32 to vector<8x768xf32>
    %310 = arith.addf %309, %308 : vector<8x768xf32>
    %311 = arith.divf %309, %310 : vector<8x768xf32>
    %312 = vector.extract_strided_slice %299 {offsets = [16, 0], sizes = [8, 768], strides = [1, 1]} : vector<32x768xf32> to vector<8x768xf32>
    %313 = math.tanh %312 : vector<8x768xf32>
    %314 = vector.extract_strided_slice %299 {offsets = [24, 0], sizes = [8, 768], strides = [1, 1]} : vector<32x768xf32> to vector<8x768xf32>
    %315 = arith.negf %314 : vector<8x768xf32>
    %316 = math.exp %315 : vector<8x768xf32>
    %cst_191 = arith.constant 1.000000e+00 : f32
    %317 = vector.broadcast %cst_191 : f32 to vector<8x768xf32>
    %318 = arith.addf %317, %316 : vector<8x768xf32>
    %319 = arith.divf %317, %318 : vector<8x768xf32>
    %c0_192 = arith.constant 0 : index
    %c0_193 = arith.constant 0 : index
    %320 = vector.load %arg7[%c0_192, %c0_193] : memref<8x768xf32, #tpu.memory_space<vmem>>, vector<8x768xf32>
    %321 = arith.mulf %311, %320 : vector<8x768xf32>
    %322 = arith.mulf %305, %313 : vector<8x768xf32>
    %323 = arith.addf %321, %322 : vector<8x768xf32>
    %324 = math.tanh %323 : vector<8x768xf32>
    %325 = arith.mulf %319, %324 : vector<8x768xf32>
    %326 = arith.mulf %325, %44 : vector<8x768xf32>
    %327 = arith.truncf %326 : vector<8x768xf32> to vector<8x768xbf16>
    %c0_194 = arith.constant 0 : index
    %c0_195 = arith.constant 0 : index
    %328 = vector.load %arg7[%c0_194, %c0_195] : memref<8x768xf32, #tpu.memory_space<vmem>>, vector<8x768xf32>
    tpu.vector_store %arg7[%c0_194, %c0_195], %323 {strides = array<i32>} : memref<8x768xf32, #tpu.memory_space<vmem>>, vector<8x768xf32>,
    %c0_196 = arith.constant 0 : index
    %c0_197 = arith.constant 0 : index
    %329 = vector.load %arg11[%c0_196, %c0_197] : memref<16x768xbf16, #tpu.memory_space<vmem>>, vector<8x768xbf16>
    tpu.vector_store %arg11[%c0_196, %c0_197], %327 {strides = array<i32>} : memref<16x768xbf16, #tpu.memory_space<vmem>>, vector<8x768xbf16>,
    %c3 = arith.constant 3 : index
    %c0_198 = arith.constant 0 : index
    %c0_199 = arith.constant 0 : index
    %330 = vector.load %arg6[%c3, %c0_198, %c0_199] : memref<8x8x768xbf16, #tpu.memory_space<vmem>>, vector<1x8x768xbf16>
    %331 = vector.shape_cast %330 : vector<1x8x768xbf16> to vector<8x768xbf16>
    %332 = vector.shape_cast %327 : vector<8x768xbf16> to vector<1x8x768xbf16>
    tpu.vector_store %arg6[%c3, %c0_198, %c0_199], %332 {strides = array<i32>} : memref<8x8x768xbf16, #tpu.memory_space<vmem>>, vector<1x8x768xbf16>,
    %c0_200 = arith.constant 0 : index
    %c0_201 = arith.constant 0 : index
    %333 = vector.load %arg11[%c0_200, %c0_201] : memref<16x768xbf16, #tpu.memory_space<vmem>>, vector<16x768xbf16>
    %334 = tpu.bitcast %333 : vector<16x768xbf16> -> vector<8x768xi32>
    %c19_i32_202 = arith.constant 19 : i32
    %335 = tpu.dynamic_rotate %334 by %c19_i32_202 dim 1 : vector<8x768xi32>, i32 -> vector<8x768xi32>
    %336 = tpu.bitcast %335 : vector<8x768xi32> -> vector<16x768xbf16>
    %c0_203 = arith.constant 0 : index
    %c0_204 = arith.constant 0 : index
    %337 = vector.load %arg10[%c0_203, %c0_204] : memref<144x768xbf16, #tpu.memory_space<vmem>>, vector<16x768xbf16>
    tpu.vector_store %arg10[%c0_203, %c0_204], %336 {strides = array<i32>} : memref<144x768xbf16, #tpu.memory_space<vmem>>, vector<16x768xbf16>,
    %338 = tpu.bitcast %333 : vector<16x768xbf16> -> vector<8x768xi32>
    %c18_i32_205 = arith.constant 18 : i32
    %339 = tpu.dynamic_rotate %338 by %c18_i32_205 dim 1 : vector<8x768xi32>, i32 -> vector<8x768xi32>
    %340 = tpu.bitcast %339 : vector<8x768xi32> -> vector<16x768xbf16>
    %c16_206 = arith.constant 16 : index
    %c0_207 = arith.constant 0 : index
    %341 = vector.load %arg10[%c16_206, %c0_207] : memref<144x768xbf16, #tpu.memory_space<vmem>>, vector<16x768xbf16>
    tpu.vector_store %arg10[%c16_206, %c0_207], %340 {strides = array<i32>} : memref<144x768xbf16, #tpu.memory_space<vmem>>, vector<16x768xbf16>,
    %342 = tpu.bitcast %333 : vector<16x768xbf16> -> vector<8x768xi32>
    %c17_i32_208 = arith.constant 17 : i32
    %343 = tpu.dynamic_rotate %342 by %c17_i32_208 dim 1 : vector<8x768xi32>, i32 -> vector<8x768xi32>
    %344 = tpu.bitcast %343 : vector<8x768xi32> -> vector<16x768xbf16>
    %c32_209 = arith.constant 32 : index
    %c0_210 = arith.constant 0 : index
    %345 = vector.load %arg10[%c32_209, %c0_210] : memref<144x768xbf16, #tpu.memory_space<vmem>>, vector<16x768xbf16>
    tpu.vector_store %arg10[%c32_209, %c0_210], %344 {strides = array<i32>} : memref<144x768xbf16, #tpu.memory_space<vmem>>, vector<16x768xbf16>,
    %346 = tpu.bitcast %333 : vector<16x768xbf16> -> vector<8x768xi32>
    %c1_i32_211 = arith.constant 1 : i32
    %347 = tpu.dynamic_rotate %346 by %c1_i32_211 dim 1 : vector<8x768xi32>, i32 -> vector<8x768xi32>
    %348 = tpu.bitcast %347 : vector<8x768xi32> -> vector<16x768xbf16>
    %c48_212 = arith.constant 48 : index
    %c0_213 = arith.constant 0 : index
    %349 = vector.load %arg10[%c48_212, %c0_213] : memref<144x768xbf16, #tpu.memory_space<vmem>>, vector<16x768xbf16>
    tpu.vector_store %arg10[%c48_212, %c0_213], %348 {strides = array<i32>} : memref<144x768xbf16, #tpu.memory_space<vmem>>, vector<16x768xbf16>,
    %c64_214 = arith.constant 64 : index
    %c0_215 = arith.constant 0 : index
    %350 = vector.load %arg10[%c64_214, %c0_215] : memref<144x768xbf16, #tpu.memory_space<vmem>>, vector<16x768xbf16>
    tpu.vector_store %arg10[%c64_214, %c0_215], %333 {strides = array<i32>} : memref<144x768xbf16, #tpu.memory_space<vmem>>, vector<16x768xbf16>,
    %351 = tpu.bitcast %333 : vector<16x768xbf16> -> vector<8x768xi32>
    %c767_i32_216 = arith.constant 767 : i32
    %352 = tpu.dynamic_rotate %351 by %c767_i32_216 dim 1 : vector<8x768xi32>, i32 -> vector<8x768xi32>
    %353 = tpu.bitcast %352 : vector<8x768xi32> -> vector<16x768xbf16>
    %c80_217 = arith.constant 80 : index
    %c0_218 = arith.constant 0 : index
    %354 = vector.load %arg10[%c80_217, %c0_218] : memref<144x768xbf16, #tpu.memory_space<vmem>>, vector<16x768xbf16>
    tpu.vector_store %arg10[%c80_217, %c0_218], %353 {strides = array<i32>} : memref<144x768xbf16, #tpu.memory_space<vmem>>, vector<16x768xbf16>,
    %355 = tpu.bitcast %333 : vector<16x768xbf16> -> vector<8x768xi32>
    %c751_i32_219 = arith.constant 751 : i32
    %356 = tpu.dynamic_rotate %355 by %c751_i32_219 dim 1 : vector<8x768xi32>, i32 -> vector<8x768xi32>
    %357 = tpu.bitcast %356 : vector<8x768xi32> -> vector<16x768xbf16>
    %c96_220 = arith.constant 96 : index
    %c0_221 = arith.constant 0 : index
    %358 = vector.load %arg10[%c96_220, %c0_221] : memref<144x768xbf16, #tpu.memory_space<vmem>>, vector<16x768xbf16>
    tpu.vector_store %arg10[%c96_220, %c0_221], %357 {strides = array<i32>} : memref<144x768xbf16, #tpu.memory_space<vmem>>, vector<16x768xbf16>,
    %359 = tpu.bitcast %333 : vector<16x768xbf16> -> vector<8x768xi32>
    %c750_i32_222 = arith.constant 750 : i32
    %360 = tpu.dynamic_rotate %359 by %c750_i32_222 dim 1 : vector<8x768xi32>, i32 -> vector<8x768xi32>
    %361 = tpu.bitcast %360 : vector<8x768xi32> -> vector<16x768xbf16>
    %c112_223 = arith.constant 112 : index
    %c0_224 = arith.constant 0 : index
    %362 = vector.load %arg10[%c112_223, %c0_224] : memref<144x768xbf16, #tpu.memory_space<vmem>>, vector<16x768xbf16>
    tpu.vector_store %arg10[%c112_223, %c0_224], %361 {strides = array<i32>} : memref<144x768xbf16, #tpu.memory_space<vmem>>, vector<16x768xbf16>,
    %363 = tpu.bitcast %333 : vector<16x768xbf16> -> vector<8x768xi32>
    %c749_i32_225 = arith.constant 749 : i32
    %364 = tpu.dynamic_rotate %363 by %c749_i32_225 dim 1 : vector<8x768xi32>, i32 -> vector<8x768xi32>
    %365 = tpu.bitcast %364 : vector<8x768xi32> -> vector<16x768xbf16>
    %c128_226 = arith.constant 128 : index
    %c0_227 = arith.constant 0 : index
    %366 = vector.load %arg10[%c128_226, %c0_227] : memref<144x768xbf16, #tpu.memory_space<vmem>>, vector<16x768xbf16>
    tpu.vector_store %arg10[%c128_226, %c0_227], %365 {strides = array<i32>} : memref<144x768xbf16, #tpu.memory_space<vmem>>, vector<16x768xbf16>,
    %c0_228 = arith.constant 0 : index
    %c0_229 = arith.constant 0 : index
    %367 = vector.load %arg3[%c0_228, %c0_229] : memref<32x144xbf16, #tpu.memory_space<vmem>>, vector<32x144xbf16>
    %c0_230 = arith.constant 0 : index
    %c0_231 = arith.constant 0 : index
    %368 = vector.load %arg10[%c0_230, %c0_231] : memref<144x768xbf16, #tpu.memory_space<vmem>>, vector<144x768xbf16>
    %cst_232 = arith.constant dense<0.000000e+00> : vector<32x768xf32>
    %369 = tpu.matmul %367, %368, %cst_232 {dimension_numbers = #tpu.dot_dimension_numbers<[1], [0], [0], [1], [0, 0, 1, 1], [], []>} : vector<32x144xbf16>, vector<144x768xbf16>, vector<32x768xf32> -> vector<32x768xf32>
    %c0_233 = arith.constant 0 : index
    %c3072 = arith.constant 3072 : index
    %370 = vector.load %arg9[%c0_233, %c3072] : memref<32x6144xf32, #tpu.memory_space<vmem>>, vector<32x768xf32>
    %371 = arith.addf %369, %370 : vector<32x768xf32>
    %372 = vector.extract_strided_slice %371 {offsets = [0, 0], sizes = [8, 768], strides = [1, 1]} : vector<32x768xf32> to vector<8x768xf32>
    %373 = arith.negf %372 : vector<8x768xf32>
    %374 = math.exp %373 : vector<8x768xf32>
    %cst_234 = arith.constant 1.000000e+00 : f32
    %375 = vector.broadcast %cst_234 : f32 to vector<8x768xf32>
    %376 = arith.addf %375, %374 : vector<8x768xf32>
    %377 = arith.divf %375, %376 : vector<8x768xf32>
    %378 = vector.extract_strided_slice %371 {offsets = [8, 0], sizes = [8, 768], strides = [1, 1]} : vector<32x768xf32> to vector<8x768xf32>
    %379 = arith.negf %378 : vector<8x768xf32>
    %380 = math.exp %379 : vector<8x768xf32>
    %cst_235 = arith.constant 1.000000e+00 : f32
    %381 = vector.broadcast %cst_235 : f32 to vector<8x768xf32>
    %382 = arith.addf %381, %380 : vector<8x768xf32>
    %383 = arith.divf %381, %382 : vector<8x768xf32>
    %384 = vector.extract_strided_slice %371 {offsets = [16, 0], sizes = [8, 768], strides = [1, 1]} : vector<32x768xf32> to vector<8x768xf32>
    %385 = math.tanh %384 : vector<8x768xf32>
    %386 = vector.extract_strided_slice %371 {offsets = [24, 0], sizes = [8, 768], strides = [1, 1]} : vector<32x768xf32> to vector<8x768xf32>
    %387 = arith.negf %386 : vector<8x768xf32>
    %388 = math.exp %387 : vector<8x768xf32>
    %cst_236 = arith.constant 1.000000e+00 : f32
    %389 = vector.broadcast %cst_236 : f32 to vector<8x768xf32>
    %390 = arith.addf %389, %388 : vector<8x768xf32>
    %391 = arith.divf %389, %390 : vector<8x768xf32>
    %c0_237 = arith.constant 0 : index
    %c0_238 = arith.constant 0 : index
    %392 = vector.load %arg7[%c0_237, %c0_238] : memref<8x768xf32, #tpu.memory_space<vmem>>, vector<8x768xf32>
    %393 = arith.mulf %383, %392 : vector<8x768xf32>
    %394 = arith.mulf %377, %385 : vector<8x768xf32>
    %395 = arith.addf %393, %394 : vector<8x768xf32>
    %396 = math.tanh %395 : vector<8x768xf32>
    %397 = arith.mulf %391, %396 : vector<8x768xf32>
    %398 = arith.mulf %397, %44 : vector<8x768xf32>
    %399 = arith.truncf %398 : vector<8x768xf32> to vector<8x768xbf16>
    %c0_239 = arith.constant 0 : index
    %c0_240 = arith.constant 0 : index
    %400 = vector.load %arg7[%c0_239, %c0_240] : memref<8x768xf32, #tpu.memory_space<vmem>>, vector<8x768xf32>
    tpu.vector_store %arg7[%c0_239, %c0_240], %395 {strides = array<i32>} : memref<8x768xf32, #tpu.memory_space<vmem>>, vector<8x768xf32>,
    %c0_241 = arith.constant 0 : index
    %c0_242 = arith.constant 0 : index
    %401 = vector.load %arg11[%c0_241, %c0_242] : memref<16x768xbf16, #tpu.memory_space<vmem>>, vector<8x768xbf16>
    tpu.vector_store %arg11[%c0_241, %c0_242], %399 {strides = array<i32>} : memref<16x768xbf16, #tpu.memory_space<vmem>>, vector<8x768xbf16>,
    %c4 = arith.constant 4 : index
    %c0_243 = arith.constant 0 : index
    %c0_244 = arith.constant 0 : index
    %402 = vector.load %arg6[%c4, %c0_243, %c0_244] : memref<8x8x768xbf16, #tpu.memory_space<vmem>>, vector<1x8x768xbf16>
    %403 = vector.shape_cast %402 : vector<1x8x768xbf16> to vector<8x768xbf16>
    %404 = vector.shape_cast %399 : vector<8x768xbf16> to vector<1x8x768xbf16>
    tpu.vector_store %arg6[%c4, %c0_243, %c0_244], %404 {strides = array<i32>} : memref<8x8x768xbf16, #tpu.memory_space<vmem>>, vector<1x8x768xbf16>,
    %c0_245 = arith.constant 0 : index
    %c0_246 = arith.constant 0 : index
    %405 = vector.load %arg11[%c0_245, %c0_246] : memref<16x768xbf16, #tpu.memory_space<vmem>>, vector<16x768xbf16>
    %406 = tpu.bitcast %405 : vector<16x768xbf16> -> vector<8x768xi32>
    %c19_i32_247 = arith.constant 19 : i32
    %407 = tpu.dynamic_rotate %406 by %c19_i32_247 dim 1 : vector<8x768xi32>, i32 -> vector<8x768xi32>
    %408 = tpu.bitcast %407 : vector<8x768xi32> -> vector<16x768xbf16>
    %c0_248 = arith.constant 0 : index
    %c0_249 = arith.constant 0 : index
    %409 = vector.load %arg10[%c0_248, %c0_249] : memref<144x768xbf16, #tpu.memory_space<vmem>>, vector<16x768xbf16>
    tpu.vector_store %arg10[%c0_248, %c0_249], %408 {strides = array<i32>} : memref<144x768xbf16, #tpu.memory_space<vmem>>, vector<16x768xbf16>,
    %410 = tpu.bitcast %405 : vector<16x768xbf16> -> vector<8x768xi32>
    %c18_i32_250 = arith.constant 18 : i32
    %411 = tpu.dynamic_rotate %410 by %c18_i32_250 dim 1 : vector<8x768xi32>, i32 -> vector<8x768xi32>
    %412 = tpu.bitcast %411 : vector<8x768xi32> -> vector<16x768xbf16>
    %c16_251 = arith.constant 16 : index
    %c0_252 = arith.constant 0 : index
    %413 = vector.load %arg10[%c16_251, %c0_252] : memref<144x768xbf16, #tpu.memory_space<vmem>>, vector<16x768xbf16>
    tpu.vector_store %arg10[%c16_251, %c0_252], %412 {strides = array<i32>} : memref<144x768xbf16, #tpu.memory_space<vmem>>, vector<16x768xbf16>,
    %414 = tpu.bitcast %405 : vector<16x768xbf16> -> vector<8x768xi32>
    %c17_i32_253 = arith.constant 17 : i32
    %415 = tpu.dynamic_rotate %414 by %c17_i32_253 dim 1 : vector<8x768xi32>, i32 -> vector<8x768xi32>
    %416 = tpu.bitcast %415 : vector<8x768xi32> -> vector<16x768xbf16>
    %c32_254 = arith.constant 32 : index
    %c0_255 = arith.constant 0 : index
    %417 = vector.load %arg10[%c32_254, %c0_255] : memref<144x768xbf16, #tpu.memory_space<vmem>>, vector<16x768xbf16>
    tpu.vector_store %arg10[%c32_254, %c0_255], %416 {strides = array<i32>} : memref<144x768xbf16, #tpu.memory_space<vmem>>, vector<16x768xbf16>,
    %418 = tpu.bitcast %405 : vector<16x768xbf16> -> vector<8x768xi32>
    %c1_i32_256 = arith.constant 1 : i32
    %419 = tpu.dynamic_rotate %418 by %c1_i32_256 dim 1 : vector<8x768xi32>, i32 -> vector<8x768xi32>
    %420 = tpu.bitcast %419 : vector<8x768xi32> -> vector<16x768xbf16>
    %c48_257 = arith.constant 48 : index
    %c0_258 = arith.constant 0 : index
    %421 = vector.load %arg10[%c48_257, %c0_258] : memref<144x768xbf16, #tpu.memory_space<vmem>>, vector<16x768xbf16>
    tpu.vector_store %arg10[%c48_257, %c0_258], %420 {strides = array<i32>} : memref<144x768xbf16, #tpu.memory_space<vmem>>, vector<16x768xbf16>,
    %c64_259 = arith.constant 64 : index
    %c0_260 = arith.constant 0 : index
    %422 = vector.load %arg10[%c64_259, %c0_260] : memref<144x768xbf16, #tpu.memory_space<vmem>>, vector<16x768xbf16>
    tpu.vector_store %arg10[%c64_259, %c0_260], %405 {strides = array<i32>} : memref<144x768xbf16, #tpu.memory_space<vmem>>, vector<16x768xbf16>,
    %423 = tpu.bitcast %405 : vector<16x768xbf16> -> vector<8x768xi32>
    %c767_i32_261 = arith.constant 767 : i32
    %424 = tpu.dynamic_rotate %423 by %c767_i32_261 dim 1 : vector<8x768xi32>, i32 -> vector<8x768xi32>
    %425 = tpu.bitcast %424 : vector<8x768xi32> -> vector<16x768xbf16>
    %c80_262 = arith.constant 80 : index
    %c0_263 = arith.constant 0 : index
    %426 = vector.load %arg10[%c80_262, %c0_263] : memref<144x768xbf16, #tpu.memory_space<vmem>>, vector<16x768xbf16>
    tpu.vector_store %arg10[%c80_262, %c0_263], %425 {strides = array<i32>} : memref<144x768xbf16, #tpu.memory_space<vmem>>, vector<16x768xbf16>,
    %427 = tpu.bitcast %405 : vector<16x768xbf16> -> vector<8x768xi32>
    %c751_i32_264 = arith.constant 751 : i32
    %428 = tpu.dynamic_rotate %427 by %c751_i32_264 dim 1 : vector<8x768xi32>, i32 -> vector<8x768xi32>
    %429 = tpu.bitcast %428 : vector<8x768xi32> -> vector<16x768xbf16>
    %c96_265 = arith.constant 96 : index
    %c0_266 = arith.constant 0 : index
    %430 = vector.load %arg10[%c96_265, %c0_266] : memref<144x768xbf16, #tpu.memory_space<vmem>>, vector<16x768xbf16>
    tpu.vector_store %arg10[%c96_265, %c0_266], %429 {strides = array<i32>} : memref<144x768xbf16, #tpu.memory_space<vmem>>, vector<16x768xbf16>,
    %431 = tpu.bitcast %405 : vector<16x768xbf16> -> vector<8x768xi32>
    %c750_i32_267 = arith.constant 750 : i32
    %432 = tpu.dynamic_rotate %431 by %c750_i32_267 dim 1 : vector<8x768xi32>, i32 -> vector<8x768xi32>
    %433 = tpu.bitcast %432 : vector<8x768xi32> -> vector<16x768xbf16>
    %c112_268 = arith.constant 112 : index
    %c0_269 = arith.constant 0 : index
    %434 = vector.load %arg10[%c112_268, %c0_269] : memref<144x768xbf16, #tpu.memory_space<vmem>>, vector<16x768xbf16>
    tpu.vector_store %arg10[%c112_268, %c0_269], %433 {strides = array<i32>} : memref<144x768xbf16, #tpu.memory_space<vmem>>, vector<16x768xbf16>,
    %435 = tpu.bitcast %405 : vector<16x768xbf16> -> vector<8x768xi32>
    %c749_i32_270 = arith.constant 749 : i32
    %436 = tpu.dynamic_rotate %435 by %c749_i32_270 dim 1 : vector<8x768xi32>, i32 -> vector<8x768xi32>
    %437 = tpu.bitcast %436 : vector<8x768xi32> -> vector<16x768xbf16>
    %c128_271 = arith.constant 128 : index
    %c0_272 = arith.constant 0 : index
    %438 = vector.load %arg10[%c128_271, %c0_272] : memref<144x768xbf16, #tpu.memory_space<vmem>>, vector<16x768xbf16>
    tpu.vector_store %arg10[%c128_271, %c0_272], %437 {strides = array<i32>} : memref<144x768xbf16, #tpu.memory_space<vmem>>, vector<16x768xbf16>,
    %c0_273 = arith.constant 0 : index
    %c0_274 = arith.constant 0 : index
    %439 = vector.load %arg3[%c0_273, %c0_274] : memref<32x144xbf16, #tpu.memory_space<vmem>>, vector<32x144xbf16>
    %c0_275 = arith.constant 0 : index
    %c0_276 = arith.constant 0 : index
    %440 = vector.load %arg10[%c0_275, %c0_276] : memref<144x768xbf16, #tpu.memory_space<vmem>>, vector<144x768xbf16>
    %cst_277 = arith.constant dense<0.000000e+00> : vector<32x768xf32>
    %441 = tpu.matmul %439, %440, %cst_277 {dimension_numbers = #tpu.dot_dimension_numbers<[1], [0], [0], [1], [0, 0, 1, 1], [], []>} : vector<32x144xbf16>, vector<144x768xbf16>, vector<32x768xf32> -> vector<32x768xf32>
    %c0_278 = arith.constant 0 : index
    %c3840 = arith.constant 3840 : index
    %442 = vector.load %arg9[%c0_278, %c3840] : memref<32x6144xf32, #tpu.memory_space<vmem>>, vector<32x768xf32>
    %443 = arith.addf %441, %442 : vector<32x768xf32>
    %444 = vector.extract_strided_slice %443 {offsets = [0, 0], sizes = [8, 768], strides = [1, 1]} : vector<32x768xf32> to vector<8x768xf32>
    %445 = arith.negf %444 : vector<8x768xf32>
    %446 = math.exp %445 : vector<8x768xf32>
    %cst_279 = arith.constant 1.000000e+00 : f32
    %447 = vector.broadcast %cst_279 : f32 to vector<8x768xf32>
    %448 = arith.addf %447, %446 : vector<8x768xf32>
    %449 = arith.divf %447, %448 : vector<8x768xf32>
    %450 = vector.extract_strided_slice %443 {offsets = [8, 0], sizes = [8, 768], strides = [1, 1]} : vector<32x768xf32> to vector<8x768xf32>
    %451 = arith.negf %450 : vector<8x768xf32>
    %452 = math.exp %451 : vector<8x768xf32>
    %cst_280 = arith.constant 1.000000e+00 : f32
    %453 = vector.broadcast %cst_280 : f32 to vector<8x768xf32>
    %454 = arith.addf %453, %452 : vector<8x768xf32>
    %455 = arith.divf %453, %454 : vector<8x768xf32>
    %456 = vector.extract_strided_slice %443 {offsets = [16, 0], sizes = [8, 768], strides = [1, 1]} : vector<32x768xf32> to vector<8x768xf32>
    %457 = math.tanh %456 : vector<8x768xf32>
    %458 = vector.extract_strided_slice %443 {offsets = [24, 0], sizes = [8, 768], strides = [1, 1]} : vector<32x768xf32> to vector<8x768xf32>
    %459 = arith.negf %458 : vector<8x768xf32>
    %460 = math.exp %459 : vector<8x768xf32>
    %cst_281 = arith.constant 1.000000e+00 : f32
    %461 = vector.broadcast %cst_281 : f32 to vector<8x768xf32>
    %462 = arith.addf %461, %460 : vector<8x768xf32>
    %463 = arith.divf %461, %462 : vector<8x768xf32>
    %c0_282 = arith.constant 0 : index
    %c0_283 = arith.constant 0 : index
    %464 = vector.load %arg7[%c0_282, %c0_283] : memref<8x768xf32, #tpu.memory_space<vmem>>, vector<8x768xf32>
    %465 = arith.mulf %455, %464 : vector<8x768xf32>
    %466 = arith.mulf %449, %457 : vector<8x768xf32>
    %467 = arith.addf %465, %466 : vector<8x768xf32>
    %468 = math.tanh %467 : vector<8x768xf32>
    %469 = arith.mulf %463, %468 : vector<8x768xf32>
    %470 = arith.mulf %469, %44 : vector<8x768xf32>
    %471 = arith.truncf %470 : vector<8x768xf32> to vector<8x768xbf16>
    %c0_284 = arith.constant 0 : index
    %c0_285 = arith.constant 0 : index
    %472 = vector.load %arg7[%c0_284, %c0_285] : memref<8x768xf32, #tpu.memory_space<vmem>>, vector<8x768xf32>
    tpu.vector_store %arg7[%c0_284, %c0_285], %467 {strides = array<i32>} : memref<8x768xf32, #tpu.memory_space<vmem>>, vector<8x768xf32>,
    %c0_286 = arith.constant 0 : index
    %c0_287 = arith.constant 0 : index
    %473 = vector.load %arg11[%c0_286, %c0_287] : memref<16x768xbf16, #tpu.memory_space<vmem>>, vector<8x768xbf16>
    tpu.vector_store %arg11[%c0_286, %c0_287], %471 {strides = array<i32>} : memref<16x768xbf16, #tpu.memory_space<vmem>>, vector<8x768xbf16>,
    %c5 = arith.constant 5 : index
    %c0_288 = arith.constant 0 : index
    %c0_289 = arith.constant 0 : index
    %474 = vector.load %arg6[%c5, %c0_288, %c0_289] : memref<8x8x768xbf16, #tpu.memory_space<vmem>>, vector<1x8x768xbf16>
    %475 = vector.shape_cast %474 : vector<1x8x768xbf16> to vector<8x768xbf16>
    %476 = vector.shape_cast %471 : vector<8x768xbf16> to vector<1x8x768xbf16>
    tpu.vector_store %arg6[%c5, %c0_288, %c0_289], %476 {strides = array<i32>} : memref<8x8x768xbf16, #tpu.memory_space<vmem>>, vector<1x8x768xbf16>,
    %c0_290 = arith.constant 0 : index
    %c0_291 = arith.constant 0 : index
    %477 = vector.load %arg11[%c0_290, %c0_291] : memref<16x768xbf16, #tpu.memory_space<vmem>>, vector<16x768xbf16>
    %478 = tpu.bitcast %477 : vector<16x768xbf16> -> vector<8x768xi32>
    %c19_i32_292 = arith.constant 19 : i32
    %479 = tpu.dynamic_rotate %478 by %c19_i32_292 dim 1 : vector<8x768xi32>, i32 -> vector<8x768xi32>
    %480 = tpu.bitcast %479 : vector<8x768xi32> -> vector<16x768xbf16>
    %c0_293 = arith.constant 0 : index
    %c0_294 = arith.constant 0 : index
    %481 = vector.load %arg10[%c0_293, %c0_294] : memref<144x768xbf16, #tpu.memory_space<vmem>>, vector<16x768xbf16>
    tpu.vector_store %arg10[%c0_293, %c0_294], %480 {strides = array<i32>} : memref<144x768xbf16, #tpu.memory_space<vmem>>, vector<16x768xbf16>,
    %482 = tpu.bitcast %477 : vector<16x768xbf16> -> vector<8x768xi32>
    %c18_i32_295 = arith.constant 18 : i32
    %483 = tpu.dynamic_rotate %482 by %c18_i32_295 dim 1 : vector<8x768xi32>, i32 -> vector<8x768xi32>
    %484 = tpu.bitcast %483 : vector<8x768xi32> -> vector<16x768xbf16>
    %c16_296 = arith.constant 16 : index
    %c0_297 = arith.constant 0 : index
    %485 = vector.load %arg10[%c16_296, %c0_297] : memref<144x768xbf16, #tpu.memory_space<vmem>>, vector<16x768xbf16>
    tpu.vector_store %arg10[%c16_296, %c0_297], %484 {strides = array<i32>} : memref<144x768xbf16, #tpu.memory_space<vmem>>, vector<16x768xbf16>,
    %486 = tpu.bitcast %477 : vector<16x768xbf16> -> vector<8x768xi32>
    %c17_i32_298 = arith.constant 17 : i32
    %487 = tpu.dynamic_rotate %486 by %c17_i32_298 dim 1 : vector<8x768xi32>, i32 -> vector<8x768xi32>
    %488 = tpu.bitcast %487 : vector<8x768xi32> -> vector<16x768xbf16>
    %c32_299 = arith.constant 32 : index
    %c0_300 = arith.constant 0 : index
    %489 = vector.load %arg10[%c32_299, %c0_300] : memref<144x768xbf16, #tpu.memory_space<vmem>>, vector<16x768xbf16>
    tpu.vector_store %arg10[%c32_299, %c0_300], %488 {strides = array<i32>} : memref<144x768xbf16, #tpu.memory_space<vmem>>, vector<16x768xbf16>,
    %490 = tpu.bitcast %477 : vector<16x768xbf16> -> vector<8x768xi32>
    %c1_i32_301 = arith.constant 1 : i32
    %491 = tpu.dynamic_rotate %490 by %c1_i32_301 dim 1 : vector<8x768xi32>, i32 -> vector<8x768xi32>
    %492 = tpu.bitcast %491 : vector<8x768xi32> -> vector<16x768xbf16>
    %c48_302 = arith.constant 48 : index
    %c0_303 = arith.constant 0 : index
    %493 = vector.load %arg10[%c48_302, %c0_303] : memref<144x768xbf16, #tpu.memory_space<vmem>>, vector<16x768xbf16>
    tpu.vector_store %arg10[%c48_302, %c0_303], %492 {strides = array<i32>} : memref<144x768xbf16, #tpu.memory_space<vmem>>, vector<16x768xbf16>,
    %c64_304 = arith.constant 64 : index
    %c0_305 = arith.constant 0 : index
    %494 = vector.load %arg10[%c64_304, %c0_305] : memref<144x768xbf16, #tpu.memory_space<vmem>>, vector<16x768xbf16>
    tpu.vector_store %arg10[%c64_304, %c0_305], %477 {strides = array<i32>} : memref<144x768xbf16, #tpu.memory_space<vmem>>, vector<16x768xbf16>,
    %495 = tpu.bitcast %477 : vector<16x768xbf16> -> vector<8x768xi32>
    %c767_i32_306 = arith.constant 767 : i32
    %496 = tpu.dynamic_rotate %495 by %c767_i32_306 dim 1 : vector<8x768xi32>, i32 -> vector<8x768xi32>
    %497 = tpu.bitcast %496 : vector<8x768xi32> -> vector<16x768xbf16>
    %c80_307 = arith.constant 80 : index
    %c0_308 = arith.constant 0 : index
    %498 = vector.load %arg10[%c80_307, %c0_308] : memref<144x768xbf16, #tpu.memory_space<vmem>>, vector<16x768xbf16>
    tpu.vector_store %arg10[%c80_307, %c0_308], %497 {strides = array<i32>} : memref<144x768xbf16, #tpu.memory_space<vmem>>, vector<16x768xbf16>,
    %499 = tpu.bitcast %477 : vector<16x768xbf16> -> vector<8x768xi32>
    %c751_i32_309 = arith.constant 751 : i32
    %500 = tpu.dynamic_rotate %499 by %c751_i32_309 dim 1 : vector<8x768xi32>, i32 -> vector<8x768xi32>
    %501 = tpu.bitcast %500 : vector<8x768xi32> -> vector<16x768xbf16>
    %c96_310 = arith.constant 96 : index
    %c0_311 = arith.constant 0 : index
    %502 = vector.load %arg10[%c96_310, %c0_311] : memref<144x768xbf16, #tpu.memory_space<vmem>>, vector<16x768xbf16>
    tpu.vector_store %arg10[%c96_310, %c0_311], %501 {strides = array<i32>} : memref<144x768xbf16, #tpu.memory_space<vmem>>, vector<16x768xbf16>,
    %503 = tpu.bitcast %477 : vector<16x768xbf16> -> vector<8x768xi32>
    %c750_i32_312 = arith.constant 750 : i32
    %504 = tpu.dynamic_rotate %503 by %c750_i32_312 dim 1 : vector<8x768xi32>, i32 -> vector<8x768xi32>
    %505 = tpu.bitcast %504 : vector<8x768xi32> -> vector<16x768xbf16>
    %c112_313 = arith.constant 112 : index
    %c0_314 = arith.constant 0 : index
    %506 = vector.load %arg10[%c112_313, %c0_314] : memref<144x768xbf16, #tpu.memory_space<vmem>>, vector<16x768xbf16>
    tpu.vector_store %arg10[%c112_313, %c0_314], %505 {strides = array<i32>} : memref<144x768xbf16, #tpu.memory_space<vmem>>, vector<16x768xbf16>,
    %507 = tpu.bitcast %477 : vector<16x768xbf16> -> vector<8x768xi32>
    %c749_i32_315 = arith.constant 749 : i32
    %508 = tpu.dynamic_rotate %507 by %c749_i32_315 dim 1 : vector<8x768xi32>, i32 -> vector<8x768xi32>
    %509 = tpu.bitcast %508 : vector<8x768xi32> -> vector<16x768xbf16>
    %c128_316 = arith.constant 128 : index
    %c0_317 = arith.constant 0 : index
    %510 = vector.load %arg10[%c128_316, %c0_317] : memref<144x768xbf16, #tpu.memory_space<vmem>>, vector<16x768xbf16>
    tpu.vector_store %arg10[%c128_316, %c0_317], %509 {strides = array<i32>} : memref<144x768xbf16, #tpu.memory_space<vmem>>, vector<16x768xbf16>,
    %c0_318 = arith.constant 0 : index
    %c0_319 = arith.constant 0 : index
    %511 = vector.load %arg3[%c0_318, %c0_319] : memref<32x144xbf16, #tpu.memory_space<vmem>>, vector<32x144xbf16>
    %c0_320 = arith.constant 0 : index
    %c0_321 = arith.constant 0 : index
    %512 = vector.load %arg10[%c0_320, %c0_321] : memref<144x768xbf16, #tpu.memory_space<vmem>>, vector<144x768xbf16>
    %cst_322 = arith.constant dense<0.000000e+00> : vector<32x768xf32>
    %513 = tpu.matmul %511, %512, %cst_322 {dimension_numbers = #tpu.dot_dimension_numbers<[1], [0], [0], [1], [0, 0, 1, 1], [], []>} : vector<32x144xbf16>, vector<144x768xbf16>, vector<32x768xf32> -> vector<32x768xf32>
    %c0_323 = arith.constant 0 : index
    %c4608 = arith.constant 4608 : index
    %514 = vector.load %arg9[%c0_323, %c4608] : memref<32x6144xf32, #tpu.memory_space<vmem>>, vector<32x768xf32>
    %515 = arith.addf %513, %514 : vector<32x768xf32>
    %516 = vector.extract_strided_slice %515 {offsets = [0, 0], sizes = [8, 768], strides = [1, 1]} : vector<32x768xf32> to vector<8x768xf32>
    %517 = arith.negf %516 : vector<8x768xf32>
    %518 = math.exp %517 : vector<8x768xf32>
    %cst_324 = arith.constant 1.000000e+00 : f32
    %519 = vector.broadcast %cst_324 : f32 to vector<8x768xf32>
    %520 = arith.addf %519, %518 : vector<8x768xf32>
    %521 = arith.divf %519, %520 : vector<8x768xf32>
    %522 = vector.extract_strided_slice %515 {offsets = [8, 0], sizes = [8, 768], strides = [1, 1]} : vector<32x768xf32> to vector<8x768xf32>
    %523 = arith.negf %522 : vector<8x768xf32>
    %524 = math.exp %523 : vector<8x768xf32>
    %cst_325 = arith.constant 1.000000e+00 : f32
    %525 = vector.broadcast %cst_325 : f32 to vector<8x768xf32>
    %526 = arith.addf %525, %524 : vector<8x768xf32>
    %527 = arith.divf %525, %526 : vector<8x768xf32>
    %528 = vector.extract_strided_slice %515 {offsets = [16, 0], sizes = [8, 768], strides = [1, 1]} : vector<32x768xf32> to vector<8x768xf32>
    %529 = math.tanh %528 : vector<8x768xf32>
    %530 = vector.extract_strided_slice %515 {offsets = [24, 0], sizes = [8, 768], strides = [1, 1]} : vector<32x768xf32> to vector<8x768xf32>
    %531 = arith.negf %530 : vector<8x768xf32>
    %532 = math.exp %531 : vector<8x768xf32>
    %cst_326 = arith.constant 1.000000e+00 : f32
    %533 = vector.broadcast %cst_326 : f32 to vector<8x768xf32>
    %534 = arith.addf %533, %532 : vector<8x768xf32>
    %535 = arith.divf %533, %534 : vector<8x768xf32>
    %c0_327 = arith.constant 0 : index
    %c0_328 = arith.constant 0 : index
    %536 = vector.load %arg7[%c0_327, %c0_328] : memref<8x768xf32, #tpu.memory_space<vmem>>, vector<8x768xf32>
    %537 = arith.mulf %527, %536 : vector<8x768xf32>
    %538 = arith.mulf %521, %529 : vector<8x768xf32>
    %539 = arith.addf %537, %538 : vector<8x768xf32>
    %540 = math.tanh %539 : vector<8x768xf32>
    %541 = arith.mulf %535, %540 : vector<8x768xf32>
    %542 = arith.mulf %541, %44 : vector<8x768xf32>
    %543 = arith.truncf %542 : vector<8x768xf32> to vector<8x768xbf16>
    %c0_329 = arith.constant 0 : index
    %c0_330 = arith.constant 0 : index
    %544 = vector.load %arg7[%c0_329, %c0_330] : memref<8x768xf32, #tpu.memory_space<vmem>>, vector<8x768xf32>
    tpu.vector_store %arg7[%c0_329, %c0_330], %539 {strides = array<i32>} : memref<8x768xf32, #tpu.memory_space<vmem>>, vector<8x768xf32>,
    %c0_331 = arith.constant 0 : index
    %c0_332 = arith.constant 0 : index
    %545 = vector.load %arg11[%c0_331, %c0_332] : memref<16x768xbf16, #tpu.memory_space<vmem>>, vector<8x768xbf16>
    tpu.vector_store %arg11[%c0_331, %c0_332], %543 {strides = array<i32>} : memref<16x768xbf16, #tpu.memory_space<vmem>>, vector<8x768xbf16>,
    %c6 = arith.constant 6 : index
    %c0_333 = arith.constant 0 : index
    %c0_334 = arith.constant 0 : index
    %546 = vector.load %arg6[%c6, %c0_333, %c0_334] : memref<8x8x768xbf16, #tpu.memory_space<vmem>>, vector<1x8x768xbf16>
    %547 = vector.shape_cast %546 : vector<1x8x768xbf16> to vector<8x768xbf16>
    %548 = vector.shape_cast %543 : vector<8x768xbf16> to vector<1x8x768xbf16>
    tpu.vector_store %arg6[%c6, %c0_333, %c0_334], %548 {strides = array<i32>} : memref<8x8x768xbf16, #tpu.memory_space<vmem>>, vector<1x8x768xbf16>,
    %c0_335 = arith.constant 0 : index
    %c0_336 = arith.constant 0 : index
    %549 = vector.load %arg11[%c0_335, %c0_336] : memref<16x768xbf16, #tpu.memory_space<vmem>>, vector<16x768xbf16>
    %550 = tpu.bitcast %549 : vector<16x768xbf16> -> vector<8x768xi32>
    %c19_i32_337 = arith.constant 19 : i32
    %551 = tpu.dynamic_rotate %550 by %c19_i32_337 dim 1 : vector<8x768xi32>, i32 -> vector<8x768xi32>
    %552 = tpu.bitcast %551 : vector<8x768xi32> -> vector<16x768xbf16>
    %c0_338 = arith.constant 0 : index
    %c0_339 = arith.constant 0 : index
    %553 = vector.load %arg10[%c0_338, %c0_339] : memref<144x768xbf16, #tpu.memory_space<vmem>>, vector<16x768xbf16>
    tpu.vector_store %arg10[%c0_338, %c0_339], %552 {strides = array<i32>} : memref<144x768xbf16, #tpu.memory_space<vmem>>, vector<16x768xbf16>,
    %554 = tpu.bitcast %549 : vector<16x768xbf16> -> vector<8x768xi32>
    %c18_i32_340 = arith.constant 18 : i32
    %555 = tpu.dynamic_rotate %554 by %c18_i32_340 dim 1 : vector<8x768xi32>, i32 -> vector<8x768xi32>
    %556 = tpu.bitcast %555 : vector<8x768xi32> -> vector<16x768xbf16>
    %c16_341 = arith.constant 16 : index
    %c0_342 = arith.constant 0 : index
    %557 = vector.load %arg10[%c16_341, %c0_342] : memref<144x768xbf16, #tpu.memory_space<vmem>>, vector<16x768xbf16>
    tpu.vector_store %arg10[%c16_341, %c0_342], %556 {strides = array<i32>} : memref<144x768xbf16, #tpu.memory_space<vmem>>, vector<16x768xbf16>,
    %558 = tpu.bitcast %549 : vector<16x768xbf16> -> vector<8x768xi32>
    %c17_i32_343 = arith.constant 17 : i32
    %559 = tpu.dynamic_rotate %558 by %c17_i32_343 dim 1 : vector<8x768xi32>, i32 -> vector<8x768xi32>
    %560 = tpu.bitcast %559 : vector<8x768xi32> -> vector<16x768xbf16>
    %c32_344 = arith.constant 32 : index
    %c0_345 = arith.constant 0 : index
    %561 = vector.load %arg10[%c32_344, %c0_345] : memref<144x768xbf16, #tpu.memory_space<vmem>>, vector<16x768xbf16>
    tpu.vector_store %arg10[%c32_344, %c0_345], %560 {strides = array<i32>} : memref<144x768xbf16, #tpu.memory_space<vmem>>, vector<16x768xbf16>,
    %562 = tpu.bitcast %549 : vector<16x768xbf16> -> vector<8x768xi32>
    %c1_i32_346 = arith.constant 1 : i32
    %563 = tpu.dynamic_rotate %562 by %c1_i32_346 dim 1 : vector<8x768xi32>, i32 -> vector<8x768xi32>
    %564 = tpu.bitcast %563 : vector<8x768xi32> -> vector<16x768xbf16>
    %c48_347 = arith.constant 48 : index
    %c0_348 = arith.constant 0 : index
    %565 = vector.load %arg10[%c48_347, %c0_348] : memref<144x768xbf16, #tpu.memory_space<vmem>>, vector<16x768xbf16>
    tpu.vector_store %arg10[%c48_347, %c0_348], %564 {strides = array<i32>} : memref<144x768xbf16, #tpu.memory_space<vmem>>, vector<16x768xbf16>,
    %c64_349 = arith.constant 64 : index
    %c0_350 = arith.constant 0 : index
    %566 = vector.load %arg10[%c64_349, %c0_350] : memref<144x768xbf16, #tpu.memory_space<vmem>>, vector<16x768xbf16>
    tpu.vector_store %arg10[%c64_349, %c0_350], %549 {strides = array<i32>} : memref<144x768xbf16, #tpu.memory_space<vmem>>, vector<16x768xbf16>,
    %567 = tpu.bitcast %549 : vector<16x768xbf16> -> vector<8x768xi32>
    %c767_i32_351 = arith.constant 767 : i32
    %568 = tpu.dynamic_rotate %567 by %c767_i32_351 dim 1 : vector<8x768xi32>, i32 -> vector<8x768xi32>
    %569 = tpu.bitcast %568 : vector<8x768xi32> -> vector<16x768xbf16>
    %c80_352 = arith.constant 80 : index
    %c0_353 = arith.constant 0 : index
    %570 = vector.load %arg10[%c80_352, %c0_353] : memref<144x768xbf16, #tpu.memory_space<vmem>>, vector<16x768xbf16>
    tpu.vector_store %arg10[%c80_352, %c0_353], %569 {strides = array<i32>} : memref<144x768xbf16, #tpu.memory_space<vmem>>, vector<16x768xbf16>,
    %571 = tpu.bitcast %549 : vector<16x768xbf16> -> vector<8x768xi32>
    %c751_i32_354 = arith.constant 751 : i32
    %572 = tpu.dynamic_rotate %571 by %c751_i32_354 dim 1 : vector<8x768xi32>, i32 -> vector<8x768xi32>
    %573 = tpu.bitcast %572 : vector<8x768xi32> -> vector<16x768xbf16>
    %c96_355 = arith.constant 96 : index
    %c0_356 = arith.constant 0 : index
    %574 = vector.load %arg10[%c96_355, %c0_356] : memref<144x768xbf16, #tpu.memory_space<vmem>>, vector<16x768xbf16>
    tpu.vector_store %arg10[%c96_355, %c0_356], %573 {strides = array<i32>} : memref<144x768xbf16, #tpu.memory_space<vmem>>, vector<16x768xbf16>,
    %575 = tpu.bitcast %549 : vector<16x768xbf16> -> vector<8x768xi32>
    %c750_i32_357 = arith.constant 750 : i32
    %576 = tpu.dynamic_rotate %575 by %c750_i32_357 dim 1 : vector<8x768xi32>, i32 -> vector<8x768xi32>
    %577 = tpu.bitcast %576 : vector<8x768xi32> -> vector<16x768xbf16>
    %c112_358 = arith.constant 112 : index
    %c0_359 = arith.constant 0 : index
    %578 = vector.load %arg10[%c112_358, %c0_359] : memref<144x768xbf16, #tpu.memory_space<vmem>>, vector<16x768xbf16>
    tpu.vector_store %arg10[%c112_358, %c0_359], %577 {strides = array<i32>} : memref<144x768xbf16, #tpu.memory_space<vmem>>, vector<16x768xbf16>,
    %579 = tpu.bitcast %549 : vector<16x768xbf16> -> vector<8x768xi32>
    %c749_i32_360 = arith.constant 749 : i32
    %580 = tpu.dynamic_rotate %579 by %c749_i32_360 dim 1 : vector<8x768xi32>, i32 -> vector<8x768xi32>
    %581 = tpu.bitcast %580 : vector<8x768xi32> -> vector<16x768xbf16>
    %c128_361 = arith.constant 128 : index
    %c0_362 = arith.constant 0 : index
    %582 = vector.load %arg10[%c128_361, %c0_362] : memref<144x768xbf16, #tpu.memory_space<vmem>>, vector<16x768xbf16>
    tpu.vector_store %arg10[%c128_361, %c0_362], %581 {strides = array<i32>} : memref<144x768xbf16, #tpu.memory_space<vmem>>, vector<16x768xbf16>,
    %c0_363 = arith.constant 0 : index
    %c0_364 = arith.constant 0 : index
    %583 = vector.load %arg3[%c0_363, %c0_364] : memref<32x144xbf16, #tpu.memory_space<vmem>>, vector<32x144xbf16>
    %c0_365 = arith.constant 0 : index
    %c0_366 = arith.constant 0 : index
    %584 = vector.load %arg10[%c0_365, %c0_366] : memref<144x768xbf16, #tpu.memory_space<vmem>>, vector<144x768xbf16>
    %cst_367 = arith.constant dense<0.000000e+00> : vector<32x768xf32>
    %585 = tpu.matmul %583, %584, %cst_367 {dimension_numbers = #tpu.dot_dimension_numbers<[1], [0], [0], [1], [0, 0, 1, 1], [], []>} : vector<32x144xbf16>, vector<144x768xbf16>, vector<32x768xf32> -> vector<32x768xf32>
    %c0_368 = arith.constant 0 : index
    %c5376 = arith.constant 5376 : index
    %586 = vector.load %arg9[%c0_368, %c5376] : memref<32x6144xf32, #tpu.memory_space<vmem>>, vector<32x768xf32>
    %587 = arith.addf %585, %586 : vector<32x768xf32>
    %588 = vector.extract_strided_slice %587 {offsets = [0, 0], sizes = [8, 768], strides = [1, 1]} : vector<32x768xf32> to vector<8x768xf32>
    %589 = arith.negf %588 : vector<8x768xf32>
    %590 = math.exp %589 : vector<8x768xf32>
    %cst_369 = arith.constant 1.000000e+00 : f32
    %591 = vector.broadcast %cst_369 : f32 to vector<8x768xf32>
    %592 = arith.addf %591, %590 : vector<8x768xf32>
    %593 = arith.divf %591, %592 : vector<8x768xf32>
    %594 = vector.extract_strided_slice %587 {offsets = [8, 0], sizes = [8, 768], strides = [1, 1]} : vector<32x768xf32> to vector<8x768xf32>
    %595 = arith.negf %594 : vector<8x768xf32>
    %596 = math.exp %595 : vector<8x768xf32>
    %cst_370 = arith.constant 1.000000e+00 : f32
    %597 = vector.broadcast %cst_370 : f32 to vector<8x768xf32>
    %598 = arith.addf %597, %596 : vector<8x768xf32>
    %599 = arith.divf %597, %598 : vector<8x768xf32>
    %600 = vector.extract_strided_slice %587 {offsets = [16, 0], sizes = [8, 768], strides = [1, 1]} : vector<32x768xf32> to vector<8x768xf32>
    %601 = math.tanh %600 : vector<8x768xf32>
    %602 = vector.extract_strided_slice %587 {offsets = [24, 0], sizes = [8, 768], strides = [1, 1]} : vector<32x768xf32> to vector<8x768xf32>
    %603 = arith.negf %602 : vector<8x768xf32>
    %604 = math.exp %603 : vector<8x768xf32>
    %cst_371 = arith.constant 1.000000e+00 : f32
    %605 = vector.broadcast %cst_371 : f32 to vector<8x768xf32>
    %606 = arith.addf %605, %604 : vector<8x768xf32>
    %607 = arith.divf %605, %606 : vector<8x768xf32>
    %c0_372 = arith.constant 0 : index
    %c0_373 = arith.constant 0 : index
    %608 = vector.load %arg7[%c0_372, %c0_373] : memref<8x768xf32, #tpu.memory_space<vmem>>, vector<8x768xf32>
    %609 = arith.mulf %599, %608 : vector<8x768xf32>
    %610 = arith.mulf %593, %601 : vector<8x768xf32>
    %611 = arith.addf %609, %610 : vector<8x768xf32>
    %612 = math.tanh %611 : vector<8x768xf32>
    %613 = arith.mulf %607, %612 : vector<8x768xf32>
    %614 = arith.mulf %613, %44 : vector<8x768xf32>
    %615 = arith.truncf %614 : vector<8x768xf32> to vector<8x768xbf16>
    %c0_374 = arith.constant 0 : index
    %c0_375 = arith.constant 0 : index
    %616 = vector.load %arg7[%c0_374, %c0_375] : memref<8x768xf32, #tpu.memory_space<vmem>>, vector<8x768xf32>
    tpu.vector_store %arg7[%c0_374, %c0_375], %611 {strides = array<i32>} : memref<8x768xf32, #tpu.memory_space<vmem>>, vector<8x768xf32>,
    %c0_376 = arith.constant 0 : index
    %c0_377 = arith.constant 0 : index
    %617 = vector.load %arg11[%c0_376, %c0_377] : memref<16x768xbf16, #tpu.memory_space<vmem>>, vector<8x768xbf16>
    tpu.vector_store %arg11[%c0_376, %c0_377], %615 {strides = array<i32>} : memref<16x768xbf16, #tpu.memory_space<vmem>>, vector<8x768xbf16>,
    %c7 = arith.constant 7 : index
    %c0_378 = arith.constant 0 : index
    %c0_379 = arith.constant 0 : index
    %618 = vector.load %arg6[%c7, %c0_378, %c0_379] : memref<8x8x768xbf16, #tpu.memory_space<vmem>>, vector<1x8x768xbf16>
    %619 = vector.shape_cast %618 : vector<1x8x768xbf16> to vector<8x768xbf16>
    %620 = vector.shape_cast %615 : vector<8x768xbf16> to vector<1x8x768xbf16>
    tpu.vector_store %arg6[%c7, %c0_378, %c0_379], %620 {strides = array<i32>} : memref<8x8x768xbf16, #tpu.memory_space<vmem>>, vector<1x8x768xbf16>,
    return
  }
  func.func @transform_0(%arg0: i32) -> (i32, i32) {
    %c0_i32 = arith.constant 0 : i32
    %c0_i32_0 = arith.constant 0 : i32
    return %c0_i32, %arg0 : i32, i32
  }
  func.func @transform_1(%arg0: i32) -> (i32, i32) {
    %c0_i32 = arith.constant 0 : i32
    %c0_i32_0 = arith.constant 0 : i32
    %c0_i32_1 = arith.constant 0 : i32
    return %c0_i32, %c0_i32_0 : i32, i32
  }
  func.func @transform_2(%arg0: i32) -> (i32, i32) {
    %c0_i32 = arith.constant 0 : i32
    %c0_i32_0 = arith.constant 0 : i32
    %c0_i32_1 = arith.constant 0 : i32
    return %c0_i32, %c0_i32_0 : i32, i32
  }
  func.func @transform_3(%arg0: i32) -> (i32, i32) {
    %c0_i32 = arith.constant 0 : i32
    %c0_i32_0 = arith.constant 0 : i32
    %c0_i32_1 = arith.constant 0 : i32
    return %c0_i32, %c0_i32_0 : i32, i32
  }
  func.func @transform_4(%arg0: i32) -> (i32, i32) {
    %c0_i32 = arith.constant 0 : i32
    %c0_i32_0 = arith.constant 0 : i32
    %c0_i32_1 = arith.constant 0 : i32
    return %c0_i32, %c0_i32_0 : i32, i32
  }
  func.func @transform_5(%arg0: i32) -> (i32, i32, i32) {
    %c0_i32 = arith.constant 0 : i32
    %c0_i32_0 = arith.constant 0 : i32
    %c0_i32_1 = arith.constant 0 : i32
    return %arg0, %c0_i32, %c0_i32_0 : i32, i32, i32
  }
  func.func @transform_6(%arg0: i32) -> (i32, i32) {
    %c0_i32 = arith.constant 0 : i32
    %c0_i32_0 = arith.constant 0 : i32
    %c0_i32_1 = arith.constant 0 : i32
    return %c0_i32, %c0_i32_0 : i32, i32
  }
}

</mosaic_0001>

<bundles_post_ra>
// kernel: conv_lstm_forward.1
= control target key start
LH: loop header
LB: loop body
LE: loop exit
PB: predicated region body
PF: predicated region fallthrough
CT: control target
= control target key end

     0   :  { %s11783_s29 = smov 19   ;;  %s11784_s30 = smov 18   ;;  %vm2831_vm0 = vcmask 130048   ;;  %v423_v24 = vlaneseq  ;;  %s17727_s0 = inlined_call_operand.vmem [shape: bf16[16,6144], index: 0, kind: input, shape index: {}]   ;;  %s17728_s1 = inlined_call_operand.vmem [shape: bf16[32,144], index: 1, kind: input, shape index: {}]   ;;  %s17729_s2 = inlined_call_operand.vmem [shape: bf16[32,144], index: 2, kind: input, shape index: {}]   ;;  %s17730_s3 = inlined_call_operand.vmem [shape: f32[32,1], index: 3, kind: input, shape index: {}]   ;;  %s17731_s4 = inlined_call_operand.vmem [shape: f32[8,768], index: 4, kind: input, shape index: {}]   ;;  %s17732_s5 = inlined_call_operand.vmem [shape: bf16[8,8,768], index: 5, kind: output, shape index: {0}]   ;;  %s17733_s6 = inlined_call_operand.vmem [shape: f32[8,768], index: 6, kind: output, shape index: {1}]  }
   0x1   :  { %v62_v0 = vld [vmem:[%s17727_s0 + $0xb8] sm:$0xff]  ;;  %v39_v2 = vld [vmem:[%s17727_s0] sm:$0xff]  ;;  %s11785_s7 = smov 17   ;;  %s11786_s8 = smov 1   ;;  %v40_v7 = vld [vmem:[%s17727_s0 + $0x8] sm:$0xff] }
   0x2   :  { %v86_v1 = vld [vmem:[%s17727_s0 + $0x178] sm:$0xff]  ;;  %v63_v4 = vld [vmem:[%s17727_s0 + $0xc0] sm:$0xff]  ;;  %v64_v8 = vld [vmem:[%s17727_s0 + $0xc8] sm:$0xff]  ;;  %s11787_s13 = smov 127   ;;  %s11788_s14 = smov 111   ;;  %v12012_v26 = vand.u32 127, %v423_v24 }
   0x3   :  { %v11836_v3 = vcombine.high %v62_v0, %v86_v1  ;;  %v11841_v5 = vcombine.low %v39_v2, %v63_v4  ;;  %v11847_v6 = vcombine.high %v39_v2, %v63_v4  ;;  %v11873_v9 = vcombine.low %v40_v7, %v64_v8  ;;  %s11789_s15 = smov 110   ;;  %v11896_v10 = vld [vmem:[%s17728_s1 + $0x4] ss:$8 sps:$4 sm:$0xff]   ;;  %s11790_s18 = smov 109   ;;  %v41_v11 = vld [vmem:[%s17727_s0 + $0x10] sm:$0xff]  ;;  %v42_v16 = vld [vmem:[%s17727_s0 + $0x18] sm:$0xff] }
   0x4   :  { %10119 = vmatprep.mubr.msk.bf16.mxu0 %vm2831_vm0, %v11896_v10  ;;  %v65_v12 = vld [vmem:[%s17727_s0 + $0xd0] sm:$0xff]  ;;  %10121 = vmatprep.mubr.msk.bf16.mxu1 %vm2831_vm0, %v11896_v10  ;;  %v11924_v15 = vcombine.high %v40_v7, %v64_v8  ;;  %v66_v17 = vld [vmem:[%s17727_s0 + $0xd8] sm:$0xff]  ;;  %v43_v19 = vld [vmem:[%s17727_s0 + $0x20] sm:$0xff]  ;;  %vm425_vm1 = vcmp.lt.s32.totalorder %v12012_v26, 19  ;;  %vm666_vm2 = vcmp.lt.s32.totalorder %v12012_v26, 18  ;;  %vm907_vm3 = vcmp.lt.s32.totalorder %v12012_v26, 17 }
   0x5   :  { %421 = vrot.lane.b32.xlu1 %v11836_v3, %s11783_s29  ;;  %327 = vrot.lane.b32.xlu0 %v11841_v5, %s11783_s29  ;;  %v11914_v13 = vcombine.high %v41_v11, %v65_v12  ;;  %v11918_v14 = vcombine.low %v41_v11, %v65_v12  ;;  %v11956_v18 = vcombine.low %v42_v16, %v66_v17  ;;  %v67_v20 = vld [vmem:[%s17727_s0 + $0xe0] sm:$0xff]  ;;  %vm1148_vm4 = vcmp.lt.s32.totalorder %v12012_v26, 1  ;;  %v12071_v43 = vld [vmem:[%s17727_s0 + $0x28] sm:$0xff] }
   0x6   :  { %v11990_v21 = vcombine.high %v43_v19, %v67_v20  ;;  %v11994_v22 = vcombine.low %v43_v19, %v67_v20  ;;  %v12000_v23 = vcombine.high %v42_v16, %v66_v17  ;;  %v12076_v44 = vld [vmem:[%s17727_s0 + $0xe8] sm:$0xff]  ;;  %vm1485_vm5 = vcmp.lt.s32.totalorder %v12012_v26, 127  ;;  %v69_v7 = vld [vmem:[%s17727_s0 + $0xf0] sm:$0xff] }
   0x7   :  { %v12092_v48 = vcombine.low %v12071_v43, %v12076_v44  ;;  %vm1726_vm6 = vcmp.lt.s32.totalorder %v12012_v26, 111  ;;  %vm1967_vm7 = vcmp.lt.s32.totalorder %v12012_v26, 110  ;;  %vm2208_vm8 = vcmp.lt.s32.totalorder %v12012_v26, 109  ;;  %v12175_v11 = vld [vmem:[%s17728_s1] ss:$8 sps:$4 sm:$0xff]  }
   0x8   :  { %v12180_v16 = vld [vmem:[%s17728_s1 + $0x14] ss:$8 sps:$4 sm:$0xff]   ;;  %v11782_v26 = vld [vmem:[%s17729_s2 + $0x10] ss:$8 sps:$4 sm:$0xff]  }
   0x9   :  { %570 = vrot.lane.b32.xlu1 %v11841_v5, %s11784_s30  ;;  %329 = vrot.lane.b32.xlu0 %v11847_v6, %s11783_s29 }
   0xd   :  { %664 = vrot.lane.b32.xlu1 %v11836_v3, %s11784_s30  ;;  %572 = vrot.lane.b32.xlu0 %v11847_v6, %s11784_s30 }
  0x11   :  { %813 = vrot.lane.b32.xlu1 %v11847_v6, %s11785_s7  ;;  %811 = vrot.lane.b32.xlu0 %v11841_v5, %s11785_s7 }
  0x15   :  { %1052 = vrot.lane.b32.xlu1 %v11841_v5, %s11786_s8  ;;  %905 = vrot.lane.b32.xlu0 %v11836_v3, %s11785_s7 }
  0x19   :  { %1146 = vrot.lane.b32.xlu1 %v11836_v3, %s11786_s8  ;;  %1054 = vrot.lane.b32.xlu0 %v11847_v6, %s11786_s8 }
  0x1d   :  { %1393 = vrot.lane.b32.xlu1 %v11873_v9, %s11787_s13  ;;  %1391 = vrot.lane.b32.xlu0 %v11847_v6, %s11787_s13 }
  0x21   :  { %1632 = vrot.lane.b32.xlu1 %v11847_v6, %s11788_s14  ;;  %1389 = vrot.lane.b32.xlu0 %v11841_v5, %s11787_s13 }
  0x25   :  { %1630 = vrot.lane.b32.xlu1 %v11841_v5, %s11788_s14  ;;  %1634 = vrot.lane.b32.xlu0 %v11873_v9, %s11788_s14 }
  0x29   :  { %1875 = vrot.lane.b32.xlu1 %v11873_v9, %s11789_s15  ;;  %1873 = vrot.lane.b32.xlu0 %v11847_v6, %s11789_s15 }
  0x2d   :  { %2114 = vrot.lane.b32.xlu1 %v11847_v6, %s11790_s18  ;;  %1871 = vrot.lane.b32.xlu0 %v11841_v5, %s11789_s15 }
  0x31   :  { %2112 = vrot.lane.b32.xlu1 %v11841_v5, %s11790_s18  ;;  %2116 = vrot.lane.b32.xlu0 %v11873_v9, %s11790_s18 }
  0x35   :  { %337 = vrot.lane.b32.xlu1 %v11914_v13, %s11783_s29  ;;  %335 = vrot.lane.b32.xlu0 %v11918_v14, %s11783_s29 }
  0x39   :  { %578 = vrot.lane.b32.xlu1 %v11918_v14, %s11784_s30  ;;  %333 = vrot.lane.b32.xlu0 %v11924_v15, %s11783_s29 }
  0x3d   :  { %576 = vrot.lane.b32.xlu1 %v11924_v15, %s11784_s30  ;;  %580 = vrot.lane.b32.xlu0 %v11914_v13, %s11784_s30 }
  0x41   :  { %821 = vrot.lane.b32.xlu1 %v11914_v13, %s11785_s7  ;;  %819 = vrot.lane.b32.xlu0 %v11918_v14, %s11785_s7 }
  0x45   :  { %1060 = vrot.lane.b32.xlu1 %v11918_v14, %s11786_s8  ;;  %817 = vrot.lane.b32.xlu0 %v11924_v15, %s11785_s7 }
  0x49   :  { %1058 = vrot.lane.b32.xlu1 %v11924_v15, %s11786_s8  ;;  %1062 = vrot.lane.b32.xlu0 %v11914_v13, %s11786_s8 }
  0x4d   :  { %1399 = vrot.lane.b32.xlu1 %v11914_v13, %s11787_s13  ;;  %331 = vrot.lane.b32.xlu0 %v11873_v9, %s11783_s29 }
  0x51   :  { %1397 = vrot.lane.b32.xlu1 %v11918_v14, %s11787_s13  ;;  %1401 = vrot.lane.b32.xlu0 %v11956_v18, %s11787_s13 }
  0x55   :  { %1640 = vrot.lane.b32.xlu1 %v11914_v13, %s11788_s14  ;;  %574 = vrot.lane.b32.xlu0 %v11873_v9, %s11784_s30 }
  0x59   :  { %1638 = vrot.lane.b32.xlu1 %v11918_v14, %s11788_s14  ;;  %1642 = vrot.lane.b32.xlu0 %v11956_v18, %s11788_s14 }
  0x5d   :  { %1881 = vrot.lane.b32.xlu1 %v11914_v13, %s11789_s15  ;;  %815 = vrot.lane.b32.xlu0 %v11873_v9, %s11785_s7 }
  0x61   :  { %1879 = vrot.lane.b32.xlu1 %v11918_v14, %s11789_s15  ;;  %1883 = vrot.lane.b32.xlu0 %v11956_v18, %s11789_s15 }
  0x65   :  { %2122 = vrot.lane.b32.xlu1 %v11914_v13, %s11790_s18  ;;  %1056 = vrot.lane.b32.xlu0 %v11873_v9, %s11786_s8 }
  0x69   :  { %2120 = vrot.lane.b32.xlu1 %v11918_v14, %s11790_s18  ;;  %2124 = vrot.lane.b32.xlu0 %v11956_v18, %s11790_s18 }
  0x6d   :  { %345 = vrot.lane.b32.xlu1 %v11990_v21, %s11783_s29  ;;  %343 = vrot.lane.b32.xlu0 %v11994_v22, %s11783_s29 }
  0x71   :  { %586 = vrot.lane.b32.xlu1 %v11994_v22, %s11784_s30  ;;  %341 = vrot.lane.b32.xlu0 %v12000_v23, %s11783_s29 }
  0x75   :  { %1395 = vrot.lane.b32.xlu1 %v11924_v15, %s11787_s13  ;;  %588 = vrot.lane.b32.xlu0 %v11990_v21, %s11784_s30 }
  0x77   :  { %v12010_v25 = vpop.permute.xlu1 %421  ;;  %v328_v27 = vpop.permute.xlu0 %327 }
  0x78   :  { %v473_v31 = vsel %vm425_vm1, %v12010_v25, %v328_v27 }
  0x79   :  { %827 = vrot.lane.b32.xlu1 %v11994_v22, %s11785_s7  ;;  %584 = vrot.lane.b32.xlu0 %v12000_v23, %s11784_s30 }
  0x7b   :  { %v571_v28 = vpop.permute.xlu1 %570  ;;  %v12019_v29 = vpop.permute.xlu0 %329 }
  0x7c   :  { %v472_v30 = vsel %vm425_vm1, %v328_v27, %v12019_v29 }
  0x7d   :  { %1636 = vrot.lane.b32.xlu1 %v11924_v15, %s11788_s14  ;;  %829 = vrot.lane.b32.xlu0 %v11990_v21, %s11785_s7 }
  0x7e   :  { %2838 = vmatprep.subr.bf16.mxu0 %v472_v30  ;;  %v12204_v30 = vcombine.high %v12071_v43, %v12076_v44 }
  0x7f   :  { %2839 = vmatpush1.bf16.msra.mxu0 %v473_v31  ;;  %v12032_v32 = vpop.permute.xlu1 %664  ;;  %v12034_v33 = vpop.permute.xlu0 %572 }
  0x80   :  { %v714_v34 = vsel %vm666_vm2, %v12032_v32, %v571_v28  ;;  %v713_v35 = vsel %vm666_vm2, %v571_v28, %v12034_v33 }
  0x81   :  { %1068 = vrot.lane.b32.xlu1 %v11994_v22, %s11786_s8  ;;  %825 = vrot.lane.b32.xlu0 %v12000_v23, %s11785_s7 }
  0x82   :  { %2840 = vmatprep.subr.bf16.mxu0 %v713_v35 }
  0x83   :  { %2841 = vmatpush1.bf16.msra.mxu0 %v714_v34  ;;  %v12047_v36 = vpop.permute.xlu1 %813  ;;  %v812_v37 = vpop.permute.xlu0 %811 }
  0x84   :  { %v954_v38 = vsel %vm907_vm3, %v812_v37, %v12047_v36 }
  0x85   :  { %1877 = vrot.lane.b32.xlu1 %v11924_v15, %s11789_s15  ;;  %1070 = vrot.lane.b32.xlu0 %v11990_v21, %s11786_s8 }
  0x86   :  { %2842 = vmatprep.subr.bf16.mxu0 %v954_v38 }
  0x87   :  { %v1053_v39 = vpop.permute.xlu1 %1052  ;;  %v12056_v40 = vpop.permute.xlu0 %905 }
  0x88   :  { %v955_v41 = vsel %vm907_vm3, %v12056_v40, %v812_v37  ;;  %v12213_v37 = vld [vmem:[%s17728_s1 + $0x10] ss:$8 sps:$4 sm:$0xff]  }
  0x89   :  { %2118 = vrot.lane.b32.xlu1 %v11924_v15, %s11790_s18  ;;  %1066 = vrot.lane.b32.xlu0 %v12000_v23, %s11786_s8 }
  0x8a   :  { %2843 = vmatpush1.bf16.msra.mxu0 %v955_v41 }
  0x8b   :  { %v12066_v42 = vpop.permute.xlu1 %1146  ;;  %v12078_v45 = vpop.permute.xlu0 %1054 }
  0x8c   :  { %v1196_v46 = vsel %vm1148_vm4, %v12066_v42, %v1053_v39  ;;  %v1195_v47 = vsel %vm1148_vm4, %v1053_v39, %v12078_v45 }
  0x8d   :  { %1407 = vrot.lane.b32.xlu1 %v11990_v21, %s11787_s13  ;;  %339 = vrot.lane.b32.xlu0 %v11956_v18, %s11783_s29 }
  0x8e   :  { %2844 = vmatprep.subr.bf16.mxu0 %v1195_v47 }
  0x8f   :  { %2845 = vmatpush1.bf16.msra.mxu0 %v1196_v46  ;;  %v12094_v49 = vpop.permute.xlu1 %1393  ;;  %v1392_v50 = vpop.permute.xlu0 %1391 }
  0x90   :  { %2846 = vmatprep.subr.bf16.mxu0 %v11847_v6  ;;  %v1531_v52 = vsel %vm1485_vm5, %v1392_v50, %v12094_v49  ;;  %v45_v6 = vld [vmem:[%s17727_s0 + $0x30] sm:$0xff] }
  0x91   :  { %1405 = vrot.lane.b32.xlu1 %v11994_v22, %s11787_s13  ;;  %1409 = vrot.lane.b32.xlu0 %v12092_v48, %s11787_s13  ;;  %v12187_v19 = vcombine.high %v45_v6, %v69_v7  ;;  %v12191_v20 = vcombine.low %v45_v6, %v69_v7 }
  0x93   :  { %2847 = vmatpush1.bf16.msra.mxu0 %v11841_v5  ;;  %v1633_v51 = vpop.permute.xlu1 %1632  ;;  %v12106_v53 = vpop.permute.xlu0 %1389 }
  0x94   :  { %2848 = vmatprep.subr.bf16.mxu0 %v1531_v52  ;;  %v1532_v54 = vsel %vm1485_vm5, %v12106_v53, %v1392_v50 }
  0x95   :  { %1648 = vrot.lane.b32.xlu1 %v11990_v21, %s11788_s14  ;;  %582 = vrot.lane.b32.xlu0 %v11956_v18, %s11784_s30 }
  0x97   :  { %2849 = vmatpush1.bf16.msra.mxu0 %v1532_v54  ;;  %v12116_v55 = vpop.permute.xlu1 %1630  ;;  %v12118_v56 = vpop.permute.xlu0 %1634 }
  0x98   :  { %v1773_v57 = vsel %vm1726_vm6, %v12116_v55, %v1633_v51  ;;  %v1772_v58 = vsel %vm1726_vm6, %v1633_v51, %v12118_v56 }
  0x99   :  { %1646 = vrot.lane.b32.xlu1 %v11994_v22, %s11788_s14  ;;  %1650 = vrot.lane.b32.xlu0 %v12092_v48, %s11788_s14 }
  0x9a   :  { %2850 = vmatprep.subr.bf16.mxu0 %v1772_v58 }
  0x9b   :  { %2851 = vmatpush1.bf16.msra.mxu0 %v1773_v57  ;;  %v12131_v59 = vpop.permute.xlu1 %1875  ;;  %v1874_v60 = vpop.permute.xlu0 %1873 }
  0x9c   :  { %v2013_v61 = vsel %vm1967_vm7, %v1874_v60, %v12131_v59 }
  0x9d   :  { %1889 = vrot.lane.b32.xlu1 %v11990_v21, %s11789_s15  ;;  %823 = vrot.lane.b32.xlu0 %v11956_v18, %s11785_s7 }
  0x9e   :  { %2852 = vmatprep.subr.bf16.mxu0 %v2013_v61 }
  0x9f   :  { %v2115_v62 = vpop.permute.xlu1 %2114  ;;  %v12140_v63 = vpop.permute.xlu0 %1871 }
  0xa0   :  { %v2014_v0 = vsel %vm1967_vm7, %v12140_v63, %v1874_v60 }
  0xa1   :  { %1887 = vrot.lane.b32.xlu1 %v11994_v22, %s11789_s15  ;;  %1891 = vrot.lane.b32.xlu0 %v12092_v48, %s11789_s15 }
  0xa2   :  { %2853 = vmatpush1.bf16.msra.mxu0 %v2014_v0 }
  0xa3   :  { %v12150_v1 = vpop.permute.xlu1 %2112  ;;  %v12152_v2 = vpop.permute.xlu0 %2116 }
  0xa4   :  { %v2255_v4 = vsel %vm2208_vm8, %v12150_v1, %v2115_v62  ;;  %v2254_v5 = vsel %vm2208_vm8, %v2115_v62, %v12152_v2 }
  0xa5   :  { %2130 = vrot.lane.b32.xlu1 %v11990_v21, %s11790_s18  ;;  %1064 = vrot.lane.b32.xlu0 %v11956_v18, %s11786_s8 }
  0xa6   :  { %2854 = vmatprep.subr.bf16.mxu0 %v2254_v5 }
  0xa7   :  { %2855 = vmatpush1.bf16.msra.mxu0 %v2255_v4  ;;  %v12170_v8 = vpop.permute.xlu1 %337  ;;  %v336_v12 = vpop.permute.xlu0 %335 }
  0xa8   :  { %v468_v17 = vsel %vm425_vm1, %v336_v12, %v12170_v8 }
  0xa9   :  { %2128 = vrot.lane.b32.xlu1 %v11994_v22, %s11790_s18  ;;  %2132 = vrot.lane.b32.xlu0 %v12092_v48, %s11790_s18 }
  0xaa   :  { %2944 = vmatprep.subr.bf16.mxu0 %v468_v17  ;;  %2871 = vmatmul.mubr.bf16.vlgmr.msra.gmra.mrb[0].mxu0 %v12175_v11  ;;  %v12298_v17 = vld [vmem:[%s17727_s0 + $0xf8] sm:$0xff] }
  0xab   :  { %v579_v24 = vpop.permute.xlu1 %578  ;;  %v334_v27 = vpop.permute.xlu0 %333  ;;  %10120 = vmatprep.mubr.msk.bf16.mxu0 %vm2831_vm0, %v12180_v16 }
  0xac   :  { %v469_v28 = vsel %vm425_vm1, %v334_v27, %v336_v12  ;;  %v12293_v12 = vld [vmem:[%s17727_s0 + $0x38] sm:$0xff] }
  0xad   :  { %353 = vrot.lane.b32.xlu1 %v12187_v19, %s11783_s29  ;;  %351 = vrot.lane.b32.xlu0 %v12191_v20, %s11783_s29 }
  0xae   :  { %2945 = vmatpush1.bf16.msra.mxu0 %v469_v28  ;;  %v12314_v28 = vcombine.low %v12293_v12, %v12298_v17 }
  0xaf   :  { %v577_v31 = vpop.permute.xlu1 %576  ;;  %v12206_v34 = vpop.permute.xlu0 %580 }
  0xb0   :  { %v710_v35 = vsel %vm666_vm2, %v577_v31, %v579_v24  ;;  %v709_v38 = vsel %vm666_vm2, %v579_v24, %v12206_v34 }
  0xb1   :  { %594 = vrot.lane.b32.xlu1 %v12191_v20, %s11784_s30  ;;  %349 = vrot.lane.b32.xlu0 %v12204_v30, %s11783_s29 }
  0xb2   :  { %2946 = vmatprep.subr.bf16.mxu0 %v709_v38  ;;  %2881 = vmatmul.mubr.bf16.gmra.mrb[4].mxu0 %v12213_v37 }
  0xb3   :  { %2947 = vmatpush1.bf16.msra.mxu0 %v710_v35  ;;  %v12222_v39 = vpop.permute.xlu1 %821  ;;  %v820_v41 = vpop.permute.xlu0 %819  ;;  %10123 = vmatprep.mubr.msk.bf16.mxu0 %vm2831_vm0, %v11896_v10 }
  0xb4   :  { %v950_v43 = vsel %vm907_vm3, %v820_v41, %v12222_v39 }
  0xb5   :  { %1403 = vrot.lane.b32.xlu1 %v12000_v23, %s11787_s13  ;;  %596 = vrot.lane.b32.xlu0 %v12187_v19, %s11784_s30 }
  0xb6   :  { %2948 = vmatprep.subr.bf16.mxu0 %v950_v43 }
  0xb7   :  { %v1061_v44 = vpop.permute.xlu1 %1060  ;;  %v818_v46 = vpop.permute.xlu0 %817 }
  0xb8   :  { %v951_v47 = vsel %vm907_vm3, %v818_v46, %v820_v41 }
  0xb9   :  { %835 = vrot.lane.b32.xlu1 %v12191_v20, %s11785_s7  ;;  %592 = vrot.lane.b32.xlu0 %v12204_v30, %s11784_s30 }
  0xba   :  { %2949 = vmatpush1.bf16.msra.mxu0 %v951_v47 }
  0xbb   :  { %v12240_v50 = vpop.permute.xlu1 %1058  ;;  %v12242_v51 = vpop.permute.xlu0 %1062 }
  0xbc   :  { %v1192_v52 = vsel %vm1148_vm4, %v12240_v50, %v1061_v44  ;;  %v1191_v54 = vsel %vm1148_vm4, %v1061_v44, %v12242_v51 }
  0xbd   :  { %1644 = vrot.lane.b32.xlu1 %v12000_v23, %s11788_s14  ;;  %837 = vrot.lane.b32.xlu0 %v12187_v19, %s11785_s7 }
  0xbe   :  { %2950 = vmatprep.subr.bf16.mxu0 %v1191_v54 }
  0xbf   :  { %2951 = vmatpush1.bf16.msra.mxu0 %v1192_v52  ;;  %v1400_v57 = vpop.permute.xlu1 %1399  ;;  %v332_v58 = vpop.permute.xlu0 %331 }
  0xc0   :  { %2952 = vmatprep.subr.bf16.mxu0 %v11914_v13  ;;  %v470_v60 = vsel %vm425_vm1, %v332_v58, %v334_v27  ;;  %v471_v61 = vsel %vm425_vm1, %v12019_v29, %v332_v58 }
  0xc1   :  { %1076 = vrot.lane.b32.xlu1 %v12191_v20, %s11786_s8  ;;  %833 = vrot.lane.b32.xlu0 %v12204_v30, %s11785_s7 }
  0xc2   :  { %2891 = vmatprep.subr.bf16.mxu1 %v470_v60 }
  0xc3   :  { %2892 = vmatpush1.bf16.msra.mxu1 %v471_v61  ;;  %2953 = vmatpush1.bf16.msra.mxu0 %v11918_v14  ;;  %v12265_v62 = vpop.permute.xlu1 %1397  ;;  %v12267_v13 = vpop.permute.xlu0 %1401 }
  0xc4   :  { %v1528_v0 = vsel %vm1485_vm5, %v12265_v62, %v1400_v57  ;;  %v1527_v29 = vsel %vm1485_vm5, %v1400_v57, %v12267_v13 }
  0xc5   :  { %1885 = vrot.lane.b32.xlu1 %v12000_v23, %s11789_s15  ;;  %1078 = vrot.lane.b32.xlu0 %v12187_v19, %s11786_s8 }
  0xc6   :  { %2954 = vmatprep.subr.bf16.mxu0 %v1527_v29 }
  0xc7   :  { %2955 = vmatpush1.bf16.msra.mxu0 %v1528_v0  ;;  %v1641_v14 = vpop.permute.xlu1 %1640  ;;  %v575_v4 = vpop.permute.xlu0 %574 }
  0xc8   :  { %v711_v5 = vsel %vm666_vm2, %v575_v4, %v577_v31  ;;  %v712_v6 = vsel %vm666_vm2, %v12034_v33, %v575_v4  ;;  %v47_v4 = vld [vmem:[%s17727_s0 + $0x40] sm:$0xff] }
  0xc9   :  { %2126 = vrot.lane.b32.xlu1 %v12000_v23, %s11790_s18  ;;  %1074 = vrot.lane.b32.xlu0 %v12204_v30, %s11786_s8 }
  0xca   :  { %2893 = vmatprep.subr.bf16.mxu1 %v711_v5  ;;  %v71_v5 = vld [vmem:[%s17727_s0 + $0x100] sm:$0xff] }
  0xcb   :  { %2894 = vmatpush1.bf16.msra.mxu1 %v712_v6  ;;  %v12288_v7 = vpop.permute.xlu1 %1638  ;;  %v12300_v24 = vpop.permute.xlu0 %1642 }
  0xcc   :  { %v1769_v33 = vsel %vm1726_vm6, %v12288_v7, %v1641_v14  ;;  %v1768_v27 = vsel %vm1726_vm6, %v1641_v14, %v12300_v24 }
  0xcd   :  { %1415 = vrot.lane.b32.xlu1 %v12187_v19, %s11787_s13  ;;  %347 = vrot.lane.b32.xlu0 %v12092_v48, %s11783_s29 }
  0xce   :  { %2956 = vmatprep.subr.bf16.mxu0 %v1768_v27 }
  0xcf   :  { %2957 = vmatpush1.bf16.msra.mxu0 %v1769_v33  ;;  %v1882_v31 = vpop.permute.xlu1 %1881  ;;  %v816_v35 = vpop.permute.xlu0 %815 }
  0xd0   :  { %v952_v38 = vsel %vm907_vm3, %v816_v35, %v818_v46  ;;  %v953_v41 = vsel %vm907_vm3, %v12047_v36, %v816_v35 }
  0xd1   :  { %1413 = vrot.lane.b32.xlu1 %v12191_v20, %s11787_s13  ;;  %1417 = vrot.lane.b32.xlu0 %v12314_v28, %s11787_s13 }
  0xd2   :  { %2895 = vmatprep.subr.bf16.mxu1 %v952_v38  ;;  %v12405_v38 = vcombine.high %v47_v4, %v71_v5 }
  0xd3   :  { %2896 = vmatpush1.bf16.msra.mxu1 %v953_v41  ;;  %v12325_v43 = vpop.permute.xlu1 %1879  ;;  %v12327_v44 = vpop.permute.xlu0 %1883  ;;  %v12409_v41 = vcombine.low %v47_v4, %v71_v5 }
  0xd4   :  { %v2010_v47 = vsel %vm1967_vm7, %v12325_v43, %v1882_v31  ;;  %v2009_v36 = vsel %vm1967_vm7, %v1882_v31, %v12327_v44 }
  0xd5   :  { %1656 = vrot.lane.b32.xlu1 %v12187_v19, %s11788_s14  ;;  %590 = vrot.lane.b32.xlu0 %v12092_v48, %s11784_s30 }
  0xd6   :  { %2958 = vmatprep.subr.bf16.mxu0 %v2009_v36  ;;  %v12425_v36 = vcombine.high %v12293_v12, %v12298_v17 }
  0xd7   :  { %2959 = vmatpush1.bf16.msra.mxu0 %v2010_v47  ;;  %v2123_v46 = vpop.permute.xlu1 %2122  ;;  %v1057_v52 = vpop.permute.xlu0 %1056 }
  0xd8   :  { %v1193_v54 = vsel %vm1148_vm4, %v1057_v52, %v12240_v50  ;;  %v1194_v57 = vsel %vm1148_vm4, %v12078_v45, %v1057_v52 }
  0xd9   :  { %1654 = vrot.lane.b32.xlu1 %v12191_v20, %s11788_s14  ;;  %1658 = vrot.lane.b32.xlu0 %v12314_v28, %s11788_s14 }
  0xda   :  { %2897 = vmatprep.subr.bf16.mxu1 %v1193_v54 }
  0xdb   :  { %2898 = vmatpush1.bf16.msra.mxu1 %v1194_v57  ;;  %v12349_v58 = vpop.permute.xlu1 %2120  ;;  %v12351_v60 = vpop.permute.xlu0 %2124 }
  0xdc   :  { %v2251_v61 = vsel %vm2208_vm8, %v12349_v58, %v2123_v46  ;;  %2899 = vmatprep.subr.bf16.mxu1 %v11924_v15  ;;  %v2250_v45 = vsel %vm2208_vm8, %v2123_v46, %v12351_v60 }
  0xdd   :  { %1897 = vrot.lane.b32.xlu1 %v12187_v19, %s11789_s15  ;;  %831 = vrot.lane.b32.xlu0 %v12092_v48, %s11785_s7 }
  0xde   :  { %2960 = vmatprep.subr.bf16.mxu0 %v2250_v45 }
  0xdf   :  { %2961 = vmatpush1.bf16.msra.mxu0 %v2251_v61  ;;  %v12364_v50 = vpop.permute.xlu1 %345  ;;  %2900 = vmatpush1.bf16.msra.mxu1 %v11873_v9  ;;  %v344_v0 = vpop.permute.xlu0 %343 }
  0xe0   :  { %v464_v15 = vsel %vm425_vm1, %v344_v0, %v12364_v50 }
  0xe1   :  { %1895 = vrot.lane.b32.xlu1 %v12191_v20, %s11789_s15  ;;  %1899 = vrot.lane.b32.xlu0 %v12314_v28, %s11789_s15 }
  0xe2   :  { %3050 = vmatprep.subr.bf16.mxu0 %v464_v15  ;;  %2977 = vmatmul.mubr.bf16.vlgmr.msra.gmra.mrb[8].mxu0 %v12175_v11 }
  0xe3   :  { %v587_v29 = vpop.permute.xlu1 %586  ;;  %v12375_v14 = vpop.permute.xlu0 %341  ;;  %10124 = vmatprep.mubr.msk.bf16.mxu0 %vm2831_vm0, %v12180_v16 }
  0xe4   :  { %v465_v9 = vsel %vm425_vm1, %v12375_v14, %v344_v0 }
  0xe5   :  { %2138 = vrot.lane.b32.xlu1 %v12187_v19, %s11790_s18  ;;  %1072 = vrot.lane.b32.xlu0 %v12092_v48, %s11786_s8 }
  0xe6   :  { %3051 = vmatpush1.bf16.msra.mxu0 %v465_v9 }
  0xe7   :  { %v1396_v6 = vpop.permute.xlu1 %1395  ;;  %v12392_v33 = vpop.permute.xlu0 %588 }
  0xe8   :  { %v1529_v27 = vsel %vm1485_vm5, %v1396_v6, %v12265_v62  ;;  %v1530_v31 = vsel %vm1485_vm5, %v12094_v49, %v1396_v6  ;;  %v705_v35 = vsel %vm666_vm2, %v587_v29, %v12392_v33 }
  0xe9   :  { %2136 = vrot.lane.b32.xlu1 %v12191_v20, %s11790_s18  ;;  %2901 = vmatprep.subr.bf16.mxu1 %v1529_v27 }
  0xea   :  { %2140 = vrot.lane.b32.xlu0 %v12314_v28, %s11790_s18  ;;  %3052 = vmatprep.subr.bf16.mxu0 %v705_v35 }
  0xeb   :  { %2902 = vmatpush1.bf16.msra.mxu1 %v1530_v31  ;;  %v828_v62 = vpop.permute.xlu1 %827  ;;  %2987 = vmatmul.mubr.bf16.gmra.mrb[12].mxu0 %v12213_v37  ;;  %v12412_v49 = vpop.permute.xlu0 %584 }
  0xec   :  { %10127 = vmatprep.mubr.msk.bf16.mxu0 %vm2831_vm0, %v11896_v10  ;;  %v706_v47 = vsel %vm666_vm2, %v12412_v49, %v587_v29 }
  0xed   :  { %361 = vrot.lane.b32.xlu1 %v12405_v38, %s11783_s29  ;;  %3053 = vmatpush1.bf16.msra.mxu0 %v706_v47 }
  0xee   :  { %359 = vrot.lane.b32.xlu0 %v12409_v41, %s11783_s29 }
  0xef   :  { %v1637_v46 = vpop.permute.xlu1 %1636  ;;  %v12427_v52 = vpop.permute.xlu0 %829 }
  0xf0   :  { %v1770_v54 = vsel %vm1726_vm6, %v1637_v46, %v12288_v7  ;;  %v1771_v57 = vsel %vm1726_vm6, %v12118_v56, %v1637_v46  ;;  %v946_v12 = vsel %vm907_vm3, %v828_v62, %v12427_v52 }
  0xf1   :  { %602 = vrot.lane.b32.xlu1 %v12409_v41, %s11784_s30  ;;  %2903 = vmatprep.subr.bf16.mxu1 %v1770_v54  ;;  %v12525_v54 = vld [vmem:[%s17727_s0 + $0x48] sm:$0xff] }
  0xf2   :  { %357 = vrot.lane.b32.xlu0 %v12425_v36, %s11783_s29  ;;  %3054 = vmatprep.subr.bf16.mxu0 %v946_v12 }
  0xf3   :  { %2904 = vmatpush1.bf16.msra.mxu1 %v1771_v57  ;;  %v1069_v17 = vpop.permute.xlu1 %1068  ;;  %v12442_v61 = vpop.permute.xlu0 %825 }
  0xf4   :  { %v947_v56 = vsel %vm907_vm3, %v12442_v61, %v828_v62 }
  0xf5   :  { %1411 = vrot.lane.b32.xlu1 %v12204_v30, %s11787_s13  ;;  %3055 = vmatpush1.bf16.msra.mxu0 %v947_v56 }
  0xf6   :  { %604 = vrot.lane.b32.xlu0 %v12405_v38, %s11784_s30 }
  0xf7   :  { %v1878_v7 = vpop.permute.xlu1 %1877  ;;  %v12451_v45 = vpop.permute.xlu0 %1070 }
  0xf8   :  { %v2011_v0 = vsel %vm1967_vm7, %v1878_v7, %v12325_v43  ;;  %v2012_v15 = vsel %vm1967_vm7, %v12131_v59, %v1878_v7  ;;  %v1187_v29 = vsel %vm1148_vm4, %v1069_v17, %v12451_v45 }
  0xf9   :  { %843 = vrot.lane.b32.xlu1 %v12409_v41, %s11785_s7  ;;  %2905 = vmatprep.subr.bf16.mxu1 %v2011_v0 }
  0xfa   :  { %600 = vrot.lane.b32.xlu0 %v12425_v36, %s11784_s30  ;;  %3056 = vmatprep.subr.bf16.mxu0 %v1187_v29 }
  0xfb   :  { %2906 = vmatpush1.bf16.msra.mxu1 %v2012_v15  ;;  %v2119_v9 = vpop.permute.xlu1 %2118  ;;  %v12466_v4 = vpop.permute.xlu0 %1066 }
  0xfc   :  { %v2252_v59 = vsel %vm2208_vm8, %v2119_v9, %v12349_v58  ;;  %v2253_v43 = vsel %vm2208_vm8, %v12152_v2, %v2119_v9  ;;  %v1188_v5 = vsel %vm1148_vm4, %v12466_v4, %v1069_v17 }
  0xfd   :  { %1652 = vrot.lane.b32.xlu1 %v12204_v30, %s11788_s14  ;;  %2907 = vmatprep.subr.bf16.mxu1 %v2252_v59 }
  0xfe   :  { %845 = vrot.lane.b32.xlu0 %v12405_v38, %s11785_s7  ;;  %3057 = vmatpush1.bf16.msra.mxu0 %v1188_v5 }
  0xff   :  { %2908 = vmatpush1.bf16.msra.mxu1 %v2253_v43  ;;  %v1408_v6 = vpop.permute.xlu1 %1407  ;;  %3058 = vmatprep.subr.bf16.mxu0 %v11990_v21  ;;  %v340_v58 = vpop.permute.xlu0 %339 }
 0x100   :  { %v466_v2 = vsel %vm425_vm1, %v340_v58, %v12375_v14  ;;  %v467_v27 = vsel %vm425_vm1, %v12170_v8, %v340_v58 }
 0x101   :  { %1084 = vrot.lane.b32.xlu1 %v12409_v41, %s11786_s8  ;;  %2997 = vmatprep.subr.bf16.mxu1 %v466_v2 }
 0x102   :  { %841 = vrot.lane.b32.xlu0 %v12425_v36, %s11785_s7  ;;  %2924 = vmatmul.mubr.bf16.vlgmr.msra.gmra.mrb[0].mxu1 %v12175_v11 }
 0x103   :  { %3059 = vmatpush1.bf16.msra.mxu0 %v11994_v22  ;;  %v12494_v21 = vpop.permute.xlu1 %1405  ;;  %2998 = vmatpush1.bf16.msra.mxu1 %v467_v27  ;;  %v12496_v31 = vpop.permute.xlu0 %1409 }
 0x104   :  { %v1524_v14 = vsel %vm1485_vm5, %v12494_v21, %v1408_v6  ;;  %10122 = vmatprep.mubr.msk.bf16.mxu1 %vm2831_vm0, %v12180_v16  ;;  %v1523_v8 = vsel %vm1485_vm5, %v1408_v6, %v12496_v31 }
 0x105   :  { %1893 = vrot.lane.b32.xlu1 %v12204_v30, %s11789_s15  ;;  %3060 = vmatprep.subr.bf16.mxu0 %v1523_v8 }
 0x106   :  { %1086 = vrot.lane.b32.xlu0 %v12405_v38, %s11786_s8 }
 0x107   :  { %3061 = vmatpush1.bf16.msra.mxu0 %v1524_v14  ;;  %v1649_v22 = vpop.permute.xlu1 %1648  ;;  %v583_v35 = vpop.permute.xlu0 %582 }
 0x108   :  { %v707_v62 = vsel %vm666_vm2, %v583_v35, %v12412_v49  ;;  %v708_v47 = vsel %vm666_vm2, %v12206_v34, %v583_v35  ;;  %v12530_v49 = vld [vmem:[%s17727_s0 + $0x108] sm:$0xff]  ;;  %v49_v35 = vld [vmem:[%s17727_s0 + $0x50] sm:$0xff] }
 0x109   :  { %2134 = vrot.lane.b32.xlu1 %v12204_v30, %s11790_s18  ;;  %2999 = vmatprep.subr.bf16.mxu1 %v707_v62  ;;  %v12549_v17 = vcombine.low %v12525_v54, %v12530_v49  ;;  %v73_v62 = vld [vmem:[%s17727_s0 + $0x110] sm:$0xff] }
 0x10a   :  { %1082 = vrot.lane.b32.xlu0 %v12425_v36, %s11786_s8  ;;  %3000 = vmatpush1.bf16.msra.mxu1 %v708_v47 }
 0x10b   :  { %v12520_v46 = vpop.permute.xlu1 %1646  ;;  %v12532_v57 = vpop.permute.xlu0 %1650  ;;  %2934 = vmatmul.mubr.bf16.gmra.mrb[4].mxu1 %v12213_v37 }
 0x10c   :  { %v1765_v34 = vsel %vm1726_vm6, %v12520_v46, %v1649_v22  ;;  %v1764_v12 = vsel %vm1726_vm6, %v1649_v22, %v12532_v57  ;;  %10125 = vmatprep.mubr.msk.bf16.mxu1 %vm2831_vm0, %v11896_v10 }
 0x10d   :  { %1423 = vrot.lane.b32.xlu1 %v12405_v38, %s11787_s13  ;;  %3062 = vmatprep.subr.bf16.mxu0 %v1764_v12 }
 0x10e   :  { %355 = vrot.lane.b32.xlu0 %v12314_v28, %s11783_s29  ;;  %3063 = vmatpush1.bf16.msra.mxu0 %v1765_v34 }
 0x10f   :  { %v1890_v56 = vpop.permute.xlu1 %1889  ;;  %v824_v7 = vpop.permute.xlu0 %823 }
 0x110   :  { %v948_v0 = vsel %vm907_vm3, %v824_v7, %v12442_v61  ;;  %v949_v15 = vsel %vm907_vm3, %v12222_v39, %v824_v7 }
 0x111   :  { %1421 = vrot.lane.b32.xlu1 %v12409_v41, %s11787_s13  ;;  %3001 = vmatprep.subr.bf16.mxu1 %v948_v0  ;;  %v12641_v0 = vcombine.high %v49_v35, %v73_v62 }
 0x112   :  { %1425 = vrot.lane.b32.xlu0 %v12549_v17, %s11787_s13  ;;  %3002 = vmatpush1.bf16.msra.mxu1 %v949_v15  ;;  %v12645_v15 = vcombine.low %v49_v35, %v73_v62 }
 0x113   :  { %v12561_v29 = vpop.permute.xlu1 %1887  ;;  %v12563_v9 = vpop.permute.xlu0 %1891 }
 0x114   :  { %v2006_v59 = vsel %vm1967_vm7, %v12561_v29, %v1890_v56  ;;  %v2005_v39 = vsel %vm1967_vm7, %v1890_v56, %v12563_v9 }
 0x115   :  { %1664 = vrot.lane.b32.xlu1 %v12405_v38, %s11788_s14  ;;  %3064 = vmatprep.subr.bf16.mxu0 %v2005_v39  ;;  %v12661_v39 = vcombine.high %v12525_v54, %v12530_v49 }
 0x116   :  { %598 = vrot.lane.b32.xlu0 %v12314_v28, %s11784_s30  ;;  %3065 = vmatpush1.bf16.msra.mxu0 %v2006_v59 }
 0x117   :  { %v2131_v61 = vpop.permute.xlu1 %2130  ;;  %v1065_v43 = vpop.permute.xlu0 %1064 }
 0x118   :  { %v1189_v5 = vsel %vm1148_vm4, %v1065_v43, %v12466_v4  ;;  %v1190_v6 = vsel %vm1148_vm4, %v12242_v51, %v1065_v43 }
 0x119   :  { %1662 = vrot.lane.b32.xlu1 %v12409_v41, %s11788_s14  ;;  %3003 = vmatprep.subr.bf16.mxu1 %v1189_v5 }
 0x11a   :  { %1666 = vrot.lane.b32.xlu0 %v12549_v17, %s11788_s14  ;;  %3004 = vmatpush1.bf16.msra.mxu1 %v1190_v6 }
 0x11b   :  { %v12585_v58 = vpop.permute.xlu1 %2128  ;;  %v12587_v2 = vpop.permute.xlu0 %2132  ;;  %3005 = vmatprep.subr.bf16.mxu1 %v12000_v23 }
 0x11c   :  { %v2247_v27 = vsel %vm2208_vm8, %v12585_v58, %v2131_v61  ;;  %v2246_v51 = vsel %vm2208_vm8, %v2131_v61, %v12587_v2 }
 0x11d   :  { %1905 = vrot.lane.b32.xlu1 %v12405_v38, %s11789_s15  ;;  %3066 = vmatprep.subr.bf16.mxu0 %v2246_v51 }
 0x11e   :  { %839 = vrot.lane.b32.xlu0 %v12314_v28, %s11785_s7  ;;  %3067 = vmatpush1.bf16.msra.mxu0 %v2247_v27 }
 0x11f   :  { %v12600_v4 = vpop.permute.xlu1 %353  ;;  %3006 = vmatpush1.bf16.msra.mxu1 %v11956_v18  ;;  %v352_v14 = vpop.permute.xlu0 %351 }
 0x120   :  { %v460_v23 = vsel %vm425_vm1, %v352_v14, %v12600_v4 }
 0x121   :  { %1903 = vrot.lane.b32.xlu1 %v12409_v41, %s11789_s15  ;;  %3156 = vmatprep.subr.bf16.mxu0 %v460_v23 }
 0x122   :  { %1907 = vrot.lane.b32.xlu0 %v12549_v17, %s11789_s15  ;;  %3083 = vmatmul.mubr.bf16.vlgmr.msra.gmra.mrb[16].mxu0 %v12175_v11 }
 0x123   :  { %v595_v8 = vpop.permute.xlu1 %594  ;;  %v12611_v22 = vpop.permute.xlu0 %349  ;;  %10128 = vmatprep.mubr.msk.bf16.mxu0 %vm2831_vm0, %v12180_v16 }
 0x124   :  { %v461_v18 = vsel %vm425_vm1, %v12611_v22, %v352_v14 }
 0x125   :  { %2146 = vrot.lane.b32.xlu1 %v12405_v38, %s11790_s18  ;;  %3157 = vmatpush1.bf16.msra.mxu0 %v461_v18 }
 0x126   :  { %1080 = vrot.lane.b32.xlu0 %v12314_v28, %s11786_s8 }
 0x127   :  { %v1404_v47 = vpop.permute.xlu1 %1403  ;;  %v12628_v34 = vpop.permute.xlu0 %596 }
 0x128   :  { %v1525_v12 = vsel %vm1485_vm5, %v1404_v47, %v12494_v21  ;;  %v1526_v56 = vsel %vm1485_vm5, %v12267_v13, %v1404_v47  ;;  %v701_v7 = vsel %vm666_vm2, %v595_v8, %v12628_v34 }
 0x129   :  { %2144 = vrot.lane.b32.xlu1 %v12409_v41, %s11790_s18  ;;  %3007 = vmatprep.subr.bf16.mxu1 %v1525_v12 }
 0x12a   :  { %2148 = vrot.lane.b32.xlu0 %v12549_v17, %s11790_s18  ;;  %3158 = vmatprep.subr.bf16.mxu0 %v701_v7 }
 0x12b   :  { %3008 = vmatpush1.bf16.msra.mxu1 %v1526_v56  ;;  %v836_v21 = vpop.permute.xlu1 %835  ;;  %3093 = vmatmul.mubr.bf16.gmra.mrb[20].mxu0 %v12213_v37  ;;  %v12648_v13 = vpop.permute.xlu0 %592 }
 0x12c   :  { %10131 = vmatprep.mubr.msk.bf16.mxu0 %vm2831_vm0, %v11896_v10  ;;  %v702_v59 = vsel %vm666_vm2, %v12648_v13, %v595_v8 }
 0x12d   :  { %369 = vrot.lane.b32.xlu1 %v12641_v0, %s11783_s29  ;;  %3159 = vmatpush1.bf16.msra.mxu0 %v702_v59 }
 0x12e   :  { %367 = vrot.lane.b32.xlu0 %v12645_v15, %s11783_s29 }
 0x12f   :  { %v1645_v61 = vpop.permute.xlu1 %1644  ;;  %v12663_v43 = vpop.permute.xlu0 %837 }
 0x130   :  { %v1766_v10 = vsel %vm1726_vm6, %v1645_v61, %v12520_v46  ;;  %v1767_v5 = vsel %vm1726_vm6, %v12300_v24, %v1645_v61  ;;  %v942_v54 = vsel %vm907_vm3, %v836_v21, %v12663_v43  ;;  %v12761_v61 = vld [vmem:[%s17727_s0 + $0x58] sm:$0xff] }
 0x131   :  { %610 = vrot.lane.b32.xlu1 %v12645_v15, %s11784_s30  ;;  %3009 = vmatprep.subr.bf16.mxu1 %v1766_v10 }
 0x132   :  { %365 = vrot.lane.b32.xlu0 %v12661_v39, %s11783_s29  ;;  %3160 = vmatprep.subr.bf16.mxu0 %v942_v54  ;;  %v12782_v54 = vld [vmem:[%s17728_s1 + $0x4] ss:$8 sps:$4 sm:$0xff]  }
 0x133   :  { %3010 = vmatpush1.bf16.msra.mxu1 %v1767_v5  ;;  %v1077_v49 = vpop.permute.xlu1 %1076  ;;  %v12678_v6 = vpop.permute.xlu0 %833 }
 0x134   :  { %v943_v24 = vsel %vm907_vm3, %v12678_v6, %v836_v21 }
 0x135   :  { %1419 = vrot.lane.b32.xlu1 %v12425_v36, %s11787_s13  ;;  %3161 = vmatpush1.bf16.msra.mxu0 %v943_v24 }
 0x136   :  { %612 = vrot.lane.b32.xlu0 %v12641_v0, %s11784_s30 }
 0x137   :  { %v1886_v46 = vpop.permute.xlu1 %1885  ;;  %v12687_v27 = vpop.permute.xlu0 %1078 }
 0x138   :  { %v2007_v51 = vsel %vm1967_vm7, %v1886_v46, %v12561_v29  ;;  %v2008_v14 = vsel %vm1967_vm7, %v12327_v44, %v1886_v46  ;;  %v1183_v23 = vsel %vm1148_vm4, %v1077_v49, %v12687_v27 }
 0x139   :  { %851 = vrot.lane.b32.xlu1 %v12645_v15, %s11785_s7  ;;  %3011 = vmatprep.subr.bf16.mxu1 %v2007_v51 }
 0x13a   :  { %608 = vrot.lane.b32.xlu0 %v12661_v39, %s11784_s30  ;;  %3162 = vmatprep.subr.bf16.mxu0 %v1183_v23 }
 0x13b   :  { %3012 = vmatpush1.bf16.msra.mxu1 %v2008_v14  ;;  %v2127_v8 = vpop.permute.xlu1 %2126  ;;  %v12702_v18 = vpop.permute.xlu0 %1074 }
 0x13c   :  { %v2248_v44 = vsel %vm2208_vm8, %v2127_v8, %v12585_v58  ;;  %v2249_v29 = vsel %vm2208_vm8, %v12351_v60, %v2127_v8  ;;  %v1184_v35 = vsel %vm1148_vm4, %v12702_v18, %v1077_v49 }
 0x13d   :  { %1660 = vrot.lane.b32.xlu1 %v12425_v36, %s11788_s14  ;;  %3013 = vmatprep.subr.bf16.mxu1 %v2248_v44 }
 0x13e   :  { %853 = vrot.lane.b32.xlu0 %v12641_v0, %s11785_s7  ;;  %3163 = vmatpush1.bf16.msra.mxu0 %v1184_v35 }
 0x13f   :  { %3014 = vmatpush1.bf16.msra.mxu1 %v2249_v29  ;;  %v1416_v62 = vpop.permute.xlu1 %1415  ;;  %3164 = vmatprep.subr.bf16.mxu0 %v12187_v19  ;;  %v348_v58 = vpop.permute.xlu0 %347 }
 0x140   :  { %v462_v60 = vsel %vm425_vm1, %v348_v58, %v12611_v22  ;;  %v463_v47 = vsel %vm425_vm1, %v12364_v50, %v348_v58 }
 0x141   :  { %1092 = vrot.lane.b32.xlu1 %v12645_v15, %s11786_s8  ;;  %3103 = vmatprep.subr.bf16.mxu1 %v462_v60 }
 0x142   :  { %849 = vrot.lane.b32.xlu0 %v12661_v39, %s11785_s7  ;;  %3030 = vmatmul.mubr.bf16.vlgmr.msra.gmra.mrb[8].mxu1 %v12175_v11 }
 0x143   :  { %3165 = vmatpush1.bf16.msra.mxu0 %v12191_v20  ;;  %v12730_v19 = vpop.permute.xlu1 %1413  ;;  %3104 = vmatpush1.bf16.msra.mxu1 %v463_v47  ;;  %v12732_v12 = vpop.permute.xlu0 %1417 }
 0x144   :  { %v1520_v22 = vsel %vm1485_vm5, %v12730_v19, %v1416_v62  ;;  %10126 = vmatprep.mubr.msk.bf16.mxu1 %vm2831_vm0, %v12180_v16  ;;  %v1519_v50 = vsel %vm1485_vm5, %v1416_v62, %v12732_v12 }
 0x145   :  { %1901 = vrot.lane.b32.xlu1 %v12425_v36, %s11789_s15  ;;  %3166 = vmatprep.subr.bf16.mxu0 %v1519_v50 }
 0x146   :  { %1094 = vrot.lane.b32.xlu0 %v12641_v0, %s11786_s8 }
 0x147   :  { %3167 = vmatpush1.bf16.msra.mxu0 %v1520_v22  ;;  %v1657_v20 = vpop.permute.xlu1 %1656  ;;  %v591_v56 = vpop.permute.xlu0 %590 }
 0x148   :  { %v703_v7 = vsel %vm666_vm2, %v591_v56, %v12648_v13  ;;  %v704_v21 = vsel %vm666_vm2, %v12392_v33, %v591_v56  ;;  %v12766_v13 = vld [vmem:[%s17727_s0 + $0x118] sm:$0xff]  ;;  %v51_v56 = vld [vmem:[%s17727_s0 + $0x60] sm:$0xff] }
 0x149   :  { %2142 = vrot.lane.b32.xlu1 %v12425_v36, %s11790_s18  ;;  %3105 = vmatprep.subr.bf16.mxu1 %v703_v7  ;;  %v12790_v49 = vcombine.low %v12761_v61, %v12766_v13  ;;  %v75_v7 = vld [vmem:[%s17727_s0 + $0x120] sm:$0xff] }
 0x14a   :  { %1090 = vrot.lane.b32.xlu0 %v12661_v39, %s11786_s8  ;;  %3106 = vmatpush1.bf16.msra.mxu1 %v704_v21 }
 0x14b   :  { %v12756_v59 = vpop.permute.xlu1 %1654  ;;  %v12768_v10 = vpop.permute.xlu0 %1658  ;;  %3040 = vmatmul.mubr.bf16.gmra.mrb[12].mxu1 %v12213_v37 }
 0x14c   :  { %v1761_v33 = vsel %vm1726_vm6, %v12756_v59, %v1657_v20  ;;  %v1760_v5 = vsel %vm1726_vm6, %v1657_v20, %v12768_v10  ;;  %10129 = vmatprep.mubr.msk.bf16.mxu1 %vm2831_vm0, %v12782_v54 }
 0x14d   :  { %1431 = vrot.lane.b32.xlu1 %v12641_v0, %s11787_s13  ;;  %3168 = vmatprep.subr.bf16.mxu0 %v1760_v5 }
 0x14e   :  { %363 = vrot.lane.b32.xlu0 %v12549_v17, %s11783_s29  ;;  %3169 = vmatpush1.bf16.msra.mxu0 %v1761_v33 }
 0x14f   :  { %v1898_v24 = vpop.permute.xlu1 %1897  ;;  %v832_v46 = vpop.permute.xlu0 %831 }
 0x150   :  { %v944_v51 = vsel %vm907_vm3, %v832_v46, %v12678_v6  ;;  %v945_v14 = vsel %vm907_vm3, %v12427_v52, %v832_v46 }
 0x151   :  { %1429 = vrot.lane.b32.xlu1 %v12645_v15, %s11787_s13  ;;  %3107 = vmatprep.subr.bf16.mxu1 %v944_v51  ;;  %v12882_v51 = vcombine.high %v51_v56, %v75_v7 }
 0x152   :  { %1433 = vrot.lane.b32.xlu0 %v12790_v49, %s11787_s13  ;;  %3108 = vmatpush1.bf16.msra.mxu1 %v945_v14  ;;  %v12886_v14 = vcombine.low %v51_v56, %v75_v7 }
 0x153   :  { %v12802_v23 = vpop.permute.xlu1 %1895  ;;  %v12804_v8 = vpop.permute.xlu0 %1899 }
 0x154   :  { %v2002_v44 = vsel %vm1967_vm7, %v12802_v23, %v1898_v24  ;;  %v2001_v52 = vsel %vm1967_vm7, %v1898_v24, %v12804_v8 }
 0x155   :  { %1672 = vrot.lane.b32.xlu1 %v12641_v0, %s11788_s14  ;;  %3170 = vmatprep.subr.bf16.mxu0 %v2001_v52  ;;  %v12902_v52 = vcombine.high %v12761_v61, %v12766_v13 }
 0x156   :  { %606 = vrot.lane.b32.xlu0 %v12549_v17, %s11784_s30  ;;  %3171 = vmatpush1.bf16.msra.mxu0 %v2002_v44 }
 0x157   :  { %v2139_v6 = vpop.permute.xlu1 %2138  ;;  %v1073_v29 = vpop.permute.xlu0 %1072 }
 0x158   :  { %v1185_v35 = vsel %vm1148_vm4, %v1073_v29, %v12702_v18  ;;  %v1186_v62 = vsel %vm1148_vm4, %v12451_v45, %v1073_v29 }
 0x159   :  { %1670 = vrot.lane.b32.xlu1 %v12645_v15, %s11788_s14  ;;  %3109 = vmatprep.subr.bf16.mxu1 %v1185_v35 }
 0x15a   :  { %1674 = vrot.lane.b32.xlu0 %v12790_v49, %s11788_s14  ;;  %3110 = vmatpush1.bf16.msra.mxu1 %v1186_v62 }
 0x15b   :  { %v12826_v58 = vpop.permute.xlu1 %2136  ;;  %3111 = vmatprep.subr.bf16.mxu1 %v12204_v30 }
 0x15c   :  { %v12828_v60 = vpop.permute.xlu0 %2140  ;;  %v2243_v47 = vsel %vm2208_vm8, %v12826_v58, %v2139_v6 }
 0x15d   :  { %1913 = vrot.lane.b32.xlu1 %v12641_v0, %s11789_s15  ;;  %v2242_v45 = vsel %vm2208_vm8, %v2139_v6, %v12828_v60 }
 0x15e   :  { %847 = vrot.lane.b32.xlu0 %v12549_v17, %s11785_s7  ;;  %3172 = vmatprep.subr.bf16.mxu0 %v2242_v45 }
 0x15f   :  { %3173 = vmatpush1.bf16.msra.mxu0 %v2243_v47  ;;  %v12841_v18 = vpop.permute.xlu1 %361  ;;  %3112 = vmatpush1.bf16.msra.mxu1 %v12092_v48 }
 0x160   :  { %v360_v22 = vpop.permute.xlu0 %359 }
 0x161   :  { %1911 = vrot.lane.b32.xlu1 %v12645_v15, %s11789_s15  ;;  %v456_v30 = vsel %vm425_vm1, %v360_v22, %v12841_v18 }
 0x162   :  { %1915 = vrot.lane.b32.xlu0 %v12790_v49, %s11789_s15  ;;  %3262 = vmatprep.subr.bf16.mxu0 %v456_v30 }
 0x163   :  { %v603_v50 = vpop.permute.xlu1 %602  ;;  %3189 = vmatmul.mubr.bf16.vlgmr.msra.gmra.mrb[24].mxu0 %v12175_v11 }
 0x164   :  { %v12852_v20 = vpop.permute.xlu0 %357  ;;  %10132 = vmatprep.mubr.msk.bf16.mxu0 %vm2831_vm0, %v12180_v16 }
 0x165   :  { %2154 = vrot.lane.b32.xlu1 %v12641_v0, %s11790_s18  ;;  %v457_v48 = vsel %vm425_vm1, %v12852_v20, %v360_v22 }
 0x166   :  { %1088 = vrot.lane.b32.xlu0 %v12549_v17, %s11786_s8  ;;  %3263 = vmatpush1.bf16.msra.mxu0 %v457_v48 }
 0x167   :  { %v1412_v21 = vpop.permute.xlu1 %1411 }
 0x168   :  { %v12869_v33 = vpop.permute.xlu0 %604  ;;  %v1521_v5 = vsel %vm1485_vm5, %v1412_v21, %v12730_v19  ;;  %v1522_v24 = vsel %vm1485_vm5, %v12496_v31, %v1412_v21 }
 0x169   :  { %2152 = vrot.lane.b32.xlu1 %v12645_v15, %s11790_s18  ;;  %3113 = vmatprep.subr.bf16.mxu1 %v1521_v5  ;;  %v697_v46 = vsel %vm666_vm2, %v603_v50, %v12869_v33 }
 0x16a   :  { %2156 = vrot.lane.b32.xlu0 %v12790_v49, %s11790_s18  ;;  %3264 = vmatprep.subr.bf16.mxu0 %v697_v46 }
 0x16b   :  { %3114 = vmatpush1.bf16.msra.mxu1 %v1522_v24  ;;  %v844_v19 = vpop.permute.xlu1 %843  ;;  %3199 = vmatmul.mubr.bf16.gmra.mrb[28].mxu0 %v12213_v37 }
 0x16c   :  { %v12889_v31 = vpop.permute.xlu0 %600  ;;  %10135 = vmatprep.mubr.msk.bf16.mxu0 %vm2831_vm0, %v12782_v54 }
 0x16d   :  { %377 = vrot.lane.b32.xlu1 %v12882_v51, %s11783_s29  ;;  %v698_v44 = vsel %vm666_vm2, %v12889_v31, %v603_v50 }
 0x16e   :  { %375 = vrot.lane.b32.xlu0 %v12886_v14, %s11783_s29  ;;  %3265 = vmatpush1.bf16.msra.mxu0 %v698_v44  ;;  %v13002_v44 = vld [vmem:[%s17727_s0 + $0x68] sm:$0xff] }
 0x16f   :  { %v1653_v6 = vpop.permute.xlu1 %1652 }
 0x170   :  { %v12904_v29 = vpop.permute.xlu0 %845  ;;  %v1762_v35 = vsel %vm1726_vm6, %v1653_v6, %v12756_v59  ;;  %v1763_v62 = vsel %vm1726_vm6, %v12532_v57, %v1653_v6 }
 0x171   :  { %618 = vrot.lane.b32.xlu1 %v12886_v14, %s11784_s30  ;;  %3115 = vmatprep.subr.bf16.mxu1 %v1762_v35  ;;  %v938_v61 = vsel %vm907_vm3, %v844_v19, %v12904_v29 }
 0x172   :  { %373 = vrot.lane.b32.xlu0 %v12902_v52, %s11783_s29  ;;  %3266 = vmatprep.subr.bf16.mxu0 %v938_v61 }
 0x173   :  { %3116 = vmatpush1.bf16.msra.mxu1 %v1763_v62  ;;  %v1085_v13 = vpop.permute.xlu1 %1084 }
 0x174   :  { %v12919_v47 = vpop.permute.xlu0 %841 }
 0x175   :  { %1427 = vrot.lane.b32.xlu1 %v12661_v39, %s11787_s13  ;;  %v939_v57 = vsel %vm907_vm3, %v12919_v47, %v844_v19 }
 0x176   :  { %620 = vrot.lane.b32.xlu0 %v12882_v51, %s11784_s30  ;;  %3267 = vmatpush1.bf16.msra.mxu0 %v939_v57 }
 0x177   :  { %v1894_v59 = vpop.permute.xlu1 %1893 }
 0x178   :  { %v12928_v45 = vpop.permute.xlu0 %1086  ;;  %v2003_v22 = vsel %vm1967_vm7, %v1894_v59, %v12802_v23  ;;  %v2004_v30 = vsel %vm1967_vm7, %v12563_v9, %v1894_v59 }
 0x179   :  { %859 = vrot.lane.b32.xlu1 %v12886_v14, %s11785_s7  ;;  %3117 = vmatprep.subr.bf16.mxu1 %v2003_v22  ;;  %v1179_v50 = vsel %vm1148_vm4, %v1085_v13, %v12928_v45 }
 0x17a   :  { %616 = vrot.lane.b32.xlu0 %v12902_v52, %s11784_s30  ;;  %3268 = vmatprep.subr.bf16.mxu0 %v1179_v50 }
 0x17b   :  { %3118 = vmatpush1.bf16.msra.mxu1 %v2004_v30  ;;  %v2135_v48 = vpop.permute.xlu1 %2134 }
 0x17c   :  { %v12943_v56 = vpop.permute.xlu0 %1082  ;;  %v2244_v9 = vsel %vm2208_vm8, %v2135_v48, %v12826_v58  ;;  %v2245_v23 = vsel %vm2208_vm8, %v12587_v2, %v2135_v48 }
 0x17d   :  { %1668 = vrot.lane.b32.xlu1 %v12661_v39, %s11788_s14  ;;  %3119 = vmatprep.subr.bf16.mxu1 %v2244_v9  ;;  %v1180_v7 = vsel %vm1148_vm4, %v12943_v56, %v1085_v13 }
 0x17e   :  { %861 = vrot.lane.b32.xlu0 %v12882_v51, %s11785_s7  ;;  %3269 = vmatpush1.bf16.msra.mxu0 %v1180_v7 }
 0x17f   :  { %3120 = vmatpush1.bf16.msra.mxu1 %v2245_v23  ;;  %v1424_v21 = vpop.permute.xlu1 %1423  ;;  %3270 = vmatprep.subr.bf16.mxu0 %v12405_v38 }
 0x180   :  { %v356_v58 = vpop.permute.xlu0 %355 }
 0x181   :  { %1100 = vrot.lane.b32.xlu1 %v12886_v14, %s11786_s8  ;;  %v458_v2 = vsel %vm425_vm1, %v356_v58, %v12852_v20  ;;  %v459_v5 = vsel %vm425_vm1, %v12600_v4, %v356_v58 }
 0x182   :  { %857 = vrot.lane.b32.xlu0 %v12902_v52, %s11785_s7  ;;  %3209 = vmatprep.subr.bf16.mxu1 %v458_v2 }
 0x183   :  { %3136 = vmatmul.mubr.bf16.vlgmr.msra.gmra.mrb[16].mxu1 %v12175_v11  ;;  %3271 = vmatpush1.bf16.msra.mxu0 %v12409_v41  ;;  %v12971_v38 = vpop.permute.xlu1 %1421 }
 0x184   :  { %3210 = vmatpush1.bf16.msra.mxu1 %v459_v5  ;;  %v12973_v24 = vpop.permute.xlu0 %1425  ;;  %v1516_v20 = vsel %vm1485_vm5, %v12971_v38, %v1424_v21  ;;  %10130 = vmatprep.mubr.msk.bf16.mxu1 %vm2831_vm0, %v12180_v16  ;;  %v13090_v5 = vld [vmem:[%s17728_s1] ss:$8 sps:$4 sm:$0xff]  }
 0x185   :  { %1909 = vrot.lane.b32.xlu1 %v12661_v39, %s11789_s15  ;;  %v1515_v11 = vsel %vm1485_vm5, %v1424_v21, %v12973_v24 }
 0x186   :  { %1102 = vrot.lane.b32.xlu0 %v12882_v51, %s11786_s8  ;;  %3272 = vmatprep.subr.bf16.mxu0 %v1515_v11 }
 0x187   :  { %3273 = vmatpush1.bf16.msra.mxu0 %v1516_v20  ;;  %v1665_v41 = vpop.permute.xlu1 %1664  ;;  %v13098_v20 = vld [vmem:[%s17728_s1 + $0x14] ss:$8 sps:$4 sm:$0xff]  }
 0x188   :  { %v599_v4 = vpop.permute.xlu0 %598 }
 0x189   :  { %2150 = vrot.lane.b32.xlu1 %v12661_v39, %s11790_s18  ;;  %v699_v16 = vsel %vm666_vm2, %v599_v4, %v12889_v31  ;;  %v700_v46 = vsel %vm666_vm2, %v12628_v34, %v599_v4  ;;  %v13007_v31 = vld [vmem:[%s17727_s0 + $0x128] sm:$0xff]  ;;  %v77_v4 = vld [vmem:[%s17727_s0 + $0x130] sm:$0xff] }
 0x18a   :  { %1098 = vrot.lane.b32.xlu0 %v12902_v52, %s11786_s8  ;;  %3211 = vmatprep.subr.bf16.mxu1 %v699_v16  ;;  %v13026_v62 = vcombine.low %v13002_v44, %v13007_v31 }
 0x18b   :  { %3212 = vmatpush1.bf16.msra.mxu1 %v700_v46  ;;  %v12997_v19 = vpop.permute.xlu1 %1662 }
 0x18c   :  { %v13009_v6 = vpop.permute.xlu0 %1666  ;;  %v1757_v34 = vsel %vm1726_vm6, %v12997_v19, %v1665_v41  ;;  %3146 = vmatmul.mubr.bf16.gmra.mrb[20].mxu1 %v12213_v37 }
 0x18d   :  { %1439 = vrot.lane.b32.xlu1 %v12882_v51, %s11787_s13  ;;  %v1756_v35 = vsel %vm1726_vm6, %v1665_v41, %v13009_v6  ;;  %10133 = vmatprep.mubr.msk.bf16.mxu1 %vm2831_vm0, %v12782_v54  ;;  %v53_v41 = vld [vmem:[%s17727_s0 + $0x70] sm:$0xff] }
 0x18e   :  { %371 = vrot.lane.b32.xlu0 %v12790_v49, %s11783_s29  ;;  %3274 = vmatprep.subr.bf16.mxu0 %v1756_v35 }
 0x18f   :  { %3275 = vmatpush1.bf16.msra.mxu0 %v1757_v34  ;;  %v1906_v37 = vpop.permute.xlu1 %1905 }
 0x190   :  { %v840_v61 = vpop.permute.xlu0 %839 }
 0x191   :  { %1437 = vrot.lane.b32.xlu1 %v12886_v14, %s11787_s13  ;;  %v940_v13 = vsel %vm907_vm3, %v840_v61, %v12919_v47  ;;  %v941_v57 = vsel %vm907_vm3, %v12663_v43, %v840_v61  ;;  %v13128_v61 = vcombine.high %v53_v41, %v77_v4 }
 0x192   :  { %1441 = vrot.lane.b32.xlu0 %v13026_v62, %s11787_s13  ;;  %3213 = vmatprep.subr.bf16.mxu1 %v940_v13  ;;  %v13132_v13 = vcombine.low %v53_v41, %v77_v4 }
 0x193   :  { %3214 = vmatpush1.bf16.msra.mxu1 %v941_v57  ;;  %v13038_v59 = vpop.permute.xlu1 %1903 }
 0x194   :  { %v13040_v22 = vpop.permute.xlu0 %1907  ;;  %v1998_v30 = vsel %vm1967_vm7, %v13038_v59, %v1906_v37 }
 0x195   :  { %1680 = vrot.lane.b32.xlu1 %v12882_v51, %s11788_s14  ;;  %v1997_v43 = vsel %vm1967_vm7, %v1906_v37, %v13040_v22 }
 0x196   :  { %614 = vrot.lane.b32.xlu0 %v12790_v49, %s11784_s30  ;;  %3276 = vmatprep.subr.bf16.mxu0 %v1997_v43  ;;  %v13153_v43 = vcombine.high %v13002_v44, %v13007_v31 }
 0x197   :  { %3277 = vmatpush1.bf16.msra.mxu0 %v1998_v30  ;;  %v2147_v47 = vpop.permute.xlu1 %2146 }
 0x198   :  { %v1081_v50 = vpop.permute.xlu0 %1080 }
 0x199   :  { %1678 = vrot.lane.b32.xlu1 %v12886_v14, %s11788_s14  ;;  %v1181_v48 = vsel %vm1148_vm4, %v1081_v50, %v12943_v56  ;;  %v1182_v9 = vsel %vm1148_vm4, %v12687_v27, %v1081_v50 }
 0x19a   :  { %1682 = vrot.lane.b32.xlu0 %v13026_v62, %s11788_s14  ;;  %3215 = vmatprep.subr.bf16.mxu1 %v1181_v48 }
 0x19b   :  { %3216 = vmatpush1.bf16.msra.mxu1 %v1182_v9  ;;  %v13062_v23 = vpop.permute.xlu1 %2144 }
 0x19c   :  { %v13064_v7 = vpop.permute.xlu0 %2148  ;;  %v2239_v21 = vsel %vm2208_vm8, %v13062_v23, %v2147_v47  ;;  %3217 = vmatprep.subr.bf16.mxu1 %v12425_v36 }
 0x19d   :  { %1921 = vrot.lane.b32.xlu1 %v12882_v51, %s11789_s15  ;;  %v2238_v27 = vsel %vm2208_vm8, %v2147_v47, %v13064_v7 }
 0x19e   :  { %855 = vrot.lane.b32.xlu0 %v12790_v49, %s11785_s7  ;;  %3278 = vmatprep.subr.bf16.mxu0 %v2238_v27 }
 0x19f   :  { %3279 = vmatpush1.bf16.msra.mxu0 %v2239_v21  ;;  %v13077_v56 = vpop.permute.xlu1 %369  ;;  %3218 = vmatpush1.bf16.msra.mxu1 %v12314_v28 }
 0x1a0   :  { %v368_v58 = vpop.permute.xlu0 %367 }
 0x1a1   :  { %1919 = vrot.lane.b32.xlu1 %v12886_v14, %s11789_s15  ;;  %v452_v36 = vsel %vm425_vm1, %v368_v58, %v13077_v56 }
 0x1a2   :  { %1923 = vrot.lane.b32.xlu0 %v13026_v62, %s11789_s15  ;;  %3368 = vmatprep.subr.bf16.mxu0 %v452_v36 }
 0x1a3   :  { %v611_v2 = vpop.permute.xlu1 %610  ;;  %3295 = vmatmul.mubr.bf16.vlgmr.msra.gmra.mrb[32].mxu0 %v13090_v5 }
 0x1a4   :  { %v13093_v28 = vpop.permute.xlu0 %365  ;;  %10136 = vmatprep.mubr.msk.bf16.mxu0 %vm2831_vm0, %v13098_v20 }
 0x1a5   :  { %2162 = vrot.lane.b32.xlu1 %v12882_v51, %s11790_s18  ;;  %v453_v11 = vsel %vm425_vm1, %v13093_v28, %v368_v58 }
 0x1a6   :  { %1096 = vrot.lane.b32.xlu0 %v12790_v49, %s11786_s8  ;;  %3369 = vmatpush1.bf16.msra.mxu0 %v453_v11 }
 0x1a7   :  { %v1420_v16 = vpop.permute.xlu1 %1419 }
 0x1a8   :  { %v13115_v46 = vpop.permute.xlu0 %612  ;;  %v1517_v34 = vsel %vm1485_vm5, %v1420_v16, %v12971_v38  ;;  %v1518_v35 = vsel %vm1485_vm5, %v12732_v12, %v1420_v16  ;;  %v13137_v12 = vld [vmem:[%s17728_s1 + $0x10] ss:$8 sps:$4 sm:$0xff]  }
 0x1a9   :  { %2160 = vrot.lane.b32.xlu1 %v12886_v14, %s11790_s18  ;;  %3219 = vmatprep.subr.bf16.mxu1 %v1517_v34  ;;  %v693_v37 = vsel %vm666_vm2, %v611_v2, %v13115_v46 }
 0x1aa   :  { %2164 = vrot.lane.b32.xlu0 %v13026_v62, %s11790_s18  ;;  %3370 = vmatprep.subr.bf16.mxu0 %v693_v37 }
 0x1ab   :  { %3220 = vmatpush1.bf16.msra.mxu1 %v1518_v35  ;;  %v852_v38 = vpop.permute.xlu1 %851  ;;  %3305 = vmatmul.mubr.bf16.gmra.mrb[36].mxu0 %v13137_v12 }
 0x1ac   :  { %v13140_v57 = vpop.permute.xlu0 %608  ;;  %10139 = vmatprep.mubr.msk.bf16.mxu0 %vm2831_vm0, %v12782_v54 }
 0x1ad   :  { %385 = vrot.lane.b32.xlu1 %v13128_v61, %s11783_s29  ;;  %v694_v30 = vsel %vm666_vm2, %v13140_v57, %v611_v2 }
 0x1ae   :  { %383 = vrot.lane.b32.xlu0 %v13132_v13, %s11783_s29  ;;  %3371 = vmatpush1.bf16.msra.mxu0 %v694_v30 }
 0x1af   :  { %v1661_v47 = vpop.permute.xlu1 %1660 }
 0x1b0   :  { %v13155_v50 = vpop.permute.xlu0 %853  ;;  %v1758_v48 = vsel %vm1726_vm6, %v1661_v47, %v12997_v19  ;;  %v1759_v9 = vsel %vm1726_vm6, %v12768_v10, %v1661_v47 }
 0x1b1   :  { %626 = vrot.lane.b32.xlu1 %v13132_v13, %s11784_s30  ;;  %3221 = vmatprep.subr.bf16.mxu1 %v1758_v48  ;;  %v934_v44 = vsel %vm907_vm3, %v852_v38, %v13155_v50  ;;  %v13253_v48 = vld [vmem:[%s17727_s0 + $0x78] sm:$0xff] }
 0x1b2   :  { %381 = vrot.lane.b32.xlu0 %v13153_v43, %s11783_s29  ;;  %3372 = vmatprep.subr.bf16.mxu0 %v934_v44 }
 0x1b3   :  { %3222 = vmatpush1.bf16.msra.mxu1 %v1759_v9  ;;  %v1093_v31 = vpop.permute.xlu1 %1092 }
 0x1b4   :  { %v13170_v21 = vpop.permute.xlu0 %849 }
 0x1b5   :  { %1435 = vrot.lane.b32.xlu1 %v12902_v52, %s11787_s13  ;;  %v935_v10 = vsel %vm907_vm3, %v13170_v21, %v852_v38 }
 0x1b6   :  { %628 = vrot.lane.b32.xlu0 %v13128_v61, %s11784_s30  ;;  %3373 = vmatpush1.bf16.msra.mxu0 %v935_v10 }
 0x1b7   :  { %v1902_v19 = vpop.permute.xlu1 %1901 }
 0x1b8   :  { %v13179_v27 = vpop.permute.xlu0 %1094  ;;  %v1999_v58 = vsel %vm1967_vm7, %v1902_v19, %v13038_v59  ;;  %v2000_v36 = vsel %vm1967_vm7, %v12804_v8, %v1902_v19 }
 0x1b9   :  { %867 = vrot.lane.b32.xlu1 %v13132_v13, %s11785_s7  ;;  %3223 = vmatprep.subr.bf16.mxu1 %v1999_v58  ;;  %v1175_v2 = vsel %vm1148_vm4, %v1093_v31, %v13179_v27 }
 0x1ba   :  { %624 = vrot.lane.b32.xlu0 %v13153_v43, %s11784_s30  ;;  %3374 = vmatprep.subr.bf16.mxu0 %v1175_v2 }
 0x1bb   :  { %3224 = vmatpush1.bf16.msra.mxu1 %v2000_v36  ;;  %v2143_v11 = vpop.permute.xlu1 %2142 }
 0x1bc   :  { %v13194_v41 = vpop.permute.xlu0 %1090  ;;  %v2240_v8 = vsel %vm2208_vm8, %v2143_v11, %v13062_v23  ;;  %v2241_v59 = vsel %vm2208_vm8, %v12828_v60, %v2143_v11 }
 0x1bd   :  { %1676 = vrot.lane.b32.xlu1 %v12902_v52, %s11788_s14  ;;  %3225 = vmatprep.subr.bf16.mxu1 %v2240_v8  ;;  %v1176_v4 = vsel %vm1148_vm4, %v13194_v41, %v1093_v31 }
 0x1be   :  { %869 = vrot.lane.b32.xlu0 %v13128_v61, %s11785_s7  ;;  %3375 = vmatpush1.bf16.msra.mxu0 %v1176_v4 }
 0x1bf   :  { %3226 = vmatpush1.bf16.msra.mxu1 %v2241_v59  ;;  %v1432_v16 = vpop.permute.xlu1 %1431  ;;  %3376 = vmatprep.subr.bf16.mxu0 %v12641_v0 }
 0x1c0   :  { %v364_v23 = vpop.permute.xlu0 %363 }
 0x1c1   :  { %1108 = vrot.lane.b32.xlu1 %v13132_v13, %s11786_s8  ;;  %v454_v60 = vsel %vm425_vm1, %v364_v23, %v13093_v28  ;;  %v455_v34 = vsel %vm425_vm1, %v12841_v18, %v364_v23 }
 0x1c2   :  { %865 = vrot.lane.b32.xlu0 %v13153_v43, %s11785_s7  ;;  %3315 = vmatprep.subr.bf16.mxu1 %v454_v60 }
 0x1c3   :  { %3242 = vmatmul.mubr.bf16.vlgmr.msra.gmra.mrb[24].mxu1 %v13090_v5  ;;  %3377 = vmatpush1.bf16.msra.mxu0 %v12645_v15  ;;  %v13222_v0 = vpop.permute.xlu1 %1429 }
 0x1c4   :  { %3316 = vmatpush1.bf16.msra.mxu1 %v455_v34  ;;  %v13224_v35 = vpop.permute.xlu0 %1433  ;;  %v1512_v28 = vsel %vm1485_vm5, %v13222_v0, %v1432_v16  ;;  %10134 = vmatprep.mubr.msk.bf16.mxu1 %vm2831_vm0, %v13098_v20 }
 0x1c5   :  { %1917 = vrot.lane.b32.xlu1 %v12902_v52, %s11789_s15  ;;  %v1511_v18 = vsel %vm1485_vm5, %v1432_v16, %v13224_v35 }
 0x1c6   :  { %1110 = vrot.lane.b32.xlu0 %v13128_v61, %s11786_s8  ;;  %3378 = vmatprep.subr.bf16.mxu0 %v1511_v18 }
 0x1c7   :  { %3379 = vmatpush1.bf16.msra.mxu0 %v1512_v28  ;;  %v1673_v15 = vpop.permute.xlu1 %1672 }
 0x1c8   :  { %v607_v37 = vpop.permute.xlu0 %606 }
 0x1c9   :  { %2158 = vrot.lane.b32.xlu1 %v12902_v52, %s11790_s18  ;;  %v695_v38 = vsel %vm666_vm2, %v607_v37, %v13140_v57  ;;  %v696_v30 = vsel %vm666_vm2, %v12869_v33, %v607_v37  ;;  %v13258_v57 = vld [vmem:[%s17727_s0 + $0x138] sm:$0xff]  ;;  %v55_v37 = vld [vmem:[%s17727_s0 + $0x80] sm:$0xff] }
 0x1ca   :  { %1106 = vrot.lane.b32.xlu0 %v13153_v43, %s11786_s8  ;;  %3317 = vmatprep.subr.bf16.mxu1 %v695_v38  ;;  %v13277_v31 = vcombine.low %v13253_v48, %v13258_v57  ;;  %v79_v38 = vld [vmem:[%s17727_s0 + $0x140] sm:$0xff] }
 0x1cb   :  { %3318 = vmatpush1.bf16.msra.mxu1 %v696_v30  ;;  %v13248_v47 = vpop.permute.xlu1 %1670 }
 0x1cc   :  { %v13260_v9 = vpop.permute.xlu0 %1674  ;;  %v1753_v33 = vsel %vm1726_vm6, %v13248_v47, %v1673_v15  ;;  %3252 = vmatmul.mubr.bf16.gmra.mrb[28].mxu1 %v13137_v12 }
 0x1cd   :  { %1447 = vrot.lane.b32.xlu1 %v13128_v61, %s11787_s13  ;;  %v1752_v44 = vsel %vm1726_vm6, %v1673_v15, %v13260_v9  ;;  %10137 = vmatprep.mubr.msk.bf16.mxu1 %vm2831_vm0, %v12782_v54 }
 0x1ce   :  { %379 = vrot.lane.b32.xlu0 %v13026_v62, %s11783_s29  ;;  %3380 = vmatprep.subr.bf16.mxu0 %v1752_v44 }
 0x1cf   :  { %3381 = vmatpush1.bf16.msra.mxu0 %v1753_v33  ;;  %v1914_v10 = vpop.permute.xlu1 %1913 }
 0x1d0   :  { %v848_v19 = vpop.permute.xlu0 %847 }
 0x1d1   :  { %1445 = vrot.lane.b32.xlu1 %v13132_v13, %s11787_s13  ;;  %v936_v58 = vsel %vm907_vm3, %v848_v19, %v13170_v21  ;;  %v937_v36 = vsel %vm907_vm3, %v12904_v29, %v848_v19 }
 0x1d2   :  { %1449 = vrot.lane.b32.xlu0 %v13277_v31, %s11787_s13  ;;  %3319 = vmatprep.subr.bf16.mxu1 %v936_v58  ;;  %v13369_v58 = vcombine.high %v55_v37, %v79_v38 }
 0x1d3   :  { %3320 = vmatpush1.bf16.msra.mxu1 %v937_v36  ;;  %v13289_v2 = vpop.permute.xlu1 %1911  ;;  %v13373_v36 = vcombine.low %v55_v37, %v79_v38 }
 0x1d4   :  { %v13291_v11 = vpop.permute.xlu0 %1915  ;;  %v1994_v8 = vsel %vm1967_vm7, %v13289_v2, %v1914_v10 }
 0x1d5   :  { %1688 = vrot.lane.b32.xlu1 %v13128_v61, %s11788_s14  ;;  %v1993_v29 = vsel %vm1967_vm7, %v1914_v10, %v13291_v11 }
 0x1d6   :  { %622 = vrot.lane.b32.xlu0 %v13026_v62, %s11784_s30  ;;  %3382 = vmatprep.subr.bf16.mxu0 %v1993_v29  ;;  %v13389_v29 = vcombine.high %v13253_v48, %v13258_v57 }
 0x1d7   :  { %3383 = vmatpush1.bf16.msra.mxu0 %v1994_v8  ;;  %v2155_v21 = vpop.permute.xlu1 %2154 }
 0x1d8   :  { %v1089_v59 = vpop.permute.xlu0 %1088 }
 0x1d9   :  { %1686 = vrot.lane.b32.xlu1 %v13132_v13, %s11788_s14  ;;  %v1177_v4 = vsel %vm1148_vm4, %v1089_v59, %v13194_v41  ;;  %v1178_v16 = vsel %vm1148_vm4, %v12928_v45, %v1089_v59 }
 0x1da   :  { %1690 = vrot.lane.b32.xlu0 %v13277_v31, %s11788_s14  ;;  %3321 = vmatprep.subr.bf16.mxu1 %v1177_v4 }
 0x1db   :  { %3322 = vmatpush1.bf16.msra.mxu1 %v1178_v16  ;;  %v13313_v23 = vpop.permute.xlu1 %2152 }
 0x1dc   :  { %v13315_v60 = vpop.permute.xlu0 %2156  ;;  %v2235_v34 = vsel %vm2208_vm8, %v13313_v23, %v2155_v21  ;;  %3323 = vmatprep.subr.bf16.mxu1 %v12661_v39 }
 0x1dd   :  { %1929 = vrot.lane.b32.xlu1 %v13128_v61, %s11789_s15  ;;  %v2234_v45 = vsel %vm2208_vm8, %v2155_v21, %v13315_v60 }
 0x1de   :  { %863 = vrot.lane.b32.xlu0 %v13026_v62, %s11785_s7  ;;  %3384 = vmatprep.subr.bf16.mxu0 %v2234_v45 }
 0x1df   :  { %3385 = vmatpush1.bf16.msra.mxu0 %v2235_v34  ;;  %v13328_v41 = vpop.permute.xlu1 %377  ;;  %3324 = vmatpush1.bf16.msra.mxu1 %v12549_v17 }
 0x1e0   :  { %v376_v28 = vpop.permute.xlu0 %375 }
 0x1e1   :  { %1927 = vrot.lane.b32.xlu1 %v13132_v13, %s11789_s15  ;;  %v448_v39 = vsel %vm425_vm1, %v376_v28, %v13328_v41 }
 0x1e2   :  { %1931 = vrot.lane.b32.xlu0 %v13277_v31, %s11789_s15  ;;  %3474 = vmatprep.subr.bf16.mxu0 %v448_v39 }
 0x1e3   :  { %v619_v18 = vpop.permute.xlu1 %618  ;;  %3401 = vmatmul.mubr.bf16.vlgmr.msra.gmra.mrb[40].mxu0 %v13090_v5 }
 0x1e4   :  { %v13339_v15 = vpop.permute.xlu0 %373  ;;  %10140 = vmatprep.mubr.msk.bf16.mxu0 %vm2831_vm0, %v13098_v20 }
 0x1e5   :  { %2170 = vrot.lane.b32.xlu1 %v13128_v61, %s11790_s18  ;;  %v449_v17 = vsel %vm425_vm1, %v13339_v15, %v376_v28 }
 0x1e6   :  { %1104 = vrot.lane.b32.xlu0 %v13026_v62, %s11786_s8  ;;  %3475 = vmatpush1.bf16.msra.mxu0 %v449_v17 }
 0x1e7   :  { %v1428_v30 = vpop.permute.xlu1 %1427 }
 0x1e8   :  { %v13356_v33 = vpop.permute.xlu0 %620  ;;  %v1513_v44 = vsel %vm1485_vm5, %v1428_v30, %v13222_v0  ;;  %v1514_v10 = vsel %vm1485_vm5, %v12973_v24, %v1428_v30 }
 0x1e9   :  { %2168 = vrot.lane.b32.xlu1 %v13132_v13, %s11790_s18  ;;  %3325 = vmatprep.subr.bf16.mxu1 %v1513_v44  ;;  %v689_v19 = vsel %vm666_vm2, %v619_v18, %v13356_v33 }
 0x1ea   :  { %2172 = vrot.lane.b32.xlu0 %v13277_v31, %s11790_s18  ;;  %3476 = vmatprep.subr.bf16.mxu0 %v689_v19 }
 0x1eb   :  { %3326 = vmatpush1.bf16.msra.mxu1 %v1514_v10  ;;  %v860_v0 = vpop.permute.xlu1 %859  ;;  %3411 = vmatmul.mubr.bf16.gmra.mrb[44].mxu0 %v13137_v12 }
 0x1ec   :  { %v13376_v24 = vpop.permute.xlu0 %616  ;;  %10143 = vmatprep.mubr.msk.bf16.mxu0 %vm2831_vm0, %v12782_v54 }
 0x1ed   :  { %393 = vrot.lane.b32.xlu1 %v13369_v58, %s11783_s29  ;;  %v690_v8 = vsel %vm666_vm2, %v13376_v24, %v619_v18 }
 0x1ee   :  { %391 = vrot.lane.b32.xlu0 %v13373_v36, %s11783_s29  ;;  %3477 = vmatpush1.bf16.msra.mxu0 %v690_v8 }
 0x1ef   :  { %v1669_v21 = vpop.permute.xlu1 %1668 }
 0x1f0   :  { %v13391_v59 = vpop.permute.xlu0 %861  ;;  %v1754_v4 = vsel %vm1726_vm6, %v1669_v21, %v13248_v47  ;;  %v1755_v16 = vsel %vm1726_vm6, %v13009_v6, %v1669_v21 }
 0x1f1   :  { %634 = vrot.lane.b32.xlu1 %v13373_v36, %s11784_s30  ;;  %3327 = vmatprep.subr.bf16.mxu1 %v1754_v4  ;;  %v930_v48 = vsel %vm907_vm3, %v860_v0, %v13391_v59  ;;  %v13489_v4 = vld [vmem:[%s17727_s0 + $0x88] sm:$0xff] }
 0x1f2   :  { %389 = vrot.lane.b32.xlu0 %v13389_v29, %s11783_s29  ;;  %3478 = vmatprep.subr.bf16.mxu0 %v930_v48 }
 0x1f3   :  { %3328 = vmatpush1.bf16.msra.mxu1 %v1755_v16  ;;  %v1101_v57 = vpop.permute.xlu1 %1100 }
 0x1f4   :  { %v13406_v34 = vpop.permute.xlu0 %857 }
 0x1f5   :  { %1443 = vrot.lane.b32.xlu1 %v13153_v43, %s11787_s13  ;;  %v931_v6 = vsel %vm907_vm3, %v13406_v34, %v860_v0 }
 0x1f6   :  { %636 = vrot.lane.b32.xlu0 %v13369_v58, %s11784_s30  ;;  %3479 = vmatpush1.bf16.msra.mxu0 %v931_v6 }
 0x1f7   :  { %v1910_v47 = vpop.permute.xlu1 %1909 }
 0x1f8   :  { %v13415_v45 = vpop.permute.xlu0 %1102  ;;  %v1995_v28 = vsel %vm1967_vm7, %v1910_v47, %v13289_v2  ;;  %v1996_v39 = vsel %vm1967_vm7, %v13040_v22, %v1910_v47 }
 0x1f9   :  { %875 = vrot.lane.b32.xlu1 %v13373_v36, %s11785_s7  ;;  %3329 = vmatprep.subr.bf16.mxu1 %v1995_v28  ;;  %v1171_v18 = vsel %vm1148_vm4, %v1101_v57, %v13415_v45 }
 0x1fa   :  { %632 = vrot.lane.b32.xlu0 %v13389_v29, %s11784_s30  ;;  %3480 = vmatprep.subr.bf16.mxu0 %v1171_v18 }
 0x1fb   :  { %3330 = vmatpush1.bf16.msra.mxu1 %v1996_v39  ;;  %v2151_v17 = vpop.permute.xlu1 %2150 }
 0x1fc   :  { %v13430_v37 = vpop.permute.xlu0 %1098  ;;  %v2236_v22 = vsel %vm2208_vm8, %v2151_v17, %v13313_v23  ;;  %v2237_v2 = vsel %vm2208_vm8, %v13064_v7, %v2151_v17 }
 0x1fd   :  { %1684 = vrot.lane.b32.xlu1 %v13153_v43, %s11788_s14  ;;  %3331 = vmatprep.subr.bf16.mxu1 %v2236_v22  ;;  %v1172_v38 = vsel %vm1148_vm4, %v13430_v37, %v1101_v57 }
 0x1fe   :  { %877 = vrot.lane.b32.xlu0 %v13369_v58, %s11785_s7  ;;  %3481 = vmatpush1.bf16.msra.mxu0 %v1172_v38 }
 0x1ff   :  { %3332 = vmatpush1.bf16.msra.mxu1 %v2237_v2  ;;  %v1440_v30 = vpop.permute.xlu1 %1439  ;;  %3482 = vmatprep.subr.bf16.mxu0 %v12882_v51 }
 0x200   :  { %v372_v23 = vpop.permute.xlu0 %371 }
 0x201   :  { %1116 = vrot.lane.b32.xlu1 %v13373_v36, %s11786_s8  ;;  %v450_v7 = vsel %vm425_vm1, %v372_v23, %v13339_v15  ;;  %v451_v44 = vsel %vm425_vm1, %v13077_v56, %v372_v23 }
 0x202   :  { %873 = vrot.lane.b32.xlu0 %v13389_v29, %s11785_s7  ;;  %3421 = vmatprep.subr.bf16.mxu1 %v450_v7 }
 0x203   :  { %3348 = vmatmul.mubr.bf16.vlgmr.msra.gmra.mrb[32].mxu1 %v13090_v5  ;;  %3483 = vmatpush1.bf16.msra.mxu0 %v12886_v14  ;;  %v13458_v51 = vpop.permute.xlu1 %1437 }
 0x204   :  { %3422 = vmatpush1.bf16.msra.mxu1 %v451_v44  ;;  %v13460_v10 = vpop.permute.xlu0 %1441  ;;  %v1508_v15 = vsel %vm1485_vm5, %v13458_v51, %v1440_v30  ;;  %10138 = vmatprep.mubr.msk.bf16.mxu1 %vm2831_vm0, %v13098_v20 }
 0x205   :  { %1925 = vrot.lane.b32.xlu1 %v13153_v43, %s11789_s15  ;;  %v1507_v56 = vsel %vm1485_vm5, %v1440_v30, %v13460_v10 }
 0x206   :  { %1118 = vrot.lane.b32.xlu0 %v13369_v58, %s11786_s8  ;;  %3484 = vmatprep.subr.bf16.mxu0 %v1507_v56 }
 0x207   :  { %3485 = vmatpush1.bf16.msra.mxu0 %v1508_v15  ;;  %v1681_v14 = vpop.permute.xlu1 %1680 }
 0x208   :  { %v615_v19 = vpop.permute.xlu0 %614 }
 0x209   :  { %2166 = vrot.lane.b32.xlu1 %v13153_v43, %s11790_s18  ;;  %v691_v0 = vsel %vm666_vm2, %v615_v19, %v13376_v24  ;;  %v692_v8 = vsel %vm666_vm2, %v13115_v46, %v615_v19  ;;  %v13494_v24 = vld [vmem:[%s17727_s0 + $0x148] sm:$0xff]  ;;  %v81_v19 = vld [vmem:[%s17727_s0 + $0x150] sm:$0xff] }
 0x20a   :  { %1114 = vrot.lane.b32.xlu0 %v13389_v29, %s11786_s8  ;;  %3423 = vmatprep.subr.bf16.mxu1 %v691_v0  ;;  %v13513_v57 = vcombine.low %v13489_v4, %v13494_v24 }
 0x20b   :  { %3424 = vmatpush1.bf16.msra.mxu1 %v692_v8  ;;  %v13484_v21 = vpop.permute.xlu1 %1678 }
 0x20c   :  { %v13496_v16 = vpop.permute.xlu0 %1682  ;;  %v1749_v46 = vsel %vm1726_vm6, %v13484_v21, %v1681_v14  ;;  %3358 = vmatmul.mubr.bf16.gmra.mrb[36].mxu1 %v13137_v12 }
 0x20d   :  { %1455 = vrot.lane.b32.xlu1 %v13369_v58, %s11787_s13  ;;  %v1748_v48 = vsel %vm1726_vm6, %v1681_v14, %v13496_v16  ;;  %10141 = vmatprep.mubr.msk.bf16.mxu1 %vm2831_vm0, %v12782_v54  ;;  %v57_v14 = vld [vmem:[%s17727_s0 + $0x90] sm:$0xff] }
 0x20e   :  { %387 = vrot.lane.b32.xlu0 %v13277_v31, %s11783_s29  ;;  %3486 = vmatprep.subr.bf16.mxu0 %v1748_v48 }
 0x20f   :  { %3487 = vmatpush1.bf16.msra.mxu0 %v1749_v46  ;;  %v1922_v6 = vpop.permute.xlu1 %1921 }
 0x210   :  { %v856_v47 = vpop.permute.xlu0 %855 }
 0x211   :  { %1453 = vrot.lane.b32.xlu1 %v13373_v36, %s11787_s13  ;;  %v932_v28 = vsel %vm907_vm3, %v856_v47, %v13406_v34  ;;  %v933_v54 = vsel %vm907_vm3, %v13155_v50, %v856_v47  ;;  %v13605_v47 = vcombine.high %v57_v14, %v81_v19 }
 0x212   :  { %1457 = vrot.lane.b32.xlu0 %v13513_v57, %s11787_s13  ;;  %3425 = vmatprep.subr.bf16.mxu1 %v932_v28  ;;  %v13609_v28 = vcombine.low %v57_v14, %v81_v19 }
 0x213   :  { %3426 = vmatpush1.bf16.msra.mxu1 %v933_v54  ;;  %v13525_v39 = vpop.permute.xlu1 %1919  ;;  %v13617_v54 = vld [vmem:[%s17728_s1 + $0x4] ss:$8 sps:$4 sm:$0xff]  }
 0x214   :  { %v13527_v18 = vpop.permute.xlu0 %1923  ;;  %v1990_v17 = vsel %vm1967_vm7, %v13525_v39, %v1922_v6 }
 0x215   :  { %1696 = vrot.lane.b32.xlu1 %v13369_v58, %s11788_s14  ;;  %v1989_v50 = vsel %vm1967_vm7, %v1922_v6, %v13527_v18 }
 0x216   :  { %630 = vrot.lane.b32.xlu0 %v13277_v31, %s11784_s30  ;;  %3488 = vmatprep.subr.bf16.mxu0 %v1989_v50  ;;  %v13630_v50 = vcombine.high %v13489_v4, %v13494_v24 }
 0x217   :  { %3489 = vmatpush1.bf16.msra.mxu0 %v1990_v17  ;;  %v2163_v34 = vpop.permute.xlu1 %2162 }
 0x218   :  { %v1097_v22 = vpop.permute.xlu0 %1096 }
 0x219   :  { %1694 = vrot.lane.b32.xlu1 %v13373_v36, %s11788_s14  ;;  %v1173_v2 = vsel %vm1148_vm4, %v1097_v22, %v13430_v37  ;;  %v1174_v38 = vsel %vm1148_vm4, %v13179_v27, %v1097_v22 }
 0x21a   :  { %1698 = vrot.lane.b32.xlu0 %v13513_v57, %s11788_s14  ;;  %3427 = vmatprep.subr.bf16.mxu1 %v1173_v2 }
 0x21b   :  { %3428 = vmatpush1.bf16.msra.mxu1 %v1174_v38  ;;  %v13549_v30 = vpop.permute.xlu1 %2160 }
 0x21c   :  { %v13551_v23 = vpop.permute.xlu0 %2164  ;;  %v2231_v7 = vsel %vm2208_vm8, %v13549_v30, %v2163_v34  ;;  %3429 = vmatprep.subr.bf16.mxu1 %v12902_v52 }
 0x21d   :  { %1937 = vrot.lane.b32.xlu1 %v13369_v58, %s11789_s15  ;;  %v2230_v27 = vsel %vm2208_vm8, %v2163_v34, %v13551_v23 }
 0x21e   :  { %871 = vrot.lane.b32.xlu0 %v13277_v31, %s11785_s7  ;;  %3490 = vmatprep.subr.bf16.mxu0 %v2230_v27 }
 0x21f   :  { %3491 = vmatpush1.bf16.msra.mxu0 %v2231_v7  ;;  %v13564_v37 = vpop.permute.xlu1 %385  ;;  %3430 = vmatpush1.bf16.msra.mxu1 %v12790_v49 }
 0x220   :  { %v384_v44 = vpop.permute.xlu0 %383 }
 0x221   :  { %1935 = vrot.lane.b32.xlu1 %v13373_v36, %s11789_s15  ;;  %v444_v52 = vsel %vm425_vm1, %v384_v44, %v13564_v37 }
 0x222   :  { %1939 = vrot.lane.b32.xlu0 %v13513_v57, %s11789_s15  ;;  %3580 = vmatprep.subr.bf16.mxu0 %v444_v52 }
 0x223   :  { %v627_v15 = vpop.permute.xlu1 %626  ;;  %3507 = vmatmul.mubr.bf16.vlgmr.msra.gmra.mrb[48].mxu0 %v13090_v5 }
 0x224   :  { %v13575_v56 = vpop.permute.xlu0 %381  ;;  %10144 = vmatprep.mubr.msk.bf16.mxu0 %vm2831_vm0, %v13098_v20 }
 0x225   :  { %2178 = vrot.lane.b32.xlu1 %v13369_v58, %s11790_s18  ;;  %v445_v49 = vsel %vm425_vm1, %v13575_v56, %v384_v44 }
 0x226   :  { %1112 = vrot.lane.b32.xlu0 %v13277_v31, %s11786_s8  ;;  %3581 = vmatpush1.bf16.msra.mxu0 %v445_v49 }
 0x227   :  { %v1436_v0 = vpop.permute.xlu1 %1435 }
 0x228   :  { %v13592_v8 = vpop.permute.xlu0 %628  ;;  %v1509_v46 = vsel %vm1485_vm5, %v1436_v0, %v13458_v51  ;;  %v1510_v48 = vsel %vm1485_vm5, %v13224_v35, %v1436_v0 }
 0x229   :  { %2176 = vrot.lane.b32.xlu1 %v13373_v36, %s11790_s18  ;;  %3431 = vmatprep.subr.bf16.mxu1 %v1509_v46  ;;  %v685_v6 = vsel %vm666_vm2, %v627_v15, %v13592_v8 }
 0x22a   :  { %2180 = vrot.lane.b32.xlu0 %v13513_v57, %s11790_s18  ;;  %3582 = vmatprep.subr.bf16.mxu0 %v685_v6 }
 0x22b   :  { %3432 = vmatpush1.bf16.msra.mxu1 %v1510_v48  ;;  %v868_v51 = vpop.permute.xlu1 %867  ;;  %3517 = vmatmul.mubr.bf16.gmra.mrb[52].mxu0 %v13137_v12 }
 0x22c   :  { %v13612_v35 = vpop.permute.xlu0 %624  ;;  %10147 = vmatprep.mubr.msk.bf16.mxu0 %vm2831_vm0, %v13617_v54 }
 0x22d   :  { %401 = vrot.lane.b32.xlu1 %v13605_v47, %s11783_s29  ;;  %v686_v17 = vsel %vm666_vm2, %v13612_v35, %v627_v15 }
 0x22e   :  { %399 = vrot.lane.b32.xlu0 %v13609_v28, %s11783_s29  ;;  %3583 = vmatpush1.bf16.msra.mxu0 %v686_v17 }
 0x22f   :  { %v1677_v34 = vpop.permute.xlu1 %1676 }
 0x230   :  { %v13632_v22 = vpop.permute.xlu0 %869  ;;  %v1750_v2 = vsel %vm1726_vm6, %v1677_v34, %v13484_v21  ;;  %v1751_v38 = vsel %vm1726_vm6, %v13260_v9, %v1677_v34 }
 0x231   :  { %642 = vrot.lane.b32.xlu1 %v13609_v28, %s11784_s30  ;;  %3433 = vmatprep.subr.bf16.mxu1 %v1750_v2  ;;  %v926_v4 = vsel %vm907_vm3, %v868_v51, %v13632_v22  ;;  %v13730_v2 = vld [vmem:[%s17727_s0 + $0x98] sm:$0xff] }
 0x232   :  { %397 = vrot.lane.b32.xlu0 %v13630_v50, %s11783_s29  ;;  %3584 = vmatprep.subr.bf16.mxu0 %v926_v4 }
 0x233   :  { %3434 = vmatpush1.bf16.msra.mxu1 %v1751_v38  ;;  %v1109_v24 = vpop.permute.xlu1 %1108 }
 0x234   :  { %v13647_v7 = vpop.permute.xlu0 %865 }
 0x235   :  { %1451 = vrot.lane.b32.xlu1 %v13389_v29, %s11787_s13  ;;  %v927_v9 = vsel %vm907_vm3, %v13647_v7, %v868_v51 }
 0x236   :  { %644 = vrot.lane.b32.xlu0 %v13605_v47, %s11784_s30  ;;  %3585 = vmatpush1.bf16.msra.mxu0 %v927_v9 }
 0x237   :  { %v1918_v21 = vpop.permute.xlu1 %1917 }
 0x238   :  { %v13656_v27 = vpop.permute.xlu0 %1110  ;;  %v1991_v44 = vsel %vm1967_vm7, %v1918_v21, %v13525_v39  ;;  %v1992_v52 = vsel %vm1967_vm7, %v13291_v11, %v1918_v21 }
 0x239   :  { %883 = vrot.lane.b32.xlu1 %v13609_v28, %s11785_s7  ;;  %3435 = vmatprep.subr.bf16.mxu1 %v1991_v44  ;;  %v1167_v15 = vsel %vm1148_vm4, %v1109_v24, %v13656_v27 }
 0x23a   :  { %640 = vrot.lane.b32.xlu0 %v13630_v50, %s11784_s30  ;;  %3586 = vmatprep.subr.bf16.mxu0 %v1167_v15 }
 0x23b   :  { %3436 = vmatpush1.bf16.msra.mxu1 %v1992_v52  ;;  %v2159_v49 = vpop.permute.xlu1 %2158 }
 0x23c   :  { %v13671_v14 = vpop.permute.xlu0 %1106  ;;  %v2232_v11 = vsel %vm2208_vm8, %v2159_v49, %v13549_v30  ;;  %v2233_v39 = vsel %vm2208_vm8, %v13315_v60, %v2159_v49 }
 0x23d   :  { %1692 = vrot.lane.b32.xlu1 %v13389_v29, %s11788_s14  ;;  %3437 = vmatprep.subr.bf16.mxu1 %v2232_v11  ;;  %v1168_v19 = vsel %vm1148_vm4, %v13671_v14, %v1109_v24 }
 0x23e   :  { %885 = vrot.lane.b32.xlu0 %v13605_v47, %s11785_s7  ;;  %3587 = vmatpush1.bf16.msra.mxu0 %v1168_v19 }
 0x23f   :  { %3438 = vmatpush1.bf16.msra.mxu1 %v2233_v39  ;;  %v1448_v0 = vpop.permute.xlu1 %1447  ;;  %3588 = vmatprep.subr.bf16.mxu0 %v13128_v61 }
 0x240   :  { %v380_v30 = vpop.permute.xlu0 %379 }
 0x241   :  { %1124 = vrot.lane.b32.xlu1 %v13609_v28, %s11786_s8  ;;  %v446_v60 = vsel %vm425_vm1, %v380_v30, %v13575_v56  ;;  %v447_v46 = vsel %vm425_vm1, %v13328_v41, %v380_v30 }
 0x242   :  { %881 = vrot.lane.b32.xlu0 %v13630_v50, %s11785_s7  ;;  %3527 = vmatprep.subr.bf16.mxu1 %v446_v60 }
 0x243   :  { %3454 = vmatmul.mubr.bf16.vlgmr.msra.gmra.mrb[40].mxu1 %v13090_v5  ;;  %3589 = vmatpush1.bf16.msra.mxu0 %v13132_v13  ;;  %v13699_v61 = vpop.permute.xlu1 %1445 }
 0x244   :  { %3528 = vmatpush1.bf16.msra.mxu1 %v447_v46  ;;  %v13701_v48 = vpop.permute.xlu0 %1449  ;;  %v1504_v56 = vsel %vm1485_vm5, %v13699_v61, %v1448_v0  ;;  %10142 = vmatprep.mubr.msk.bf16.mxu1 %vm2831_vm0, %v13098_v20 }
 0x245   :  { %1933 = vrot.lane.b32.xlu1 %v13389_v29, %s11789_s15  ;;  %v1503_v41 = vsel %vm1485_vm5, %v1448_v0, %v13701_v48 }
 0x246   :  { %1126 = vrot.lane.b32.xlu0 %v13605_v47, %s11786_s8  ;;  %3590 = vmatprep.subr.bf16.mxu0 %v1503_v41 }
 0x247   :  { %3591 = vmatpush1.bf16.msra.mxu0 %v1504_v56  ;;  %v1689_v13 = vpop.permute.xlu1 %1688 }
 0x248   :  { %v623_v6 = vpop.permute.xlu0 %622 }
 0x249   :  { %2174 = vrot.lane.b32.xlu1 %v13389_v29, %s11790_s18  ;;  %v687_v51 = vsel %vm666_vm2, %v623_v6, %v13612_v35  ;;  %v688_v17 = vsel %vm666_vm2, %v13356_v33, %v623_v6  ;;  %v13735_v35 = vld [vmem:[%s17727_s0 + $0x158] sm:$0xff]  ;;  %v83_v6 = vld [vmem:[%s17727_s0 + $0x160] sm:$0xff] }
 0x24a   :  { %1122 = vrot.lane.b32.xlu0 %v13630_v50, %s11786_s8  ;;  %3529 = vmatprep.subr.bf16.mxu1 %v687_v51  ;;  %v13754_v24 = vcombine.low %v13730_v2, %v13735_v35 }
 0x24b   :  { %3530 = vmatpush1.bf16.msra.mxu1 %v688_v17  ;;  %v13725_v34 = vpop.permute.xlu1 %1686 }
 0x24c   :  { %v13737_v38 = vpop.permute.xlu0 %1690  ;;  %v1745_v33 = vsel %vm1726_vm6, %v13725_v34, %v1689_v13  ;;  %3464 = vmatmul.mubr.bf16.gmra.mrb[44].mxu1 %v13137_v12 }
 0x24d   :  { %1463 = vrot.lane.b32.xlu1 %v13605_v47, %s11787_s13  ;;  %v1744_v4 = vsel %vm1726_vm6, %v1689_v13, %v13737_v38  ;;  %10145 = vmatprep.mubr.msk.bf16.mxu1 %vm2831_vm0, %v13617_v54 }
 0x24e   :  { %395 = vrot.lane.b32.xlu0 %v13513_v57, %s11783_s29  ;;  %3592 = vmatprep.subr.bf16.mxu0 %v1744_v4 }
 0x24f   :  { %3593 = vmatpush1.bf16.msra.mxu0 %v1745_v33  ;;  %v1930_v9 = vpop.permute.xlu1 %1929 }
 0x250   :  { %v864_v21 = vpop.permute.xlu0 %863 }
 0x251   :  { %1461 = vrot.lane.b32.xlu1 %v13609_v28, %s11787_s13  ;;  %v928_v44 = vsel %vm907_vm3, %v864_v21, %v13647_v7  ;;  %v929_v52 = vsel %vm907_vm3, %v13391_v59, %v864_v21 }
 0x252   :  { %1465 = vrot.lane.b32.xlu0 %v13754_v24, %s11787_s13  ;;  %3531 = vmatprep.subr.bf16.mxu1 %v928_v44 }
 0x253   :  { %3532 = vmatpush1.bf16.msra.mxu1 %v929_v52  ;;  %v13766_v15 = vpop.permute.xlu1 %1927  ;;  %v11791_v52 = vmov 0  }
 0x254   :  { %v13768_v49 = vpop.permute.xlu0 %1931  ;;  %v1986_v11 = vsel %vm1967_vm7, %v13766_v15, %v1930_v9  ;;  %32 = vst [vmem:[#allocation5 + $0x28] sm:$0xff] %v11791_v52  ;;  %27 = vst [vmem:[#allocation5] sm:$0xff] %v11791_v52  ;;  %10934 = vset.pattern.permute.xlu0 %v11791_v52  ;;  %10935 = vset.pattern.permute.xlu1 %v11791_v52 }
 0x255   :  { %1704 = vrot.lane.b32.xlu1 %v13605_v47, %s11788_s14  ;;  %v1985_v59 = vsel %vm1967_vm7, %v1930_v9, %v13768_v49  ;;  %28 = vst [vmem:[#allocation5 + $0x8] sm:$0xff] %v11791_v52  ;;  %29 = vst [vmem:[#allocation5 + $0x10] sm:$0xff] %v11791_v52 }
 0x256   :  { %638 = vrot.lane.b32.xlu0 %v13513_v57, %s11784_s30  ;;  %3594 = vmatprep.subr.bf16.mxu0 %v1985_v59  ;;  %30 = vst [vmem:[#allocation5 + $0x18] sm:$0xff] %v11791_v52  ;;  %31 = vst [vmem:[#allocation5 + $0x20] sm:$0xff] %v11791_v52 }
 0x257   :  { %3595 = vmatpush1.bf16.msra.mxu0 %v1986_v11  ;;  %v2171_v7 = vpop.permute.xlu1 %2170 }
 0x258   :  { %v1105_v39 = vpop.permute.xlu0 %1104 }
 0x259   :  { %1702 = vrot.lane.b32.xlu1 %v13609_v28, %s11788_s14  ;;  %v1169_v19 = vsel %vm1148_vm4, %v1105_v39, %v13671_v14  ;;  %v1170_v0 = vsel %vm1148_vm4, %v13415_v45, %v1105_v39 }
 0x25a   :  { %1706 = vrot.lane.b32.xlu0 %v13754_v24, %s11788_s14  ;;  %3533 = vmatprep.subr.bf16.mxu1 %v1169_v19 }
 0x25b   :  { %3534 = vmatpush1.bf16.msra.mxu1 %v1170_v0  ;;  %v13790_v30 = vpop.permute.xlu1 %2168 }
 0x25c   :  { %v13792_v60 = vpop.permute.xlu0 %2172  ;;  %v2227_v46 = vsel %vm2208_vm8, %v13790_v30, %v2171_v7  ;;  %3535 = vmatprep.subr.bf16.mxu1 %v13153_v43 }
 0x25d   :  { %1945 = vrot.lane.b32.xlu1 %v13605_v47, %s11789_s15  ;;  %v2226_v45 = vsel %vm2208_vm8, %v2171_v7, %v13792_v60 }
 0x25e   :  { %879 = vrot.lane.b32.xlu0 %v13513_v57, %s11785_s7  ;;  %3596 = vmatprep.subr.bf16.mxu0 %v2226_v45 }
 0x25f   :  { %3597 = vmatpush1.bf16.msra.mxu0 %v2227_v46  ;;  %v13805_v14 = vpop.permute.xlu1 %393  ;;  %3536 = vmatpush1.bf16.msra.mxu1 %v13026_v62 }
 0x260   :  { %v392_v56 = vpop.permute.xlu0 %391 }
 0x261   :  { %1943 = vrot.lane.b32.xlu1 %v13609_v28, %s11789_s15  ;;  %v440_v43 = vsel %vm425_vm1, %v392_v56, %v13805_v14 }
 0x262   :  { %1947 = vrot.lane.b32.xlu0 %v13754_v24, %s11789_s15  ;;  %3686 = vmatprep.subr.bf16.mxu0 %v440_v43 }
 0x263   :  { %v635_v41 = vpop.permute.xlu1 %634  ;;  %3613 = vmatmul.mubr.bf16.vlgmr.msra.gmra.mrb[56].mxu0 %v13090_v5  ;;  %v59_v5 = vld [vmem:[%s17727_s0 + $0xa0] sm:$0xff] }
 0x264   :  { %v13816_v13 = vpop.permute.xlu0 %389  ;;  %10148 = vmatprep.mubr.msk.bf16.mxu0 %vm2831_vm0, %v13098_v20  ;;  %v13846_v9 = vcombine.high %v59_v5, %v83_v6  ;;  %v13850_v21 = vcombine.low %v59_v5, %v83_v6 }
 0x265   :  { %2186 = vrot.lane.b32.xlu1 %v13605_v47, %s11790_s18  ;;  %v441_v62 = vsel %vm425_vm1, %v13816_v13, %v392_v56 }
 0x266   :  { %1120 = vrot.lane.b32.xlu0 %v13513_v57, %s11786_s8  ;;  %3687 = vmatpush1.bf16.msra.mxu0 %v441_v62 }
 0x267   :  { %v1444_v20 = vpop.permute.xlu1 %1443 }
 0x268   :  { %v13833_v51 = vpop.permute.xlu0 %636  ;;  %v1505_v17 = vsel %vm1485_vm5, %v1444_v20, %v13699_v61  ;;  %v1506_v33 = vsel %vm1485_vm5, %v13460_v10, %v1444_v20 }
 0x269   :  { %2184 = vrot.lane.b32.xlu1 %v13609_v28, %s11790_s18  ;;  %3537 = vmatprep.subr.bf16.mxu1 %v1505_v17  ;;  %v681_v4 = vsel %vm666_vm2, %v635_v41, %v13833_v51  ;;  %v13958_v17 = vld [vmem:[%s17728_s1 + $0x14] ss:$8 sps:$4 sm:$0xff]  }
 0x26a   :  { %2188 = vrot.lane.b32.xlu0 %v13754_v24, %s11790_s18  ;;  %3688 = vmatprep.subr.bf16.mxu0 %v681_v4 }
 0x26b   :  { %3538 = vmatpush1.bf16.msra.mxu1 %v1506_v33  ;;  %v876_v61 = vpop.permute.xlu1 %875  ;;  %3623 = vmatmul.mubr.bf16.gmra.mrb[60].mxu0 %v13137_v12  ;;  %v13873_v12 = vcombine.high %v13730_v2, %v13735_v35 }
 0x26c   :  { %v13853_v10 = vpop.permute.xlu0 %632  ;;  %10151 = vmatprep.mubr.msk.bf16.mxu0 %vm2831_vm0, %v13617_v54 }
 0x26d   :  { %409 = vrot.lane.b32.xlu1 %v13846_v9, %s11783_s29  ;;  %v682_v44 = vsel %vm666_vm2, %v13853_v10, %v635_v41 }
 0x26e   :  { %407 = vrot.lane.b32.xlu0 %v13850_v21, %s11783_s29  ;;  %3689 = vmatpush1.bf16.msra.mxu0 %v682_v44 }
 0x26f   :  { %v1685_v11 = vpop.permute.xlu1 %1684 }
 0x270   :  { %v13876_v59 = vpop.permute.xlu0 %877  ;;  %v1746_v7 = vsel %vm1726_vm6, %v1685_v11, %v13725_v34  ;;  %v1747_v39 = vsel %vm1726_vm6, %v13496_v16, %v1685_v11 }
 0x271   :  { %650 = vrot.lane.b32.xlu1 %v13850_v21, %s11784_s30  ;;  %3539 = vmatprep.subr.bf16.mxu1 %v1746_v7  ;;  %v922_v2 = vsel %vm907_vm3, %v876_v61, %v13876_v59  ;;  %v13984_v7 = vld [vmem:[%s17727_s0 + $0xa8] sm:$0xff] }
 0x272   :  { %405 = vrot.lane.b32.xlu0 %v13873_v12, %s11783_s29  ;;  %3690 = vmatprep.subr.bf16.mxu0 %v922_v2  ;;  %v13999_v2 = vld [vmem:[%s17728_s1 + $0x10] ss:$8 sps:$4 sm:$0xff]  }
 0x273   :  { %3540 = vmatpush1.bf16.msra.mxu1 %v1747_v39  ;;  %v1117_v35 = vpop.permute.xlu1 %1116 }
 0x274   :  { %v13891_v19 = vpop.permute.xlu0 %873 }
 0x275   :  { %1459 = vrot.lane.b32.xlu1 %v13630_v50, %s11787_s13  ;;  %v923_v16 = vsel %vm907_vm3, %v13891_v19, %v876_v61 }
 0x276   :  { %652 = vrot.lane.b32.xlu0 %v13846_v9, %s11784_s30  ;;  %3691 = vmatpush1.bf16.msra.mxu0 %v923_v16 }
 0x277   :  { %v1926_v34 = vpop.permute.xlu1 %1925 }
 0x278   :  { %v13900_v0 = vpop.permute.xlu0 %1118  ;;  %v1987_v46 = vsel %vm1967_vm7, %v1926_v34, %v13766_v15  ;;  %v1988_v45 = vsel %vm1967_vm7, %v13527_v18, %v1926_v34 }
 0x279   :  { %891 = vrot.lane.b32.xlu1 %v13850_v21, %s11785_s7  ;;  %3541 = vmatprep.subr.bf16.mxu1 %v1987_v46  ;;  %v1163_v56 = vsel %vm1148_vm4, %v1117_v35, %v13900_v0 }
 0x27a   :  { %648 = vrot.lane.b32.xlu0 %v13873_v12, %s11784_s30  ;;  %3692 = vmatprep.subr.bf16.mxu0 %v1163_v56 }
 0x27b   :  { %3542 = vmatpush1.bf16.msra.mxu1 %v1988_v45  ;;  %v2167_v43 = vpop.permute.xlu1 %2166 }
 0x27c   :  { %v13915_v41 = vpop.permute.xlu0 %1114  ;;  %v2228_v18 = vsel %vm2208_vm8, %v2167_v43, %v13790_v30  ;;  %v2229_v15 = vsel %vm2208_vm8, %v13551_v23, %v2167_v43 }
 0x27d   :  { %1700 = vrot.lane.b32.xlu1 %v13630_v50, %s11788_s14  ;;  %3543 = vmatprep.subr.bf16.mxu1 %v2228_v18  ;;  %v1164_v62 = vsel %vm1148_vm4, %v13915_v41, %v1117_v35 }
 0x27e   :  { %893 = vrot.lane.b32.xlu0 %v13846_v9, %s11785_s7  ;;  %3693 = vmatpush1.bf16.msra.mxu0 %v1164_v62 }
 0x27f   :  { %3544 = vmatpush1.bf16.msra.mxu1 %v2229_v15  ;;  %v1456_v5 = vpop.permute.xlu1 %1455  ;;  %3694 = vmatprep.subr.bf16.mxu0 %v13369_v58  ;;  %v13944_v58 = vld [vmem:[%s17728_s1] ss:$8 sps:$4 sm:$0xff]  }
 0x280   :  { %v388_v30 = vpop.permute.xlu0 %387 }
 0x281   :  { %1132 = vrot.lane.b32.xlu1 %v13850_v21, %s11786_s8  ;;  %v442_v23 = vsel %vm425_vm1, %v388_v30, %v13816_v13  ;;  %v443_v6 = vsel %vm425_vm1, %v13564_v37, %v388_v30 }
 0x282   :  { %889 = vrot.lane.b32.xlu0 %v13873_v12, %s11785_s7  ;;  %3633 = vmatprep.subr.bf16.mxu1 %v442_v23 }
 0x283   :  { %3560 = vmatmul.mubr.bf16.vlgmr.msra.gmra.mrb[48].mxu1 %v13944_v58  ;;  %3695 = vmatpush1.bf16.msra.mxu0 %v13373_v36  ;;  %v13948_v20 = vpop.permute.xlu1 %1453 }
 0x284   :  { %3634 = vmatpush1.bf16.msra.mxu1 %v443_v6  ;;  %v13950_v13 = vpop.permute.xlu0 %1457  ;;  %v1500_v37 = vsel %vm1485_vm5, %v13948_v20, %v1456_v5  ;;  %10146 = vmatprep.mubr.msk.bf16.mxu1 %vm2831_vm0, %v13958_v17 }
 0x285   :  { %1941 = vrot.lane.b32.xlu1 %v13630_v50, %s11789_s15  ;;  %v1499_v36 = vsel %vm1485_vm5, %v1456_v5, %v13950_v13 }
 0x286   :  { %1134 = vrot.lane.b32.xlu0 %v13846_v9, %s11786_s8  ;;  %3696 = vmatprep.subr.bf16.mxu0 %v1499_v36 }
 0x287   :  { %3697 = vmatpush1.bf16.msra.mxu0 %v1500_v37  ;;  %v1697_v33 = vpop.permute.xlu1 %1696 }
 0x288   :  { %v631_v4 = vpop.permute.xlu0 %630 }
 0x289   :  { %2182 = vrot.lane.b32.xlu1 %v13630_v50, %s11790_s18  ;;  %v683_v61 = vsel %vm666_vm2, %v631_v4, %v13853_v10  ;;  %v684_v44 = vsel %vm666_vm2, %v13592_v8, %v631_v4  ;;  %v13989_v10 = vld [vmem:[%s17727_s0 + $0x168] sm:$0xff] }
 0x28a   :  { %1130 = vrot.lane.b32.xlu0 %v13873_v12, %s11786_s8  ;;  %3635 = vmatprep.subr.bf16.mxu1 %v683_v61  ;;  %v14013_v16 = vcombine.low %v13984_v7, %v13989_v10  ;;  %v61_v61 = vld [vmem:[%s17727_s0 + $0xb0] sm:$0xff] }
 0x28b   :  { %3636 = vmatpush1.bf16.msra.mxu1 %v684_v44  ;;  %v13979_v11 = vpop.permute.xlu1 %1694  ;;  %v85_v44 = vld [vmem:[%s17727_s0 + $0x170] sm:$0xff] }
 0x28c   :  { %v13991_v39 = vpop.permute.xlu0 %1698  ;;  %v1741_v8 = vsel %vm1726_vm6, %v13979_v11, %v1697_v33  ;;  %3570 = vmatmul.mubr.bf16.gmra.mrb[52].mxu1 %v13999_v2 }
 0x28d   :  { %1471 = vrot.lane.b32.xlu1 %v13846_v9, %s11787_s13  ;;  %v1740_v35 = vsel %vm1726_vm6, %v1697_v33, %v13991_v39  ;;  %10149 = vmatprep.mubr.msk.bf16.mxu1 %vm2831_vm0, %v13617_v54 }
 0x28e   :  { %403 = vrot.lane.b32.xlu0 %v13754_v24, %s11783_s29  ;;  %3698 = vmatprep.subr.bf16.mxu0 %v1740_v35 }
 0x28f   :  { %3699 = vmatpush1.bf16.msra.mxu0 %v1741_v8  ;;  %v1938_v34 = vpop.permute.xlu1 %1937 }
 0x290   :  { %v872_v46 = vpop.permute.xlu0 %871 }
 0x291   :  { %1469 = vrot.lane.b32.xlu1 %v13850_v21, %s11787_s13  ;;  %v924_v45 = vsel %vm907_vm3, %v872_v46, %v13891_v19  ;;  %v925_v56 = vsel %vm907_vm3, %v13632_v22, %v872_v46 }
 0x292   :  { %1473 = vrot.lane.b32.xlu0 %v14013_v16, %s11787_s13  ;;  %3637 = vmatprep.subr.bf16.mxu1 %v924_v45 }
 0x293   :  { %3638 = vmatpush1.bf16.msra.mxu1 %v925_v56  ;;  %v14025_v43 = vpop.permute.xlu1 %1935  ;;  %v14105_v56 = vcombine.high %v61_v61, %v85_v44 }
 0x294   :  { %v14027_v18 = vpop.permute.xlu0 %1939  ;;  %v1982_v15 = vsel %vm1967_vm7, %v14025_v43, %v1938_v34 }
 0x295   :  { %1712 = vrot.lane.b32.xlu1 %v13846_v9, %s11788_s14  ;;  %v1981_v22 = vsel %vm1967_vm7, %v1938_v34, %v14027_v18 }
 0x296   :  { %646 = vrot.lane.b32.xlu0 %v13754_v24, %s11784_s30  ;;  %3700 = vmatprep.subr.bf16.mxu0 %v1981_v22 }
 0x297   :  { %3701 = vmatpush1.bf16.msra.mxu0 %v1982_v15  ;;  %v2179_v19 = vpop.permute.xlu1 %2178  ;;  %v14109_v15 = vcombine.low %v61_v61, %v85_v44 }
 0x298   :  { %v1113_v62 = vpop.permute.xlu0 %1112 }
 0x299   :  { %1710 = vrot.lane.b32.xlu1 %v13850_v21, %s11788_s14  ;;  %v1165_v5 = vsel %vm1148_vm4, %v1113_v62, %v13915_v41  ;;  %v1166_v30 = vsel %vm1148_vm4, %v13656_v27, %v1113_v62 }
 0x29a   :  { %1714 = vrot.lane.b32.xlu0 %v14013_v16, %s11788_s14  ;;  %3639 = vmatprep.subr.bf16.mxu1 %v1165_v5 }
 0x29b   :  { %3640 = vmatpush1.bf16.msra.mxu1 %v1166_v30  ;;  %v14049_v23 = vpop.permute.xlu1 %2176 }
 0x29c   :  { %v14051_v6 = vpop.permute.xlu0 %2180  ;;  %v2223_v37 = vsel %vm2208_vm8, %v14049_v23, %v2179_v19  ;;  %3641 = vmatprep.subr.bf16.mxu1 %v13389_v29 }
 0x29d   :  { %1953 = vrot.lane.b32.xlu1 %v13846_v9, %s11789_s15  ;;  %v2222_v27 = vsel %vm2208_vm8, %v2179_v19, %v14051_v6  ;;  %v14125_v19 = vcombine.high %v13984_v7, %v13989_v10 }
 0x29e   :  { %887 = vrot.lane.b32.xlu0 %v13754_v24, %s11785_s7  ;;  %3702 = vmatprep.subr.bf16.mxu0 %v2222_v27 }
 0x29f   :  { %3703 = vmatpush1.bf16.msra.mxu0 %v2223_v37  ;;  %v14064_v41 = vpop.permute.xlu1 %401  ;;  %3642 = vmatpush1.bf16.msra.mxu1 %v13277_v31 }
 0x2a0   :  { %v400_v36 = vpop.permute.xlu0 %399 }
 0x2a1   :  { %1951 = vrot.lane.b32.xlu1 %v13850_v21, %s11789_s15  ;;  %v436_v29 = vsel %vm425_vm1, %v400_v36, %v14064_v41 }
 0x2a2   :  { %1955 = vrot.lane.b32.xlu0 %v14013_v16, %s11789_s15  ;;  %3792 = vmatprep.subr.bf16.mxu0 %v436_v29 }
 0x2a3   :  { %v643_v33 = vpop.permute.xlu1 %642  ;;  %3719 = vmatmul.mubr.bf16.vlgmr.msra.gmra.mrb[64].mxu0 %v13944_v58 }
 0x2a4   :  { %v14075_v4 = vpop.permute.xlu0 %397  ;;  %10152 = vmatprep.mubr.msk.bf16.mxu0 %vm2831_vm0, %v13958_v17 }
 0x2a5   :  { %2194 = vrot.lane.b32.xlu1 %v13846_v9, %s11790_s18  ;;  %v437_v31 = vsel %vm425_vm1, %v14075_v4, %v400_v36 }
 0x2a6   :  { %1128 = vrot.lane.b32.xlu0 %v13754_v24, %s11786_s8  ;;  %3793 = vmatpush1.bf16.msra.mxu0 %v437_v31 }
 0x2a7   :  { %v1452_v8 = vpop.permute.xlu1 %1451 }
 0x2a8   :  { %v14092_v35 = vpop.permute.xlu0 %644  ;;  %v1501_v34 = vsel %vm1485_vm5, %v1452_v8, %v13948_v20  ;;  %v1502_v46 = vsel %vm1485_vm5, %v13701_v48, %v1452_v8 }
 0x2a9   :  { %2192 = vrot.lane.b32.xlu1 %v13850_v21, %s11790_s18  ;;  %3643 = vmatprep.subr.bf16.mxu1 %v1501_v34  ;;  %v677_v45 = vsel %vm666_vm2, %v643_v33, %v14092_v35 }
 0x2aa   :  { %2196 = vrot.lane.b32.xlu0 %v14013_v16, %s11790_s18  ;;  %3794 = vmatprep.subr.bf16.mxu0 %v677_v45 }
 0x2ab   :  { %3644 = vmatpush1.bf16.msra.mxu1 %v1502_v46  ;;  %v884_v20 = vpop.permute.xlu1 %883  ;;  %3729 = vmatmul.mubr.bf16.gmra.mrb[68].mxu0 %v13999_v2 }
 0x2ac   :  { %v14112_v48 = vpop.permute.xlu0 %640  ;;  %10155 = vmatprep.mubr.msk.bf16.mxu0 %vm2831_vm0, %v13617_v54 }
 0x2ad   :  { %417 = vrot.lane.b32.xlu1 %v14105_v56, %s11783_s29  ;;  %v678_v22 = vsel %vm666_vm2, %v14112_v48, %v643_v33 }
 0x2ae   :  { %415 = vrot.lane.b32.xlu0 %v14109_v15, %s11783_s29  ;;  %3795 = vmatpush1.bf16.msra.mxu0 %v678_v22 }
 0x2af   :  { %v1693_v62 = vpop.permute.xlu1 %1692 }
 0x2b0   :  { %v14127_v5 = vpop.permute.xlu0 %885  ;;  %v1742_v30 = vsel %vm1726_vm6, %v1693_v62, %v13979_v11  ;;  %v1743_v37 = vsel %vm1726_vm6, %v13737_v38, %v1693_v62 }
 0x2b1   :  { %658 = vrot.lane.b32.xlu1 %v14109_v15, %s11784_s30  ;;  %3645 = vmatprep.subr.bf16.mxu1 %v1742_v30  ;;  %v918_v7 = vsel %vm907_vm3, %v884_v20, %v14127_v5 }
 0x2b2   :  { %413 = vrot.lane.b32.xlu0 %v14125_v19, %s11783_s29  ;;  %3796 = vmatprep.subr.bf16.mxu0 %v918_v7 }
 0x2b3   :  { %3646 = vmatpush1.bf16.msra.mxu1 %v1743_v37  ;;  %v1125_v10 = vpop.permute.xlu1 %1124 }
 0x2b4   :  { %v14142_v27 = vpop.permute.xlu0 %881 }
 0x2b5   :  { %1467 = vrot.lane.b32.xlu1 %v13873_v12, %s11787_s13  ;;  %v919_v38 = vsel %vm907_vm3, %v14142_v27, %v884_v20 }
 0x2b6   :  { %660 = vrot.lane.b32.xlu0 %v14105_v56, %s11784_s30  ;;  %3797 = vmatpush1.bf16.msra.mxu0 %v919_v38 }
 0x2b7   :  { %v1934_v11 = vpop.permute.xlu1 %1933 }
 0x2b8   :  { %v14151_v36 = vpop.permute.xlu0 %1126  ;;  %v1983_v29 = vsel %vm1967_vm7, %v1934_v11, %v14025_v43  ;;  %v1984_v33 = vsel %vm1967_vm7, %v13768_v49, %v1934_v11 }
 0x2b9   :  { %899 = vrot.lane.b32.xlu1 %v14109_v15, %s11785_s7  ;;  %3647 = vmatprep.subr.bf16.mxu1 %v1983_v29  ;;  %v1159_v31 = vsel %vm1148_vm4, %v1125_v10, %v14151_v36 }
 0x2ba   :  { %656 = vrot.lane.b32.xlu0 %v14125_v19, %s11784_s30  ;;  %3798 = vmatprep.subr.bf16.mxu0 %v1159_v31 }
 0x2bb   :  { %3648 = vmatpush1.bf16.msra.mxu1 %v1984_v33  ;;  %v2175_v61 = vpop.permute.xlu1 %2174 }
 0x2bc   :  { %v14166_v44 = vpop.permute.xlu0 %1122  ;;  %v2224_v49 = vsel %vm2208_vm8, %v2175_v61, %v14049_v23  ;;  %v2225_v43 = vsel %vm2208_vm8, %v13792_v60, %v2175_v61 }
 0x2bd   :  { %1708 = vrot.lane.b32.xlu1 %v13873_v12, %s11788_s14  ;;  %3649 = vmatprep.subr.bf16.mxu1 %v2224_v49  ;;  %v1160_v8 = vsel %vm1148_vm4, %v14166_v44, %v1125_v10  ;;  %v11743_v10 = vld [vmem:[%s17727_s0 + $0x178] sm:$0xff] }
 0x2be   :  { %901 = vrot.lane.b32.xlu0 %v14105_v56, %s11785_s7  ;;  %3799 = vmatpush1.bf16.msra.mxu0 %v1160_v8 }
 0x2bf   :  { %3650 = vmatpush1.bf16.msra.mxu1 %v2225_v43  ;;  %v1464_v34 = vpop.permute.xlu1 %1463  ;;  %3800 = vmatprep.subr.bf16.mxu0 %v13605_v47 }
 0x2c0   :  { %v396_v23 = vpop.permute.xlu0 %395 }
 0x2c1   :  { %1140 = vrot.lane.b32.xlu1 %v14109_v15, %s11786_s8  ;;  %v438_v60 = vsel %vm425_vm1, %v396_v23, %v14075_v4  ;;  %v439_v46 = vsel %vm425_vm1, %v13805_v14, %v396_v23 }
 0x2c2   :  { %897 = vrot.lane.b32.xlu0 %v14125_v19, %s11785_s7  ;;  %3739 = vmatprep.subr.bf16.mxu1 %v438_v60 }
 0x2c3   :  { %3666 = vmatmul.mubr.bf16.vlgmr.msra.gmra.mrb[56].mxu1 %v13944_v58  ;;  %3801 = vmatpush1.bf16.msra.mxu0 %v13609_v28  ;;  %v14194_v47 = vpop.permute.xlu1 %1461 }
 0x2c4   :  { %3740 = vmatpush1.bf16.msra.mxu1 %v439_v46  ;;  %v14196_v45 = vpop.permute.xlu0 %1465  ;;  %v1496_v4 = vsel %vm1485_vm5, %v14194_v47, %v1464_v34  ;;  %10150 = vmatprep.mubr.msk.bf16.mxu1 %vm2831_vm0, %v13958_v17 }
 0x2c5   :  { %1949 = vrot.lane.b32.xlu1 %v13873_v12, %s11789_s15  ;;  %v1495_v14 = vsel %vm1485_vm5, %v1464_v34, %v14196_v45 }
 0x2c6   :  { %1142 = vrot.lane.b32.xlu0 %v14105_v56, %s11786_s8  ;;  %3802 = vmatprep.subr.bf16.mxu0 %v1495_v14 }
 0x2c7   :  { %3803 = vmatpush1.bf16.msra.mxu0 %v1496_v4  ;;  %v1705_v28 = vpop.permute.xlu1 %1704 }
 0x2c8   :  { %v639_v20 = vpop.permute.xlu0 %638 }
 0x2c9   :  { %2190 = vrot.lane.b32.xlu1 %v13873_v12, %s11790_s18  ;;  %v679_v22 = vsel %vm666_vm2, %v639_v20, %v14112_v48  ;;  %v680_v62 = vsel %vm666_vm2, %v13833_v51, %v639_v20  ;;  %v11742_v48 = vld [vmem:[%s17727_s0 + $0xb8] sm:$0xff] }
 0x2ca   :  { %1138 = vrot.lane.b32.xlu0 %v14125_v19, %s11786_s8  ;;  %3741 = vmatprep.subr.bf16.mxu1 %v679_v22  ;;  %v14243_v38 = vcombine.low %v11742_v48, %v11743_v10 }
 0x2cb   :  { %3742 = vmatpush1.bf16.msra.mxu1 %v680_v62  ;;  %v14220_v30 = vpop.permute.xlu1 %1702 }
 0x2cc   :  { %v14222_v37 = vpop.permute.xlu0 %1706  ;;  %v1737_v7 = vsel %vm1726_vm6, %v14220_v30, %v1705_v28  ;;  %3676 = vmatmul.mubr.bf16.gmra.mrb[60].mxu1 %v13999_v2 }
 0x2cd   :  { %1479 = vrot.lane.b32.xlu1 %v14105_v56, %s11787_s13  ;;  %v1736_v51 = vsel %vm1726_vm6, %v1705_v28, %v14222_v37  ;;  %10153 = vmatprep.mubr.msk.bf16.mxu1 %vm2831_vm0, %v13617_v54 }
 0x2ce   :  { %411 = vrot.lane.b32.xlu0 %v14013_v16, %s11783_s29  ;;  %3804 = vmatprep.subr.bf16.mxu0 %v1736_v51 }
 0x2cf   :  { %3805 = vmatpush1.bf16.msra.mxu0 %v1737_v7  ;;  %v1946_v11 = vpop.permute.xlu1 %1945 }
 0x2d0   :  { %v880_v29 = vpop.permute.xlu0 %879 }
 0x2d1   :  { %1477 = vrot.lane.b32.xlu1 %v14109_v15, %s11787_s13  ;;  %v920_v33 = vsel %vm907_vm3, %v880_v29, %v14142_v27  ;;  %v921_v31 = vsel %vm907_vm3, %v13876_v59, %v880_v29 }
 0x2d2   :  { %1481 = vrot.lane.b32.xlu0 %v14243_v38, %s11787_s13  ;;  %3743 = vmatprep.subr.bf16.mxu1 %v920_v33 }
 0x2d3   :  { %3744 = vmatpush1.bf16.msra.mxu1 %v921_v31  ;;  %v14255_v61 = vpop.permute.xlu1 %1943 }
 0x2d4   :  { %v14257_v49 = vpop.permute.xlu0 %1947  ;;  %v1978_v43 = vsel %vm1967_vm7, %v14255_v61, %v1946_v11 }
 0x2d5   :  { %1720 = vrot.lane.b32.xlu1 %v14105_v56, %s11788_s14  ;;  %v1977_v59 = vsel %vm1967_vm7, %v1946_v11, %v14257_v49 }
 0x2d6   :  { %654 = vrot.lane.b32.xlu0 %v14013_v16, %s11784_s30  ;;  %3806 = vmatprep.subr.bf16.mxu0 %v1977_v59 }
 0x2d7   :  { %3807 = vmatpush1.bf16.msra.mxu0 %v1978_v43  ;;  %v2187_v27 = vpop.permute.xlu1 %2186 }
 0x2d8   :  { %v1121_v8 = vpop.permute.xlu0 %1120 }
 0x2d9   :  { %1718 = vrot.lane.b32.xlu1 %v14109_v15, %s11788_s14  ;;  %v1161_v34 = vsel %vm1148_vm4, %v1121_v8, %v14166_v44  ;;  %v1162_v23 = vsel %vm1148_vm4, %v13900_v0, %v1121_v8 }
 0x2da   :  { %1722 = vrot.lane.b32.xlu0 %v14243_v38, %s11788_s14  ;;  %3745 = vmatprep.subr.bf16.mxu1 %v1161_v34 }
 0x2db   :  { %3746 = vmatpush1.bf16.msra.mxu1 %v1162_v23  ;;  %v14279_v60 = vpop.permute.xlu1 %2184 }
 0x2dc   :  { %v14281_v46 = vpop.permute.xlu0 %2188  ;;  %v2219_v4 = vsel %vm2208_vm8, %v14279_v60, %v2187_v27  ;;  %3747 = vmatprep.subr.bf16.mxu1 %v13630_v50 }
 0x2dd   :  { %1961 = vrot.lane.b32.xlu1 %v14105_v56, %s11789_s15  ;;  %v2218_v0 = vsel %vm2208_vm8, %v2187_v27, %v14281_v46 }
 0x2de   :  { %895 = vrot.lane.b32.xlu0 %v14013_v16, %s11785_s7  ;;  %3808 = vmatprep.subr.bf16.mxu0 %v2218_v0 }
 0x2df   :  { %3809 = vmatpush1.bf16.msra.mxu0 %v2219_v4  ;;  %v14294_v44 = vpop.permute.xlu1 %409  ;;  %3748 = vmatpush1.bf16.msra.mxu1 %v13513_v57 }
 0x2e0   :  { %v408_v14 = vpop.permute.xlu0 %407 }
 0x2e1   :  { %1959 = vrot.lane.b32.xlu1 %v14109_v15, %s11789_s15  ;;  %v432_v50 = vsel %vm425_vm1, %v408_v14, %v14294_v44 }
 0x2e2   :  { %1963 = vrot.lane.b32.xlu0 %v14243_v38, %s11789_s15  ;;  %3898 = vmatprep.subr.bf16.mxu0 %v432_v50 }
 0x2e3   :  { %v651_v28 = vpop.permute.xlu1 %650  ;;  %3825 = vmatmul.mubr.bf16.vlgmr.msra.gmra.mrb[72].mxu0 %v13944_v58 }
 0x2e4   :  { %v14305_v20 = vpop.permute.xlu0 %405  ;;  %10156 = vmatprep.mubr.msk.bf16.mxu0 %vm2831_vm0, %v13958_v17 }
 0x2e5   :  { %2202 = vrot.lane.b32.xlu1 %v14105_v56, %s11790_s18  ;;  %v433_v57 = vsel %vm425_vm1, %v14305_v20, %v408_v14 }
 0x2e6   :  { %1136 = vrot.lane.b32.xlu0 %v14013_v16, %s11786_s8  ;;  %3899 = vmatpush1.bf16.msra.mxu0 %v433_v57 }
 0x2e7   :  { %v1460_v22 = vpop.permute.xlu1 %1459 }
 0x2e8   :  { %v14316_v62 = vpop.permute.xlu0 %652  ;;  %v1497_v7 = vsel %vm1485_vm5, %v1460_v22, %v14194_v47  ;;  %v1498_v51 = vsel %vm1485_vm5, %v13950_v13, %v1460_v22 }
 0x2e9   :  { %2200 = vrot.lane.b32.xlu1 %v14109_v15, %s11790_s18  ;;  %3749 = vmatprep.subr.bf16.mxu1 %v1497_v7  ;;  %v673_v48 = vsel %vm666_vm2, %v651_v28, %v14316_v62 }
 0x2ea   :  { %2204 = vrot.lane.b32.xlu0 %v14243_v38, %s11790_s18  ;;  %3900 = vmatprep.subr.bf16.mxu0 %v673_v48 }
 0x2eb   :  { %3750 = vmatpush1.bf16.msra.mxu1 %v1498_v51  ;;  %v892_v10 = vpop.permute.xlu1 %891  ;;  %3835 = vmatmul.mubr.bf16.gmra.mrb[76].mxu0 %v13999_v2 }
 0x2ec   :  { %v14332_v47 = vpop.permute.xlu0 %648  ;;  %10159 = vmatprep.mubr.msk.bf16.mxu0 %vm2831_vm0, %v13617_v54 }
 0x2ed   :  { %4330 = vrot.lane.b32.xlu1 %v11791_v52, %s11783_s29  ;;  %v674_v13 = vsel %vm666_vm2, %v14332_v47, %v651_v28 }
 0x2ee   :  { %10855 = vrot.lane.b32.xlu0 %v11791_v52, %s11783_s29  ;;  %3901 = vmatpush1.bf16.msra.mxu0 %v674_v13 }
 0x2ef   :  { %v1701_v11 = vpop.permute.xlu1 %1700 }
 0x2f0   :  { %v14343_v29 = vpop.permute.xlu0 %893  ;;  %v1738_v33 = vsel %vm1726_vm6, %v1701_v11, %v14220_v30  ;;  %v1739_v54 = vsel %vm1726_vm6, %v13991_v39, %v1701_v11 }
 0x2f1   :  { %10860 = vrot.lane.b32.xlu1 %v11791_v52, %s11784_s30  ;;  %3751 = vmatprep.subr.bf16.mxu1 %v1738_v33  ;;  %v914_v31 = vsel %vm907_vm3, %v892_v10, %v14343_v29 }
 0x2f2   :  { %1475 = vrot.lane.b32.xlu0 %v14125_v19, %s11787_s13  ;;  %3902 = vmatprep.subr.bf16.mxu0 %v914_v31 }
 0x2f3   :  { %3752 = vmatpush1.bf16.msra.mxu1 %v1739_v54  ;;  %v1133_v43 = vpop.permute.xlu1 %1132 }
 0x2f4   :  { %v14358_v59 = vpop.permute.xlu0 %889 }
 0x2f5   :  { %1716 = vrot.lane.b32.xlu1 %v14125_v19, %s11788_s14  ;;  %v915_v39 = vsel %vm907_vm3, %v14358_v59, %v892_v10 }
 0x2f6   :  { %4360 = vrot.lane.b32.xlu0 %v11791_v52, %s11784_s30  ;;  %3903 = vmatpush1.bf16.msra.mxu0 %v915_v39 }
 0x2f7   :  { %v1942_v30 = vpop.permute.xlu1 %1941 }
 0x2f8   :  { %v14367_v27 = vpop.permute.xlu0 %1134  ;;  %v1979_v8 = vsel %vm1967_vm7, %v1942_v30, %v14255_v61  ;;  %v1980_v34 = vsel %vm1967_vm7, %v14027_v18, %v1942_v30 }
 0x2f9   :  { %4390 = vrot.lane.b32.xlu1 %v11791_v52, %s11785_s7  ;;  %3753 = vmatprep.subr.bf16.mxu1 %v1979_v8  ;;  %v1155_v23 = vsel %vm1148_vm4, %v1133_v43, %v14367_v27 }
 0x2fa   :  { %10865 = vrot.lane.b32.xlu0 %v11791_v52, %s11785_s7  ;;  %3904 = vmatprep.subr.bf16.mxu0 %v1155_v23 }
 0x2fb   :  { %3754 = vmatpush1.bf16.msra.mxu1 %v1980_v34  ;;  %v2183_v4 = vpop.permute.xlu1 %2182 }
 0x2fc   :  { %v14382_v0 = vpop.permute.xlu0 %1130  ;;  %v2220_v18 = vsel %vm2208_vm8, %v2183_v4, %v14279_v60  ;;  %v2221_v61 = vsel %vm2208_vm8, %v14051_v6, %v2183_v4 }
 0x2fd   :  { %10870 = vrot.lane.b32.xlu1 %v11791_v52, %s11786_s8  ;;  %3755 = vmatprep.subr.bf16.mxu1 %v2220_v18  ;;  %v1156_v14 = vsel %vm1148_vm4, %v14382_v0, %v1133_v43 }
 0x2fe   :  { %1957 = vrot.lane.b32.xlu0 %v14125_v19, %s11789_s15  ;;  %3905 = vmatpush1.bf16.msra.mxu0 %v1156_v14 }
 0x2ff   :  { %3756 = vmatpush1.bf16.msra.mxu1 %v2221_v61  ;;  %v1472_v50 = vpop.permute.xlu1 %1471  ;;  %3906 = vmatprep.subr.bf16.mxu0 %v13846_v9 }
 0x300   :  { %v404_v60 = vpop.permute.xlu0 %403 }
 0x301   :  { %2198 = vrot.lane.b32.xlu1 %v14125_v19, %s11790_s18  ;;  %v434_v6 = vsel %vm425_vm1, %v404_v60, %v14305_v20  ;;  %v435_v28 = vsel %vm425_vm1, %v14064_v41, %v404_v60 }
 0x302   :  { %4420 = vrot.lane.b32.xlu0 %v11791_v52, %s11786_s8  ;;  %3845 = vmatprep.subr.bf16.mxu1 %v434_v6 }
 0x303   :  { %3772 = vmatmul.mubr.bf16.vlgmr.msra.gmra.mrb[64].mxu1 %v13944_v58  ;;  %3907 = vmatpush1.bf16.msra.mxu0 %v13850_v21  ;;  %v14410_v9 = vpop.permute.xlu1 %1469 }
 0x304   :  { %3846 = vmatpush1.bf16.msra.mxu1 %v435_v28  ;;  %v14412_v57 = vpop.permute.xlu0 %1473  ;;  %v1492_v20 = vsel %vm1485_vm5, %v14410_v9, %v1472_v50  ;;  %10154 = vmatprep.mubr.msk.bf16.mxu1 %vm2831_vm0, %v13958_v17 }
 0x305   :  { %10875 = vrot.lane.b32.xlu1 %v11791_v52, %s11787_s13  ;;  %v1491_v41 = vsel %vm1485_vm5, %v1472_v50, %v14412_v57 }
 0x306   :  { %419 = vrot.lane.b32.xlu0 %v14243_v38, %s11783_s29  ;;  %3908 = vmatprep.subr.bf16.mxu0 %v1491_v41 }
 0x307   :  { %3909 = vmatpush1.bf16.msra.mxu0 %v1492_v20  ;;  %v1713_v21 = vpop.permute.xlu1 %1712 }
 0x308   :  { %v647_v22 = vpop.permute.xlu0 %646 }
 0x309   :  { %662 = vrot.lane.b32.xlu1 %v14243_v38, %s11784_s30  ;;  %v675_v7 = vsel %vm666_vm2, %v647_v22, %v14332_v47  ;;  %v676_v51 = vsel %vm666_vm2, %v14092_v35, %v647_v22  ;;  %v14452_v47 = vld [vmem:[%s17728_s1 + $0x4] ss:$8 sps:$4 sm:$0xff]  }
 0x30a   :  { %4446 = vrot.lane.b32.xlu0 %v11791_v52, %s11787_s13  ;;  %3847 = vmatprep.subr.bf16.mxu1 %v675_v7 }
 0x30b   :  { %3848 = vmatpush1.bf16.msra.mxu1 %v676_v51  ;;  %v14436_v48 = vpop.permute.xlu1 %1710 }
 0x30c   :  { %v14438_v10 = vpop.permute.xlu0 %1714  ;;  %v1733_v13 = vsel %vm1726_vm6, %v14436_v48, %v1713_v21  ;;  %3782 = vmatmul.mubr.bf16.gmra.mrb[68].mxu1 %v13999_v2 }
 0x30d   :  { %4476 = vrot.lane.b32.xlu1 %v11791_v52, %s11788_s14  ;;  %v1732_v35 = vsel %vm1726_vm6, %v1713_v21, %v14438_v10  ;;  %10157 = vmatprep.mubr.msk.bf16.mxu1 %vm2831_vm0, %v14452_v47 }
 0x30e   :  { %10880 = vrot.lane.b32.xlu0 %v11791_v52, %s11788_s14  ;;  %3910 = vmatprep.subr.bf16.mxu0 %v1732_v35 }
 0x30f   :  { %3911 = vmatpush1.bf16.msra.mxu0 %v1733_v13  ;;  %v1954_v11 = vpop.permute.xlu1 %1953 }
 0x310   :  { %v888_v33 = vpop.permute.xlu0 %887 }
 0x311   :  { %10885 = vrot.lane.b32.xlu1 %v11791_v52, %s11789_s15  ;;  %v916_v54 = vsel %vm907_vm3, %v888_v33, %v14358_v59  ;;  %v917_v31 = vsel %vm907_vm3, %v14127_v5, %v888_v33 }
 0x312   :  { %903 = vrot.lane.b32.xlu0 %v14243_v38, %s11785_s7  ;;  %3849 = vmatprep.subr.bf16.mxu1 %v916_v54 }
 0x313   :  { %3850 = vmatpush1.bf16.msra.mxu1 %v917_v31  ;;  %v14468_v43 = vpop.permute.xlu1 %1951 }
 0x314   :  { %v14470_v39 = vpop.permute.xlu0 %1955  ;;  %v1974_v30 = vsel %vm1967_vm7, %v14468_v43, %v1954_v11 }
 0x315   :  { %1144 = vrot.lane.b32.xlu1 %v14243_v38, %s11786_s8  ;;  %v1973_v5 = vsel %vm1967_vm7, %v1954_v11, %v14470_v39 }
 0x316   :  { %4506 = vrot.lane.b32.xlu0 %v11791_v52, %s11789_s15  ;;  %3912 = vmatprep.subr.bf16.mxu0 %v1973_v5 }
 0x317   :  { %3913 = vmatpush1.bf16.msra.mxu0 %v1974_v30  ;;  %v2195_v59 = vpop.permute.xlu1 %2194 }
 0x318   :  { %v1129_v8 = vpop.permute.xlu0 %1128 }
 0x319   :  { %4536 = vrot.lane.b32.xlu1 %v11791_v52, %s11790_s18  ;;  %v1157_v34 = vsel %vm1148_vm4, %v1129_v8, %v14382_v0  ;;  %v1158_v23 = vsel %vm1148_vm4, %v14151_v36, %v1129_v8 }
 0x31a   :  { %10890 = vrot.lane.b32.xlu0 %v11791_v52, %s11790_s18  ;;  %3851 = vmatprep.subr.bf16.mxu1 %v1157_v34 }
 0x31b   :  { %3852 = vmatpush1.bf16.msra.mxu1 %v1158_v23  ;;  %v14492_v4 = vpop.permute.xlu1 %2192 }
 0x31c   :  { %v14494_v18 = vpop.permute.xlu0 %2196  ;;  %v2215_v61 = vsel %vm2208_vm8, %v14492_v4, %v2195_v59  ;;  %3853 = vmatprep.subr.bf16.mxu1 %v13873_v12 }
 0x31d   :  { %1483 = vrot.lane.b32.xlu1 %v11836_v3, %s11787_s13  ;;  %v2214_v36 = vsel %vm2208_vm8, %v2195_v59, %v14494_v18 }
 0x31e   :  { %10895 = vrot.lane.b32.xlu0 %v11791_v52, %s11783_s29  ;;  %3914 = vmatprep.subr.bf16.mxu0 %v2214_v36 }
 0x31f   :  { %3915 = vmatpush1.bf16.msra.mxu0 %v2215_v61  ;;  %v14507_v0 = vpop.permute.xlu1 %417  ;;  %3854 = vmatpush1.bf16.msra.mxu1 %v13754_v24 }
 0x320   :  { %v416_v14 = vpop.permute.xlu0 %415 }
 0x321   :  { %1724 = vrot.lane.b32.xlu1 %v11836_v3, %s11788_s14  ;;  %v428_v12 = vsel %vm425_vm1, %v416_v14, %v14507_v0 }
 0x322   :  { %10900 = vrot.lane.b32.xlu0 %v11791_v52, %s11784_s30  ;;  %4004 = vmatprep.subr.bf16.mxu0 %v428_v12 }
 0x323   :  { %v659_v50 = vpop.permute.xlu1 %658  ;;  %3931 = vmatmul.mubr.bf16.vlgmr.msra.gmra.mrb[80].mxu0 %v13944_v58 }
 0x324   :  { %v14518_v60 = vpop.permute.xlu0 %413  ;;  %10160 = vmatprep.mubr.msk.bf16.mxu0 %vm2831_vm0, %v13958_v17 }
 0x325   :  { %1965 = vrot.lane.b32.xlu1 %v11836_v3, %s11789_s15  ;;  %v429_v24 = vsel %vm425_vm1, %v14518_v60, %v416_v14 }
 0x326   :  { %10905 = vrot.lane.b32.xlu0 %v11791_v52, %s11785_s7  ;;  %4005 = vmatpush1.bf16.msra.mxu0 %v429_v24 }
 0x327   :  { %v1468_v6 = vpop.permute.xlu1 %1467 }
 0x328   :  { %v14529_v28 = vpop.permute.xlu0 %660  ;;  %v1493_v20 = vsel %vm1485_vm5, %v1468_v6, %v14410_v9  ;;  %v1494_v41 = vsel %vm1485_vm5, %v14196_v45, %v1468_v6 }
 0x329   :  { %2206 = vrot.lane.b32.xlu1 %v11836_v3, %s11790_s18  ;;  %3855 = vmatprep.subr.bf16.mxu1 %v1493_v20  ;;  %v669_v21 = vsel %vm666_vm2, %v659_v50, %v14529_v28 }
 0x32a   :  { %10910 = vrot.lane.b32.xlu0 %v11791_v52, %s11786_s8  ;;  %4006 = vmatprep.subr.bf16.mxu0 %v669_v21  ;;  %v2789_v21 = vld [vmem:[%s17730_s3] sm:$0xff] }
 0x32b   :  { %3856 = vmatpush1.bf16.msra.mxu1 %v1494_v41  ;;  %v900_v22 = vpop.permute.xlu1 %899  ;;  %3941 = vmatmul.mubr.bf16.gmra.mrb[84].mxu0 %v13999_v2 }
 0x32c   :  { %v14545_v9 = vpop.permute.xlu0 %656  ;;  %10163 = vmatprep.mubr.msk.bf16.mxu0 %vm2831_vm0, %v14452_v47 }
 0x32d   :  { %10915 = vrot.lane.b32.xlu1 %v11791_v52, %s11787_s13  ;;  %v670_v45 = vsel %vm666_vm2, %v14545_v9, %v659_v50 }
 0x32e   :  { %4324 = vrot.lane.b32.xlu0 %v11791_v52, %s11783_s29  ;;  %4007 = vmatpush1.bf16.msra.mxu0 %v670_v45 }
 0x32f   :  { %v1709_v7 = vpop.permute.xlu1 %1708 }
 0x330   :  { %v14556_v51 = vpop.permute.xlu0 %901  ;;  %v1734_v13 = vsel %vm1726_vm6, %v1709_v7, %v14436_v48  ;;  %v1735_v35 = vsel %vm1726_vm6, %v14222_v37, %v1709_v7 }
 0x331   :  { %10920 = vrot.lane.b32.xlu1 %v11791_v52, %s11788_s14  ;;  %3857 = vmatprep.subr.bf16.mxu1 %v1734_v13  ;;  %v910_v11 = vsel %vm907_vm3, %v900_v22, %v14556_v51  ;;  %v2791_v13 = vld [vmem:[%s17730_s3 + $0x10] sm:$0xff] }
 0x332   :  { %4354 = vrot.lane.b32.xlu0 %v11791_v52, %s11784_s30  ;;  %4008 = vmatprep.subr.bf16.mxu0 %v910_v11 }
 0x333   :  { %3858 = vmatpush1.bf16.msra.mxu1 %v1735_v35  ;;  %v1141_v33 = vpop.permute.xlu1 %1140  ;;  %v2792_v35 = vld [vmem:[%s17730_s3 + $0x18] sm:$0xff] }
 0x334   :  { %v14571_v54 = vpop.permute.xlu0 %897 }
 0x335   :  { %10925 = vrot.lane.b32.xlu1 %v11791_v52, %s11789_s15  ;;  %v911_v37 = vsel %vm907_vm3, %v14571_v54, %v900_v22  ;;  %v2790_v22 = vld [vmem:[%s17730_s3 + $0x8] sm:$0xff] }
 0x336   :  { %4384 = vrot.lane.b32.xlu0 %v11791_v52, %s11785_s7  ;;  %4009 = vmatpush1.bf16.msra.mxu0 %v911_v37 }
 0x337   :  { %v1950_v48 = vpop.permute.xlu1 %1949 }
 0x338   :  { %v14580_v31 = vpop.permute.xlu0 %1142  ;;  %v1975_v30 = vsel %vm1967_vm7, %v1950_v48, %v14468_v43  ;;  %v1976_v5 = vsel %vm1967_vm7, %v14257_v49, %v1950_v48 }
 0x339   :  { %10930 = vrot.lane.b32.xlu1 %v11791_v52, %s11790_s18  ;;  %3859 = vmatprep.subr.bf16.mxu1 %v1975_v30  ;;  %v1151_v59 = vsel %vm1148_vm4, %v1141_v33, %v14580_v31 }
 0x33a   :  { %4414 = vrot.lane.b32.xlu0 %v11791_v52, %s11786_s8  ;;  %4010 = vmatprep.subr.bf16.mxu0 %v1151_v59 }
 0x33b   :  { %3860 = vmatpush1.bf16.msra.mxu1 %v1976_v5  ;;  %v2191_v8 = vpop.permute.xlu1 %2190 }
 0x33c   :  { %v14595_v34 = vpop.permute.xlu0 %1138  ;;  %v2216_v49 = vsel %vm2208_vm8, %v2191_v8, %v14492_v4  ;;  %v2217_v43 = vsel %vm2208_vm8, %v14281_v46, %v2191_v8 }
 0x33d   :  { %4482 = vrot.lane.b32.xlu1 %v11791_v52, %s11788_s14  ;;  %3861 = vmatprep.subr.bf16.mxu1 %v2216_v49  ;;  %v1152_v23 = vsel %vm1148_vm4, %v14595_v34, %v1141_v33 }
 0x33e   :  { %4452 = vrot.lane.b32.xlu0 %v11791_v52, %s11787_s13  ;;  %4011 = vmatpush1.bf16.msra.mxu0 %v1152_v23 }
 0x33f   :  { %3862 = vmatpush1.bf16.msra.mxu1 %v2217_v43  ;;  %v1480_v61 = vpop.permute.xlu1 %1479  ;;  %4012 = vmatprep.subr.bf16.mxu0 %v14105_v56 }
 0x340   :  { %v412_v4 = vpop.permute.xlu0 %411 }
 0x341   :  { %4542 = vrot.lane.b32.xlu1 %v11791_v52, %s11790_s18  ;;  %v430_v46 = vsel %vm425_vm1, %v412_v4, %v14518_v60  ;;  %v431_v36 = vsel %vm425_vm1, %v14294_v44, %v412_v4 }
 0x342   :  { %4512 = vrot.lane.b32.xlu0 %v11791_v52, %s11789_s15  ;;  %3951 = vmatprep.subr.bf16.mxu1 %v430_v46 }
 0x343   :  { %3878 = vmatmul.mubr.bf16.vlgmr.msra.gmra.mrb[72].mxu1 %v13944_v58  ;;  %4013 = vmatpush1.bf16.msra.mxu0 %v14109_v15  ;;  %v14623_v56 = vpop.permute.xlu1 %1477 }
 0x344   :  { %3952 = vmatpush1.bf16.msra.mxu1 %v431_v36  ;;  %v14625_v14 = vpop.permute.xlu0 %1481  ;;  %v1488_v12 = vsel %vm1485_vm5, %v14623_v56, %v1480_v61  ;;  %10158 = vmatprep.mubr.msk.bf16.mxu1 %vm2831_vm0, %v13958_v17 }
 0x345   :  { %v1487_v52 = vsel %vm1485_vm5, %v1480_v61, %v14625_v14  ;;  %2800 = vperm.xlu1 %10935, %v2790_v22  }
 0x346   :  { %4014 = vmatprep.subr.bf16.mxu0 %v1487_v52  ;;  %2795 = vperm.xlu0 %10934, %v2789_v21  }
 0x347   :  { %4015 = vmatpush1.bf16.msra.mxu0 %v1488_v12  ;;  %v1721_v44 = vpop.permute.xlu1 %1720 }
 0x348   :  { %v655_v15 = vpop.permute.xlu0 %654 }
 0x349   :  { %v671_v50 = vsel %vm666_vm2, %v655_v15, %v14545_v9  ;;  %v672_v60 = vsel %vm666_vm2, %v14316_v62, %v655_v15  ;;  %2805 = vperm.xlu1 %10935, %v2791_v13  }
 0x34a   :  { %3953 = vmatprep.subr.bf16.mxu1 %v671_v50  ;;  %2810 = vperm.xlu0 %10934, %v2792_v35  }
 0x34b   :  { %3954 = vmatpush1.bf16.msra.mxu1 %v672_v60  ;;  %v14641_v24 = vpop.permute.xlu1 %1718 }
 0x34c   :  { %v14643_v6 = vpop.permute.xlu0 %1722  ;;  %v1729_v20 = vsel %vm1726_vm6, %v14641_v24, %v1721_v44  ;;  %3888 = vmatmul.mubr.bf16.gmra.mrb[76].mxu1 %v13999_v2 }
 0x34d   :  { %v1728_v41 = vsel %vm1726_vm6, %v1721_v44, %v14643_v6  ;;  %10161 = vmatprep.mubr.msk.bf16.mxu1 %vm2831_vm0, %v14452_v47 }
 0x34e   :  { %4016 = vmatprep.subr.bf16.mxu0 %v1728_v41 }
 0x34f   :  { %4017 = vmatpush1.bf16.msra.mxu0 %v1729_v20  ;;  %v1962_v62 = vpop.permute.xlu1 %1961 }
 0x350   :  { %v896_v9 = vpop.permute.xlu0 %895 }
 0x351   :  { %v912_v45 = vsel %vm907_vm3, %v896_v9, %v14571_v54  ;;  %v913_v7 = vsel %vm907_vm3, %v14343_v29, %v896_v9 }
 0x352   :  { %3955 = vmatprep.subr.bf16.mxu1 %v912_v45 }
 0x353   :  { %3956 = vmatpush1.bf16.msra.mxu1 %v913_v7  ;;  %v14672_v11 = vpop.permute.xlu1 %1959 }
 0x354   :  { %v14674_v33 = vpop.permute.xlu0 %1963  ;;  %v1970_v54 = vsel %vm1967_vm7, %v14672_v11, %v1962_v62 }
 0x355   :  { %v1969_v29 = vsel %vm1967_vm7, %v1962_v62, %v14674_v33 }
 0x356   :  { %4018 = vmatprep.subr.bf16.mxu0 %v1969_v29 }
 0x357   :  { %4019 = vmatpush1.bf16.msra.mxu0 %v1970_v54  ;;  %v2203_v37 = vpop.permute.xlu1 %2202 }
 0x358   :  { %v1137_v48 = vpop.permute.xlu0 %1136 }
 0x359   :  { %v1153_v30 = vsel %vm1148_vm4, %v1137_v48, %v14595_v34  ;;  %v1154_v5 = vsel %vm1148_vm4, %v14367_v27, %v1137_v48 }
 0x35a   :  { %3957 = vmatprep.subr.bf16.mxu1 %v1153_v30  ;;  %v14785_v30 = vld [vmem:[#allocation5 + $0x28] sm:$0xff] }
 0x35b   :  { %3958 = vmatpush1.bf16.msra.mxu1 %v1154_v5  ;;  %v2201_v59 = vpop.permute.xlu1 %2200 }
 0x35c   :  { %v14688_v8 = vpop.permute.xlu0 %2204  ;;  %v2211_v49 = vsel %vm2208_vm8, %v2201_v59, %v2203_v37  ;;  %3959 = vmatprep.subr.bf16.mxu1 %v14125_v19 }
 0x35d   :  { %v2210_v43 = vsel %vm2208_vm8, %v2203_v37, %v14688_v8 }
 0x35e   :  { %4020 = vmatprep.subr.bf16.mxu0 %v2210_v43 }
 0x35f   :  { %4021 = vmatpush1.bf16.msra.mxu0 %v2211_v49  ;;  %v14696_v34 = vpop.permute.xlu1 %4330  ;;  %3960 = vmatpush1.bf16.msra.mxu1 %v14013_v16 }
 0x360   :  { %v14699_v27 = vpop.permute.xlu0 %10855 }
 0x361   :  { %v10858_v23 = vunpack.i.h.bf16 %v14699_v27  ;;  %v10857_v61 = vunpack.i.l.bf16 %v14699_v27 }
 0x362   :  { %4037 = vmatmul.mubr.bf16.vlgmr.msra.gmra.mrb[88].mxu0 %v13944_v58 }
 0x363   :  { %v14704_v4 = vpop.permute.xlu1 %10860  ;;  %v4336_v19 = vsel %vm425_vm1, %v10857_v61, %v10858_v23  ;;  %v4337_v46 = vsel %vm425_vm1, %v14696_v34, %v10857_v61  ;;  %10164 = vmatprep.mubr.msk.bf16.mxu0 %vm2831_vm0, %v13958_v17 }
 0x364   :  { %v10863_v16 = vunpack.i.h.bf16 %v14704_v4  ;;  %v10862_v36 = vunpack.i.l.bf16 %v14704_v4  ;;  %v1476_v12 = vpop.permute.xlu0 %1475  ;;  %4672 = vmatprep.subr.bf16.mxu0 %v4336_v19  ;;  %v14804_v19 = vld [vmem:[%s17728_s1] ss:$8 sps:$4 sm:$0xff]  }
 0x365   :  { %4673 = vmatpush1.bf16.msra.mxu0 %v4337_v46  ;;  %v1489_v58 = vsel %vm1485_vm5, %v1476_v12, %v14623_v56  ;;  %v1490_v52 = vsel %vm1485_vm5, %v14412_v57, %v1476_v12  ;;  %v14738_v57 = vld [vmem:[%s17729_s2 + $0x4] ss:$8 sps:$4 sm:$0xff]  }
 0x366   :  { %3961 = vmatprep.subr.bf16.mxu1 %v1489_v58  ;;  %v4366_v17 = vsel %vm666_vm2, %v10862_v36, %v10863_v16 }
 0x367   :  { %3962 = vmatpush1.bf16.msra.mxu1 %v1490_v52  ;;  %v1717_v44 = vpop.permute.xlu1 %1716  ;;  %4674 = vmatprep.subr.bf16.mxu0 %v4366_v17 }
 0x368   :  { %v14727_v15 = vpop.permute.xlu0 %4360  ;;  %v1730_v50 = vsel %vm1726_vm6, %v1717_v44, %v14641_v24  ;;  %v1731_v56 = vsel %vm1726_vm6, %v14438_v10, %v1717_v44 }
 0x369   :  { %3963 = vmatprep.subr.bf16.mxu1 %v1730_v50  ;;  %v4367_v60 = vsel %vm666_vm2, %v14727_v15, %v10862_v36  ;;  %v14815_v36 = vld [vmem:[%s17728_s1 + $0x14] ss:$8 sps:$4 sm:$0xff]  }
 0x36a   :  { %4675 = vmatpush1.bf16.msra.mxu0 %v4367_v60  ;;  %v14843_v60 = vld [vmem:[%s17728_s1 + $0x10] ss:$8 sps:$4 sm:$0xff]  }
 0x36b   :  { %3964 = vmatpush1.bf16.msra.mxu1 %v1731_v56  ;;  %v14743_v20 = vpop.permute.xlu1 %4390  ;;  %4047 = vmatmul.mubr.bf16.gmra.mrb[92].mxu0 %v13999_v2 }
 0x36c   :  { %v14746_v24 = vpop.permute.xlu0 %10865  ;;  %10171 = vmatprep.mubr.msk.bf16.mxu0 %vm2831_vm0, %v14738_v57 }
 0x36d   :  { %v10868_v10 = vunpack.i.h.bf16 %v14746_v24  ;;  %v10867_v41 = vunpack.i.l.bf16 %v14746_v24 }
 0x36f   :  { %v14752_v62 = vpop.permute.xlu1 %10870  ;;  %v4396_v21 = vsel %vm907_vm3, %v10867_v41, %v10868_v10  ;;  %v4397_v2 = vsel %vm907_vm3, %v14743_v20, %v10867_v41 }
 0x370   :  { %v10873_v22 = vunpack.i.h.bf16 %v14752_v62  ;;  %v10872_v9 = vunpack.i.l.bf16 %v14752_v62  ;;  %v1958_v45 = vpop.permute.xlu0 %1957  ;;  %4676 = vmatprep.subr.bf16.mxu0 %v4396_v21 }
 0x371   :  { %4677 = vmatpush1.bf16.msra.mxu0 %v4397_v2  ;;  %v1971_v7 = vsel %vm1967_vm7, %v1958_v45, %v14672_v11  ;;  %v1972_v13 = vsel %vm1967_vm7, %v14470_v39, %v1958_v45 }
 0x372   :  { %3965 = vmatprep.subr.bf16.mxu1 %v1971_v7  ;;  %v4426_v35 = vsel %vm1148_vm4, %v10872_v9, %v10873_v22 }
 0x373   :  { %3966 = vmatpush1.bf16.msra.mxu1 %v1972_v13  ;;  %v2199_v54 = vpop.permute.xlu1 %2198  ;;  %4678 = vmatprep.subr.bf16.mxu0 %v4426_v35 }
 0x374   :  { %v14773_v29 = vpop.permute.xlu0 %4420  ;;  %v2212_v37 = vsel %vm2208_vm8, %v2199_v54, %v2201_v59  ;;  %v2213_v11 = vsel %vm2208_vm8, %v14494_v18, %v2199_v54 }
 0x375   :  { %3967 = vmatprep.subr.bf16.mxu1 %v2212_v37  ;;  %v4427_v39 = vsel %vm1148_vm4, %v14773_v29, %v10872_v9 }
 0x376   :  { %4679 = vmatpush1.bf16.msra.mxu0 %v4427_v39 }
 0x377   :  { %3968 = vmatpush1.bf16.msra.mxu1 %v2213_v11  ;;  %v14783_v48 = vpop.permute.xlu1 %10875  ;;  %4680 = vmatprep.subr.bf16.mxu0 %v14785_v30 }
 0x378   :  { %v10878_v5 = vunpack.i.h.bf16 %v14783_v48  ;;  %v10877_v59 = vunpack.i.l.bf16 %v14783_v48  ;;  %v420_v49 = vpop.permute.xlu0 %419 }
 0x379   :  { %v426_v18 = vsel %vm425_vm1, %v420_v49, %v12010_v25  ;;  %v427_v43 = vsel %vm425_vm1, %v14507_v0, %v420_v49 }
 0x37a   :  { %4057 = vmatprep.subr.bf16.mxu1 %v426_v18  ;;  %4681 = vmatpush1.bf16.msra.mxu0 %v14785_v30  ;;  %v4461_v61 = vsel %vm1485_vm5, %v10877_v59, %v10878_v5  ;;  %v14895_v18 = vld [vmem:[%s17729_s2] ss:$8 sps:$4 sm:$0xff]  }
 0x37b   :  { %3984 = vmatmul.mubr.bf16.vlgmr.msra.gmra.mrb[80].mxu1 %v14804_v19  ;;  %v663_v25 = vpop.permute.xlu1 %662  ;;  %4682 = vmatprep.subr.bf16.mxu0 %v4461_v61 }
 0x37c   :  { %4058 = vmatpush1.bf16.msra.mxu1 %v427_v43  ;;  %v14807_v46 = vpop.permute.xlu0 %4446  ;;  %v667_v0 = vsel %vm666_vm2, %v663_v25, %v12032_v32  ;;  %10162 = vmatprep.mubr.msk.bf16.mxu1 %vm2831_vm0, %v14815_v36  ;;  %v668_v58 = vsel %vm666_vm2, %v14529_v28, %v663_v25  ;;  %v14900_v25 = vld [vmem:[%s17729_s2 + $0x14] ss:$8 sps:$4 sm:$0xff]  }
 0x37d   :  { %4059 = vmatprep.subr.bf16.mxu1 %v667_v0  ;;  %v4462_v12 = vsel %vm1485_vm5, %v14807_v46, %v10877_v59 }
 0x37e   :  { %4683 = vmatpush1.bf16.msra.mxu0 %v4462_v12 }
 0x37f   :  { %v14825_v52 = vpop.permute.xlu1 %4476 }
 0x380   :  { %4060 = vmatpush1.bf16.msra.mxu1 %v668_v58  ;;  %v14827_v32 = vpop.permute.xlu0 %10880 }
 0x381   :  { %v10883_v17 = vunpack.i.h.bf16 %v14827_v32  ;;  %v10882_v44 = vunpack.i.l.bf16 %v14827_v32 }
 0x383   :  { %v14831_v50 = vpop.permute.xlu1 %10885  ;;  %v4491_v56 = vsel %vm1726_vm6, %v10882_v44, %v10883_v17  ;;  %v4492_v28 = vsel %vm1726_vm6, %v14825_v52, %v10882_v44  ;;  %3994 = vmatmul.mubr.bf16.gmra.mrb[84].mxu1 %v14843_v60 }
 0x384   :  { %v10888_v41 = vunpack.i.h.bf16 %v14831_v50  ;;  %v10887_v21 = vunpack.i.l.bf16 %v14831_v50  ;;  %v904_v2 = vpop.permute.xlu0 %903  ;;  %4684 = vmatprep.subr.bf16.mxu0 %v4491_v56  ;;  %10165 = vmatprep.mubr.msk.bf16.mxu1 %vm2831_vm0, %v14452_v47 }
 0x385   :  { %4685 = vmatpush1.bf16.msra.mxu0 %v4492_v28  ;;  %v908_v9 = vsel %vm907_vm3, %v904_v2, %v12056_v40  ;;  %v909_v45 = vsel %vm907_vm3, %v14556_v51, %v904_v2 }
 0x386   :  { %4061 = vmatprep.subr.bf16.mxu1 %v908_v9  ;;  %v4521_v7 = vsel %vm1967_vm7, %v10887_v21, %v10888_v41 }
 0x387   :  { %4062 = vmatpush1.bf16.msra.mxu1 %v909_v45  ;;  %v1145_v13 = vpop.permute.xlu1 %1144  ;;  %4686 = vmatprep.subr.bf16.mxu0 %v4521_v7  ;;  %v14930_v45 = vld [vmem:[%s17729_s2 + $0x10] ss:$8 sps:$4 sm:$0xff]  }
 0x388   :  { %v14860_v35 = vpop.permute.xlu0 %4506  ;;  %v1149_v47 = vsel %vm1148_vm4, %v1145_v13, %v12066_v42  ;;  %v1150_v40 = vsel %vm1148_vm4, %v14580_v31, %v1145_v13 }
 0x389   :  { %4063 = vmatprep.subr.bf16.mxu1 %v1149_v47  ;;  %v4522_v51 = vsel %vm1967_vm7, %v14860_v35, %v10887_v21 }
 0x38a   :  { %4687 = vmatpush1.bf16.msra.mxu0 %v4522_v51 }
 0x38b   :  { %4064 = vmatpush1.bf16.msra.mxu1 %v1150_v40  ;;  %v14871_v54 = vpop.permute.xlu1 %4536 }
 0x38c   :  { %v14873_v37 = vpop.permute.xlu0 %10890  ;;  %4065 = vmatprep.subr.bf16.mxu1 %v11836_v3 }
 0x38d   :  { %v10893_v11 = vunpack.i.h.bf16 %v14873_v37  ;;  %v10892_v42 = vunpack.i.l.bf16 %v14873_v37 }
 0x38f   :  { %4066 = vmatpush1.bf16.msra.mxu1 %v14243_v38  ;;  %v1484_v31 = vpop.permute.xlu1 %1483  ;;  %v4551_v39 = vsel %vm2208_vm8, %v10892_v42, %v10893_v11  ;;  %v4552_v59 = vsel %vm2208_vm8, %v14871_v54, %v10892_v42 }
 0x390   :  { %v10896_v49 = vpop.permute.xlu0 %10895  ;;  %4688 = vmatprep.subr.bf16.mxu0 %v4551_v39  ;;  %v1533_v3 = vsel %vm1485_vm5, %v1484_v31, %v12106_v53  ;;  %v1486_v38 = vsel %vm1485_vm5, %v14625_v14, %v1484_v31 }
 0x391   :  { %v10898_v43 = vunpack.i.h.bf16 %v10896_v49  ;;  %v10897_v61 = vunpack.i.l.bf16 %v10896_v49  ;;  %4689 = vmatpush1.bf16.msra.mxu0 %v4552_v59  ;;  %4067 = vmatprep.subr.bf16.mxu1 %v1533_v3 }
 0x393   :  { %4068 = vmatpush1.bf16.msra.mxu1 %v1486_v38  ;;  %v1725_v53 = vpop.permute.xlu1 %1724  ;;  %v4332_v14 = vsel %vm425_vm1, %v10897_v61, %v14696_v34  ;;  %v4333_v0 = vsel %vm425_vm1, %v10898_v43, %v10897_v61 }
 0x394   :  { %v10901_v12 = vpop.permute.xlu0 %10900  ;;  %4705 = vmatmul.mubr.bf16.vlgmr.msra.gmra.mrb[0].mxu0 %v14895_v18  ;;  %4778 = vmatprep.subr.bf16.mxu0 %v4332_v14  ;;  %v1774_v58 = vsel %vm1726_vm6, %v1725_v53, %v12116_v55  ;;  %v1727_v44 = vsel %vm1726_vm6, %v14643_v6, %v1725_v53 }
 0x395   :  { %v10903_v56 = vunpack.i.h.bf16 %v10901_v12  ;;  %v10902_v28 = vunpack.i.l.bf16 %v10901_v12  ;;  %4779 = vmatpush1.bf16.msra.mxu0 %v4333_v0  ;;  %4069 = vmatprep.subr.bf16.mxu1 %v1774_v58 }
 0x396   :  { %10172 = vmatprep.mubr.msk.bf16.mxu0 %vm2831_vm0, %v14900_v25 }
 0x397   :  { %4070 = vmatpush1.bf16.msra.mxu1 %v1727_v44  ;;  %v1966_v34 = vpop.permute.xlu1 %1965  ;;  %v4362_v21 = vsel %vm666_vm2, %v10902_v28, %v14727_v15  ;;  %v4363_v55 = vsel %vm666_vm2, %v10903_v56, %v10902_v28 }
 0x398   :  { %v10906_v2 = vpop.permute.xlu0 %10905  ;;  %4780 = vmatprep.subr.bf16.mxu0 %v4362_v21  ;;  %v2015_v6 = vsel %vm1967_vm7, %v1966_v34, %v12140_v63  ;;  %v1968_v9 = vsel %vm1967_vm7, %v14674_v33, %v1966_v34 }
 0x399   :  { %v10908_v7 = vunpack.i.h.bf16 %v10906_v2  ;;  %v10907_v15 = vunpack.i.l.bf16 %v10906_v2  ;;  %4781 = vmatpush1.bf16.msra.mxu0 %v4363_v55  ;;  %4071 = vmatprep.subr.bf16.mxu1 %v2015_v6 }
 0x39b   :  { %4072 = vmatpush1.bf16.msra.mxu1 %v1968_v9  ;;  %v2207_v13 = vpop.permute.xlu1 %2206  ;;  %v4392_v47 = vsel %vm907_vm3, %v10907_v15, %v14743_v20  ;;  %v4393_v63 = vsel %vm907_vm3, %v10908_v7, %v10907_v15 }
 0x39c   :  { %v10911_v40 = vpop.permute.xlu0 %10910  ;;  %4715 = vmatmul.mubr.bf16.gmra.mrb[4].mxu0 %v14930_v45  ;;  %4782 = vmatprep.subr.bf16.mxu0 %v4392_v47  ;;  %v2256_v33 = vsel %vm2208_vm8, %v2207_v13, %v12150_v1  ;;  %v2209_v51 = vsel %vm2208_vm8, %v14688_v8, %v2207_v13 }
 0x39d   :  { %v10913_v42 = vunpack.i.h.bf16 %v10911_v40  ;;  %v10912_v31 = vunpack.i.l.bf16 %v10911_v40  ;;  %4783 = vmatpush1.bf16.msra.mxu0 %v4393_v63  ;;  %4073 = vmatprep.subr.bf16.mxu1 %v2256_v33 }
 0x39e   :  { %10175 = vmatprep.mubr.msk.bf16.mxu0 %vm2831_vm0, %v14738_v57 }
 0x39f   :  { %4074 = vmatpush1.bf16.msra.mxu1 %v2209_v51  ;;  %v10916_v20 = vpop.permute.xlu1 %10915  ;;  %v4422_v39 = vsel %vm1148_vm4, %v10912_v31, %v14773_v29  ;;  %v4423_v1 = vsel %vm1148_vm4, %v10913_v42, %v10912_v31 }
 0x3a0   :  { %v4325_v59 = vpop.permute.xlu0 %4324  ;;  %4784 = vmatprep.subr.bf16.mxu0 %v4422_v39  ;;  %v10917_v49 = vunpack.i.l.bf16 %v10916_v20  ;;  %v10918_v38 = vunpack.i.h.bf16 %v10916_v20 }
 0x3a1   :  { %4785 = vmatpush1.bf16.msra.mxu0 %v4423_v1  ;;  %v4334_v8 = vsel %vm425_vm1, %v4325_v59, %v10898_v43  ;;  %v4335_v3 = vsel %vm425_vm1, %v10858_v23, %v4325_v59 }
 0x3a2   :  { %4725 = vmatprep.subr.bf16.mxu1 %v4334_v8  ;;  %4090 = vmatmul.mubr.bf16.vlgmr.msra.gmra.mrb[88].mxu1 %v14804_v19  ;;  %v4463_v23 = vsel %vm1485_vm5, %v10917_v49, %v14807_v46 }
 0x3a3   :  { %4726 = vmatpush1.bf16.msra.mxu1 %v4335_v3  ;;  %v10921_v29 = vpop.permute.xlu1 %10920  ;;  %4786 = vmatprep.subr.bf16.mxu0 %v14785_v30 }
 0x3a4   :  { %v4355_v61 = vpop.permute.xlu0 %4354  ;;  %10166 = vmatprep.mubr.msk.bf16.mxu1 %vm2831_vm0, %v14815_v36  ;;  %v10922_v53 = vunpack.i.l.bf16 %v10921_v29  ;;  %v10923_v43 = vunpack.i.h.bf16 %v10921_v29  ;;  %v4458_v36 = vsel %vm1485_vm5, %v10918_v38, %v10917_v49 }
 0x3a5   :  { %4787 = vmatpush1.bf16.msra.mxu0 %v14785_v30  ;;  %v4364_v27 = vsel %vm666_vm2, %v4355_v61, %v10903_v56  ;;  %v4365_v19 = vsel %vm666_vm2, %v10863_v16, %v4355_v61 }
 0x3a6   :  { %4727 = vmatprep.subr.bf16.mxu1 %v4364_v27  ;;  %4788 = vmatprep.subr.bf16.mxu0 %v4463_v23  ;;  %v4493_v4 = vsel %vm1726_vm6, %v10922_v53, %v14825_v52  ;;  %v4488_v44 = vsel %vm1726_vm6, %v10923_v43, %v10922_v53 }
 0x3a7   :  { %4728 = vmatpush1.bf16.msra.mxu1 %v4365_v19  ;;  %v10926_v14 = vpop.permute.xlu1 %10925 }
 0x3a8   :  { %v4385_v0 = vpop.permute.xlu0 %4384  ;;  %v10927_v12 = vunpack.i.l.bf16 %v10926_v14  ;;  %v10928_v46 = vunpack.i.h.bf16 %v10926_v14 }
 0x3a9   :  { %4789 = vmatpush1.bf16.msra.mxu0 %v4458_v36  ;;  %v4394_v58 = vsel %vm907_vm3, %v4385_v0, %v10908_v7  ;;  %v4395_v16 = vsel %vm907_vm3, %v10868_v10, %v4385_v0 }
 0x3aa   :  { %4729 = vmatprep.subr.bf16.mxu1 %v4394_v58  ;;  %4790 = vmatprep.subr.bf16.mxu0 %v4493_v4  ;;  %v4523_v24 = vsel %vm1967_vm7, %v10927_v12, %v14860_v35 }
 0x3ab   :  { %4730 = vmatpush1.bf16.msra.mxu1 %v4395_v16  ;;  %v10931_v56 = vpop.permute.xlu1 %10930 }
 0x3ac   :  { %v4415_v28 = vpop.permute.xlu0 %4414  ;;  %4100 = vmatmul.mubr.bf16.gmra.mrb[92].mxu1 %v14843_v60  ;;  %v10932_v34 = vunpack.i.l.bf16 %v10931_v56  ;;  %v10933_v21 = vunpack.i.h.bf16 %v10931_v56  ;;  %v4518_v60 = vsel %vm1967_vm7, %v10928_v46, %v10927_v12 }
 0x3ad   :  { %4791 = vmatpush1.bf16.msra.mxu0 %v4488_v44  ;;  %v4424_v52 = vsel %vm1148_vm4, %v4415_v28, %v10913_v42  ;;  %v4425_v10 = vsel %vm1148_vm4, %v10873_v22, %v4415_v28  ;;  %10173 = vmatprep.mubr.msk.bf16.mxu1 %vm2831_vm0, %v14738_v57 }
 0x3ae   :  { %4731 = vmatprep.subr.bf16.mxu1 %v4424_v52  ;;  %4792 = vmatprep.subr.bf16.mxu0 %v4523_v24  ;;  %v4553_v62 = vsel %vm2208_vm8, %v10932_v34, %v14871_v54  ;;  %v4548_v22 = vsel %vm2208_vm8, %v10933_v21, %v10932_v34 }
 0x3af   :  { %4732 = vmatpush1.bf16.msra.mxu1 %v4425_v10  ;;  %v4483_v2 = vpop.permute.xlu1 %4482 }
 0x3b0   :  { %v4453_v55 = vpop.permute.xlu0 %4452  ;;  %4733 = vmatprep.subr.bf16.mxu1 %v14785_v30  ;;  %v4489_v54 = vsel %vm1726_vm6, %v4483_v2, %v10923_v43 }
 0x3b1   :  { %4793 = vmatpush1.bf16.msra.mxu0 %v4518_v60  ;;  %v4459_v35 = vsel %vm1485_vm5, %v4453_v55, %v10918_v38  ;;  %v4460_v6 = vsel %vm1485_vm5, %v10878_v5, %v4453_v55 }
 0x3b2   :  { %4794 = vmatprep.subr.bf16.mxu0 %v4553_v62 }
 0x3b3   :  { %4734 = vmatpush1.bf16.msra.mxu1 %v14785_v30  ;;  %v4490_v30 = vsel %vm1726_vm6, %v10883_v17, %v4483_v2  ;;  %v4543_v5 = vpop.permute.xlu1 %4542 }
 0x3b4   :  { %4735 = vmatprep.subr.bf16.mxu1 %v4459_v35  ;;  %v4513_v9 = vpop.permute.xlu0 %4512  ;;  %v4549_v15 = vsel %vm2208_vm8, %v4543_v5, %v10933_v21  ;;  %v4550_v32 = vsel %vm2208_vm8, %v10893_v11, %v4543_v5 }
 0x3b5   :  { %4795 = vmatpush1.bf16.msra.mxu0 %v4548_v22  ;;  %v4519_v48 = vsel %vm1967_vm7, %v4513_v9, %v10928_v46  ;;  %v4520_v7 = vsel %vm1967_vm7, %v10888_v41, %v4513_v9 }
 0x3b7   :  { %4736 = vmatpush1.bf16.msra.mxu1 %v4460_v6 }
 0x3b8   :  { %4737 = vmatprep.subr.bf16.mxu1 %v4489_v54  ;;  %4811 = vmatmul.mubr.bf16.vlgmr.msra.gmra.mrb[8].mxu0 %v14895_v18 }
 0x3b9   :  { %10176 = vmatprep.mubr.msk.bf16.mxu0 %vm2831_vm0, %v14900_v25 }
 0x3bb   :  { %4738 = vmatpush1.bf16.msra.mxu1 %v4490_v30 }
 0x3bc   :  { %4739 = vmatprep.subr.bf16.mxu1 %v4519_v48 }
 0x3bf   :  { %4740 = vmatpush1.bf16.msra.mxu1 %v4520_v7 }
 0x3c0   :  { %4741 = vmatprep.subr.bf16.mxu1 %v4549_v15  ;;  %4821 = vmatmul.mubr.bf16.gmra.mrb[12].mxu0 %v14930_v45 }
 0x3c1   :  { %10204 = vmatprep.mubr.msk.bf16.mxu0 %vm2831_vm0, %v14738_v57 }
 0x3c3   :  { %4742 = vmatpush1.bf16.msra.mxu1 %v4550_v32 }
 0x3c4   :  { %v15043_v41 = vpop.permute.xlu1 %2800 }
 0x3c5   :  { %v15041_v17 = vpop.permute.xlu0 %2795 }
 0x3c6   :  { %4758 = vmatmul.mubr.bf16.vlgmr.msra.gmra.mrb[0].mxu1 %v14895_v18 }
 0x3c7   :  { %10174 = vmatprep.mubr.msk.bf16.mxu1 %vm2831_vm0, %v14900_v25 }
 0x3c8   :  { %v15049_v20 = vpop.permute.xlu1 %2805 }
 0x3c9   :  { %v15051_v1 = vpop.permute.xlu0 %2810 }
 0x3ce   :  { %4768 = vmatmul.mubr.bf16.gmra.mrb[4].mxu1 %v14930_v45 }
 0x3cf   :  { %10202 = vmatprep.mubr.msk.bf16.mxu1 %vm2831_vm0, %v14738_v57 }
 0x467   :  { %v4706_v50 = vpop.f32.mrb[0].mxu0 }
 0x468   :  { %v10460_v37 = vadd.f32 %v4706_v50, %v15041_v17  ;;  %v4708_v13 = vpop.f32.mrb[1].mxu0 }
 0x469   :  { %v10461_v11 = vadd.f32 %v4708_v13, %v15041_v17  ;;  %v4710_v47 = vpop.f32.mrb[2].mxu0 }
 0x46a   :  { %v10177_v63 = vmul.f32 -1.442695, %v10460_v37  ;;  %v10462_v40 = vadd.f32 %v4710_v47, %v15043_v41  ;;  %v4712_v33 = vpop.f32.mrb[3].mxu0 }
 0x46b   :  { %v10178_v51 = vmul.f32 -1.442695, %v10461_v11  ;;  %v10463_v42 = vadd.f32 %v4712_v33, %v15043_v41 }
 0x46c   :  { %10966 = vpow2.f32 %v10177_v63  ;;  %v10183_v57 = vmul.f32 -1.442695, %v10462_v40  ;;  %v15070_v40 = vld [vmem:[%s17731_s4] sm:$0xff] }
 0x46d   :  { %10968 = vpow2.f32 %v10178_v51  ;;  %v10184_v31 = vmul.f32 -1.442695, %v10463_v42 }
 0x46e   :  { %10970 = vpow2.f32 %v10183_v57  ;;  %v15075_v57 = vld [vmem:[%s17731_s4 + $0x8] sm:$0xff] }
 0x46f   :  { %10972 = vpow2.f32 %v10184_v31  ;;  %v4716_v39 = vpop.f32.mrb[4].mxu0 }
 0x470   :  { %v4718_v59 = vpop.f32.mrb[5].mxu0  ;;  %v10464_v49 = vadd.f32 %v4716_v39, %v15049_v20 }
 0x471   :  { %v4720_v8 = vpop.f32.mrb[6].mxu0  ;;  %v10465_v3 = vadd.f32 %v4718_v59, %v15049_v20 }
 0x472   :  { %v10466_v38 = vadd.f32 %v4720_v8, %v15051_v1  ;;  %v4722_v29 = vpop.f32.mrb[7].mxu0  ;;  %10974 = vtanh.f32 %v10464_v49 }
 0x473   :  { %v10467_v61 = vadd.f32 %v4722_v29, %v15051_v1  ;;  %10976 = vtanh.f32 %v10465_v3 }
 0x474   :  { %v10189_v53 = vmul.f32 -1.442695, %v10466_v38 }
 0x475   :  { %v10190_v27 = vmul.f32 -1.442695, %v10467_v61 }
 0x476   :  { %v10967_v23 = vpop.eup %10966  ;;  %10978 = vpow2.f32 %v10189_v53 }
 0x477   :  { %v10969_v19 = vpop.eup %10968  ;;  %v4849_v43 = vadd.f32 1.0, %v10967_v23  ;;  %10980 = vpow2.f32 %v10190_v27 }
 0x478   :  { %v10971_v36 = vpop.eup %10970  ;;  %v4850_v14 = vadd.f32 1.0, %v10969_v19 }
 0x479   :  { %v10973_v0 = vpop.eup %10972  ;;  %10982 = vrcp.f32 %v4849_v43  ;;  %v4885_v12 = vadd.f32 1.0, %v10971_v36 }
 0x47a   :  { %10984 = vrcp.f32 %v4850_v14  ;;  %v4886_v58 = vadd.f32 1.0, %v10973_v0 }
 0x47b   :  { %10986 = vrcp.f32 %v4885_v12 }
 0x47c   :  { %10988 = vrcp.f32 %v4886_v58  ;;  %v10975_v4 = vpop.eup %10974 }
 0x47d   :  { %v10977_v16 = vpop.eup %10976 }
 0x480   :  { %v10979_v46 = vpop.eup %10978 }
 0x481   :  { %v10981_v44 = vpop.eup %10980  ;;  %v4927_v52 = vadd.f32 1.0, %v10979_v46 }
 0x482   :  { %v4928_v21 = vadd.f32 1.0, %v10981_v44 }
 0x483   :  { %v10983_v56 = vpop.eup %10982  ;;  %10990 = vrcp.f32 %v4927_v52 }
 0x484   :  { %v10985_v28 = vpop.eup %10984  ;;  %v4957_v34 = vmul.f32 %v10983_v56, %v10975_v4  ;;  %10992 = vrcp.f32 %v4928_v21 }
 0x485   :  { %v10987_v24 = vpop.eup %10986  ;;  %v4958_v10 = vmul.f32 %v10985_v28, %v10977_v16 }
 0x486   :  { %v10989_v60 = vpop.eup %10988  ;;  %v4951_v55 = vmul.f32 0.0, %v10987_v24 }
 0x487   :  { %v4952_v62 = vmul.f32 0.0, %v10989_v60 }
 0x488   :  { %v15057_v22 = vadd.f32 %v4957_v34, %v4951_v55 }
 0x489   :  { %v15059_v35 = vadd.f32 %v4958_v10, %v4952_v62 }
 0x48a   :  { %10994 = vtanh.f32 %v15057_v22 }
 0x48b   :  { %10996 = vtanh.f32 %v15059_v35  ;;  %v4812_v2 = vpop.f32.mrb[8].mxu0 }
 0x48c   :  { %v10476_v6 = vadd.f32 %v4812_v2, %v15041_v17  ;;  %v4814_v54 = vpop.f32.mrb[9].mxu0 }
 0x48d   :  { %v10477_v9 = vadd.f32 %v4814_v54, %v15041_v17  ;;  %v4816_v30 = vpop.f32.mrb[10].mxu0  ;;  %v10991_v13 = vpop.eup %10990 }
 0x48e   :  { %v10181_v48 = vmul.f32 -1.442695, %v10476_v6  ;;  %v10478_v5 = vadd.f32 %v4816_v30, %v15043_v41  ;;  %v4818_v7 = vpop.f32.mrb[11].mxu0  ;;  %v10993_v11 = vpop.eup %10992 }
 0x48f   :  { %v10182_v15 = vmul.f32 -1.442695, %v10477_v9  ;;  %v10479_v32 = vadd.f32 %v4818_v7, %v15043_v41 }
 0x490   :  { %10998 = vpow2.f32 %v10181_v48  ;;  %v10187_v50 = vmul.f32 -1.442695, %v10478_v5 }
 0x491   :  { %11000 = vpow2.f32 %v10182_v15  ;;  %v10188_v37 = vmul.f32 -1.442695, %v10479_v32 }
 0x492   :  { %11002 = vpow2.f32 %v10187_v50 }
 0x493   :  { %11004 = vpow2.f32 %v10188_v37  ;;  %v4822_v47 = vpop.f32.mrb[12].mxu0 }
 0x494   :  { %v10995_v63 = vpop.eup %10994  ;;  %v4824_v33 = vpop.f32.mrb[13].mxu0  ;;  %v10480_v31 = vadd.f32 %v4822_v47, %v15049_v20 }
 0x495   :  { %v10997_v51 = vpop.eup %10996  ;;  %v4975_v42 = vmul.f32 %v10995_v63, %v10991_v13  ;;  %v4826_v39 = vpop.f32.mrb[14].mxu0  ;;  %v10481_v61 = vadd.f32 %v4824_v33, %v15049_v20 }
 0x496   :  { %v4976_v59 = vmul.f32 %v10997_v51, %v10993_v11  ;;  %v10482_v49 = vadd.f32 %v4826_v39, %v15051_v1  ;;  %v4828_v8 = vpop.f32.mrb[15].mxu0  ;;  %11006 = vtanh.f32 %v10480_v31 }
 0x497   :  { %v4981_v3 = vmul.f32 %v4975_v42, %v15070_v40  ;;  %v10483_v38 = vadd.f32 %v4828_v8, %v15051_v1 }
 0x498   :  { %v4982_v29 = vmul.f32 %v4976_v59, %v15075_v57  ;;  %v10193_v53 = vmul.f32 -1.442695, %v10482_v49 }
 0x499   :  { %v4987_v27 = vpack.c.bf16 %v4981_v3, %v4981_v3  ;;  %v10194_v23 = vmul.f32 -1.442695, %v10483_v38  ;;  %v4759_v19 = vpop.f32.mrb[0].mxu1 }
 0x49a   :  { %v10999_v43 = vpop.eup %10998  ;;  %v4988_v36 = vpack.c.bf16 %v4982_v29, %v4982_v29  ;;  %v10436_v14 = vpack.c.bf16 %v4982_v29, %v4981_v3  ;;  %11008 = vpow2.f32 %v10193_v53  ;;  %v10468_v0 = vadd.f32 %v4759_v19, %v15041_v17  ;;  %v4761_v12 = vpop.f32.mrb[1].mxu1 }
 0x49b   :  { %v11001_v58 = vpop.eup %11000  ;;  %4999 = vst [vmem:[#allocation5] sm:$0xf] %v4987_v27  ;;  %v4853_v4 = vadd.f32 1.0, %v10999_v43  ;;  %11010 = vpow2.f32 %v10194_v23  ;;  %v10469_v16 = vadd.f32 %v4761_v12, %v15041_v17  ;;  %v4763_v46 = vpop.f32.mrb[2].mxu1 }
 0x49c   :  { %v11003_v44 = vpop.eup %11002  ;;  %5000 = vst [vmem:[#allocation5 + $0x8] sm:$0xf] %v4988_v36  ;;  %5023 = vst [vmem:[%s17732_s5] sm:$0xff] %v10436_v14  ;;  %v4854_v56 = vadd.f32 1.0, %v11001_v58  ;;  %11012 = vtanh.f32 %v10481_v61  ;;  %v10470_v28 = vadd.f32 %v4763_v46, %v15043_v41  ;;  %v4765_v34 = vpop.f32.mrb[3].mxu1  ;;  %v10179_v10 = vmul.f32 -1.442695, %v10468_v0 }
 0x49d   :  { %v11005_v52 = vpop.eup %11004  ;;  %11014 = vrcp.f32 %v4853_v4  ;;  %v4889_v24 = vadd.f32 1.0, %v11003_v44  ;;  %v10471_v21 = vadd.f32 %v4765_v34, %v15043_v41  ;;  %v10180_v55 = vmul.f32 -1.442695, %v10469_v16  ;;  %v15123_v34 = vld [vmem:[%s17731_s4 + $0x20] sm:$0xff] }
 0x49e   :  { %11016 = vrcp.f32 %v4854_v56  ;;  %v4890_v60 = vadd.f32 1.0, %v11005_v52  ;;  %v10185_v62 = vmul.f32 -1.442695, %v10470_v28 }
 0x49f   :  { %11018 = vrcp.f32 %v4889_v24  ;;  %v10186_v2 = vmul.f32 -1.442695, %v10471_v21 }
 0x4a0   :  { %11020 = vrcp.f32 %v4890_v60  ;;  %v11007_v30 = vpop.eup %11006 }
 0x4a1   :  { %11022 = vpow2.f32 %v10179_v10  ;;  %v4769_v6 = vpop.f32.mrb[4].mxu1  ;;  %v15128_v10 = vld [vmem:[%s17731_s4 + $0x28] sm:$0xff] }
 0x4a2   :  { %v15090_v54 = vld [vmem:[#allocation5] sm:$0xff]  ;;  %11024 = vpow2.f32 %v10180_v55  ;;  %v4771_v9 = vpop.f32.mrb[5].mxu1  ;;  %v10472_v7 = vadd.f32 %v4769_v6, %v15049_v20 }
 0x4a3   :  { %11026 = vpow2.f32 %v10185_v62  ;;  %v4773_v48 = vpop.f32.mrb[6].mxu1  ;;  %5068 = vrot.lane.b32.xlu0 %v15090_v54, %s11784_s30  ;;  %5038 = vrot.lane.b32.xlu1 %v15090_v54, %s11783_s29  ;;  %v10473_v37 = vadd.f32 %v4771_v9, %v15049_v20  ;;  %v15104_v3 = vld [vmem:[#allocation5 + $0x8] sm:$0xff] }
 0x4a4   :  { %v11009_v5 = vpop.eup %11008  ;;  %11028 = vpow2.f32 %v10186_v2  ;;  %v10474_v15 = vadd.f32 %v4773_v48, %v15051_v1  ;;  %v4775_v32 = vpop.f32.mrb[7].mxu1 }
 0x4a5   :  { %v11011_v50 = vpop.eup %11010  ;;  %v10475_v13 = vadd.f32 %v4775_v32, %v15051_v1  ;;  %v4931_v47 = vadd.f32 1.0, %v11009_v5  ;;  %11030 = vtanh.f32 %v10472_v7 }
 0x4a6   :  { %v11013_v11 = vpop.eup %11012  ;;  %v4932_v33 = vadd.f32 1.0, %v11011_v50  ;;  %v10191_v31 = vmul.f32 -1.442695, %v10474_v15  ;;  %11032 = vtanh.f32 %v10473_v37 }
 0x4a7   :  { %v11015_v63 = vpop.eup %11014  ;;  %5128 = vrot.lane.b32.xlu0 %v15090_v54, %s11786_s8  ;;  %5098 = vrot.lane.b32.xlu1 %v15090_v54, %s11785_s7  ;;  %v10192_v49 = vmul.f32 -1.442695, %v10475_v13  ;;  %11034 = vrcp.f32 %v4931_v47 }
 0x4a8   :  { %v11017_v51 = vpop.eup %11016  ;;  %v4961_v42 = vmul.f32 %v11015_v63, %v11007_v30  ;;  %11036 = vrcp.f32 %v4932_v33 }
 0x4a9   :  { %v11019_v39 = vpop.eup %11018  ;;  %v4962_v59 = vmul.f32 %v11017_v51, %v11013_v11  ;;  %11038 = vpow2.f32 %v10191_v31  ;;  %v15148_v31 = vld [vmem:[%s17731_s4 + $0x10] sm:$0xff] }
 0x4aa   :  { %v11021_v8 = vpop.eup %11020  ;;  %v4955_v38 = vmul.f32 0.0, %v11019_v39  ;;  %11040 = vpow2.f32 %v10192_v49  ;;  %v15153_v49 = vld [vmem:[%s17731_s4 + $0x18] sm:$0xff] }
 0x4ab   :  { %v11023_v29 = vpop.eup %11022  ;;  %v4956_v61 = vmul.f32 0.0, %v11021_v8  ;;  %5040 = vrot.lane.b32.xlu0 %v15104_v3, %s11783_s29  ;;  %5070 = vrot.lane.b32.xlu1 %v15104_v3, %s11784_s30 }
 0x4ac   :  { %v11025_v53 = vpop.eup %11024  ;;  %v15110_v27 = vadd.f32 %v4961_v42, %v4955_v38  ;;  %v4851_v23 = vadd.f32 1.0, %v11023_v29 }
 0x4ad   :  { %v11027_v19 = vpop.eup %11026  ;;  %v15112_v43 = vadd.f32 %v4962_v59, %v4956_v61  ;;  %v4852_v36 = vadd.f32 1.0, %v11025_v53 }
 0x4ae   :  { %v11029_v14 = vpop.eup %11028  ;;  %11042 = vtanh.f32 %v15110_v27  ;;  %v4887_v0 = vadd.f32 1.0, %v11027_v19 }
 0x4af   :  { %11044 = vtanh.f32 %v15112_v43  ;;  %v4888_v12 = vadd.f32 1.0, %v11029_v14  ;;  %5100 = vrot.lane.b32.xlu0 %v15104_v3, %s11785_s7  ;;  %5130 = vrot.lane.b32.xlu1 %v15104_v3, %s11786_s8  ;;  %v11031_v58 = vpop.eup %11030 }
 0x4b0   :  { %11046 = vrcp.f32 %v4851_v23  ;;  %v11033_v4 = vpop.eup %11032 }
 0x4b1   :  { %11048 = vrcp.f32 %v4852_v36  ;;  %v11035_v16 = vpop.eup %11034 }
 0x4b2   :  { %11050 = vrcp.f32 %v4887_v0  ;;  %v11037_v46 = vpop.eup %11036 }
 0x4b3   :  { %11052 = vrcp.f32 %v4888_v12  ;;  %v11039_v44 = vpop.eup %11038 }
 0x4b4   :  { %v11041_v56 = vpop.eup %11040  ;;  %v4929_v6 = vadd.f32 1.0, %v11039_v44 }
 0x4b5   :  { %v4930_v5 = vadd.f32 1.0, %v11041_v56 }
 0x4b6   :  { %11054 = vrcp.f32 %v4929_v6 }
 0x4b7   :  { %11056 = vrcp.f32 %v4930_v5 }
 0x4b8   :  { %v11043_v28 = vpop.eup %11042 }
 0x4b9   :  { %v11045_v52 = vpop.eup %11044  ;;  %v4979_v24 = vmul.f32 %v11043_v28, %v11035_v16 }
 0x4ba   :  { %v11047_v21 = vpop.eup %11046  ;;  %v4980_v60 = vmul.f32 %v11045_v52, %v11037_v46 }
 0x4bb   :  { %v11049_v55 = vpop.eup %11048  ;;  %v4985_v62 = vmul.f32 %v4979_v24, %v15123_v34  ;;  %v4959_v2 = vmul.f32 %v11047_v21, %v11031_v58 }
 0x4bc   :  { %v11051_v9 = vpop.eup %11050  ;;  %v4986_v30 = vmul.f32 %v4980_v60, %v15128_v10  ;;  %v4960_v48 = vmul.f32 %v11049_v55, %v11033_v4 }
 0x4bd   :  { %v11053_v7 = vpop.eup %11052  ;;  %v4991_v15 = vpack.c.bf16 %v4985_v62, %v4985_v62  ;;  %v4953_v32 = vmul.f32 0.0, %v11051_v9 }
 0x4be   :  { %v4992_v50 = vpack.c.bf16 %v4986_v30, %v4986_v30  ;;  %v10438_v37 = vpack.c.bf16 %v4986_v30, %v4985_v62  ;;  %v4954_v13 = vmul.f32 0.0, %v11053_v7 }
 0x4bf   :  { %5003 = vst [vmem:[#allocation5 + $0x20] sm:$0xf] %v4991_v15  ;;  %v15132_v11 = vadd.f32 %v4959_v2, %v4953_v32 }
 0x4c0   :  { %5004 = vst [vmem:[#allocation5 + $0x28] sm:$0xf] %v4992_v50  ;;  %5025 = vst [vmem:[%s17732_s5 + $0x10] sm:$0xff] %v10438_v37  ;;  %v15137_v47 = vadd.f32 %v4960_v48, %v4954_v13  ;;  %v11055_v33 = vpop.eup %11054 }
 0x4c1   :  { %11058 = vtanh.f32 %v15132_v11  ;;  %v11057_v51 = vpop.eup %11056 }
 0x4c2   :  { %11060 = vtanh.f32 %v15137_v47 }
 0x4c6   :  { %v15184_v36 = vld [vmem:[#allocation5 + $0x20] sm:$0xff] }
 0x4c7   :  { %v15141_v63 = vld [vmem:[#allocation5 + $0x28] sm:$0xff] }
 0x4c8   :  { %5048 = vrot.lane.b32.xlu1 %v15141_v63, %s11783_s29 }
 0x4cb   :  { %v11059_v42 = vpop.eup %11058 }
 0x4cc   :  { %v11061_v39 = vpop.eup %11060  ;;  %v4977_v59 = vmul.f32 %v11059_v42, %v11055_v33  ;;  %5166 = vrot.lane.b32.xlu1 %v15104_v3, %s11787_s13 }
 0x4cd   :  { %v4978_v8 = vmul.f32 %v11061_v39, %v11057_v51 }
 0x4ce   :  { %v4983_v38 = vmul.f32 %v4977_v59, %v15148_v31 }
 0x4cf   :  { %v4984_v29 = vmul.f32 %v4978_v8, %v15153_v49 }
 0x4d0   :  { %v4989_v61 = vpack.c.bf16 %v4983_v38, %v4983_v38  ;;  %5108 = vrot.lane.b32.xlu1 %v15141_v63, %s11785_s7 }
 0x4d1   :  { %v4990_v53 = vpack.c.bf16 %v4984_v29, %v4984_v29  ;;  %v10437_v23 = vpack.c.bf16 %v4984_v29, %v4983_v38 }
 0x4d2   :  { %5001 = vst [vmem:[#allocation5 + $0x10] sm:$0xf] %v4989_v61 }
 0x4d3   :  { %5002 = vst [vmem:[#allocation5 + $0x18] sm:$0xf] %v4990_v53  ;;  %5024 = vst [vmem:[%s17732_s5 + $0x8] sm:$0xff] %v10437_v23 }
 0x4d4   :  { %5164 = vrot.lane.b32.xlu1 %v15090_v54, %s11787_s13 }
 0x4d9   :  { %v15166_v19 = vld [vmem:[#allocation5 + $0x10] sm:$0xff] }
 0x4da   :  { %5168 = vrot.lane.b32.xlu0 %v15166_v19, %s11787_s13  ;;  %5198 = vrot.lane.b32.xlu1 %v15166_v19, %s11788_s14  ;;  %v15202_v14 = vld [vmem:[#allocation5 + $0x18] sm:$0xff] }
 0x4de   :  { %5078 = vrot.lane.b32.xlu0 %v15141_v63, %s11784_s30  ;;  %5226 = vrot.lane.b32.xlu1 %v15104_v3, %s11789_s15 }
 0x4e2   :  { %5196 = vrot.lane.b32.xlu0 %v15104_v3, %s11788_s14  ;;  %5224 = vrot.lane.b32.xlu1 %v15090_v54, %s11789_s15 }
 0x4e6   :  { %5138 = vrot.lane.b32.xlu0 %v15141_v63, %s11786_s8  ;;  %5258 = vrot.lane.b32.xlu1 %v15166_v19, %s11790_s18 }
 0x4ea   :  { %5194 = vrot.lane.b32.xlu0 %v15090_v54, %s11788_s14  ;;  %5046 = vrot.lane.b32.xlu1 %v15184_v36, %s11783_s29 }
 0x4ee   :  { %5228 = vrot.lane.b32.xlu0 %v15166_v19, %s11789_s15  ;;  %5076 = vrot.lane.b32.xlu1 %v15184_v36, %s11784_s30 }
 0x4f2   :  { %5256 = vrot.lane.b32.xlu0 %v15104_v3, %s11790_s18  ;;  %5106 = vrot.lane.b32.xlu1 %v15184_v36, %s11785_s7 }
 0x4f6   :  { %5254 = vrot.lane.b32.xlu0 %v15090_v54, %s11790_s18  ;;  %5136 = vrot.lane.b32.xlu1 %v15184_v36, %s11786_s8 }
 0x4fa   :  { %5044 = vrot.lane.b32.xlu0 %v15202_v14, %s11783_s29  ;;  %5042 = vrot.lane.b32.xlu1 %v15166_v19, %s11783_s29 }
 0x4fe   :  { %5074 = vrot.lane.b32.xlu0 %v15202_v14, %s11784_s30  ;;  %5172 = vrot.lane.b32.xlu1 %v15184_v36, %s11787_s13 }
 0x502   :  { %5104 = vrot.lane.b32.xlu0 %v15202_v14, %s11785_s7  ;;  %5204 = vrot.lane.b32.xlu1 %v15141_v63, %s11788_s14 }
 0x506   :  { %5134 = vrot.lane.b32.xlu0 %v15202_v14, %s11786_s8  ;;  %5102 = vrot.lane.b32.xlu1 %v15166_v19, %s11785_s7 }
 0x50a   :  { %5174 = vrot.lane.b32.xlu0 %v15141_v63, %s11787_s13  ;;  %5232 = vrot.lane.b32.xlu1 %v15184_v36, %s11789_s15 }
 0x50e   :  { %5072 = vrot.lane.b32.xlu0 %v15166_v19, %s11784_s30  ;;  %5264 = vrot.lane.b32.xlu1 %v15141_v63, %s11790_s18 }
 0x512   :  { %5202 = vrot.lane.b32.xlu0 %v15184_v36, %s11788_s14  ;;  %5170 = vrot.lane.b32.xlu1 %v15202_v14, %s11787_s13 }
 0x515   :  { %v5069_v0 = vpop.permute.xlu0 %5068  ;;  %v5039_v58 = vpop.permute.xlu1 %5038 }
 0x516   :  { %5234 = vrot.lane.b32.xlu0 %v15141_v63, %s11789_s15  ;;  %5230 = vrot.lane.b32.xlu1 %v15202_v14, %s11789_s15 }
 0x519   :  { %v5129_v12 = vpop.permute.xlu0 %5128  ;;  %v5099_v46 = vpop.permute.xlu1 %5098 }
 0x51a   :  { %5132 = vrot.lane.b32.xlu0 %v15166_v19, %s11786_s8 }
 0x51d   :  { %v15238_v4 = vpop.permute.xlu0 %5040  ;;  %v15249_v44 = vpop.permute.xlu1 %5070 }
 0x51e   :  { %5262 = vrot.lane.b32.xlu0 %v15184_v36, %s11790_s18  ;;  %v5054_v16 = vsel %vm425_vm1, %v5039_v58, %v15238_v4  ;;  %v5084_v24 = vsel %vm666_vm2, %v5069_v0, %v15249_v44 }
 0x51f   :  { %5390 = vmatprep.subr.bf16.mxu1 %v5054_v16 }
 0x521   :  { %v15251_v56 = vpop.permute.xlu1 %5130  ;;  %v15262_v62 = vpop.permute.xlu0 %5100 }
 0x522   :  { %5200 = vrot.lane.b32.xlu0 %v15202_v14, %s11788_s14  ;;  %v5114_v5 = vsel %vm907_vm3, %v5099_v46, %v15262_v62  ;;  %v5144_v50 = vsel %vm1148_vm4, %v5129_v12, %v15251_v56 }
 0x526   :  { %5260 = vrot.lane.b32.xlu0 %v15202_v14, %s11790_s18 }
 0x53a   :  { %v5049_v28 = vpop.permute.xlu1 %5048 }
 0x53b   :  { %v5055_v52 = vsel %vm425_vm1, %v5049_v28, %v5039_v58 }
 0x53c   :  { %5391 = vmatpush1.bf16.msra.mxu1 %v5055_v52 }
 0x53d   :  { %5392 = vmatprep.subr.bf16.mxu1 %v5084_v24 }
 0x53e   :  { %v5167_v21 = vpop.permute.xlu1 %5166 }
 0x542   :  { %v15258_v60 = vpop.permute.xlu1 %5108 }
 0x543   :  { %v5115_v32 = vsel %vm907_vm3, %v15258_v60, %v5099_v46 }
 0x546   :  { %v15260_v55 = vpop.permute.xlu1 %5164 }
 0x547   :  { %v5180_v38 = vsel %vm1485_vm5, %v15260_v55, %v5167_v21 }
 0x54c   :  { %v15264_v2 = vpop.permute.xlu0 %5168  ;;  %v15266_v6 = vpop.permute.xlu1 %5198 }
 0x54d   :  { %v5179_v39 = vsel %vm1485_vm5, %v5167_v21, %v15264_v2 }
 0x550   :  { %v5079_v9 = vpop.permute.xlu0 %5078  ;;  %v5227_v30 = vpop.permute.xlu1 %5226 }
 0x551   :  { %v5085_v48 = vsel %vm666_vm2, %v5079_v9, %v5069_v0 }
 0x552   :  { %5393 = vmatpush1.bf16.msra.mxu1 %v5085_v48 }
 0x553   :  { %5394 = vmatprep.subr.bf16.mxu1 %v5114_v5 }
 0x554   :  { %v5197_v7 = vpop.permute.xlu0 %5196  ;;  %v15273_v15 = vpop.permute.xlu1 %5224 }
 0x556   :  { %5395 = vmatpush1.bf16.msra.mxu1 %v5115_v32 }
 0x557   :  { %5396 = vmatprep.subr.bf16.mxu1 %v5144_v50 }
 0x558   :  { %v5139_v37 = vpop.permute.xlu0 %5138  ;;  %v15281_v13 = vpop.permute.xlu1 %5258 }
 0x559   :  { %v5145_v33 = vsel %vm1148_vm4, %v5139_v37, %v5129_v12  ;;  %v5240_v12 = vsel %vm1967_vm7, %v15273_v15, %v5227_v30 }
 0x55a   :  { %5397 = vmatpush1.bf16.msra.mxu1 %v5145_v33 }
 0x55b   :  { %5398 = vmatprep.subr.bf16.mxu1 %v15104_v3  ;;  %v5209_v3 = vsel %vm1726_vm6, %v5197_v7, %v15266_v6 }
 0x55c   :  { %v15286_v51 = vpop.permute.xlu0 %5194  ;;  %v5047_v42 = vpop.permute.xlu1 %5046 }
 0x55d   :  { %v5210_v61 = vsel %vm1726_vm6, %v15286_v51, %v5197_v7 }
 0x55e   :  { %5399 = vmatpush1.bf16.msra.mxu1 %v15090_v54 }
 0x55f   :  { %5400 = vmatprep.subr.bf16.mxu1 %v5179_v39 }
 0x560   :  { %v15292_v59 = vpop.permute.xlu0 %5228  ;;  %v5077_v8 = vpop.permute.xlu1 %5076 }
 0x561   :  { %v5239_v53 = vsel %vm1967_vm7, %v5227_v30, %v15292_v59  ;;  %v5050_v30 = vsel %vm425_vm1, %v5047_v42, %v5049_v28  ;;  %v5080_v7 = vsel %vm666_vm2, %v5077_v8, %v5079_v9 }
 0x562   :  { %5401 = vmatpush1.bf16.msra.mxu1 %v5180_v38 }
 0x563   :  { %5402 = vmatprep.subr.bf16.mxu1 %v5209_v3 }
 0x564   :  { %v5257_v29 = vpop.permute.xlu0 %5256  ;;  %v5107_v54 = vpop.permute.xlu1 %5106 }
 0x565   :  { %v5269_v58 = vsel %vm2208_vm8, %v5257_v29, %v15281_v13 }
 0x566   :  { %5403 = vmatpush1.bf16.msra.mxu1 %v5210_v61 }
 0x567   :  { %5404 = vmatprep.subr.bf16.mxu1 %v5239_v53 }
 0x568   :  { %v15306_v23 = vpop.permute.xlu0 %5254  ;;  %v5137_v0 = vpop.permute.xlu1 %5136 }
 0x569   :  { %v5270_v52 = vsel %vm2208_vm8, %v15306_v23, %v5257_v29 }
 0x56a   :  { %5405 = vmatpush1.bf16.msra.mxu1 %v5240_v12 }
 0x56b   :  { %5406 = vmatprep.subr.bf16.mxu1 %v5269_v58 }
 0x56c   :  { %v5045_v16 = vpop.permute.xlu0 %5044  ;;  %v5043_v46 = vpop.permute.xlu1 %5042 }
 0x56d   :  { %v5052_v24 = vsel %vm425_vm1, %v5043_v46, %v5045_v16  ;;  %v5053_v21 = vsel %vm425_vm1, %v15238_v4, %v5043_v46  ;;  %v5051_v5 = vsel %vm425_vm1, %v5045_v16, %v5047_v42  ;;  %v11749_v42 = vld [vmem:[%s17729_s2 + $0x4] ss:$8 sps:$4 sm:$0xff]  }
 0x56e   :  { %5407 = vmatpush1.bf16.msra.mxu1 %v5270_v52  ;;  %5443 = vmatprep.subr.bf16.mxu0 %v5052_v24 }
 0x56f   :  { %5496 = vmatprep.subr.bf16.mxu1 %v5050_v30  ;;  %5444 = vmatpush1.bf16.msra.mxu0 %v5053_v21  ;;  %v11751_v30 = vld [vmem:[%s17729_s2 + $0x14] ss:$8 sps:$4 sm:$0xff]  }
 0x570   :  { %v5075_v48 = vpop.permute.xlu0 %5074  ;;  %v5173_v32 = vpop.permute.xlu1 %5172 }
 0x571   :  { %5423 = vmatmul.mubr.bf16.vlgmr.msra.gmra.mrb[8].mxu1 %v14895_v18  ;;  %v5081_v28 = vsel %vm666_vm2, %v5075_v48, %v5077_v8  ;;  %v5110_v18 = vsel %vm907_vm3, %v5107_v54, %v15258_v60 }
 0x572   :  { %5497 = vmatpush1.bf16.msra.mxu1 %v5051_v5  ;;  %10203 = vmatprep.mubr.msk.bf16.mxu1 %vm2831_vm0, %v14900_v25  ;;  %v5140_v25 = vsel %vm1148_vm4, %v5137_v0, %v5139_v37 }
 0x573   :  { %5498 = vmatprep.subr.bf16.mxu1 %v5080_v7 }
 0x574   :  { %v5105_v4 = vpop.permute.xlu0 %5104  ;;  %v5205_v50 = vpop.permute.xlu1 %5204 }
 0x575   :  { %v5111_v9 = vsel %vm907_vm3, %v5105_v4, %v5107_v54 }
 0x576   :  { %5499 = vmatpush1.bf16.msra.mxu1 %v5081_v28 }
 0x577   :  { %5500 = vmatprep.subr.bf16.mxu1 %v5110_v18 }
 0x578   :  { %v5135_v33 = vpop.permute.xlu0 %5134  ;;  %v5103_v8 = vpop.permute.xlu1 %5102 }
 0x579   :  { %5433 = vmatmul.mubr.bf16.gmra.mrb[12].mxu1 %v14930_v45  ;;  %v5141_v39 = vsel %vm1148_vm4, %v5135_v33, %v5137_v0 }
 0x57a   :  { %5501 = vmatpush1.bf16.msra.mxu1 %v5111_v9  ;;  %10206 = vmatprep.mubr.msk.bf16.mxu1 %vm2831_vm0, %v11749_v42 }
 0x57b   :  { %5502 = vmatprep.subr.bf16.mxu1 %v5140_v25 }
 0x57c   :  { %v5175_v60 = vpop.permute.xlu0 %5174  ;;  %v5233_v29 = vpop.permute.xlu1 %5232 }
 0x57d   :  { %v5181_v3 = vsel %vm1485_vm5, %v5175_v60, %v15260_v55  ;;  %v5176_v61 = vsel %vm1485_vm5, %v5173_v32, %v5175_v60 }
 0x57e   :  { %5503 = vmatpush1.bf16.msra.mxu1 %v5141_v39 }
 0x57f   :  { %5504 = vmatprep.subr.bf16.mxu1 %v15141_v63  ;;  %v5112_v63 = vsel %vm907_vm3, %v5103_v8, %v5105_v4 }
 0x580   :  { %v5073_v45 = vpop.permute.xlu0 %5072  ;;  %v5265_v12 = vpop.permute.xlu1 %5264 }
 0x581   :  { %v5082_v38 = vsel %vm666_vm2, %v5073_v45, %v5075_v48  ;;  %v5083_v37 = vsel %vm666_vm2, %v15249_v44, %v5073_v45  ;;  %v5211_v44 = vsel %vm1726_vm6, %v5205_v50, %v15286_v51 }
 0x582   :  { %5445 = vmatprep.subr.bf16.mxu0 %v5082_v38  ;;  %5505 = vmatpush1.bf16.msra.mxu1 %v15184_v36  ;;  %v5113_v36 = vsel %vm907_vm3, %v15262_v62, %v5103_v8 }
 0x583   :  { %5446 = vmatpush1.bf16.msra.mxu0 %v5083_v37  ;;  %5506 = vmatprep.subr.bf16.mxu1 %v5181_v3 }
 0x584   :  { %v5203_v54 = vpop.permute.xlu0 %5202  ;;  %5447 = vmatprep.subr.bf16.mxu0 %v5112_v63  ;;  %v5171_v46 = vpop.permute.xlu1 %5170 }
 0x585   :  { %v5206_v53 = vsel %vm1726_vm6, %v5203_v54, %v5205_v50 }
 0x586   :  { %5507 = vmatpush1.bf16.msra.mxu1 %v5176_v61 }
 0x587   :  { %5448 = vmatpush1.bf16.msra.mxu0 %v5113_v36  ;;  %5508 = vmatprep.subr.bf16.mxu1 %v5211_v44 }
 0x588   :  { %v5235_v55 = vpop.permute.xlu0 %5234  ;;  %v5231_v48 = vpop.permute.xlu1 %5230 }
 0x589   :  { %v5241_v0 = vsel %vm1967_vm7, %v5235_v55, %v15273_v15  ;;  %v5236_v51 = vsel %vm1967_vm7, %v5233_v29, %v5235_v55  ;;  %v5271_v15 = vsel %vm2208_vm8, %v5265_v12, %v15306_v23  ;;  %v11750_v23 = vld [vmem:[%s17729_s2] ss:$8 sps:$4 sm:$0xff]   ;;  %v5238_v4 = vsel %vm1967_vm7, %v15292_v59, %v5231_v48 }
 0x58a   :  { %5509 = vmatpush1.bf16.msra.mxu1 %v5206_v53 }
 0x58b   :  { %5510 = vmatprep.subr.bf16.mxu1 %v5241_v0 }
 0x58c   :  { %v5133_v58 = vpop.permute.xlu0 %5132 }
 0x58d   :  { %v5142_v62 = vsel %vm1148_vm4, %v5133_v58, %v5135_v33  ;;  %v5143_v16 = vsel %vm1148_vm4, %v15251_v56, %v5133_v58  ;;  %v5177_v56 = vsel %vm1485_vm5, %v5171_v46, %v5173_v32  ;;  %v11752_v32 = vld [vmem:[%s17729_s2 + $0x10] ss:$8 sps:$4 sm:$0xff]  }
 0x58e   :  { %5449 = vmatprep.subr.bf16.mxu0 %v5142_v62  ;;  %5511 = vmatpush1.bf16.msra.mxu1 %v5236_v51 }
 0x58f   :  { %5450 = vmatpush1.bf16.msra.mxu0 %v5143_v16  ;;  %5512 = vmatprep.subr.bf16.mxu1 %v5271_v15 }
 0x590   :  { %v5263_v52 = vpop.permute.xlu0 %5262  ;;  %5451 = vmatprep.subr.bf16.mxu0 %v15202_v14  ;;  %v5178_v14 = vsel %vm1485_vm5, %v15264_v2, %v5171_v46  ;;  %v5237_v2 = vsel %vm1967_vm7, %v5231_v48, %v5233_v29 }
 0x591   :  { %v5266_v24 = vsel %vm2208_vm8, %v5263_v52, %v5265_v12 }
 0x592   :  { %5513 = vmatpush1.bf16.msra.mxu1 %v5266_v24 }
 0x593   :  { %5452 = vmatpush1.bf16.msra.mxu0 %v15166_v19 }
 0x594   :  { %v5201_v21 = vpop.permute.xlu0 %5200  ;;  %5453 = vmatprep.subr.bf16.mxu0 %v5177_v56 }
 0x595   :  { %5529 = vmatmul.mubr.bf16.vlgmr.msra.gmra.mrb[16].mxu1 %v11750_v23  ;;  %v5207_v19 = vsel %vm1726_vm6, %v5201_v21, %v5203_v54  ;;  %v5208_v5 = vsel %vm1726_vm6, %v15266_v6, %v5201_v21 }
 0x596   :  { %10207 = vmatprep.mubr.msk.bf16.mxu1 %vm2831_vm0, %v11751_v30 }
 0x597   :  { %5454 = vmatpush1.bf16.msra.mxu0 %v5178_v14 }
 0x598   :  { %5455 = vmatprep.subr.bf16.mxu0 %v5207_v19  ;;  %v5261_v7 = vpop.permute.xlu0 %5260 }
 0x599   :  { %v5267_v28 = vsel %vm2208_vm8, %v5261_v7, %v5263_v52  ;;  %v5268_v6 = vsel %vm2208_vm8, %v15281_v13, %v5261_v7 }
 0x59b   :  { %5456 = vmatpush1.bf16.msra.mxu0 %v5208_v5 }
 0x59c   :  { %5457 = vmatprep.subr.bf16.mxu0 %v5237_v2 }
 0x59d   :  { %5539 = vmatmul.mubr.bf16.gmra.mrb[20].mxu1 %v11752_v32 }
 0x59f   :  { %5458 = vmatpush1.bf16.msra.mxu0 %v5238_v4 }
 0x5a0   :  { %5459 = vmatprep.subr.bf16.mxu0 %v5267_v28 }
 0x5a3   :  { %5460 = vmatpush1.bf16.msra.mxu0 %v5268_v6 }
 0x5a6   :  { %5476 = vmatmul.mubr.bf16.vlgmr.msra.gmra.mrb[16].mxu0 %v11750_v23 }
 0x5a7   :  { %10205 = vmatprep.mubr.msk.bf16.mxu0 %vm2831_vm0, %v11751_v30 }
 0x5ae   :  { %5486 = vmatmul.mubr.bf16.gmra.mrb[20].mxu0 %v11752_v32 }
 0x644   :  { %v5424_v18 = vpop.f32.mrb[8].mxu1 }
 0x645   :  { %v10484_v50 = vadd.f32 %v5424_v18, %v15041_v17  ;;  %v5426_v33 = vpop.f32.mrb[9].mxu1 }
 0x646   :  { %v10485_v59 = vadd.f32 %v5426_v33, %v15041_v17  ;;  %v5428_v9 = vpop.f32.mrb[10].mxu1 }
 0x647   :  { %v10208_v25 = vmul.f32 -1.442695, %v10484_v50  ;;  %v10486_v42 = vadd.f32 %v5428_v9, %v15043_v41  ;;  %v5430_v60 = vpop.f32.mrb[11].mxu1 }
 0x648   :  { %v10209_v39 = vmul.f32 -1.442695, %v10485_v59  ;;  %v10487_v8 = vadd.f32 %v5430_v60, %v15043_v41 }
 0x649   :  { %11062 = vpow2.f32 %v10208_v25  ;;  %v10214_v13 = vmul.f32 -1.442695, %v10486_v42 }
 0x64a   :  { %11064 = vpow2.f32 %v10209_v39  ;;  %v10215_v45 = vmul.f32 -1.442695, %v10487_v8 }
 0x64b   :  { %11066 = vpow2.f32 %v10214_v13 }
 0x64c   :  { %11068 = vpow2.f32 %v10215_v45  ;;  %v5434_v38 = vpop.f32.mrb[12].mxu1 }
 0x64d   :  { %v5436_v37 = vpop.f32.mrb[13].mxu1  ;;  %v10488_v3 = vadd.f32 %v5434_v38, %v15049_v20 }
 0x64e   :  { %v5438_v63 = vpop.f32.mrb[14].mxu1  ;;  %v10489_v29 = vadd.f32 %v5436_v37, %v15049_v20 }
 0x64f   :  { %v10490_v54 = vadd.f32 %v5438_v63, %v15051_v1  ;;  %v5440_v61 = vpop.f32.mrb[15].mxu1  ;;  %11070 = vtanh.f32 %v10488_v3 }
 0x650   :  { %v10491_v36 = vadd.f32 %v5440_v61, %v15051_v1  ;;  %11072 = vtanh.f32 %v10489_v29 }
 0x651   :  { %v10220_v44 = vmul.f32 -1.442695, %v10490_v54 }
 0x652   :  { %v10221_v55 = vmul.f32 -1.442695, %v10491_v36 }
 0x653   :  { %v11063_v53 = vpop.eup %11062  ;;  %11074 = vpow2.f32 %v10220_v44 }
 0x654   :  { %v11065_v0 = vpop.eup %11064  ;;  %v5567_v12 = vadd.f32 1.0, %v11063_v53  ;;  %11076 = vpow2.f32 %v10221_v55 }
 0x655   :  { %v11067_v58 = vpop.eup %11066  ;;  %v5568_v62 = vadd.f32 1.0, %v11065_v0 }
 0x656   :  { %v11069_v51 = vpop.eup %11068  ;;  %11078 = vrcp.f32 %v5567_v12  ;;  %v5603_v16 = vadd.f32 1.0, %v11067_v58 }
 0x657   :  { %11080 = vrcp.f32 %v5568_v62  ;;  %v5604_v15 = vadd.f32 1.0, %v11069_v51 }
 0x658   :  { %11082 = vrcp.f32 %v5603_v16 }
 0x659   :  { %11084 = vrcp.f32 %v5604_v15  ;;  %v11071_v46 = vpop.eup %11070 }
 0x65a   :  { %v11073_v52 = vpop.eup %11072 }
 0x65d   :  { %v11075_v24 = vpop.eup %11074 }
 0x65e   :  { %v11077_v56 = vpop.eup %11076  ;;  %v5645_v30 = vadd.f32 1.0, %v11075_v24 }
 0x65f   :  { %v5646_v5 = vadd.f32 1.0, %v11077_v56 }
 0x660   :  { %v11079_v21 = vpop.eup %11078  ;;  %11086 = vrcp.f32 %v5645_v30 }
 0x661   :  { %v11081_v23 = vpop.eup %11080  ;;  %v5675_v14 = vmul.f32 %v11079_v21, %v11071_v46  ;;  %11088 = vrcp.f32 %v5646_v5 }
 0x662   :  { %v11083_v19 = vpop.eup %11082  ;;  %v5676_v48 = vmul.f32 %v11081_v23, %v11073_v52 }
 0x663   :  { %v11085_v2 = vpop.eup %11084  ;;  %v5669_v7 = vmul.f32 %v11083_v19, %v15057_v22 }
 0x664   :  { %v5670_v32 = vmul.f32 %v11085_v2, %v15059_v35 }
 0x665   :  { %v15427_v4 = vadd.f32 %v5675_v14, %v5669_v7 }
 0x666   :  { %v15429_v28 = vadd.f32 %v5676_v48, %v5670_v32 }
 0x667   :  { %11090 = vtanh.f32 %v15427_v4 }
 0x668   :  { %11092 = vtanh.f32 %v15429_v28  ;;  %v5530_v6 = vpop.f32.mrb[16].mxu1 }
 0x669   :  { %v10500_v18 = vadd.f32 %v5530_v6, %v15041_v17  ;;  %v5532_v50 = vpop.f32.mrb[17].mxu1 }
 0x66a   :  { %v10501_v33 = vadd.f32 %v5532_v50, %v15041_v17  ;;  %v5534_v59 = vpop.f32.mrb[18].mxu1  ;;  %v11087_v8 = vpop.eup %11086 }
 0x66b   :  { %v10212_v22 = vmul.f32 -1.442695, %v10500_v18  ;;  %v10502_v35 = vadd.f32 %v5534_v59, %v15043_v41  ;;  %v5536_v9 = vpop.f32.mrb[19].mxu1  ;;  %v11089_v13 = vpop.eup %11088 }
 0x66c   :  { %v10213_v25 = vmul.f32 -1.442695, %v10501_v33  ;;  %v10503_v42 = vadd.f32 %v5536_v9, %v15043_v41 }
 0x66d   :  { %11094 = vpow2.f32 %v10212_v22  ;;  %v10218_v60 = vmul.f32 -1.442695, %v10502_v35 }
 0x66e   :  { %11096 = vpow2.f32 %v10213_v25  ;;  %v10219_v39 = vmul.f32 -1.442695, %v10503_v42 }
 0x66f   :  { %11098 = vpow2.f32 %v10218_v60 }
 0x670   :  { %11100 = vpow2.f32 %v10219_v39  ;;  %v5540_v45 = vpop.f32.mrb[20].mxu1 }
 0x671   :  { %v11091_v38 = vpop.eup %11090  ;;  %v5542_v37 = vpop.f32.mrb[21].mxu1  ;;  %v10504_v29 = vadd.f32 %v5540_v45, %v15049_v20 }
 0x672   :  { %v11093_v3 = vpop.eup %11092  ;;  %v5693_v63 = vmul.f32 %v11091_v38, %v11087_v8  ;;  %v5544_v54 = vpop.f32.mrb[22].mxu1  ;;  %v10505_v12 = vadd.f32 %v5542_v37, %v15049_v20 }
 0x673   :  { %v5694_v61 = vmul.f32 %v11093_v3, %v11089_v13  ;;  %v10506_v36 = vadd.f32 %v5544_v54, %v15051_v1  ;;  %v5546_v44 = vpop.f32.mrb[23].mxu1  ;;  %11102 = vtanh.f32 %v10504_v29 }
 0x674   :  { %v5699_v55 = vmul.f32 %v5693_v63, %v15070_v40  ;;  %v10507_v53 = vadd.f32 %v5546_v44, %v15051_v1 }
 0x675   :  { %v5700_v0 = vmul.f32 %v5694_v61, %v15075_v57  ;;  %v10224_v58 = vmul.f32 -1.442695, %v10506_v36 }
 0x676   :  { %v5705_v62 = vpack.c.bf16 %v5699_v55, %v5699_v55  ;;  %v10225_v51 = vmul.f32 -1.442695, %v10507_v53 }
 0x677   :  { %v11095_v16 = vpop.eup %11094  ;;  %v5706_v15 = vpack.c.bf16 %v5700_v0, %v5700_v0  ;;  %v10439_v46 = vpack.c.bf16 %v5700_v0, %v5699_v55  ;;  %11104 = vpow2.f32 %v10224_v58 }
 0x678   :  { %v11097_v52 = vpop.eup %11096  ;;  %5717 = vst [vmem:[#allocation5] sm:$0xf] %v5705_v62  ;;  %v5571_v24 = vadd.f32 1.0, %v11095_v16  ;;  %11106 = vpow2.f32 %v10225_v51 }
 0x679   :  { %v11099_v56 = vpop.eup %11098  ;;  %5718 = vst [vmem:[#allocation5 + $0x8] sm:$0xf] %v5706_v15  ;;  %10229 = vst [vmem:[%s17732_s5 + $0x18] sm:$0xff] %v10439_v46  ;;  %v5572_v40 = vadd.f32 1.0, %v11097_v52  ;;  %11108 = vtanh.f32 %v10505_v12  ;;  %v5477_v57 = vpop.f32.mrb[16].mxu0 }
 0x67a   :  { %v11101_v21 = vpop.eup %11100  ;;  %11110 = vrcp.f32 %v5571_v24  ;;  %v5607_v23 = vadd.f32 1.0, %v11099_v56  ;;  %v10492_v14 = vadd.f32 %v5477_v57, %v15041_v17  ;;  %v5479_v30 = vpop.f32.mrb[17].mxu0 }
 0x67b   :  { %11112 = vrcp.f32 %v5572_v40  ;;  %v5608_v19 = vadd.f32 1.0, %v11101_v21  ;;  %v10493_v48 = vadd.f32 %v5479_v30, %v15041_v17  ;;  %v5481_v5 = vpop.f32.mrb[18].mxu0 }
 0x67c   :  { %11114 = vrcp.f32 %v5607_v23  ;;  %v10210_v2 = vmul.f32 -1.442695, %v10492_v14  ;;  %v10494_v7 = vadd.f32 %v5481_v5, %v15043_v41  ;;  %v5483_v32 = vpop.f32.mrb[19].mxu0 }
 0x67d   :  { %11116 = vrcp.f32 %v5608_v19  ;;  %v10211_v6 = vmul.f32 -1.442695, %v10493_v48  ;;  %v10495_v18 = vadd.f32 %v5483_v32, %v15043_v41  ;;  %v11103_v22 = vpop.eup %11102 }
 0x67e   :  { %11118 = vpow2.f32 %v10210_v2  ;;  %v10216_v50 = vmul.f32 -1.442695, %v10494_v7 }
 0x67f   :  { %11120 = vpow2.f32 %v10211_v6  ;;  %v10217_v33 = vmul.f32 -1.442695, %v10495_v18  ;;  %v15450_v59 = vld [vmem:[#allocation5] sm:$0xff] }
 0x680   :  { %11122 = vpow2.f32 %v10216_v50  ;;  %5787 = vrot.lane.b32.xlu0 %v15450_v59, %s11784_s30  ;;  %5757 = vrot.lane.b32.xlu1 %v15450_v59, %s11783_s29  ;;  %v15465_v58 = vld [vmem:[#allocation5 + $0x8] sm:$0xff] }
 0x681   :  { %v11105_v35 = vpop.eup %11104  ;;  %11124 = vpow2.f32 %v10217_v33  ;;  %v5487_v9 = vpop.f32.mrb[20].mxu0 }
 0x682   :  { %v11107_v25 = vpop.eup %11106  ;;  %v5649_v42 = vadd.f32 1.0, %v11105_v35  ;;  %v5489_v60 = vpop.f32.mrb[21].mxu0  ;;  %v10496_v13 = vadd.f32 %v5487_v9, %v15049_v20 }
 0x683   :  { %v11109_v39 = vpop.eup %11108  ;;  %v5650_v8 = vadd.f32 1.0, %v11107_v25  ;;  %v5491_v45 = vpop.f32.mrb[22].mxu0  ;;  %v10497_v37 = vadd.f32 %v5489_v60, %v15049_v20 }
 0x684   :  { %v11111_v38 = vpop.eup %11110  ;;  %v10498_v3 = vadd.f32 %v5491_v45, %v15051_v1  ;;  %5847 = vrot.lane.b32.xlu0 %v15450_v59, %s11786_s8  ;;  %5817 = vrot.lane.b32.xlu1 %v15450_v59, %s11785_s7  ;;  %v5493_v63 = vpop.f32.mrb[23].mxu0  ;;  %11126 = vrcp.f32 %v5649_v42 }
 0x685   :  { %v11113_v29 = vpop.eup %11112  ;;  %v5679_v54 = vmul.f32 %v11111_v38, %v11103_v22  ;;  %v10499_v61 = vadd.f32 %v5493_v63, %v15051_v1  ;;  %11128 = vrcp.f32 %v5650_v8 }
 0x686   :  { %v11115_v36 = vpop.eup %11114  ;;  %v5680_v44 = vmul.f32 %v11113_v29, %v11109_v39  ;;  %v10222_v55 = vmul.f32 -1.442695, %v10498_v3  ;;  %11130 = vtanh.f32 %v10496_v13 }
 0x687   :  { %v11117_v53 = vpop.eup %11116  ;;  %v5673_v0 = vmul.f32 %v11115_v36, %v15110_v27  ;;  %v10223_v12 = vmul.f32 -1.442695, %v10499_v61  ;;  %11132 = vtanh.f32 %v10497_v37 }
 0x688   :  { %v11119_v62 = vpop.eup %11118  ;;  %v5674_v51 = vmul.f32 %v11117_v53, %v15112_v43  ;;  %5759 = vrot.lane.b32.xlu0 %v15465_v58, %s11783_s29  ;;  %5789 = vrot.lane.b32.xlu1 %v15465_v58, %s11784_s30  ;;  %11134 = vpow2.f32 %v10222_v55 }
 0x689   :  { %v11121_v16 = vpop.eup %11120  ;;  %v15472_v15 = vadd.f32 %v5679_v54, %v5673_v0  ;;  %v5569_v46 = vadd.f32 1.0, %v11119_v62  ;;  %11136 = vpow2.f32 %v10223_v12 }
 0x68a   :  { %v11123_v27 = vpop.eup %11122  ;;  %v15474_v52 = vadd.f32 %v5680_v44, %v5674_v51  ;;  %v5570_v24 = vadd.f32 1.0, %v11121_v16 }
 0x68b   :  { %v11125_v56 = vpop.eup %11124  ;;  %11138 = vtanh.f32 %v15472_v15  ;;  %v5605_v43 = vadd.f32 1.0, %v11123_v27 }
 0x68c   :  { %11140 = vtanh.f32 %v15474_v52  ;;  %v5606_v40 = vadd.f32 1.0, %v11125_v56  ;;  %5819 = vrot.lane.b32.xlu0 %v15465_v58, %s11785_s7  ;;  %5849 = vrot.lane.b32.xlu1 %v15465_v58, %s11786_s8 }
 0x68d   :  { %11142 = vrcp.f32 %v5569_v46 }
 0x68e   :  { %11144 = vrcp.f32 %v5570_v24  ;;  %v11127_v57 = vpop.eup %11126 }
 0x68f   :  { %11146 = vrcp.f32 %v5605_v43  ;;  %v11129_v21 = vpop.eup %11128 }
 0x690   :  { %11148 = vrcp.f32 %v5606_v40  ;;  %v11131_v23 = vpop.eup %11130 }
 0x691   :  { %v11133_v14 = vpop.eup %11132 }
 0x692   :  { %v11135_v30 = vpop.eup %11134 }
 0x693   :  { %v11137_v19 = vpop.eup %11136  ;;  %v5647_v33 = vadd.f32 1.0, %v11135_v30 }
 0x694   :  { %v5648_v25 = vadd.f32 1.0, %v11137_v19 }
 0x695   :  { %v11139_v48 = vpop.eup %11138  ;;  %11150 = vrcp.f32 %v5647_v33 }
 0x696   :  { %v11141_v5 = vpop.eup %11140  ;;  %v5697_v2 = vmul.f32 %v11139_v48, %v11127_v57  ;;  %11152 = vrcp.f32 %v5648_v25 }
 0x697   :  { %v11143_v7 = vpop.eup %11142  ;;  %v5698_v32 = vmul.f32 %v11141_v5, %v11129_v21 }
 0x698   :  { %v11145_v6 = vpop.eup %11144  ;;  %v5703_v18 = vmul.f32 %v5697_v2, %v15123_v34  ;;  %v5677_v50 = vmul.f32 %v11143_v7, %v11131_v23 }
 0x699   :  { %v11147_v22 = vpop.eup %11146  ;;  %v5704_v35 = vmul.f32 %v5698_v32, %v15128_v10  ;;  %v5678_v9 = vmul.f32 %v11145_v6, %v11133_v14 }
 0x69a   :  { %v11149_v42 = vpop.eup %11148  ;;  %v5709_v60 = vpack.c.bf16 %v5703_v18, %v5703_v18  ;;  %v5671_v39 = vmul.f32 %v11147_v22, %v15132_v11 }
 0x69b   :  { %v5710_v8 = vpack.c.bf16 %v5704_v35, %v5704_v35  ;;  %v10441_v13 = vpack.c.bf16 %v5704_v35, %v5703_v18  ;;  %v5672_v45 = vmul.f32 %v11149_v42, %v15137_v47 }
 0x69c   :  { %5721 = vst [vmem:[#allocation5 + $0x20] sm:$0xf] %v5709_v60  ;;  %v15486_v38 = vadd.f32 %v5677_v50, %v5671_v39 }
 0x69d   :  { %5722 = vst [vmem:[#allocation5 + $0x28] sm:$0xf] %v5710_v8  ;;  %10231 = vst [vmem:[%s17732_s5 + $0x28] sm:$0xff] %v10441_v13  ;;  %v15491_v34 = vadd.f32 %v5678_v9, %v5672_v45 }
 0x69e   :  { %11154 = vtanh.f32 %v15486_v38 }
 0x69f   :  { %11156 = vtanh.f32 %v15491_v34  ;;  %v11151_v11 = vpop.eup %11150 }
 0x6a0   :  { %v11153_v47 = vpop.eup %11152 }
 0x6a4   :  { %v15495_v10 = vld [vmem:[#allocation5 + $0x28] sm:$0xff] }
 0x6a5   :  { %5767 = vrot.lane.b32.xlu1 %v15495_v10, %s11783_s29 }
 0x6a8   :  { %v11155_v37 = vpop.eup %11154 }
 0x6a9   :  { %v11157_v3 = vpop.eup %11156  ;;  %v5695_v63 = vmul.f32 %v11155_v37, %v11151_v11  ;;  %5885 = vrot.lane.b32.xlu1 %v15465_v58, %s11787_s13 }
 0x6aa   :  { %v5696_v29 = vmul.f32 %v11157_v3, %v11153_v47 }
 0x6ab   :  { %v5701_v54 = vmul.f32 %v5695_v63, %v15148_v31  ;;  %v15528_v31 = vld [vmem:[#allocation5 + $0x20] sm:$0xff] }
 0x6ac   :  { %v5702_v61 = vmul.f32 %v5696_v29, %v15153_v49  ;;  %v15541_v49 = vld [vmem:[%s17729_s2 + $0x4] ss:$8 sps:$4 sm:$0xff]  }
 0x6ad   :  { %v5707_v36 = vpack.c.bf16 %v5701_v54, %v5701_v54  ;;  %5827 = vrot.lane.b32.xlu1 %v15495_v10, %s11785_s7  ;;  %10236 = vmatprep.mubr.msk.bf16.mxu0 %vm2831_vm0, %v15541_v49 }
 0x6ae   :  { %v5708_v44 = vpack.c.bf16 %v5702_v61, %v5702_v61  ;;  %v10440_v55 = vpack.c.bf16 %v5702_v61, %v5701_v54  ;;  %10238 = vmatprep.mubr.msk.bf16.mxu1 %vm2831_vm0, %v15541_v49 }
 0x6af   :  { %5719 = vst [vmem:[#allocation5 + $0x10] sm:$0xf] %v5707_v36 }
 0x6b0   :  { %5720 = vst [vmem:[#allocation5 + $0x18] sm:$0xf] %v5708_v44  ;;  %10230 = vst [vmem:[%s17732_s5 + $0x20] sm:$0xff] %v10440_v55 }
 0x6b1   :  { %5883 = vrot.lane.b32.xlu1 %v15450_v59, %s11787_s13 }
 0x6b6   :  { %v15510_v53 = vld [vmem:[#allocation5 + $0x10] sm:$0xff] }
 0x6b7   :  { %5917 = vrot.lane.b32.xlu1 %v15510_v53, %s11788_s14  ;;  %5887 = vrot.lane.b32.xlu0 %v15510_v53, %s11787_s13  ;;  %v15555_v0 = vld [vmem:[#allocation5 + $0x18] sm:$0xff] }
 0x6bb   :  { %5945 = vrot.lane.b32.xlu1 %v15465_v58, %s11789_s15  ;;  %5797 = vrot.lane.b32.xlu0 %v15495_v10, %s11784_s30 }
 0x6bf   :  { %5943 = vrot.lane.b32.xlu1 %v15450_v59, %s11789_s15  ;;  %5915 = vrot.lane.b32.xlu0 %v15465_v58, %s11788_s14 }
 0x6c3   :  { %5977 = vrot.lane.b32.xlu1 %v15510_v53, %s11790_s18  ;;  %5857 = vrot.lane.b32.xlu0 %v15495_v10, %s11786_s8 }
 0x6c7   :  { %5765 = vrot.lane.b32.xlu1 %v15528_v31, %s11783_s29  ;;  %5913 = vrot.lane.b32.xlu0 %v15450_v59, %s11788_s14 }
 0x6cb   :  { %5795 = vrot.lane.b32.xlu1 %v15528_v31, %s11784_s30  ;;  %5947 = vrot.lane.b32.xlu0 %v15510_v53, %s11789_s15 }
 0x6cf   :  { %5825 = vrot.lane.b32.xlu1 %v15528_v31, %s11785_s7  ;;  %5975 = vrot.lane.b32.xlu0 %v15465_v58, %s11790_s18 }
 0x6d3   :  { %5855 = vrot.lane.b32.xlu1 %v15528_v31, %s11786_s8  ;;  %5973 = vrot.lane.b32.xlu0 %v15450_v59, %s11790_s18 }
 0x6d7   :  { %5761 = vrot.lane.b32.xlu1 %v15510_v53, %s11783_s29  ;;  %5763 = vrot.lane.b32.xlu0 %v15555_v0, %s11783_s29 }
 0x6db   :  { %5891 = vrot.lane.b32.xlu1 %v15528_v31, %s11787_s13  ;;  %5793 = vrot.lane.b32.xlu0 %v15555_v0, %s11784_s30 }
 0x6df   :  { %5821 = vrot.lane.b32.xlu1 %v15510_v53, %s11785_s7  ;;  %5823 = vrot.lane.b32.xlu0 %v15555_v0, %s11785_s7 }
 0x6e3   :  { %5923 = vrot.lane.b32.xlu1 %v15495_v10, %s11788_s14  ;;  %5853 = vrot.lane.b32.xlu0 %v15555_v0, %s11786_s8 }
 0x6e7   :  { %5951 = vrot.lane.b32.xlu1 %v15528_v31, %s11789_s15  ;;  %5791 = vrot.lane.b32.xlu0 %v15510_v53, %s11784_s30 }
 0x6eb   :  { %5983 = vrot.lane.b32.xlu1 %v15495_v10, %s11790_s18  ;;  %5893 = vrot.lane.b32.xlu0 %v15495_v10, %s11787_s13 }
 0x6ef   :  { %5889 = vrot.lane.b32.xlu1 %v15555_v0, %s11787_s13  ;;  %5921 = vrot.lane.b32.xlu0 %v15528_v31, %s11788_s14 }
 0x6f2   :  { %v5788_v12 = vpop.permute.xlu0 %5787  ;;  %v5758_v51 = vpop.permute.xlu1 %5757 }
 0x6f3   :  { %5949 = vrot.lane.b32.xlu1 %v15555_v0, %s11789_s15  ;;  %5953 = vrot.lane.b32.xlu0 %v15495_v10, %s11789_s15 }
 0x6f6   :  { %v5848_v62 = vpop.permute.xlu0 %5847  ;;  %v5818_v27 = vpop.permute.xlu1 %5817 }
 0x6f7   :  { %5851 = vrot.lane.b32.xlu0 %v15510_v53, %s11786_s8 }
 0x6fa   :  { %v15591_v16 = vpop.permute.xlu0 %5759  ;;  %v15602_v24 = vpop.permute.xlu1 %5789 }
 0x6fb   :  { %5981 = vrot.lane.b32.xlu0 %v15528_v31, %s11790_s18  ;;  %v5773_v46 = vsel %vm425_vm1, %v5758_v51, %v15591_v16  ;;  %v5803_v57 = vsel %vm666_vm2, %v5788_v12, %v15602_v24 }
 0x6fc   :  { %6109 = vmatprep.subr.bf16.mxu0 %v5773_v46 }
 0x6fe   :  { %v15604_v56 = vpop.permute.xlu1 %5849  ;;  %v15615_v30 = vpop.permute.xlu0 %5819 }
 0x6ff   :  { %5919 = vrot.lane.b32.xlu0 %v15555_v0, %s11788_s14  ;;  %v5833_v32 = vsel %vm907_vm3, %v5818_v27, %v15615_v30  ;;  %v5863_v33 = vsel %vm1148_vm4, %v5848_v62, %v15604_v56 }
 0x703   :  { %5979 = vrot.lane.b32.xlu0 %v15555_v0, %s11790_s18 }
 0x717   :  { %v5768_v43 = vpop.permute.xlu1 %5767 }
 0x718   :  { %v5774_v40 = vsel %vm425_vm1, %v5768_v43, %v5758_v51  ;;  %v15685_v51 = vld [vmem:[%s17729_s2 + $0x14] ss:$8 sps:$4 sm:$0xff]  }
 0x719   :  { %6110 = vmatpush1.bf16.msra.mxu0 %v5774_v40 }
 0x71a   :  { %6111 = vmatprep.subr.bf16.mxu0 %v5803_v57 }
 0x71b   :  { %v5886_v21 = vpop.permute.xlu1 %5885 }
 0x71f   :  { %v15611_v23 = vpop.permute.xlu1 %5827 }
 0x720   :  { %v5834_v50 = vsel %vm907_vm3, %v15611_v23, %v5818_v27 }
 0x723   :  { %v15613_v14 = vpop.permute.xlu1 %5883 }
 0x724   :  { %v5899_v13 = vsel %vm1485_vm5, %v15613_v14, %v5886_v21 }
 0x729   :  { %v15617_v19 = vpop.permute.xlu0 %5887  ;;  %v15619_v48 = vpop.permute.xlu1 %5917 }
 0x72a   :  { %v5898_v60 = vsel %vm1485_vm5, %v5886_v21, %v15617_v19  ;;  %v15701_v21 = vld [vmem:[%s17729_s2 + $0x10] ss:$8 sps:$4 sm:$0xff]  }
 0x72d   :  { %v5798_v5 = vpop.permute.xlu0 %5797  ;;  %v5946_v2 = vpop.permute.xlu1 %5945 }
 0x72e   :  { %v5804_v7 = vsel %vm666_vm2, %v5798_v5, %v5788_v12  ;;  %v15678_v12 = vld [vmem:[%s17729_s2] ss:$8 sps:$4 sm:$0xff]  }
 0x72f   :  { %6112 = vmatpush1.bf16.msra.mxu0 %v5804_v7 }
 0x730   :  { %6113 = vmatprep.subr.bf16.mxu0 %v5833_v32 }
 0x731   :  { %v5916_v6 = vpop.permute.xlu0 %5915  ;;  %v15626_v18 = vpop.permute.xlu1 %5943 }
 0x732   :  { %v5959_v63 = vsel %vm1967_vm7, %v15626_v18, %v5946_v2 }
 0x733   :  { %6114 = vmatpush1.bf16.msra.mxu0 %v5834_v50 }
 0x734   :  { %6115 = vmatprep.subr.bf16.mxu0 %v5863_v33 }
 0x735   :  { %v5858_v22 = vpop.permute.xlu0 %5857  ;;  %v15634_v35 = vpop.permute.xlu1 %5977 }
 0x736   :  { %v5864_v9 = vsel %vm1148_vm4, %v5858_v22, %v5848_v62 }
 0x737   :  { %6116 = vmatpush1.bf16.msra.mxu0 %v5864_v9 }
 0x738   :  { %6117 = vmatprep.subr.bf16.mxu0 %v15465_v58  ;;  %v5928_v58 = vsel %vm1726_vm6, %v5916_v6, %v15619_v48 }
 0x739   :  { %v15639_v25 = vpop.permute.xlu0 %5913  ;;  %v5766_v42 = vpop.permute.xlu1 %5765 }
 0x73a   :  { %v5929_v11 = vsel %vm1726_vm6, %v15639_v25, %v5916_v6  ;;  %v5769_v62 = vsel %vm425_vm1, %v5766_v42, %v5768_v43 }
 0x73b   :  { %6118 = vmatpush1.bf16.msra.mxu0 %v15450_v59 }
 0x73c   :  { %6119 = vmatprep.subr.bf16.mxu0 %v5898_v60 }
 0x73d   :  { %v15645_v39 = vpop.permute.xlu0 %5947  ;;  %v5796_v8 = vpop.permute.xlu1 %5795 }
 0x73e   :  { %v5958_v47 = vsel %vm1967_vm7, %v5946_v2, %v15645_v39  ;;  %v5799_v40 = vsel %vm666_vm2, %v5796_v8, %v5798_v5 }
 0x73f   :  { %6120 = vmatpush1.bf16.msra.mxu0 %v5899_v13 }
 0x740   :  { %6121 = vmatprep.subr.bf16.mxu0 %v5928_v58 }
 0x741   :  { %v5976_v45 = vpop.permute.xlu0 %5975  ;;  %v5826_v59 = vpop.permute.xlu1 %5825 }
 0x742   :  { %v5988_v29 = vsel %vm2208_vm8, %v5976_v45, %v15634_v35  ;;  %v5829_v2 = vsel %vm907_vm3, %v5826_v59, %v15611_v23 }
 0x743   :  { %6122 = vmatpush1.bf16.msra.mxu0 %v5929_v11 }
 0x744   :  { %6123 = vmatprep.subr.bf16.mxu0 %v5958_v47 }
 0x745   :  { %v15659_v37 = vpop.permute.xlu0 %5973  ;;  %v5856_v3 = vpop.permute.xlu1 %5855 }
 0x746   :  { %v5989_v36 = vsel %vm2208_vm8, %v15659_v37, %v5976_v45  ;;  %v5859_v6 = vsel %vm1148_vm4, %v5856_v3, %v5858_v22 }
 0x747   :  { %6124 = vmatpush1.bf16.msra.mxu0 %v5959_v63 }
 0x748   :  { %6125 = vmatprep.subr.bf16.mxu0 %v5988_v29 }
 0x749   :  { %v5764_v54 = vpop.permute.xlu0 %5763  ;;  %v5762_v61 = vpop.permute.xlu1 %5761 }
 0x74a   :  { %v5771_v44 = vsel %vm425_vm1, %v5762_v61, %v5764_v54  ;;  %v5772_v55 = vsel %vm425_vm1, %v15591_v16, %v5762_v61  ;;  %v5770_v16 = vsel %vm425_vm1, %v5764_v54, %v5766_v42 }
 0x74b   :  { %6126 = vmatpush1.bf16.msra.mxu0 %v5989_v36  ;;  %6162 = vmatprep.subr.bf16.mxu1 %v5771_v44 }
 0x74c   :  { %6163 = vmatpush1.bf16.msra.mxu1 %v5772_v55  ;;  %6215 = vmatprep.subr.bf16.mxu0 %v5769_v62 }
 0x74d   :  { %v5794_v46 = vpop.permute.xlu0 %5793  ;;  %v15690_v27 = vpop.permute.xlu1 %5891 }
 0x74e   :  { %6142 = vmatmul.mubr.bf16.vlgmr.msra.gmra.mrb[24].mxu0 %v15678_v12  ;;  %v5800_v57 = vsel %vm666_vm2, %v5794_v46, %v5796_v8 }
 0x74f   :  { %6216 = vmatpush1.bf16.msra.mxu0 %v5770_v16  ;;  %10237 = vmatprep.mubr.msk.bf16.mxu0 %vm2831_vm0, %v15685_v51 }
 0x750   :  { %6217 = vmatprep.subr.bf16.mxu0 %v5799_v40 }
 0x751   :  { %v5824_v43 = vpop.permute.xlu0 %5823  ;;  %v5822_v5 = vpop.permute.xlu1 %5821 }
 0x752   :  { %v5830_v32 = vsel %vm907_vm3, %v5824_v43, %v5826_v59  ;;  %v5831_v22 = vsel %vm907_vm3, %v5822_v5, %v5824_v43 }
 0x753   :  { %6218 = vmatpush1.bf16.msra.mxu0 %v5800_v57 }
 0x754   :  { %6219 = vmatprep.subr.bf16.mxu0 %v5829_v2 }
 0x755   :  { %v5854_v7 = vpop.permute.xlu0 %5853  ;;  %v5924_v42 = vpop.permute.xlu1 %5923 }
 0x756   :  { %6152 = vmatmul.mubr.bf16.gmra.mrb[28].mxu0 %v15701_v21  ;;  %v5860_v33 = vsel %vm1148_vm4, %v5854_v7, %v5856_v3  ;;  %v5930_v45 = vsel %vm1726_vm6, %v5924_v42, %v15639_v25 }
 0x757   :  { %6220 = vmatpush1.bf16.msra.mxu0 %v5830_v32  ;;  %10240 = vmatprep.mubr.msk.bf16.mxu0 %vm2831_vm0, %v15541_v49 }
 0x758   :  { %6221 = vmatprep.subr.bf16.mxu0 %v5859_v6 }
 0x759   :  { %v5792_v50 = vpop.permute.xlu0 %5791  ;;  %v5952_v13 = vpop.permute.xlu1 %5951 }
 0x75a   :  { %v5801_v23 = vsel %vm666_vm2, %v5792_v50, %v5794_v46  ;;  %v5802_v9 = vsel %vm666_vm2, %v15602_v24, %v5792_v50  ;;  %v5832_v24 = vsel %vm907_vm3, %v15615_v30, %v5822_v5 }
 0x75b   :  { %6164 = vmatprep.subr.bf16.mxu1 %v5801_v23  ;;  %6222 = vmatpush1.bf16.msra.mxu0 %v5860_v33 }
 0x75c   :  { %6165 = vmatpush1.bf16.msra.mxu1 %v5802_v9  ;;  %6223 = vmatprep.subr.bf16.mxu0 %v15495_v10 }
 0x75d   :  { %v5894_v60 = vpop.permute.xlu0 %5893  ;;  %6166 = vmatprep.subr.bf16.mxu1 %v5831_v22  ;;  %v5984_v59 = vpop.permute.xlu1 %5983 }
 0x75e   :  { %v5900_v8 = vsel %vm1485_vm5, %v5894_v60, %v15613_v14  ;;  %v5895_v10 = vsel %vm1485_vm5, %v15690_v27, %v5894_v60 }
 0x75f   :  { %6224 = vmatpush1.bf16.msra.mxu0 %v15528_v31 }
 0x760   :  { %6167 = vmatpush1.bf16.msra.mxu1 %v5832_v24  ;;  %6225 = vmatprep.subr.bf16.mxu0 %v5900_v8 }
 0x761   :  { %v5922_v58 = vpop.permute.xlu0 %5921  ;;  %v5890_v63 = vpop.permute.xlu1 %5889 }
 0x762   :  { %v5925_v31 = vsel %vm1726_vm6, %v5922_v58, %v5924_v42 }
 0x763   :  { %6226 = vmatpush1.bf16.msra.mxu0 %v5895_v10 }
 0x764   :  { %6227 = vmatprep.subr.bf16.mxu0 %v5930_v45 }
 0x765   :  { %v5954_v14 = vpop.permute.xlu0 %5953 }
 0x766   :  { %v5960_v30 = vsel %vm1967_vm7, %v5954_v14, %v15626_v18  ;;  %v5955_v3 = vsel %vm1967_vm7, %v5952_v13, %v5954_v14  ;;  %v5990_v18 = vsel %vm2208_vm8, %v5984_v59, %v15659_v37  ;;  %v5897_v37 = vsel %vm1485_vm5, %v15617_v19, %v5890_v63 }
 0x767   :  { %6228 = vmatpush1.bf16.msra.mxu0 %v5925_v31 }
 0x768   :  { %6229 = vmatprep.subr.bf16.mxu0 %v5960_v30 }
 0x769   :  { %v5852_v11 = vpop.permute.xlu0 %5851 }
 0x76a   :  { %v5861_v47 = vsel %vm1148_vm4, %v5852_v11, %v5854_v7  ;;  %v5862_v25 = vsel %vm1148_vm4, %v15604_v56, %v5852_v11  ;;  %v5896_v56 = vsel %vm1485_vm5, %v5890_v63, %v15690_v27 }
 0x76b   :  { %6168 = vmatprep.subr.bf16.mxu1 %v5861_v47  ;;  %6230 = vmatpush1.bf16.msra.mxu0 %v5955_v3 }
 0x76c   :  { %6169 = vmatpush1.bf16.msra.mxu1 %v5862_v25  ;;  %6231 = vmatprep.subr.bf16.mxu0 %v5990_v18 }
 0x76d   :  { %v5982_v29 = vpop.permute.xlu0 %5981  ;;  %6170 = vmatprep.subr.bf16.mxu1 %v15555_v0 }
 0x76e   :  { %v5985_v54 = vsel %vm2208_vm8, %v5982_v29, %v5984_v59 }
 0x76f   :  { %6232 = vmatpush1.bf16.msra.mxu0 %v5985_v54 }
 0x770   :  { %6171 = vmatpush1.bf16.msra.mxu1 %v15510_v53  ;;  %v5950_v53 = vpop.permute.xlu1 %5949 }
 0x771   :  { %v5920_v61 = vpop.permute.xlu0 %5919  ;;  %6172 = vmatprep.subr.bf16.mxu1 %v5896_v56  ;;  %v5956_v44 = vsel %vm1967_vm7, %v5950_v53, %v5952_v13  ;;  %v5957_v19 = vsel %vm1967_vm7, %v15645_v39, %v5950_v53 }
 0x772   :  { %6248 = vmatmul.mubr.bf16.vlgmr.msra.gmra.mrb[32].mxu0 %v15678_v12  ;;  %v5926_v0 = vsel %vm1726_vm6, %v5920_v61, %v5922_v58  ;;  %v5927_v36 = vsel %vm1726_vm6, %v15619_v48, %v5920_v61 }
 0x773   :  { %10241 = vmatprep.mubr.msk.bf16.mxu0 %vm2831_vm0, %v15685_v51 }
 0x774   :  { %6173 = vmatpush1.bf16.msra.mxu1 %v5897_v37 }
 0x775   :  { %6174 = vmatprep.subr.bf16.mxu1 %v5926_v0  ;;  %v5980_v55 = vpop.permute.xlu0 %5979 }
 0x776   :  { %v5986_v62 = vsel %vm2208_vm8, %v5980_v55, %v5982_v29  ;;  %v5987_v48 = vsel %vm2208_vm8, %v15634_v35, %v5980_v55 }
 0x778   :  { %6175 = vmatpush1.bf16.msra.mxu1 %v5927_v36 }
 0x779   :  { %6176 = vmatprep.subr.bf16.mxu1 %v5956_v44 }
 0x77a   :  { %6258 = vmatmul.mubr.bf16.gmra.mrb[36].mxu0 %v15701_v21 }
 0x77b   :  { %10272 = vmatprep.mubr.msk.bf16.mxu0 %vm2831_vm0, %v15541_v49 }
 0x77c   :  { %6177 = vmatpush1.bf16.msra.mxu1 %v5957_v19 }
 0x77d   :  { %6178 = vmatprep.subr.bf16.mxu1 %v5986_v62 }
 0x780   :  { %6179 = vmatpush1.bf16.msra.mxu1 %v5987_v48 }
 0x783   :  { %6195 = vmatmul.mubr.bf16.vlgmr.msra.gmra.mrb[24].mxu1 %v15678_v12 }
 0x784   :  { %10239 = vmatprep.mubr.msk.bf16.mxu1 %vm2831_vm0, %v15685_v51 }
 0x78b   :  { %6205 = vmatmul.mubr.bf16.gmra.mrb[28].mxu1 %v15701_v21 }
 0x78c   :  { %10270 = vmatprep.mubr.msk.bf16.mxu1 %vm2831_vm0, %v15541_v49 }
 0x821   :  { %v6143_v39 = vpop.f32.mrb[24].mxu0 }
 0x822   :  { %v10508_v46 = vadd.f32 %v6143_v39, %v15041_v17  ;;  %v6145_v16 = vpop.f32.mrb[25].mxu0 }
 0x823   :  { %v10509_v27 = vadd.f32 %v6145_v16, %v15041_v17  ;;  %v6147_v40 = vpop.f32.mrb[26].mxu0 }
 0x824   :  { %v10242_v43 = vmul.f32 -1.442695, %v10508_v46  ;;  %v10510_v35 = vadd.f32 %v6147_v40, %v15043_v41  ;;  %v6149_v57 = vpop.f32.mrb[27].mxu0 }
 0x825   :  { %v10243_v2 = vmul.f32 -1.442695, %v10509_v27  ;;  %v10511_v5 = vadd.f32 %v6149_v57, %v15043_v41 }
 0x826   :  { %11158 = vpow2.f32 %v10242_v43  ;;  %v10248_v7 = vmul.f32 -1.442695, %v10510_v35 }
 0x827   :  { %11160 = vpow2.f32 %v10243_v2  ;;  %v10249_v32 = vmul.f32 -1.442695, %v10511_v5 }
 0x828   :  { %11162 = vpow2.f32 %v10248_v7 }
 0x829   :  { %11164 = vpow2.f32 %v10249_v32  ;;  %v6153_v49 = vpop.f32.mrb[28].mxu0 }
 0x82a   :  { %v6155_v6 = vpop.f32.mrb[29].mxu0  ;;  %v10512_v50 = vadd.f32 %v6153_v49, %v15049_v20 }
 0x82b   :  { %v6157_v23 = vpop.f32.mrb[30].mxu0  ;;  %v10513_v33 = vadd.f32 %v6155_v6, %v15049_v20 }
 0x82c   :  { %v10514_v9 = vadd.f32 %v6157_v23, %v15051_v1  ;;  %v6159_v42 = vpop.f32.mrb[31].mxu0  ;;  %11166 = vtanh.f32 %v10512_v50 }
 0x82d   :  { %v10515_v22 = vadd.f32 %v6159_v42, %v15051_v1  ;;  %11168 = vtanh.f32 %v10513_v33  ;;  %v15813_v42 = vld [vmem:[%s17731_s4] sm:$0xff] }
 0x82e   :  { %v10254_v60 = vmul.f32 -1.442695, %v10514_v9 }
 0x82f   :  { %v10255_v8 = vmul.f32 -1.442695, %v10515_v22 }
 0x830   :  { %v11159_v24 = vpop.eup %11158  ;;  %11170 = vpow2.f32 %v10254_v60 }
 0x831   :  { %v11161_v13 = vpop.eup %11160  ;;  %v6286_v58 = vadd.f32 1.0, %v11159_v24  ;;  %11172 = vpow2.f32 %v10255_v8  ;;  %v15820_v8 = vld [vmem:[%s17731_s4 + $0x8] sm:$0xff] }
 0x832   :  { %v11163_v10 = vpop.eup %11162  ;;  %v6287_v45 = vadd.f32 1.0, %v11161_v13 }
 0x833   :  { %v11165_v14 = vpop.eup %11164  ;;  %11174 = vrcp.f32 %v6286_v58  ;;  %v6322_v31 = vadd.f32 1.0, %v11163_v10 }
 0x834   :  { %11176 = vrcp.f32 %v6287_v45  ;;  %v6323_v30 = vadd.f32 1.0, %v11165_v14 }
 0x835   :  { %11178 = vrcp.f32 %v6322_v31 }
 0x836   :  { %11180 = vrcp.f32 %v6323_v30  ;;  %v11167_v59 = vpop.eup %11166 }
 0x837   :  { %v11169_v11 = vpop.eup %11168 }
 0x83a   :  { %v11171_v47 = vpop.eup %11170 }
 0x83b   :  { %v11173_v3 = vpop.eup %11172  ;;  %v6364_v29 = vadd.f32 1.0, %v11171_v47 }
 0x83c   :  { %v6365_v61 = vadd.f32 1.0, %v11173_v3 }
 0x83d   :  { %v11175_v25 = vpop.eup %11174  ;;  %11182 = vrcp.f32 %v6364_v29 }
 0x83e   :  { %v11177_v18 = vpop.eup %11176  ;;  %v6394_v63 = vmul.f32 %v11175_v25, %v11167_v59  ;;  %11184 = vrcp.f32 %v6365_v61 }
 0x83f   :  { %v11179_v54 = vpop.eup %11178  ;;  %v6395_v56 = vmul.f32 %v11177_v18, %v11169_v11 }
 0x840   :  { %v11181_v37 = vpop.eup %11180  ;;  %v6388_v0 = vmul.f32 %v11179_v54, %v15427_v4 }
 0x841   :  { %v6389_v53 = vmul.f32 %v11181_v37, %v15429_v28 }
 0x842   :  { %v15798_v36 = vadd.f32 %v6394_v63, %v6388_v0 }
 0x843   :  { %v15800_v44 = vadd.f32 %v6395_v56, %v6389_v53 }
 0x844   :  { %11186 = vtanh.f32 %v15798_v36 }
 0x845   :  { %11188 = vtanh.f32 %v15800_v44  ;;  %v6249_v55 = vpop.f32.mrb[32].mxu0 }
 0x846   :  { %v10524_v19 = vadd.f32 %v6249_v55, %v15041_v17  ;;  %v6251_v62 = vpop.f32.mrb[33].mxu0 }
 0x847   :  { %v10525_v48 = vadd.f32 %v6251_v62, %v15041_v17  ;;  %v6253_v39 = vpop.f32.mrb[34].mxu0  ;;  %v11183_v35 = vpop.eup %11182 }
 0x848   :  { %v10246_v4 = vmul.f32 -1.442695, %v10524_v19  ;;  %v10526_v28 = vadd.f32 %v6253_v39, %v15043_v41  ;;  %v6255_v46 = vpop.f32.mrb[35].mxu0  ;;  %v11185_v57 = vpop.eup %11184 }
 0x849   :  { %v10247_v16 = vmul.f32 -1.442695, %v10525_v48  ;;  %v10527_v27 = vadd.f32 %v6255_v46, %v15043_v41 }
 0x84a   :  { %11190 = vpow2.f32 %v10246_v4  ;;  %v10252_v40 = vmul.f32 -1.442695, %v10526_v28 }
 0x84b   :  { %11192 = vpow2.f32 %v10247_v16  ;;  %v10253_v43 = vmul.f32 -1.442695, %v10527_v27 }
 0x84c   :  { %11194 = vpow2.f32 %v10252_v40 }
 0x84d   :  { %11196 = vpow2.f32 %v10253_v43  ;;  %v6259_v2 = vpop.f32.mrb[36].mxu0 }
 0x84e   :  { %v11187_v5 = vpop.eup %11186  ;;  %v6261_v7 = vpop.f32.mrb[37].mxu0  ;;  %v10528_v6 = vadd.f32 %v6259_v2, %v15049_v20 }
 0x84f   :  { %v11189_v32 = vpop.eup %11188  ;;  %v6412_v49 = vmul.f32 %v11187_v5, %v11183_v35  ;;  %v6263_v50 = vpop.f32.mrb[38].mxu0  ;;  %v10529_v13 = vadd.f32 %v6261_v7, %v15049_v20 }
 0x850   :  { %v6413_v23 = vmul.f32 %v11189_v32, %v11185_v57  ;;  %v10530_v33 = vadd.f32 %v6263_v50, %v15051_v1  ;;  %v6265_v9 = vpop.f32.mrb[39].mxu0  ;;  %11198 = vtanh.f32 %v10528_v6 }
 0x851   :  { %v6418_v22 = vmul.f32 %v15813_v42, %v6412_v49  ;;  %v10531_v60 = vadd.f32 %v6265_v9, %v15051_v1 }
 0x852   :  { %v6419_v24 = vmul.f32 %v15820_v8, %v6413_v23  ;;  %v10258_v58 = vmul.f32 -1.442695, %v10530_v33 }
 0x853   :  { %v6424_v10 = vpack.c.bf16 %v6418_v22, %v6418_v22  ;;  %v10259_v45 = vmul.f32 -1.442695, %v10531_v60 }
 0x854   :  { %v11191_v14 = vpop.eup %11190  ;;  %v6425_v31 = vpack.c.bf16 %v6419_v24, %v6419_v24  ;;  %v10442_v30 = vpack.c.bf16 %v6419_v24, %v6418_v22  ;;  %11200 = vpow2.f32 %v10258_v58 }
 0x855   :  { %v11193_v59 = vpop.eup %11192  ;;  %6436 = vst [vmem:[#allocation5] sm:$0xf] %v6424_v10  ;;  %v6290_v11 = vadd.f32 1.0, %v11191_v14  ;;  %11202 = vpow2.f32 %v10259_v45 }
 0x856   :  { %v11195_v47 = vpop.eup %11194  ;;  %6437 = vst [vmem:[#allocation5 + $0x8] sm:$0xf] %v6425_v31  ;;  %10263 = vst [vmem:[%s17732_s5 + $0x30] sm:$0xff] %v10442_v30  ;;  %v6291_v3 = vadd.f32 1.0, %v11193_v59  ;;  %11204 = vtanh.f32 %v10529_v13  ;;  %v6196_v25 = vpop.f32.mrb[24].mxu1 }
 0x857   :  { %v11197_v18 = vpop.eup %11196  ;;  %11206 = vrcp.f32 %v6290_v11  ;;  %v6326_v63 = vadd.f32 1.0, %v11195_v47  ;;  %v10516_v29 = vadd.f32 %v6196_v25, %v15041_v17  ;;  %v6198_v54 = vpop.f32.mrb[25].mxu1 }
 0x858   :  { %11208 = vrcp.f32 %v6291_v3  ;;  %v6327_v56 = vadd.f32 1.0, %v11197_v18  ;;  %v10517_v61 = vadd.f32 %v6198_v54, %v15041_v17  ;;  %v6200_v37 = vpop.f32.mrb[26].mxu1 }
 0x859   :  { %11210 = vrcp.f32 %v6326_v63  ;;  %v10244_v0 = vmul.f32 -1.442695, %v10516_v29  ;;  %v10518_v53 = vadd.f32 %v6200_v37, %v15043_v41  ;;  %v6202_v55 = vpop.f32.mrb[27].mxu1 }
 0x85a   :  { %11212 = vrcp.f32 %v6327_v56  ;;  %v10245_v19 = vmul.f32 -1.442695, %v10517_v61  ;;  %v10519_v62 = vadd.f32 %v6202_v55, %v15043_v41  ;;  %v11199_v28 = vpop.eup %11198 }
 0x85b   :  { %11214 = vpow2.f32 %v10244_v0  ;;  %v10250_v48 = vmul.f32 -1.442695, %v10518_v53 }
 0x85c   :  { %11216 = vpow2.f32 %v10245_v19  ;;  %v10251_v39 = vmul.f32 -1.442695, %v10519_v62  ;;  %v15831_v4 = vld [vmem:[#allocation5] sm:$0xff] }
 0x85d   :  { %11218 = vpow2.f32 %v10250_v48  ;;  %6506 = vrot.lane.b32.xlu0 %v15831_v4, %s11784_s30  ;;  %6476 = vrot.lane.b32.xlu1 %v15831_v4, %s11783_s29  ;;  %v15846_v10 = vld [vmem:[#allocation5 + $0x8] sm:$0xff]  ;;  %v15866_v48 = vld [vmem:[%s17731_s4 + $0x20] sm:$0xff] }
 0x85e   :  { %v11201_v46 = vpop.eup %11200  ;;  %11220 = vpow2.f32 %v10251_v39  ;;  %v6206_v16 = vpop.f32.mrb[28].mxu1 }
 0x85f   :  { %v11203_v27 = vpop.eup %11202  ;;  %v6368_v40 = vadd.f32 1.0, %v11201_v46  ;;  %v6208_v43 = vpop.f32.mrb[29].mxu1  ;;  %v10520_v2 = vadd.f32 %v6206_v16, %v15049_v20 }
 0x860   :  { %v11205_v35 = vpop.eup %11204  ;;  %v6369_v57 = vadd.f32 1.0, %v11203_v27  ;;  %v6210_v5 = vpop.f32.mrb[30].mxu1  ;;  %v10521_v32 = vadd.f32 %v6208_v43, %v15049_v20  ;;  %v15872_v27 = vld [vmem:[%s17731_s4 + $0x28] sm:$0xff] }
 0x861   :  { %v11207_v7 = vpop.eup %11206  ;;  %v10522_v49 = vadd.f32 %v6210_v5, %v15051_v1  ;;  %6566 = vrot.lane.b32.xlu0 %v15831_v4, %s11786_s8  ;;  %6536 = vrot.lane.b32.xlu1 %v15831_v4, %s11785_s7  ;;  %v6212_v6 = vpop.f32.mrb[31].mxu1  ;;  %11222 = vrcp.f32 %v6368_v40 }
 0x862   :  { %v11209_v50 = vpop.eup %11208  ;;  %v6398_v23 = vmul.f32 %v11207_v7, %v11199_v28  ;;  %v10523_v33 = vadd.f32 %v6212_v6, %v15051_v1  ;;  %11224 = vrcp.f32 %v6369_v57 }
 0x863   :  { %v11211_v9 = vpop.eup %11210  ;;  %v6399_v22 = vmul.f32 %v11209_v50, %v11205_v35  ;;  %v10256_v60 = vmul.f32 -1.442695, %v10522_v49  ;;  %11226 = vtanh.f32 %v10520_v2 }
 0x864   :  { %v11213_v24 = vpop.eup %11212  ;;  %v6392_v13 = vmul.f32 %v11211_v9, %v15472_v15  ;;  %v10257_v58 = vmul.f32 -1.442695, %v10523_v33  ;;  %11228 = vtanh.f32 %v10521_v32 }
 0x865   :  { %v11215_v45 = vpop.eup %11214  ;;  %v6393_v14 = vmul.f32 %v11213_v24, %v15474_v52  ;;  %6478 = vrot.lane.b32.xlu0 %v15846_v10, %s11783_s29  ;;  %6508 = vrot.lane.b32.xlu1 %v15846_v10, %s11784_s30  ;;  %11230 = vpow2.f32 %v10256_v60  ;;  %v15895_v24 = vld [vmem:[%s17731_s4 + $0x10] sm:$0xff] }
 0x866   :  { %v11217_v31 = vpop.eup %11216  ;;  %v15853_v30 = vadd.f32 %v6398_v23, %v6392_v13  ;;  %v6288_v59 = vadd.f32 1.0, %v11215_v45  ;;  %11232 = vpow2.f32 %v10257_v58  ;;  %v15901_v58 = vld [vmem:[%s17731_s4 + $0x18] sm:$0xff] }
 0x867   :  { %v11219_v15 = vpop.eup %11218  ;;  %v15855_v11 = vadd.f32 %v6399_v22, %v6393_v14  ;;  %v6289_v47 = vadd.f32 1.0, %v11217_v31 }
 0x868   :  { %v11221_v3 = vpop.eup %11220  ;;  %11234 = vtanh.f32 %v15853_v30  ;;  %v6324_v52 = vadd.f32 1.0, %v11219_v15 }
 0x869   :  { %11236 = vtanh.f32 %v15855_v11  ;;  %v6325_v25 = vadd.f32 1.0, %v11221_v3  ;;  %6538 = vrot.lane.b32.xlu0 %v15846_v10, %s11785_s7  ;;  %6568 = vrot.lane.b32.xlu1 %v15846_v10, %s11786_s8 }
 0x86a   :  { %11238 = vrcp.f32 %v6288_v59 }
 0x86b   :  { %11240 = vrcp.f32 %v6289_v47  ;;  %v11223_v18 = vpop.eup %11222 }
 0x86c   :  { %11242 = vrcp.f32 %v6324_v52  ;;  %v11225_v63 = vpop.eup %11224 }
 0x86d   :  { %11244 = vrcp.f32 %v6325_v25  ;;  %v11227_v29 = vpop.eup %11226 }
 0x86e   :  { %v11229_v54 = vpop.eup %11228 }
 0x86f   :  { %v11231_v56 = vpop.eup %11230 }
 0x870   :  { %v11233_v61 = vpop.eup %11232  ;;  %v6366_v46 = vadd.f32 1.0, %v11231_v56 }
 0x871   :  { %v6367_v35 = vadd.f32 1.0, %v11233_v61 }
 0x872   :  { %v11235_v37 = vpop.eup %11234  ;;  %11246 = vrcp.f32 %v6366_v46 }
 0x873   :  { %v11237_v0 = vpop.eup %11236  ;;  %v6416_v53 = vmul.f32 %v11235_v37, %v11223_v18  ;;  %11248 = vrcp.f32 %v6367_v35 }
 0x874   :  { %v11239_v55 = vpop.eup %11238  ;;  %v6417_v19 = vmul.f32 %v11237_v0, %v11225_v63 }
 0x875   :  { %v11241_v62 = vpop.eup %11240  ;;  %v6422_v39 = vmul.f32 %v15866_v48, %v6416_v53  ;;  %v6396_v28 = vmul.f32 %v11239_v55, %v11227_v29 }
 0x876   :  { %v11243_v16 = vpop.eup %11242  ;;  %v6423_v40 = vmul.f32 %v15872_v27, %v6417_v19  ;;  %v6397_v43 = vmul.f32 %v11241_v62, %v11229_v54 }
 0x877   :  { %v11245_v57 = vpop.eup %11244  ;;  %v6428_v2 = vpack.c.bf16 %v6422_v39, %v6422_v39  ;;  %v6390_v5 = vmul.f32 %v11243_v16, %v15486_v38 }
 0x878   :  { %v6429_v7 = vpack.c.bf16 %v6423_v40, %v6423_v40  ;;  %v10444_v32 = vpack.c.bf16 %v6423_v40, %v6422_v39  ;;  %v6391_v49 = vmul.f32 %v11245_v57, %v15491_v34 }
 0x879   :  { %6440 = vst [vmem:[#allocation5 + $0x20] sm:$0xf] %v6428_v2  ;;  %v15877_v6 = vadd.f32 %v6396_v28, %v6390_v5 }
 0x87a   :  { %6441 = vst [vmem:[#allocation5 + $0x28] sm:$0xf] %v6429_v7  ;;  %10265 = vst [vmem:[%s17732_s5 + $0x40] sm:$0xff] %v10444_v32  ;;  %v15882_v50 = vadd.f32 %v6397_v43, %v6391_v49 }
 0x87b   :  { %11250 = vtanh.f32 %v15877_v6 }
 0x87c   :  { %11252 = vtanh.f32 %v15882_v50  ;;  %v11247_v34 = vpop.eup %11246 }
 0x87d   :  { %v11249_v23 = vpop.eup %11248 }
 0x880   :  { %v15929_v47 = vld [vmem:[#allocation5 + $0x20] sm:$0xff] }
 0x881   :  { %v15886_v38 = vld [vmem:[#allocation5 + $0x28] sm:$0xff] }
 0x882   :  { %6486 = vrot.lane.b32.xlu1 %v15886_v38, %s11783_s29 }
 0x885   :  { %v11251_v33 = vpop.eup %11250 }
 0x886   :  { %v11253_v9 = vpop.eup %11252  ;;  %v6414_v22 = vmul.f32 %v11251_v33, %v11247_v34  ;;  %6604 = vrot.lane.b32.xlu1 %v15846_v10, %s11787_s13 }
 0x887   :  { %v6415_v60 = vmul.f32 %v11253_v9, %v11249_v23 }
 0x888   :  { %v6420_v13 = vmul.f32 %v15895_v24, %v6414_v22 }
 0x889   :  { %v6421_v45 = vmul.f32 %v15901_v58, %v6415_v60 }
 0x88a   :  { %v6426_v14 = vpack.c.bf16 %v6420_v13, %v6420_v13  ;;  %6546 = vrot.lane.b32.xlu1 %v15886_v38, %s11785_s7 }
 0x88b   :  { %v6427_v31 = vpack.c.bf16 %v6421_v45, %v6421_v45  ;;  %v10443_v59 = vpack.c.bf16 %v6421_v45, %v6420_v13 }
 0x88c   :  { %6438 = vst [vmem:[#allocation5 + $0x10] sm:$0xf] %v6426_v14 }
 0x88d   :  { %6439 = vst [vmem:[#allocation5 + $0x18] sm:$0xf] %v6427_v31  ;;  %10264 = vst [vmem:[%s17732_s5 + $0x38] sm:$0xff] %v10443_v59 }
 0x88e   :  { %6602 = vrot.lane.b32.xlu1 %v15831_v4, %s11787_s13 }
 0x893   :  { %v15911_v15 = vld [vmem:[#allocation5 + $0x10] sm:$0xff] }
 0x894   :  { %6636 = vrot.lane.b32.xlu1 %v15911_v15, %s11788_s14  ;;  %6606 = vrot.lane.b32.xlu0 %v15911_v15, %s11787_s13  ;;  %v15947_v3 = vld [vmem:[#allocation5 + $0x18] sm:$0xff] }
 0x898   :  { %6664 = vrot.lane.b32.xlu1 %v15846_v10, %s11789_s15  ;;  %6516 = vrot.lane.b32.xlu0 %v15886_v38, %s11784_s30 }
 0x89c   :  { %6662 = vrot.lane.b32.xlu1 %v15831_v4, %s11789_s15  ;;  %6634 = vrot.lane.b32.xlu0 %v15846_v10, %s11788_s14 }
 0x8a0   :  { %6696 = vrot.lane.b32.xlu1 %v15911_v15, %s11790_s18  ;;  %6576 = vrot.lane.b32.xlu0 %v15886_v38, %s11786_s8 }
 0x8a4   :  { %6484 = vrot.lane.b32.xlu1 %v15929_v47, %s11783_s29  ;;  %6632 = vrot.lane.b32.xlu0 %v15831_v4, %s11788_s14 }
 0x8a8   :  { %6514 = vrot.lane.b32.xlu1 %v15929_v47, %s11784_s30  ;;  %6666 = vrot.lane.b32.xlu0 %v15911_v15, %s11789_s15 }
 0x8ac   :  { %6544 = vrot.lane.b32.xlu1 %v15929_v47, %s11785_s7  ;;  %6694 = vrot.lane.b32.xlu0 %v15846_v10, %s11790_s18 }
 0x8b0   :  { %6574 = vrot.lane.b32.xlu1 %v15929_v47, %s11786_s8  ;;  %6692 = vrot.lane.b32.xlu0 %v15831_v4, %s11790_s18 }
 0x8b4   :  { %6480 = vrot.lane.b32.xlu1 %v15911_v15, %s11783_s29  ;;  %6482 = vrot.lane.b32.xlu0 %v15947_v3, %s11783_s29 }
 0x8b8   :  { %6610 = vrot.lane.b32.xlu1 %v15929_v47, %s11787_s13  ;;  %6512 = vrot.lane.b32.xlu0 %v15947_v3, %s11784_s30 }
 0x8bc   :  { %6540 = vrot.lane.b32.xlu1 %v15911_v15, %s11785_s7  ;;  %6542 = vrot.lane.b32.xlu0 %v15947_v3, %s11785_s7 }
 0x8c0   :  { %6642 = vrot.lane.b32.xlu1 %v15886_v38, %s11788_s14  ;;  %6572 = vrot.lane.b32.xlu0 %v15947_v3, %s11786_s8 }
 0x8c4   :  { %6670 = vrot.lane.b32.xlu1 %v15929_v47, %s11789_s15  ;;  %6510 = vrot.lane.b32.xlu0 %v15911_v15, %s11784_s30 }
 0x8c8   :  { %6702 = vrot.lane.b32.xlu1 %v15886_v38, %s11790_s18  ;;  %6612 = vrot.lane.b32.xlu0 %v15886_v38, %s11787_s13 }
 0x8cc   :  { %6608 = vrot.lane.b32.xlu1 %v15947_v3, %s11787_s13  ;;  %6640 = vrot.lane.b32.xlu0 %v15929_v47, %s11788_s14 }
 0x8cf   :  { %v6507_v52 = vpop.permute.xlu0 %6506  ;;  %v6477_v18 = vpop.permute.xlu1 %6476 }
 0x8d0   :  { %6668 = vrot.lane.b32.xlu1 %v15947_v3, %s11789_s15  ;;  %6672 = vrot.lane.b32.xlu0 %v15886_v38, %s11789_s15 }
 0x8d3   :  { %v6567_v25 = vpop.permute.xlu0 %6566  ;;  %v6537_v54 = vpop.permute.xlu1 %6536 }
 0x8d4   :  { %6570 = vrot.lane.b32.xlu0 %v15911_v15, %s11786_s8 }
 0x8d7   :  { %v15983_v63 = vpop.permute.xlu0 %6478  ;;  %v15994_v56 = vpop.permute.xlu1 %6508 }
 0x8d8   :  { %6700 = vrot.lane.b32.xlu0 %v15929_v47, %s11790_s18  ;;  %v6492_v29 = vsel %vm425_vm1, %v6477_v18, %v15983_v63  ;;  %v6522_v53 = vsel %vm666_vm2, %v6507_v52, %v15994_v56 }
 0x8d9   :  { %6828 = vmatprep.subr.bf16.mxu1 %v6492_v29 }
 0x8db   :  { %v15996_v61 = vpop.permute.xlu1 %6568  ;;  %v16007_v39 = vpop.permute.xlu0 %6538 }
 0x8dc   :  { %6638 = vrot.lane.b32.xlu0 %v15947_v3, %s11788_s14  ;;  %v6552_v35 = vsel %vm907_vm3, %v6537_v54, %v16007_v39  ;;  %v6582_v7 = vsel %vm1148_vm4, %v6567_v25, %v15996_v61 }
 0x8e0   :  { %6698 = vrot.lane.b32.xlu0 %v15947_v3, %s11790_s18 }
 0x8f4   :  { %v6487_v37 = vpop.permute.xlu1 %6486 }
 0x8f5   :  { %v6493_v0 = vsel %vm425_vm1, %v6487_v37, %v6477_v18 }
 0x8f6   :  { %6829 = vmatpush1.bf16.msra.mxu1 %v6493_v0 }
 0x8f7   :  { %6830 = vmatprep.subr.bf16.mxu1 %v6522_v53 }
 0x8f8   :  { %v6605_v55 = vpop.permute.xlu1 %6604 }
 0x8fc   :  { %v16003_v19 = vpop.permute.xlu1 %6546 }
 0x8fd   :  { %v6553_v5 = vsel %vm907_vm3, %v16003_v19, %v6537_v54 }
 0x900   :  { %v16005_v62 = vpop.permute.xlu1 %6602 }
 0x901   :  { %v6618_v13 = vsel %vm1485_vm5, %v16005_v62, %v6605_v55 }
 0x906   :  { %v16009_v28 = vpop.permute.xlu0 %6606  ;;  %v16011_v46 = vpop.permute.xlu1 %6636 }
 0x907   :  { %v6617_v9 = vsel %vm1485_vm5, %v6605_v55, %v16009_v28 }
 0x90a   :  { %v6517_v16 = vpop.permute.xlu0 %6516  ;;  %v6665_v40 = vpop.permute.xlu1 %6664 }
 0x90b   :  { %v6523_v43 = vsel %vm666_vm2, %v6517_v16, %v6507_v52 }
 0x90c   :  { %6831 = vmatpush1.bf16.msra.mxu1 %v6523_v43 }
 0x90d   :  { %6832 = vmatprep.subr.bf16.mxu1 %v6552_v35 }
 0x90e   :  { %v6635_v57 = vpop.permute.xlu0 %6634  ;;  %v16018_v2 = vpop.permute.xlu1 %6662 }
 0x910   :  { %6833 = vmatpush1.bf16.msra.mxu1 %v6553_v5 }
 0x911   :  { %6834 = vmatprep.subr.bf16.mxu1 %v6582_v7 }
 0x912   :  { %v6577_v32 = vpop.permute.xlu0 %6576  ;;  %v16026_v49 = vpop.permute.xlu1 %6696 }
 0x913   :  { %v6583_v34 = vsel %vm1148_vm4, %v6577_v32, %v6567_v25  ;;  %v6678_v25 = vsel %vm1967_vm7, %v16018_v2, %v6665_v40 }
 0x914   :  { %6835 = vmatpush1.bf16.msra.mxu1 %v6583_v34 }
 0x915   :  { %6836 = vmatprep.subr.bf16.mxu1 %v15846_v10  ;;  %v6647_v10 = vsel %vm1726_vm6, %v6635_v57, %v16011_v46 }
 0x916   :  { %v16031_v23 = vpop.permute.xlu0 %6632  ;;  %v6485_v33 = vpop.permute.xlu1 %6484 }
 0x917   :  { %v6648_v14 = vsel %vm1726_vm6, %v16031_v23, %v6635_v57 }
 0x918   :  { %6837 = vmatpush1.bf16.msra.mxu1 %v15831_v4 }
 0x919   :  { %6838 = vmatprep.subr.bf16.mxu1 %v6617_v9 }
 0x91a   :  { %v16037_v22 = vpop.permute.xlu0 %6666  ;;  %v6515_v60 = vpop.permute.xlu1 %6514 }
 0x91b   :  { %v6677_v31 = vsel %vm1967_vm7, %v6665_v40, %v16037_v22  ;;  %v6488_v40 = vsel %vm425_vm1, %v6485_v33, %v6487_v37  ;;  %v6518_v5 = vsel %vm666_vm2, %v6515_v60, %v6517_v16 }
 0x91c   :  { %6839 = vmatpush1.bf16.msra.mxu1 %v6618_v13 }
 0x91d   :  { %6840 = vmatprep.subr.bf16.mxu1 %v6647_v10 }
 0x91e   :  { %v6695_v45 = vpop.permute.xlu0 %6694  ;;  %v6545_v4 = vpop.permute.xlu1 %6544 }
 0x91f   :  { %v6707_v18 = vsel %vm2208_vm8, %v6695_v45, %v16026_v49 }
 0x920   :  { %6841 = vmatpush1.bf16.msra.mxu1 %v6648_v14 }
 0x921   :  { %6842 = vmatprep.subr.bf16.mxu1 %v6677_v31 }
 0x922   :  { %v16051_v59 = vpop.permute.xlu0 %6692  ;;  %v6575_v52 = vpop.permute.xlu1 %6574 }
 0x923   :  { %v6708_v0 = vsel %vm2208_vm8, %v16051_v59, %v6695_v45 }
 0x924   :  { %6843 = vmatpush1.bf16.msra.mxu1 %v6678_v25 }
 0x925   :  { %6844 = vmatprep.subr.bf16.mxu1 %v6707_v18 }
 0x926   :  { %v6483_v29 = vpop.permute.xlu0 %6482  ;;  %v6481_v54 = vpop.permute.xlu1 %6480 }
 0x927   :  { %v6490_v53 = vsel %vm425_vm1, %v6481_v54, %v6483_v29  ;;  %v6491_v55 = vsel %vm425_vm1, %v15983_v63, %v6481_v54  ;;  %v6489_v35 = vsel %vm425_vm1, %v6483_v29, %v6485_v33  ;;  %v11759_v33 = vld [vmem:[%s17729_s2 + $0x4] ss:$8 sps:$4 sm:$0xff]  }
 0x928   :  { %6845 = vmatpush1.bf16.msra.mxu1 %v6708_v0  ;;  %6881 = vmatprep.subr.bf16.mxu0 %v6490_v53 }
 0x929   :  { %6882 = vmatpush1.bf16.msra.mxu0 %v6491_v55  ;;  %6934 = vmatprep.subr.bf16.mxu1 %v6488_v40  ;;  %v11761_v40 = vld [vmem:[%s17729_s2 + $0x14] ss:$8 sps:$4 sm:$0xff]  }
 0x92a   :  { %v6513_v43 = vpop.permute.xlu0 %6512  ;;  %v16072_v57 = vpop.permute.xlu1 %6610 }
 0x92b   :  { %6861 = vmatmul.mubr.bf16.vlgmr.msra.gmra.mrb[32].mxu1 %v15678_v12  ;;  %v6519_v37 = vsel %vm666_vm2, %v6513_v43, %v6515_v60  ;;  %v6548_v12 = vsel %vm907_vm3, %v6545_v4, %v16003_v19 }
 0x92c   :  { %6935 = vmatpush1.bf16.msra.mxu1 %v6489_v35  ;;  %10271 = vmatprep.mubr.msk.bf16.mxu1 %vm2831_vm0, %v15685_v51  ;;  %v6578_v51 = vsel %vm1148_vm4, %v6575_v52, %v6577_v32 }
 0x92d   :  { %6936 = vmatprep.subr.bf16.mxu1 %v6518_v5  ;;  %v11762_v5 = vld [vmem:[%s17729_s2 + $0x10] ss:$8 sps:$4 sm:$0xff]  }
 0x92e   :  { %v6543_v63 = vpop.permute.xlu0 %6542  ;;  %v6541_v7 = vpop.permute.xlu1 %6540 }
 0x92f   :  { %v6549_v16 = vsel %vm907_vm3, %v6543_v63, %v6545_v4  ;;  %v6550_v32 = vsel %vm907_vm3, %v6541_v7, %v6543_v63 }
 0x930   :  { %6937 = vmatpush1.bf16.msra.mxu1 %v6519_v37 }
 0x931   :  { %6938 = vmatprep.subr.bf16.mxu1 %v6548_v12 }
 0x932   :  { %v6573_v34 = vpop.permute.xlu0 %6572  ;;  %v6643_v13 = vpop.permute.xlu1 %6642 }
 0x933   :  { %6871 = vmatmul.mubr.bf16.gmra.mrb[36].mxu1 %v15701_v21  ;;  %v6579_v21 = vsel %vm1148_vm4, %v6573_v34, %v6575_v52  ;;  %v6649_v31 = vsel %vm1726_vm6, %v6643_v13, %v16031_v23 }
 0x934   :  { %6939 = vmatpush1.bf16.msra.mxu1 %v6549_v16  ;;  %10274 = vmatprep.mubr.msk.bf16.mxu1 %vm2831_vm0, %v11759_v33 }
 0x935   :  { %6940 = vmatprep.subr.bf16.mxu1 %v6578_v51 }
 0x936   :  { %v6511_v19 = vpop.permute.xlu0 %6510  ;;  %v6671_v4 = vpop.permute.xlu1 %6670 }
 0x937   :  { %v6520_v9 = vsel %vm666_vm2, %v6511_v19, %v6513_v43  ;;  %v6521_v60 = vsel %vm666_vm2, %v15994_v56, %v6511_v19  ;;  %v6551_v56 = vsel %vm907_vm3, %v16007_v39, %v6541_v7 }
 0x938   :  { %6883 = vmatprep.subr.bf16.mxu0 %v6520_v9  ;;  %6941 = vmatpush1.bf16.msra.mxu1 %v6579_v21 }
 0x939   :  { %6884 = vmatpush1.bf16.msra.mxu0 %v6521_v60  ;;  %6942 = vmatprep.subr.bf16.mxu1 %v15886_v38 }
 0x93a   :  { %v6613_v10 = vpop.permute.xlu0 %6612  ;;  %6885 = vmatprep.subr.bf16.mxu0 %v6550_v32  ;;  %v6703_v52 = vpop.permute.xlu1 %6702 }
 0x93b   :  { %v6619_v45 = vsel %vm1485_vm5, %v6613_v10, %v16005_v62  ;;  %v6614_v38 = vsel %vm1485_vm5, %v16072_v57, %v6613_v10 }
 0x93c   :  { %6943 = vmatpush1.bf16.msra.mxu1 %v15929_v47 }
 0x93d   :  { %6886 = vmatpush1.bf16.msra.mxu0 %v6551_v56  ;;  %6944 = vmatprep.subr.bf16.mxu1 %v6619_v45 }
 0x93e   :  { %v6641_v14 = vpop.permute.xlu0 %6640  ;;  %v6609_v54 = vpop.permute.xlu1 %6608 }
 0x93f   :  { %v6644_v47 = vsel %vm1726_vm6, %v6641_v14, %v6643_v13 }
 0x940   :  { %6945 = vmatpush1.bf16.msra.mxu1 %v6614_v38 }
 0x941   :  { %6946 = vmatprep.subr.bf16.mxu1 %v6649_v31 }
 0x942   :  { %v6673_v62 = vpop.permute.xlu0 %6672  ;;  %v6669_v43 = vpop.permute.xlu1 %6668 }
 0x943   :  { %v6679_v39 = vsel %vm1967_vm7, %v6673_v62, %v16018_v2  ;;  %v6674_v29 = vsel %vm1967_vm7, %v6671_v4, %v6673_v62  ;;  %v6709_v2 = vsel %vm2208_vm8, %v6703_v52, %v16051_v59  ;;  %v11760_v59 = vld [vmem:[%s17729_s2] ss:$8 sps:$4 sm:$0xff]   ;;  %v6676_v63 = vsel %vm1967_vm7, %v16037_v22, %v6669_v43 }
 0x944   :  { %6947 = vmatpush1.bf16.msra.mxu1 %v6644_v47 }
 0x945   :  { %6948 = vmatprep.subr.bf16.mxu1 %v6679_v39 }
 0x946   :  { %v6571_v25 = vpop.permute.xlu0 %6570 }
 0x947   :  { %v6580_v18 = vsel %vm1148_vm4, %v6571_v25, %v6573_v34  ;;  %v6581_v23 = vsel %vm1148_vm4, %v15996_v61, %v6571_v25  ;;  %v6615_v61 = vsel %vm1485_vm5, %v6609_v54, %v16072_v57 }
 0x948   :  { %6887 = vmatprep.subr.bf16.mxu0 %v6580_v18  ;;  %6949 = vmatpush1.bf16.msra.mxu1 %v6674_v29 }
 0x949   :  { %6888 = vmatpush1.bf16.msra.mxu0 %v6581_v23  ;;  %6950 = vmatprep.subr.bf16.mxu1 %v6709_v2 }
 0x94a   :  { %v6701_v0 = vpop.permute.xlu0 %6700  ;;  %6889 = vmatprep.subr.bf16.mxu0 %v15947_v3  ;;  %v6616_v3 = vsel %vm1485_vm5, %v16009_v28, %v6609_v54  ;;  %v6675_v28 = vsel %vm1967_vm7, %v6669_v43, %v6671_v4 }
 0x94b   :  { %v6704_v53 = vsel %vm2208_vm8, %v6701_v0, %v6703_v52 }
 0x94c   :  { %6951 = vmatpush1.bf16.msra.mxu1 %v6704_v53 }
 0x94d   :  { %6890 = vmatpush1.bf16.msra.mxu0 %v15911_v15 }
 0x94e   :  { %v6639_v55 = vpop.permute.xlu0 %6638  ;;  %6891 = vmatprep.subr.bf16.mxu0 %v6615_v61 }
 0x94f   :  { %6967 = vmatmul.mubr.bf16.vlgmr.msra.gmra.mrb[40].mxu1 %v11760_v59  ;;  %v6645_v15 = vsel %vm1726_vm6, %v6639_v55, %v6641_v14  ;;  %v6646_v35 = vsel %vm1726_vm6, %v16011_v46, %v6639_v55 }
 0x950   :  { %10275 = vmatprep.mubr.msk.bf16.mxu1 %vm2831_vm0, %v11761_v40 }
 0x951   :  { %6892 = vmatpush1.bf16.msra.mxu0 %v6616_v3 }
 0x952   :  { %6893 = vmatprep.subr.bf16.mxu0 %v6645_v15  ;;  %v6699_v57 = vpop.permute.xlu0 %6698 }
 0x953   :  { %v6705_v37 = vsel %vm2208_vm8, %v6699_v57, %v6701_v0  ;;  %v6706_v46 = vsel %vm2208_vm8, %v16026_v49, %v6699_v57 }
 0x955   :  { %6894 = vmatpush1.bf16.msra.mxu0 %v6646_v35 }
 0x956   :  { %6895 = vmatprep.subr.bf16.mxu0 %v6675_v28 }
 0x957   :  { %6977 = vmatmul.mubr.bf16.gmra.mrb[44].mxu1 %v11762_v5 }
 0x959   :  { %6896 = vmatpush1.bf16.msra.mxu0 %v6676_v63 }
 0x95a   :  { %6897 = vmatprep.subr.bf16.mxu0 %v6705_v37 }
 0x95d   :  { %6898 = vmatpush1.bf16.msra.mxu0 %v6706_v46 }
 0x960   :  { %6914 = vmatmul.mubr.bf16.vlgmr.msra.gmra.mrb[40].mxu0 %v11760_v59 }
 0x961   :  { %10273 = vmatprep.mubr.msk.bf16.mxu0 %vm2831_vm0, %v11761_v40 }
 0x968   :  { %6924 = vmatmul.mubr.bf16.gmra.mrb[44].mxu0 %v11762_v5 }
 0x9fe   :  { %v6862_v12 = vpop.f32.mrb[32].mxu1 }
 0x9ff   :  { %v10532_v7 = vadd.f32 %v6862_v12, %v15041_v17  ;;  %v6864_v34 = vpop.f32.mrb[33].mxu1 }
 0xa00   :  { %v10533_v22 = vadd.f32 %v6864_v34, %v15041_v17  ;;  %v6866_v16 = vpop.f32.mrb[34].mxu1 }
 0xa01   :  { %v10276_v51 = vmul.f32 -1.442695, %v10532_v7  ;;  %v10534_v33 = vadd.f32 %v6866_v16, %v15043_v41  ;;  %v6868_v19 = vpop.f32.mrb[35].mxu1 }
 0xa02   :  { %v10277_v9 = vmul.f32 -1.442695, %v10533_v22  ;;  %v10535_v21 = vadd.f32 %v6868_v19, %v15043_v41 }
 0xa03   :  { %11254 = vpow2.f32 %v10276_v51  ;;  %v10282_v49 = vmul.f32 -1.442695, %v10534_v33 }
 0xa04   :  { %11256 = vpow2.f32 %v10277_v9  ;;  %v10283_v60 = vmul.f32 -1.442695, %v10535_v21 }
 0xa05   :  { %11258 = vpow2.f32 %v10282_v49 }
 0xa06   :  { %11260 = vpow2.f32 %v10283_v60  ;;  %v6872_v13 = vpop.f32.mrb[36].mxu1 }
 0xa07   :  { %v6874_v32 = vpop.f32.mrb[37].mxu1  ;;  %v10536_v10 = vadd.f32 %v6872_v13, %v15049_v20 }
 0xa08   :  { %v6876_v45 = vpop.f32.mrb[38].mxu1  ;;  %v10537_v56 = vadd.f32 %v6874_v32, %v15049_v20 }
 0xa09   :  { %v10538_v4 = vadd.f32 %v6876_v45, %v15051_v1  ;;  %v6878_v14 = vpop.f32.mrb[39].mxu1  ;;  %11262 = vtanh.f32 %v10536_v10 }
 0xa0a   :  { %v10539_v38 = vadd.f32 %v6878_v14, %v15051_v1  ;;  %11264 = vtanh.f32 %v10537_v56 }
 0xa0b   :  { %v10288_v31 = vmul.f32 -1.442695, %v10538_v4 }
 0xa0c   :  { %v10289_v62 = vmul.f32 -1.442695, %v10539_v38 }
 0xa0d   :  { %v11255_v47 = vpop.eup %11254  ;;  %11266 = vpow2.f32 %v10288_v31 }
 0xa0e   :  { %v11257_v39 = vpop.eup %11256  ;;  %v7005_v52 = vadd.f32 1.0, %v11255_v47  ;;  %11268 = vpow2.f32 %v10289_v62 }
 0xa0f   :  { %v11259_v25 = vpop.eup %11258  ;;  %v7006_v18 = vadd.f32 1.0, %v11257_v39 }
 0xa10   :  { %v11261_v29 = vpop.eup %11260  ;;  %11270 = vrcp.f32 %v7005_v52  ;;  %v7041_v23 = vadd.f32 1.0, %v11259_v25 }
 0xa11   :  { %11272 = vrcp.f32 %v7006_v18  ;;  %v7042_v2 = vadd.f32 1.0, %v11261_v29 }
 0xa12   :  { %11274 = vrcp.f32 %v7041_v23 }
 0xa13   :  { %11276 = vrcp.f32 %v7042_v2  ;;  %v11263_v54 = vpop.eup %11262 }
 0xa14   :  { %v11265_v0 = vpop.eup %11264 }
 0xa17   :  { %v11267_v53 = vpop.eup %11266 }
 0xa18   :  { %v11269_v61 = vpop.eup %11268  ;;  %v7083_v40 = vadd.f32 1.0, %v11267_v53 }
 0xa19   :  { %v7084_v35 = vadd.f32 1.0, %v11269_v61 }
 0xa1a   :  { %v11271_v55 = vpop.eup %11270  ;;  %11278 = vrcp.f32 %v7083_v40 }
 0xa1b   :  { %v11273_v59 = vpop.eup %11272  ;;  %v7113_v3 = vmul.f32 %v11271_v55, %v11263_v54  ;;  %11280 = vrcp.f32 %v7084_v35 }
 0xa1c   :  { %v11275_v15 = vpop.eup %11274  ;;  %v7114_v43 = vmul.f32 %v11273_v59, %v11265_v0 }
 0xa1d   :  { %v11277_v28 = vpop.eup %11276  ;;  %v7107_v57 = vmul.f32 %v11275_v15, %v15798_v36 }
 0xa1e   :  { %v7108_v5 = vmul.f32 %v11277_v28, %v15800_v44 }
 0xa1f   :  { %v16176_v63 = vadd.f32 %v7113_v3, %v7107_v57 }
 0xa20   :  { %v16178_v37 = vadd.f32 %v7114_v43, %v7108_v5 }
 0xa21   :  { %11282 = vtanh.f32 %v16176_v63 }
 0xa22   :  { %11284 = vtanh.f32 %v16178_v37  ;;  %v6968_v46 = vpop.f32.mrb[40].mxu1 }
 0xa23   :  { %v10548_v12 = vadd.f32 %v6968_v46, %v15041_v17  ;;  %v6970_v7 = vpop.f32.mrb[41].mxu1 }
 0xa24   :  { %v10549_v34 = vadd.f32 %v6970_v7, %v15041_v17  ;;  %v6972_v22 = vpop.f32.mrb[42].mxu1  ;;  %v11279_v21 = vpop.eup %11278 }
 0xa25   :  { %v10280_v36 = vmul.f32 -1.442695, %v10548_v12  ;;  %v10550_v44 = vadd.f32 %v6972_v22, %v15043_v41  ;;  %v6974_v16 = vpop.f32.mrb[43].mxu1  ;;  %v11281_v49 = vpop.eup %11280 }
 0xa26   :  { %v10281_v51 = vmul.f32 -1.442695, %v10549_v34  ;;  %v10551_v33 = vadd.f32 %v6974_v16, %v15043_v41 }
 0xa27   :  { %11286 = vpow2.f32 %v10280_v36  ;;  %v10286_v19 = vmul.f32 -1.442695, %v10550_v44 }
 0xa28   :  { %11288 = vpow2.f32 %v10281_v51  ;;  %v10287_v9 = vmul.f32 -1.442695, %v10551_v33 }
 0xa29   :  { %11290 = vpow2.f32 %v10286_v19 }
 0xa2a   :  { %11292 = vpow2.f32 %v10287_v9  ;;  %v6978_v60 = vpop.f32.mrb[44].mxu1 }
 0xa2b   :  { %v11283_v13 = vpop.eup %11282  ;;  %v6980_v32 = vpop.f32.mrb[45].mxu1  ;;  %v10552_v56 = vadd.f32 %v6978_v60, %v15049_v20 }
 0xa2c   :  { %v11285_v10 = vpop.eup %11284  ;;  %v7131_v45 = vmul.f32 %v11283_v13, %v11279_v21  ;;  %v6982_v4 = vpop.f32.mrb[46].mxu1  ;;  %v10553_v52 = vadd.f32 %v6980_v32, %v15049_v20 }
 0xa2d   :  { %v7132_v14 = vmul.f32 %v11285_v10, %v11281_v49  ;;  %v10554_v38 = vadd.f32 %v6982_v4, %v15051_v1  ;;  %v6984_v31 = vpop.f32.mrb[47].mxu1  ;;  %11294 = vtanh.f32 %v10552_v56 }
 0xa2e   :  { %v7137_v62 = vmul.f32 %v15813_v42, %v7131_v45  ;;  %v10555_v47 = vadd.f32 %v6984_v31, %v15051_v1 }
 0xa2f   :  { %v7138_v39 = vmul.f32 %v15820_v8, %v7132_v14  ;;  %v10292_v25 = vmul.f32 -1.442695, %v10554_v38 }
 0xa30   :  { %v7143_v18 = vpack.c.bf16 %v7137_v62, %v7137_v62  ;;  %v10293_v29 = vmul.f32 -1.442695, %v10555_v47 }
 0xa31   :  { %v11287_v23 = vpop.eup %11286  ;;  %v7144_v2 = vpack.c.bf16 %v7138_v39, %v7138_v39  ;;  %v10445_v54 = vpack.c.bf16 %v7138_v39, %v7137_v62  ;;  %11296 = vpow2.f32 %v10292_v25 }
 0xa32   :  { %v11289_v0 = vpop.eup %11288  ;;  %7155 = vst [vmem:[#allocation5] sm:$0xf] %v7143_v18  ;;  %v7009_v53 = vadd.f32 1.0, %v11287_v23  ;;  %11298 = vpow2.f32 %v10293_v29 }
 0xa33   :  { %v11291_v61 = vpop.eup %11290  ;;  %7156 = vst [vmem:[#allocation5 + $0x8] sm:$0xf] %v7144_v2  ;;  %10297 = vst [vmem:[%s17732_s5 + $0x48] sm:$0xff] %v10445_v54  ;;  %v7010_v42 = vadd.f32 1.0, %v11289_v0  ;;  %11300 = vtanh.f32 %v10553_v52  ;;  %v6915_v8 = vpop.f32.mrb[40].mxu0 }
 0xa34   :  { %v11293_v55 = vpop.eup %11292  ;;  %11302 = vrcp.f32 %v7009_v53  ;;  %v7045_v59 = vadd.f32 1.0, %v11291_v61  ;;  %v10540_v3 = vadd.f32 %v6915_v8, %v15041_v17  ;;  %v6917_v40 = vpop.f32.mrb[41].mxu0 }
 0xa35   :  { %11304 = vrcp.f32 %v7010_v42  ;;  %v7046_v15 = vadd.f32 1.0, %v11293_v55  ;;  %v10541_v43 = vadd.f32 %v6917_v40, %v15041_v17  ;;  %v6919_v35 = vpop.f32.mrb[42].mxu0 }
 0xa36   :  { %11306 = vrcp.f32 %v7045_v59  ;;  %v10278_v28 = vmul.f32 -1.442695, %v10540_v3  ;;  %v10542_v57 = vadd.f32 %v6919_v35, %v15043_v41  ;;  %v6921_v5 = vpop.f32.mrb[43].mxu0 }
 0xa37   :  { %11308 = vrcp.f32 %v7046_v15  ;;  %v10279_v46 = vmul.f32 -1.442695, %v10541_v43  ;;  %v10543_v12 = vadd.f32 %v6921_v5, %v15043_v41  ;;  %v11295_v36 = vpop.eup %11294 }
 0xa38   :  { %11310 = vpow2.f32 %v10278_v28  ;;  %v10284_v7 = vmul.f32 -1.442695, %v10542_v57 }
 0xa39   :  { %11312 = vpow2.f32 %v10279_v46  ;;  %v10285_v34 = vmul.f32 -1.442695, %v10543_v12  ;;  %v16199_v22 = vld [vmem:[#allocation5] sm:$0xff] }
 0xa3a   :  { %11314 = vpow2.f32 %v10284_v7  ;;  %7225 = vrot.lane.b32.xlu0 %v16199_v22, %s11784_s30  ;;  %7195 = vrot.lane.b32.xlu1 %v16199_v22, %s11783_s29  ;;  %v16214_v25 = vld [vmem:[#allocation5 + $0x8] sm:$0xff] }
 0xa3b   :  { %v11297_v44 = vpop.eup %11296  ;;  %11316 = vpow2.f32 %v10285_v34  ;;  %v6925_v16 = vpop.f32.mrb[44].mxu0 }
 0xa3c   :  { %v11299_v51 = vpop.eup %11298  ;;  %v7087_v33 = vadd.f32 1.0, %v11297_v44  ;;  %v6927_v19 = vpop.f32.mrb[45].mxu0  ;;  %v10544_v49 = vadd.f32 %v6925_v16, %v15049_v20 }
 0xa3d   :  { %v11301_v9 = vpop.eup %11300  ;;  %v7088_v21 = vadd.f32 1.0, %v11299_v51  ;;  %v6929_v60 = vpop.f32.mrb[46].mxu0  ;;  %v10545_v32 = vadd.f32 %v6927_v19, %v15049_v20 }
 0xa3e   :  { %v11303_v13 = vpop.eup %11302  ;;  %v10546_v10 = vadd.f32 %v6929_v60, %v15051_v1  ;;  %7285 = vrot.lane.b32.xlu0 %v16199_v22, %s11786_s8  ;;  %7255 = vrot.lane.b32.xlu1 %v16199_v22, %s11785_s7  ;;  %v6931_v45 = vpop.f32.mrb[47].mxu0  ;;  %11318 = vrcp.f32 %v7087_v33 }
 0xa3f   :  { %v11305_v56 = vpop.eup %11304  ;;  %v7117_v4 = vmul.f32 %v11303_v13, %v11295_v36  ;;  %v10547_v14 = vadd.f32 %v6931_v45, %v15051_v1  ;;  %11320 = vrcp.f32 %v7088_v21 }
 0xa40   :  { %v11307_v38 = vpop.eup %11306  ;;  %v7118_v31 = vmul.f32 %v11305_v56, %v11301_v9  ;;  %v10290_v62 = vmul.f32 -1.442695, %v10546_v10  ;;  %11322 = vtanh.f32 %v10544_v49 }
 0xa41   :  { %v11309_v47 = vpop.eup %11308  ;;  %v7111_v39 = vmul.f32 %v11307_v38, %v15853_v30  ;;  %v10291_v52 = vmul.f32 -1.442695, %v10547_v14  ;;  %11324 = vtanh.f32 %v10545_v32 }
 0xa42   :  { %v11311_v18 = vpop.eup %11310  ;;  %v7112_v29 = vmul.f32 %v11309_v47, %v15855_v11  ;;  %7197 = vrot.lane.b32.xlu0 %v16214_v25, %s11783_s29  ;;  %7227 = vrot.lane.b32.xlu1 %v16214_v25, %s11784_s30  ;;  %11326 = vpow2.f32 %v10290_v62 }
 0xa43   :  { %v11313_v23 = vpop.eup %11312  ;;  %v16221_v2 = vadd.f32 %v7117_v4, %v7111_v39  ;;  %v7007_v54 = vadd.f32 1.0, %v11311_v18  ;;  %11328 = vpow2.f32 %v10291_v52 }
 0xa44   :  { %v11315_v30 = vpop.eup %11314  ;;  %v16223_v0 = vadd.f32 %v7118_v31, %v7112_v29  ;;  %v7008_v53 = vadd.f32 1.0, %v11313_v23 }
 0xa45   :  { %v11317_v61 = vpop.eup %11316  ;;  %11330 = vtanh.f32 %v16221_v2  ;;  %v7043_v11 = vadd.f32 1.0, %v11315_v30 }
 0xa46   :  { %11332 = vtanh.f32 %v16223_v0  ;;  %v7044_v42 = vadd.f32 1.0, %v11317_v61  ;;  %7257 = vrot.lane.b32.xlu0 %v16214_v25, %s11785_s7  ;;  %7287 = vrot.lane.b32.xlu1 %v16214_v25, %s11786_s8 }
 0xa47   :  { %11334 = vrcp.f32 %v7007_v54 }
 0xa48   :  { %11336 = vrcp.f32 %v7008_v53  ;;  %v11319_v8 = vpop.eup %11318 }
 0xa49   :  { %11338 = vrcp.f32 %v7043_v11  ;;  %v11321_v55 = vpop.eup %11320 }
 0xa4a   :  { %11340 = vrcp.f32 %v7044_v42  ;;  %v11323_v59 = vpop.eup %11322 }
 0xa4b   :  { %v11325_v3 = vpop.eup %11324 }
 0xa4c   :  { %v11327_v40 = vpop.eup %11326 }
 0xa4d   :  { %v11329_v15 = vpop.eup %11328  ;;  %v7085_v34 = vadd.f32 1.0, %v11327_v40 }
 0xa4e   :  { %v7086_v51 = vadd.f32 1.0, %v11329_v15 }
 0xa4f   :  { %v11331_v43 = vpop.eup %11330  ;;  %11342 = vrcp.f32 %v7085_v34 }
 0xa50   :  { %v11333_v35 = vpop.eup %11332  ;;  %v7135_v28 = vmul.f32 %v11331_v43, %v11319_v8  ;;  %11344 = vrcp.f32 %v7086_v51 }
 0xa51   :  { %v11335_v57 = vpop.eup %11334  ;;  %v7136_v5 = vmul.f32 %v11333_v35, %v11321_v55 }
 0xa52   :  { %v11337_v46 = vpop.eup %11336  ;;  %v7141_v12 = vmul.f32 %v15866_v48, %v7135_v28  ;;  %v7115_v7 = vmul.f32 %v11335_v57, %v11323_v59 }
 0xa53   :  { %v11339_v36 = vpop.eup %11338  ;;  %v7142_v44 = vmul.f32 %v15872_v27, %v7136_v5  ;;  %v7116_v16 = vmul.f32 %v11337_v46, %v11325_v3 }
 0xa54   :  { %v11341_v33 = vpop.eup %11340  ;;  %v7147_v19 = vpack.c.bf16 %v7141_v12, %v7141_v12  ;;  %v7109_v9 = vmul.f32 %v11339_v36, %v15877_v6 }
 0xa55   :  { %v7148_v21 = vpack.c.bf16 %v7142_v44, %v7142_v44  ;;  %v10447_v49 = vpack.c.bf16 %v7142_v44, %v7141_v12  ;;  %v7110_v60 = vmul.f32 %v11341_v33, %v15882_v50 }
 0xa56   :  { %7159 = vst [vmem:[#allocation5 + $0x20] sm:$0xf] %v7147_v19  ;;  %v16235_v13 = vadd.f32 %v7115_v7, %v7109_v9 }
 0xa57   :  { %7160 = vst [vmem:[#allocation5 + $0x28] sm:$0xf] %v7148_v21  ;;  %10299 = vst [vmem:[%s17732_s5 + $0x58] sm:$0xff] %v10447_v49  ;;  %v16240_v48 = vadd.f32 %v7116_v16, %v7110_v60 }
 0xa58   :  { %11346 = vtanh.f32 %v16235_v13 }
 0xa59   :  { %11348 = vtanh.f32 %v16240_v48  ;;  %v11343_v6 = vpop.eup %11342 }
 0xa5a   :  { %v11345_v50 = vpop.eup %11344 }
 0xa5e   :  { %v16244_v27 = vld [vmem:[#allocation5 + $0x28] sm:$0xff] }
 0xa5f   :  { %7205 = vrot.lane.b32.xlu1 %v16244_v27, %s11783_s29 }
 0xa62   :  { %v11347_v32 = vpop.eup %11346 }
 0xa63   :  { %v11349_v10 = vpop.eup %11348  ;;  %v7133_v45 = vmul.f32 %v11347_v32, %v11343_v6  ;;  %7323 = vrot.lane.b32.xlu1 %v16214_v25, %s11787_s13 }
 0xa64   :  { %v7134_v56 = vmul.f32 %v11349_v10, %v11345_v50 }
 0xa65   :  { %v7139_v4 = vmul.f32 %v15895_v24, %v7133_v45  ;;  %v16277_v24 = vld [vmem:[#allocation5 + $0x20] sm:$0xff] }
 0xa66   :  { %v7140_v14 = vmul.f32 %v15901_v58, %v7134_v56  ;;  %v16290_v58 = vld [vmem:[%s17729_s2 + $0x4] ss:$8 sps:$4 sm:$0xff]  }
 0xa67   :  { %v7145_v38 = vpack.c.bf16 %v7139_v4, %v7139_v4  ;;  %7265 = vrot.lane.b32.xlu1 %v16244_v27, %s11785_s7  ;;  %10304 = vmatprep.mubr.msk.bf16.mxu0 %vm2831_vm0, %v16290_v58 }
 0xa68   :  { %v7146_v31 = vpack.c.bf16 %v7140_v14, %v7140_v14  ;;  %v10446_v62 = vpack.c.bf16 %v7140_v14, %v7139_v4  ;;  %10306 = vmatprep.mubr.msk.bf16.mxu1 %vm2831_vm0, %v16290_v58 }
 0xa69   :  { %7157 = vst [vmem:[#allocation5 + $0x10] sm:$0xf] %v7145_v38 }
 0xa6a   :  { %7158 = vst [vmem:[#allocation5 + $0x18] sm:$0xf] %v7146_v31  ;;  %10298 = vst [vmem:[%s17732_s5 + $0x50] sm:$0xff] %v10446_v62 }
 0xa6b   :  { %7321 = vrot.lane.b32.xlu1 %v16199_v22, %s11787_s13 }
 0xa70   :  { %v16259_v47 = vld [vmem:[#allocation5 + $0x10] sm:$0xff] }
 0xa71   :  { %7355 = vrot.lane.b32.xlu1 %v16259_v47, %s11788_s14  ;;  %7325 = vrot.lane.b32.xlu0 %v16259_v47, %s11787_s13  ;;  %v16304_v39 = vld [vmem:[#allocation5 + $0x18] sm:$0xff] }
 0xa75   :  { %7383 = vrot.lane.b32.xlu1 %v16214_v25, %s11789_s15  ;;  %7235 = vrot.lane.b32.xlu0 %v16244_v27, %s11784_s30 }
 0xa79   :  { %7381 = vrot.lane.b32.xlu1 %v16199_v22, %s11789_s15  ;;  %7353 = vrot.lane.b32.xlu0 %v16214_v25, %s11788_s14 }
 0xa7d   :  { %7415 = vrot.lane.b32.xlu1 %v16259_v47, %s11790_s18  ;;  %7295 = vrot.lane.b32.xlu0 %v16244_v27, %s11786_s8 }
 0xa81   :  { %7203 = vrot.lane.b32.xlu1 %v16277_v24, %s11783_s29  ;;  %7351 = vrot.lane.b32.xlu0 %v16199_v22, %s11788_s14 }
 0xa85   :  { %7233 = vrot.lane.b32.xlu1 %v16277_v24, %s11784_s30  ;;  %7385 = vrot.lane.b32.xlu0 %v16259_v47, %s11789_s15 }
 0xa89   :  { %7263 = vrot.lane.b32.xlu1 %v16277_v24, %s11785_s7  ;;  %7413 = vrot.lane.b32.xlu0 %v16214_v25, %s11790_s18 }
 0xa8d   :  { %7293 = vrot.lane.b32.xlu1 %v16277_v24, %s11786_s8  ;;  %7411 = vrot.lane.b32.xlu0 %v16199_v22, %s11790_s18 }
 0xa91   :  { %7199 = vrot.lane.b32.xlu1 %v16259_v47, %s11783_s29  ;;  %7201 = vrot.lane.b32.xlu0 %v16304_v39, %s11783_s29 }
 0xa95   :  { %7329 = vrot.lane.b32.xlu1 %v16277_v24, %s11787_s13  ;;  %7231 = vrot.lane.b32.xlu0 %v16304_v39, %s11784_s30 }
 0xa99   :  { %7259 = vrot.lane.b32.xlu1 %v16259_v47, %s11785_s7  ;;  %7261 = vrot.lane.b32.xlu0 %v16304_v39, %s11785_s7 }
 0xa9d   :  { %7361 = vrot.lane.b32.xlu1 %v16244_v27, %s11788_s14  ;;  %7291 = vrot.lane.b32.xlu0 %v16304_v39, %s11786_s8 }
 0xaa1   :  { %7389 = vrot.lane.b32.xlu1 %v16277_v24, %s11789_s15  ;;  %7229 = vrot.lane.b32.xlu0 %v16259_v47, %s11784_s30 }
 0xaa5   :  { %7421 = vrot.lane.b32.xlu1 %v16244_v27, %s11790_s18  ;;  %7331 = vrot.lane.b32.xlu0 %v16244_v27, %s11787_s13 }
 0xaa9   :  { %7327 = vrot.lane.b32.xlu1 %v16304_v39, %s11787_s13  ;;  %7359 = vrot.lane.b32.xlu0 %v16277_v24, %s11788_s14 }
 0xaac   :  { %v7226_v52 = vpop.permute.xlu0 %7225  ;;  %v7196_v29 = vpop.permute.xlu1 %7195 }
 0xaad   :  { %7387 = vrot.lane.b32.xlu1 %v16304_v39, %s11789_s15  ;;  %7391 = vrot.lane.b32.xlu0 %v16244_v27, %s11789_s15 }
 0xab0   :  { %v7286_v18 = vpop.permute.xlu0 %7285  ;;  %v7256_v30 = vpop.permute.xlu1 %7255 }
 0xab1   :  { %7289 = vrot.lane.b32.xlu0 %v16259_v47, %s11786_s8 }
 0xab4   :  { %v16340_v23 = vpop.permute.xlu0 %7197  ;;  %v16351_v53 = vpop.permute.xlu1 %7227 }
 0xab5   :  { %7419 = vrot.lane.b32.xlu0 %v16277_v24, %s11790_s18  ;;  %v7211_v54 = vsel %vm425_vm1, %v7196_v29, %v16340_v23  ;;  %v7241_v8 = vsel %vm666_vm2, %v7226_v52, %v16351_v53 }
 0xab6   :  { %7547 = vmatprep.subr.bf16.mxu0 %v7211_v54 }
 0xab8   :  { %v16353_v61 = vpop.permute.xlu1 %7287  ;;  %v16364_v40 = vpop.permute.xlu0 %7257 }
 0xab9   :  { %7357 = vrot.lane.b32.xlu0 %v16304_v39, %s11788_s14  ;;  %v7271_v5 = vsel %vm907_vm3, %v7256_v30, %v16364_v40  ;;  %v7301_v34 = vsel %vm1148_vm4, %v7286_v18, %v16353_v61 }
 0xabd   :  { %7417 = vrot.lane.b32.xlu0 %v16304_v39, %s11790_s18 }
 0xad1   :  { %v7206_v11 = vpop.permute.xlu1 %7205 }
 0xad2   :  { %v7212_v42 = vsel %vm425_vm1, %v7206_v11, %v7196_v29  ;;  %v16434_v29 = vld [vmem:[%s17729_s2 + $0x14] ss:$8 sps:$4 sm:$0xff]  }
 0xad3   :  { %7548 = vmatpush1.bf16.msra.mxu0 %v7212_v42 }
 0xad4   :  { %7549 = vmatprep.subr.bf16.mxu0 %v7241_v8 }
 0xad5   :  { %v7324_v55 = vpop.permute.xlu1 %7323 }
 0xad9   :  { %v16360_v59 = vpop.permute.xlu1 %7265 }
 0xada   :  { %v7272_v7 = vsel %vm907_vm3, %v16360_v59, %v7256_v30 }
 0xadd   :  { %v16362_v3 = vpop.permute.xlu1 %7321 }
 0xade   :  { %v7337_v49 = vsel %vm1485_vm5, %v16362_v3, %v7324_v55 }
 0xae3   :  { %v16366_v15 = vpop.permute.xlu0 %7325  ;;  %v16368_v43 = vpop.permute.xlu1 %7355 }
 0xae4   :  { %v7336_v19 = vsel %vm1485_vm5, %v7324_v55, %v16366_v15  ;;  %v16450_v55 = vld [vmem:[%s17729_s2 + $0x10] ss:$8 sps:$4 sm:$0xff]  }
 0xae7   :  { %v7236_v35 = vpop.permute.xlu0 %7235  ;;  %v7384_v28 = vpop.permute.xlu1 %7383 }
 0xae8   :  { %v7242_v57 = vsel %vm666_vm2, %v7236_v35, %v7226_v52  ;;  %v16427_v52 = vld [vmem:[%s17729_s2] ss:$8 sps:$4 sm:$0xff]  }
 0xae9   :  { %7550 = vmatpush1.bf16.msra.mxu0 %v7242_v57 }
 0xaea   :  { %7551 = vmatprep.subr.bf16.mxu0 %v7271_v5 }
 0xaeb   :  { %v7354_v46 = vpop.permute.xlu0 %7353  ;;  %v16375_v12 = vpop.permute.xlu1 %7381 }
 0xaec   :  { %v7397_v45 = vsel %vm1967_vm7, %v16375_v12, %v7384_v28 }
 0xaed   :  { %7552 = vmatpush1.bf16.msra.mxu0 %v7272_v7 }
 0xaee   :  { %7553 = vmatprep.subr.bf16.mxu0 %v7301_v34 }
 0xaef   :  { %v7296_v36 = vpop.permute.xlu0 %7295  ;;  %v16383_v44 = vpop.permute.xlu1 %7415 }
 0xaf0   :  { %v7302_v16 = vsel %vm1148_vm4, %v7296_v36, %v7286_v18 }
 0xaf1   :  { %7554 = vmatpush1.bf16.msra.mxu0 %v7302_v16 }
 0xaf2   :  { %7555 = vmatprep.subr.bf16.mxu0 %v16214_v25  ;;  %v7366_v25 = vsel %vm1726_vm6, %v7354_v46, %v16368_v43 }
 0xaf3   :  { %v16388_v51 = vpop.permute.xlu0 %7351  ;;  %v7204_v33 = vpop.permute.xlu1 %7203 }
 0xaf4   :  { %v7367_v6 = vsel %vm1726_vm6, %v16388_v51, %v7354_v46  ;;  %v7207_v18 = vsel %vm425_vm1, %v7204_v33, %v7206_v11 }
 0xaf5   :  { %7556 = vmatpush1.bf16.msra.mxu0 %v16199_v22 }
 0xaf6   :  { %7557 = vmatprep.subr.bf16.mxu0 %v7336_v19 }
 0xaf7   :  { %v16394_v9 = vpop.permute.xlu0 %7385  ;;  %v7234_v21 = vpop.permute.xlu1 %7233 }
 0xaf8   :  { %v7396_v50 = vsel %vm1967_vm7, %v7384_v28, %v16394_v9  ;;  %v7237_v42 = vsel %vm666_vm2, %v7234_v21, %v7236_v35 }
 0xaf9   :  { %7558 = vmatpush1.bf16.msra.mxu0 %v7337_v49 }
 0xafa   :  { %7559 = vmatprep.subr.bf16.mxu0 %v7366_v25 }
 0xafb   :  { %v7414_v60 = vpop.permute.xlu0 %7413  ;;  %v7264_v22 = vpop.permute.xlu1 %7263 }
 0xafc   :  { %v7426_v56 = vsel %vm2208_vm8, %v7414_v60, %v16383_v44  ;;  %v7267_v28 = vsel %vm907_vm3, %v7264_v22, %v16360_v59 }
 0xafd   :  { %7560 = vmatpush1.bf16.msra.mxu0 %v7367_v6 }
 0xafe   :  { %7561 = vmatprep.subr.bf16.mxu0 %v7396_v50 }
 0xaff   :  { %v16408_v32 = vpop.permute.xlu0 %7411  ;;  %v7294_v10 = vpop.permute.xlu1 %7293 }
 0xb00   :  { %v7427_v38 = vsel %vm2208_vm8, %v16408_v32, %v7414_v60  ;;  %v7297_v46 = vsel %vm1148_vm4, %v7294_v10, %v7296_v36 }
 0xb01   :  { %7562 = vmatpush1.bf16.msra.mxu0 %v7397_v45 }
 0xb02   :  { %7563 = vmatprep.subr.bf16.mxu0 %v7426_v56 }
 0xb03   :  { %v7202_v4 = vpop.permute.xlu0 %7201  ;;  %v7200_v14 = vpop.permute.xlu1 %7199 }
 0xb04   :  { %v7209_v31 = vsel %vm425_vm1, %v7200_v14, %v7202_v4  ;;  %v7210_v62 = vsel %vm425_vm1, %v16340_v23, %v7200_v14  ;;  %v7208_v23 = vsel %vm425_vm1, %v7202_v4, %v7204_v33 }
 0xb05   :  { %7564 = vmatpush1.bf16.msra.mxu0 %v7427_v38  ;;  %7600 = vmatprep.subr.bf16.mxu1 %v7209_v31 }
 0xb06   :  { %7601 = vmatpush1.bf16.msra.mxu1 %v7210_v62  ;;  %7653 = vmatprep.subr.bf16.mxu0 %v7207_v18 }
 0xb07   :  { %v7232_v54 = vpop.permute.xlu0 %7231  ;;  %v16439_v30 = vpop.permute.xlu1 %7329 }
 0xb08   :  { %7580 = vmatmul.mubr.bf16.vlgmr.msra.gmra.mrb[48].mxu0 %v16427_v52  ;;  %v7238_v8 = vsel %vm666_vm2, %v7232_v54, %v7234_v21 }
 0xb09   :  { %7654 = vmatpush1.bf16.msra.mxu0 %v7208_v23  ;;  %10305 = vmatprep.mubr.msk.bf16.mxu0 %vm2831_vm0, %v16434_v29 }
 0xb0a   :  { %7655 = vmatprep.subr.bf16.mxu0 %v7237_v42 }
 0xb0b   :  { %v7262_v11 = vpop.permute.xlu0 %7261  ;;  %v7260_v35 = vpop.permute.xlu1 %7259 }
 0xb0c   :  { %v7268_v5 = vsel %vm907_vm3, %v7262_v11, %v7264_v22  ;;  %v7269_v36 = vsel %vm907_vm3, %v7260_v35, %v7262_v11 }
 0xb0d   :  { %7656 = vmatpush1.bf16.msra.mxu0 %v7238_v8 }
 0xb0e   :  { %7657 = vmatprep.subr.bf16.mxu0 %v7267_v28 }
 0xb0f   :  { %v7292_v57 = vpop.permute.xlu0 %7291  ;;  %v7362_v33 = vpop.permute.xlu1 %7361 }
 0xb10   :  { %7590 = vmatmul.mubr.bf16.gmra.mrb[52].mxu0 %v16450_v55  ;;  %v7298_v34 = vsel %vm1148_vm4, %v7292_v57, %v7294_v10  ;;  %v7368_v60 = vsel %vm1726_vm6, %v7362_v33, %v16388_v51 }
 0xb11   :  { %7658 = vmatpush1.bf16.msra.mxu0 %v7268_v5  ;;  %10308 = vmatprep.mubr.msk.bf16.mxu0 %vm2831_vm0, %v16290_v58 }
 0xb12   :  { %7659 = vmatprep.subr.bf16.mxu0 %v7297_v46 }
 0xb13   :  { %v7230_v7 = vpop.permute.xlu0 %7229  ;;  %v7390_v49 = vpop.permute.xlu1 %7389 }
 0xb14   :  { %v7239_v59 = vsel %vm666_vm2, %v7230_v7, %v7232_v54  ;;  %v7240_v16 = vsel %vm666_vm2, %v16351_v53, %v7230_v7  ;;  %v7270_v53 = vsel %vm907_vm3, %v16364_v40, %v7260_v35 }
 0xb15   :  { %7602 = vmatprep.subr.bf16.mxu1 %v7239_v59  ;;  %7660 = vmatpush1.bf16.msra.mxu0 %v7298_v34 }
 0xb16   :  { %7603 = vmatpush1.bf16.msra.mxu1 %v7240_v16  ;;  %7661 = vmatprep.subr.bf16.mxu0 %v16244_v27 }
 0xb17   :  { %v7332_v19 = vpop.permute.xlu0 %7331  ;;  %7604 = vmatprep.subr.bf16.mxu1 %v7269_v36  ;;  %v7422_v22 = vpop.permute.xlu1 %7421 }
 0xb18   :  { %v7338_v21 = vsel %vm1485_vm5, %v7332_v19, %v16362_v3  ;;  %v7333_v27 = vsel %vm1485_vm5, %v16439_v30, %v7332_v19 }
 0xb19   :  { %7662 = vmatpush1.bf16.msra.mxu0 %v16277_v24 }
 0xb1a   :  { %7605 = vmatpush1.bf16.msra.mxu1 %v7270_v53  ;;  %7663 = vmatprep.subr.bf16.mxu0 %v7338_v21 }
 0xb1b   :  { %v7360_v25 = vpop.permute.xlu0 %7359  ;;  %v7328_v45 = vpop.permute.xlu1 %7327 }
 0xb1c   :  { %v7363_v24 = vsel %vm1726_vm6, %v7360_v25, %v7362_v33 }
 0xb1d   :  { %7664 = vmatpush1.bf16.msra.mxu0 %v7333_v27 }
 0xb1e   :  { %7665 = vmatprep.subr.bf16.mxu0 %v7368_v60 }
 0xb1f   :  { %v7392_v3 = vpop.permute.xlu0 %7391 }
 0xb20   :  { %v7398_v40 = vsel %vm1967_vm7, %v7392_v3, %v16375_v12  ;;  %v7393_v10 = vsel %vm1967_vm7, %v7390_v49, %v7392_v3  ;;  %v7428_v12 = vsel %vm2208_vm8, %v7422_v22, %v16408_v32  ;;  %v7335_v32 = vsel %vm1485_vm5, %v16366_v15, %v7328_v45 }
 0xb21   :  { %7666 = vmatpush1.bf16.msra.mxu0 %v7363_v24 }
 0xb22   :  { %7667 = vmatprep.subr.bf16.mxu0 %v7398_v40 }
 0xb23   :  { %v7290_v6 = vpop.permute.xlu0 %7289 }
 0xb24   :  { %v7299_v50 = vsel %vm1148_vm4, %v7290_v6, %v7292_v57  ;;  %v7300_v51 = vsel %vm1148_vm4, %v16353_v61, %v7290_v6  ;;  %v7334_v61 = vsel %vm1485_vm5, %v7328_v45, %v16439_v30 }
 0xb25   :  { %7606 = vmatprep.subr.bf16.mxu1 %v7299_v50  ;;  %7668 = vmatpush1.bf16.msra.mxu0 %v7393_v10 }
 0xb26   :  { %7607 = vmatpush1.bf16.msra.mxu1 %v7300_v51  ;;  %7669 = vmatprep.subr.bf16.mxu0 %v7428_v12 }
 0xb27   :  { %v7420_v56 = vpop.permute.xlu0 %7419  ;;  %7608 = vmatprep.subr.bf16.mxu1 %v16304_v39 }
 0xb28   :  { %v7423_v4 = vsel %vm2208_vm8, %v7420_v56, %v7422_v22 }
 0xb29   :  { %7670 = vmatpush1.bf16.msra.mxu0 %v7423_v4 }
 0xb2a   :  { %7609 = vmatpush1.bf16.msra.mxu1 %v16259_v47  ;;  %v7388_v47 = vpop.permute.xlu1 %7387 }
 0xb2b   :  { %v7358_v14 = vpop.permute.xlu0 %7357  ;;  %7610 = vmatprep.subr.bf16.mxu1 %v7334_v61  ;;  %v7394_v31 = vsel %vm1967_vm7, %v7388_v47, %v7390_v49  ;;  %v7395_v15 = vsel %vm1967_vm7, %v16394_v9, %v7388_v47 }
 0xb2c   :  { %7686 = vmatmul.mubr.bf16.vlgmr.msra.gmra.mrb[56].mxu0 %v16427_v52  ;;  %v7364_v39 = vsel %vm1726_vm6, %v7358_v14, %v7360_v25  ;;  %v7365_v38 = vsel %vm1726_vm6, %v16368_v43, %v7358_v14 }
 0xb2d   :  { %10309 = vmatprep.mubr.msk.bf16.mxu0 %vm2831_vm0, %v16434_v29 }
 0xb2e   :  { %7611 = vmatpush1.bf16.msra.mxu1 %v7335_v32 }
 0xb2f   :  { %7612 = vmatprep.subr.bf16.mxu1 %v7364_v39  ;;  %v7418_v62 = vpop.permute.xlu0 %7417 }
 0xb30   :  { %v7424_v18 = vsel %vm2208_vm8, %v7418_v62, %v7420_v56  ;;  %v7425_v43 = vsel %vm2208_vm8, %v16383_v44, %v7418_v62 }
 0xb32   :  { %7613 = vmatpush1.bf16.msra.mxu1 %v7365_v38 }
 0xb33   :  { %7614 = vmatprep.subr.bf16.mxu1 %v7394_v31 }
 0xb34   :  { %7696 = vmatmul.mubr.bf16.gmra.mrb[60].mxu0 %v16450_v55 }
 0xb35   :  { %10340 = vmatprep.mubr.msk.bf16.mxu0 %vm2831_vm0, %v16290_v58 }
 0xb36   :  { %7615 = vmatpush1.bf16.msra.mxu1 %v7395_v15 }
 0xb37   :  { %7616 = vmatprep.subr.bf16.mxu1 %v7424_v18 }
 0xb3a   :  { %7617 = vmatpush1.bf16.msra.mxu1 %v7425_v43 }
 0xb3d   :  { %7633 = vmatmul.mubr.bf16.vlgmr.msra.gmra.mrb[48].mxu1 %v16427_v52 }
 0xb3e   :  { %10307 = vmatprep.mubr.msk.bf16.mxu1 %vm2831_vm0, %v16434_v29 }
 0xb45   :  { %7643 = vmatmul.mubr.bf16.gmra.mrb[52].mxu1 %v16450_v55 }
 0xb46   :  { %10338 = vmatprep.mubr.msk.bf16.mxu1 %vm2831_vm0, %v16290_v58 }
 0xbdb   :  { %v7581_v9 = vpop.f32.mrb[48].mxu0 }
 0xbdc   :  { %v10556_v54 = vadd.f32 %v7581_v9, %v15041_v17  ;;  %v7583_v23 = vpop.f32.mrb[49].mxu0 }
 0xbdd   :  { %v10557_v30 = vadd.f32 %v7583_v23, %v15041_v17  ;;  %v7585_v42 = vpop.f32.mrb[50].mxu0 }
 0xbde   :  { %v10310_v11 = vmul.f32 -1.442695, %v10556_v54  ;;  %v10558_v44 = vadd.f32 %v7585_v42, %v15043_v41  ;;  %v7587_v8 = vpop.f32.mrb[51].mxu0 }
 0xbdf   :  { %v10311_v28 = vmul.f32 -1.442695, %v10557_v30  ;;  %v10559_v35 = vadd.f32 %v7587_v8, %v15043_v41 }
 0xbe0   :  { %11350 = vpow2.f32 %v10310_v11  ;;  %v10316_v57 = vmul.f32 -1.442695, %v10558_v44 }
 0xbe1   :  { %11352 = vpow2.f32 %v10311_v28  ;;  %v10317_v5 = vmul.f32 -1.442695, %v10559_v35 }
 0xbe2   :  { %11354 = vpow2.f32 %v10316_v57 }
 0xbe3   :  { %11356 = vpow2.f32 %v10317_v5  ;;  %v7591_v58 = vpop.f32.mrb[52].mxu0 }
 0xbe4   :  { %v7593_v46 = vpop.f32.mrb[53].mxu0  ;;  %v10560_v7 = vadd.f32 %v7591_v58, %v15049_v20 }
 0xbe5   :  { %v7595_v59 = vpop.f32.mrb[54].mxu0  ;;  %v10561_v34 = vadd.f32 %v7593_v46, %v15049_v20 }
 0xbe6   :  { %v10562_v16 = vadd.f32 %v7595_v59, %v15051_v1  ;;  %v7597_v33 = vpop.f32.mrb[55].mxu0  ;;  %11358 = vtanh.f32 %v10560_v7 }
 0xbe7   :  { %v10563_v36 = vadd.f32 %v7597_v33, %v15051_v1  ;;  %11360 = vtanh.f32 %v10561_v34  ;;  %v16562_v33 = vld [vmem:[%s17731_s4] sm:$0xff] }
 0xbe8   :  { %v10322_v19 = vmul.f32 -1.442695, %v10562_v16 }
 0xbe9   :  { %v10323_v21 = vmul.f32 -1.442695, %v10563_v36 }
 0xbea   :  { %v11351_v53 = vpop.eup %11350  ;;  %11362 = vpow2.f32 %v10322_v19 }
 0xbeb   :  { %v11353_v49 = vpop.eup %11352  ;;  %v7724_v25 = vadd.f32 1.0, %v11351_v53  ;;  %11364 = vpow2.f32 %v10323_v21  ;;  %v16569_v21 = vld [vmem:[%s17731_s4 + $0x8] sm:$0xff] }
 0xbec   :  { %v11355_v27 = vpop.eup %11354  ;;  %v7725_v60 = vadd.f32 1.0, %v11353_v49 }
 0xbed   :  { %v11357_v3 = vpop.eup %11356  ;;  %11366 = vrcp.f32 %v7724_v25  ;;  %v7760_v24 = vadd.f32 1.0, %v11355_v27 }
 0xbee   :  { %11368 = vrcp.f32 %v7725_v60  ;;  %v7761_v40 = vadd.f32 1.0, %v11357_v3 }
 0xbef   :  { %11370 = vrcp.f32 %v7760_v24 }
 0xbf0   :  { %11372 = vrcp.f32 %v7761_v40  ;;  %v11359_v22 = vpop.eup %11358 }
 0xbf1   :  { %v11361_v6 = vpop.eup %11360 }
 0xbf4   :  { %v11363_v50 = vpop.eup %11362 }
 0xbf5   :  { %v11365_v10 = vpop.eup %11364  ;;  %v7802_v56 = vadd.f32 1.0, %v11363_v50 }
 0xbf6   :  { %v7803_v14 = vadd.f32 1.0, %v11365_v10 }
 0xbf7   :  { %v11367_v51 = vpop.eup %11366  ;;  %11374 = vrcp.f32 %v7802_v56 }
 0xbf8   :  { %v11369_v12 = vpop.eup %11368  ;;  %v7832_v45 = vmul.f32 %v11367_v51, %v11359_v22  ;;  %11376 = vrcp.f32 %v7803_v14 }
 0xbf9   :  { %v11371_v4 = vpop.eup %11370  ;;  %v7833_v61 = vmul.f32 %v11369_v12, %v11361_v6 }
 0xbfa   :  { %v11373_v32 = vpop.eup %11372  ;;  %v7826_v39 = vmul.f32 %v11371_v4, %v16176_v63 }
 0xbfb   :  { %v7827_v47 = vmul.f32 %v11373_v32, %v16178_v37 }
 0xbfc   :  { %v16547_v38 = vadd.f32 %v7832_v45, %v7826_v39 }
 0xbfd   :  { %v16549_v31 = vadd.f32 %v7833_v61, %v7827_v47 }
 0xbfe   :  { %11378 = vtanh.f32 %v16547_v38 }
 0xbff   :  { %11380 = vtanh.f32 %v16549_v31  ;;  %v7687_v62 = vpop.f32.mrb[56].mxu0 }
 0xc00   :  { %v10572_v15 = vadd.f32 %v7687_v62, %v15041_v17  ;;  %v7689_v18 = vpop.f32.mrb[57].mxu0 }
 0xc01   :  { %v10573_v43 = vadd.f32 %v7689_v18, %v15041_v17  ;;  %v7691_v9 = vpop.f32.mrb[58].mxu0  ;;  %v11375_v44 = vpop.eup %11374 }
 0xc02   :  { %v10314_v63 = vmul.f32 -1.442695, %v10572_v15  ;;  %v10574_v37 = vadd.f32 %v7691_v9, %v15043_v41  ;;  %v7693_v54 = vpop.f32.mrb[59].mxu0  ;;  %v11377_v8 = vpop.eup %11376 }
 0xc03   :  { %v10315_v23 = vmul.f32 -1.442695, %v10573_v43  ;;  %v10575_v30 = vadd.f32 %v7693_v54, %v15043_v41 }
 0xc04   :  { %11382 = vpow2.f32 %v10314_v63  ;;  %v10320_v42 = vmul.f32 -1.442695, %v10574_v37 }
 0xc05   :  { %11384 = vpow2.f32 %v10315_v23  ;;  %v10321_v11 = vmul.f32 -1.442695, %v10575_v30 }
 0xc06   :  { %11386 = vpow2.f32 %v10320_v42 }
 0xc07   :  { %11388 = vpow2.f32 %v10321_v11  ;;  %v7697_v28 = vpop.f32.mrb[60].mxu0 }
 0xc08   :  { %v11379_v35 = vpop.eup %11378  ;;  %v7699_v57 = vpop.f32.mrb[61].mxu0  ;;  %v10576_v46 = vadd.f32 %v7697_v28, %v15049_v20 }
 0xc09   :  { %v11381_v5 = vpop.eup %11380  ;;  %v7850_v58 = vmul.f32 %v11379_v35, %v11375_v44  ;;  %v7701_v7 = vpop.f32.mrb[62].mxu0  ;;  %v10577_v49 = vadd.f32 %v7699_v57, %v15049_v20 }
 0xc0a   :  { %v7851_v59 = vmul.f32 %v11381_v5, %v11377_v8  ;;  %v10578_v34 = vadd.f32 %v7701_v7, %v15051_v1  ;;  %v7703_v16 = vpop.f32.mrb[63].mxu0  ;;  %11390 = vtanh.f32 %v10576_v46 }
 0xc0b   :  { %v7856_v36 = vmul.f32 %v16562_v33, %v7850_v58  ;;  %v10579_v19 = vadd.f32 %v7703_v16, %v15051_v1 }
 0xc0c   :  { %v7857_v53 = vmul.f32 %v16569_v21, %v7851_v59  ;;  %v10326_v25 = vmul.f32 -1.442695, %v10578_v34 }
 0xc0d   :  { %v7862_v27 = vpack.c.bf16 %v7856_v36, %v7856_v36  ;;  %v10327_v60 = vmul.f32 -1.442695, %v10579_v19 }
 0xc0e   :  { %v11383_v3 = vpop.eup %11382  ;;  %v7863_v24 = vpack.c.bf16 %v7857_v53, %v7857_v53  ;;  %v10448_v40 = vpack.c.bf16 %v7857_v53, %v7856_v36  ;;  %11392 = vpow2.f32 %v10326_v25 }
 0xc0f   :  { %v11385_v22 = vpop.eup %11384  ;;  %7874 = vst [vmem:[#allocation5] sm:$0xf] %v7862_v27  ;;  %v7728_v6 = vadd.f32 1.0, %v11383_v3  ;;  %11394 = vpow2.f32 %v10327_v60 }
 0xc10   :  { %v11387_v50 = vpop.eup %11386  ;;  %7875 = vst [vmem:[#allocation5 + $0x8] sm:$0xf] %v7863_v24  ;;  %10331 = vst [vmem:[%s17732_s5 + $0x60] sm:$0xff] %v10448_v40  ;;  %v7729_v10 = vadd.f32 1.0, %v11385_v22  ;;  %11396 = vtanh.f32 %v10577_v49  ;;  %v7634_v51 = vpop.f32.mrb[48].mxu1 }
 0xc11   :  { %v11389_v12 = vpop.eup %11388  ;;  %11398 = vrcp.f32 %v7728_v6  ;;  %v7764_v45 = vadd.f32 1.0, %v11387_v50  ;;  %v10564_v56 = vadd.f32 %v7634_v51, %v15041_v17  ;;  %v7636_v4 = vpop.f32.mrb[49].mxu1 }
 0xc12   :  { %11400 = vrcp.f32 %v7729_v10  ;;  %v7765_v61 = vadd.f32 1.0, %v11389_v12  ;;  %v10565_v14 = vadd.f32 %v7636_v4, %v15041_v17  ;;  %v7638_v32 = vpop.f32.mrb[50].mxu1 }
 0xc13   :  { %11402 = vrcp.f32 %v7764_v45  ;;  %v10312_v39 = vmul.f32 -1.442695, %v10564_v56  ;;  %v10566_v47 = vadd.f32 %v7638_v32, %v15043_v41  ;;  %v7640_v62 = vpop.f32.mrb[51].mxu1 }
 0xc14   :  { %11404 = vrcp.f32 %v7765_v61  ;;  %v10313_v15 = vmul.f32 -1.442695, %v10565_v14  ;;  %v10567_v18 = vadd.f32 %v7640_v62, %v15043_v41  ;;  %v11391_v37 = vpop.eup %11390 }
 0xc15   :  { %11406 = vpow2.f32 %v10312_v39  ;;  %v10318_v43 = vmul.f32 -1.442695, %v10566_v47 }
 0xc16   :  { %11408 = vpow2.f32 %v10313_v15  ;;  %v10319_v9 = vmul.f32 -1.442695, %v10567_v18  ;;  %v16580_v63 = vld [vmem:[#allocation5] sm:$0xff] }
 0xc17   :  { %11410 = vpow2.f32 %v10318_v43  ;;  %7944 = vrot.lane.b32.xlu0 %v16580_v63, %s11784_s30  ;;  %7914 = vrot.lane.b32.xlu1 %v16580_v63, %s11783_s29  ;;  %v16595_v27 = vld [vmem:[#allocation5 + $0x8] sm:$0xff]  ;;  %v16615_v43 = vld [vmem:[%s17731_s4 + $0x20] sm:$0xff] }
 0xc18   :  { %v11393_v54 = vpop.eup %11392  ;;  %11412 = vpow2.f32 %v10319_v9  ;;  %v7644_v23 = vpop.f32.mrb[52].mxu1 }
 0xc19   :  { %v11395_v30 = vpop.eup %11394  ;;  %v7806_v42 = vadd.f32 1.0, %v11393_v54  ;;  %v7646_v11 = vpop.f32.mrb[53].mxu1  ;;  %v10568_v28 = vadd.f32 %v7644_v23, %v15049_v20 }
 0xc1a   :  { %v11397_v44 = vpop.eup %11396  ;;  %v7807_v8 = vadd.f32 1.0, %v11395_v30  ;;  %v7648_v35 = vpop.f32.mrb[54].mxu1  ;;  %v10569_v5 = vadd.f32 %v7646_v11, %v15049_v20  ;;  %v16621_v30 = vld [vmem:[%s17731_s4 + $0x28] sm:$0xff] }
 0xc1b   :  { %v11399_v57 = vpop.eup %11398  ;;  %v10570_v58 = vadd.f32 %v7648_v35, %v15051_v1  ;;  %8004 = vrot.lane.b32.xlu0 %v16580_v63, %s11786_s8  ;;  %7974 = vrot.lane.b32.xlu1 %v16580_v63, %s11785_s7  ;;  %v7650_v46 = vpop.f32.mrb[55].mxu1  ;;  %11414 = vrcp.f32 %v7806_v42 }
 0xc1c   :  { %v11401_v7 = vpop.eup %11400  ;;  %v7836_v59 = vmul.f32 %v11399_v57, %v11391_v37  ;;  %v10571_v34 = vadd.f32 %v7650_v46, %v15051_v1  ;;  %11416 = vrcp.f32 %v7807_v8 }
 0xc1d   :  { %v11403_v16 = vpop.eup %11402  ;;  %v7837_v36 = vmul.f32 %v11401_v7, %v11397_v44  ;;  %v10324_v19 = vmul.f32 -1.442695, %v10570_v58  ;;  %11418 = vtanh.f32 %v10568_v28 }
 0xc1e   :  { %v11405_v53 = vpop.eup %11404  ;;  %v7830_v49 = vmul.f32 %v11403_v16, %v16221_v2  ;;  %v10325_v25 = vmul.f32 -1.442695, %v10571_v34  ;;  %11420 = vtanh.f32 %v10569_v5 }
 0xc1f   :  { %v11407_v60 = vpop.eup %11406  ;;  %v7831_v3 = vmul.f32 %v11405_v53, %v16223_v0  ;;  %7916 = vrot.lane.b32.xlu0 %v16595_v27, %s11783_s29  ;;  %7946 = vrot.lane.b32.xlu1 %v16595_v27, %s11784_s30  ;;  %11422 = vpow2.f32 %v10324_v19  ;;  %v16644_v53 = vld [vmem:[%s17731_s4 + $0x10] sm:$0xff] }
 0xc20   :  { %v11409_v24 = vpop.eup %11408  ;;  %v16602_v40 = vadd.f32 %v7836_v59, %v7830_v49  ;;  %v7726_v22 = vadd.f32 1.0, %v11407_v60  ;;  %11424 = vpow2.f32 %v10325_v25  ;;  %v16650_v25 = vld [vmem:[%s17731_s4 + $0x18] sm:$0xff] }
 0xc21   :  { %v11411_v2 = vpop.eup %11410  ;;  %v16604_v6 = vadd.f32 %v7837_v36, %v7831_v3  ;;  %v7727_v50 = vadd.f32 1.0, %v11409_v24 }
 0xc22   :  { %v11413_v10 = vpop.eup %11412  ;;  %11426 = vtanh.f32 %v16602_v40  ;;  %v7762_v0 = vadd.f32 1.0, %v11411_v2 }
 0xc23   :  { %11428 = vtanh.f32 %v16604_v6  ;;  %v7763_v51 = vadd.f32 1.0, %v11413_v10  ;;  %7976 = vrot.lane.b32.xlu0 %v16595_v27, %s11785_s7  ;;  %8006 = vrot.lane.b32.xlu1 %v16595_v27, %s11786_s8 }
 0xc24   :  { %11430 = vrcp.f32 %v7726_v22 }
 0xc25   :  { %11432 = vrcp.f32 %v7727_v50  ;;  %v11415_v12 = vpop.eup %11414 }
 0xc26   :  { %11434 = vrcp.f32 %v7762_v0  ;;  %v11417_v45 = vpop.eup %11416 }
 0xc27   :  { %11436 = vrcp.f32 %v7763_v51  ;;  %v11419_v56 = vpop.eup %11418 }
 0xc28   :  { %v11421_v4 = vpop.eup %11420 }
 0xc29   :  { %v11423_v61 = vpop.eup %11422 }
 0xc2a   :  { %v11425_v14 = vpop.eup %11424  ;;  %v7804_v54 = vadd.f32 1.0, %v11423_v61 }
 0xc2b   :  { %v7805_v44 = vadd.f32 1.0, %v11425_v14 }
 0xc2c   :  { %v11427_v32 = vpop.eup %11426  ;;  %11438 = vrcp.f32 %v7804_v54 }
 0xc2d   :  { %v11429_v39 = vpop.eup %11428  ;;  %v7854_v47 = vmul.f32 %v11427_v32, %v11415_v12  ;;  %11440 = vrcp.f32 %v7805_v44 }
 0xc2e   :  { %v11431_v62 = vpop.eup %11430  ;;  %v7855_v15 = vmul.f32 %v11429_v39, %v11417_v45 }
 0xc2f   :  { %v11433_v18 = vpop.eup %11432  ;;  %v7860_v9 = vmul.f32 %v16615_v43, %v7854_v47  ;;  %v7834_v37 = vmul.f32 %v11431_v62, %v11419_v56 }
 0xc30   :  { %v11435_v23 = vpop.eup %11434  ;;  %v7861_v42 = vmul.f32 %v16621_v30, %v7855_v15  ;;  %v7835_v11 = vmul.f32 %v11433_v18, %v11421_v4 }
 0xc31   :  { %v11437_v8 = vpop.eup %11436  ;;  %v7866_v28 = vpack.c.bf16 %v7860_v9, %v7860_v9  ;;  %v7828_v35 = vmul.f32 %v11435_v23, %v16235_v13 }
 0xc32   :  { %v7867_v57 = vpack.c.bf16 %v7861_v42, %v7861_v42  ;;  %v10450_v5 = vpack.c.bf16 %v7861_v42, %v7860_v9  ;;  %v7829_v58 = vmul.f32 %v11437_v8, %v16240_v48 }
 0xc33   :  { %7878 = vst [vmem:[#allocation5 + $0x20] sm:$0xf] %v7866_v28  ;;  %v16626_v46 = vadd.f32 %v7834_v37, %v7828_v35 }
 0xc34   :  { %7879 = vst [vmem:[#allocation5 + $0x28] sm:$0xf] %v7867_v57  ;;  %10333 = vst [vmem:[%s17732_s5 + $0x70] sm:$0xff] %v10450_v5  ;;  %v16631_v7 = vadd.f32 %v7835_v11, %v7829_v58 }
 0xc35   :  { %11442 = vtanh.f32 %v16626_v46 }
 0xc36   :  { %11444 = vtanh.f32 %v16631_v7  ;;  %v11439_v48 = vpop.eup %11438 }
 0xc37   :  { %v11441_v59 = vpop.eup %11440 }
 0xc3a   :  { %v16678_v50 = vld [vmem:[#allocation5 + $0x20] sm:$0xff] }
 0xc3b   :  { %v16635_v13 = vld [vmem:[#allocation5 + $0x28] sm:$0xff] }
 0xc3c   :  { %7924 = vrot.lane.b32.xlu1 %v16635_v13, %s11783_s29 }
 0xc3f   :  { %v11443_v34 = vpop.eup %11442 }
 0xc40   :  { %v11445_v16 = vpop.eup %11444  ;;  %v7852_v36 = vmul.f32 %v11443_v34, %v11439_v48  ;;  %8042 = vrot.lane.b32.xlu1 %v16595_v27, %s11787_s13 }
 0xc41   :  { %v7853_v19 = vmul.f32 %v11445_v16, %v11441_v59 }
 0xc42   :  { %v7858_v49 = vmul.f32 %v16644_v53, %v7852_v36 }
 0xc43   :  { %v7859_v60 = vmul.f32 %v16650_v25, %v7853_v19 }
 0xc44   :  { %v7864_v3 = vpack.c.bf16 %v7858_v49, %v7858_v49  ;;  %7984 = vrot.lane.b32.xlu1 %v16635_v13, %s11785_s7 }
 0xc45   :  { %v7865_v24 = vpack.c.bf16 %v7859_v60, %v7859_v60  ;;  %v10449_v22 = vpack.c.bf16 %v7859_v60, %v7858_v49 }
 0xc46   :  { %7876 = vst [vmem:[#allocation5 + $0x10] sm:$0xf] %v7864_v3 }
 0xc47   :  { %7877 = vst [vmem:[#allocation5 + $0x18] sm:$0xf] %v7865_v24  ;;  %10332 = vst [vmem:[%s17732_s5 + $0x68] sm:$0xff] %v10449_v22 }
 0xc48   :  { %8040 = vrot.lane.b32.xlu1 %v16580_v63, %s11787_s13 }
 0xc4d   :  { %v16660_v2 = vld [vmem:[#allocation5 + $0x10] sm:$0xff] }
 0xc4e   :  { %8074 = vrot.lane.b32.xlu1 %v16660_v2, %s11788_s14  ;;  %8044 = vrot.lane.b32.xlu0 %v16660_v2, %s11787_s13  ;;  %v16696_v10 = vld [vmem:[#allocation5 + $0x18] sm:$0xff] }
 0xc52   :  { %8102 = vrot.lane.b32.xlu1 %v16595_v27, %s11789_s15  ;;  %7954 = vrot.lane.b32.xlu0 %v16635_v13, %s11784_s30 }
 0xc56   :  { %8100 = vrot.lane.b32.xlu1 %v16580_v63, %s11789_s15  ;;  %8072 = vrot.lane.b32.xlu0 %v16595_v27, %s11788_s14 }
 0xc5a   :  { %8134 = vrot.lane.b32.xlu1 %v16660_v2, %s11790_s18  ;;  %8014 = vrot.lane.b32.xlu0 %v16635_v13, %s11786_s8 }
 0xc5e   :  { %7922 = vrot.lane.b32.xlu1 %v16678_v50, %s11783_s29  ;;  %8070 = vrot.lane.b32.xlu0 %v16580_v63, %s11788_s14 }
 0xc62   :  { %7952 = vrot.lane.b32.xlu1 %v16678_v50, %s11784_s30  ;;  %8104 = vrot.lane.b32.xlu0 %v16660_v2, %s11789_s15 }
 0xc66   :  { %7982 = vrot.lane.b32.xlu1 %v16678_v50, %s11785_s7  ;;  %8132 = vrot.lane.b32.xlu0 %v16595_v27, %s11790_s18 }
 0xc6a   :  { %8012 = vrot.lane.b32.xlu1 %v16678_v50, %s11786_s8  ;;  %8130 = vrot.lane.b32.xlu0 %v16580_v63, %s11790_s18 }
 0xc6e   :  { %7918 = vrot.lane.b32.xlu1 %v16660_v2, %s11783_s29  ;;  %7920 = vrot.lane.b32.xlu0 %v16696_v10, %s11783_s29 }
 0xc72   :  { %8048 = vrot.lane.b32.xlu1 %v16678_v50, %s11787_s13  ;;  %7950 = vrot.lane.b32.xlu0 %v16696_v10, %s11784_s30 }
 0xc76   :  { %7978 = vrot.lane.b32.xlu1 %v16660_v2, %s11785_s7  ;;  %7980 = vrot.lane.b32.xlu0 %v16696_v10, %s11785_s7 }
 0xc7a   :  { %8080 = vrot.lane.b32.xlu1 %v16635_v13, %s11788_s14  ;;  %8010 = vrot.lane.b32.xlu0 %v16696_v10, %s11786_s8 }
 0xc7e   :  { %8108 = vrot.lane.b32.xlu1 %v16678_v50, %s11789_s15  ;;  %7948 = vrot.lane.b32.xlu0 %v16660_v2, %s11784_s30 }
 0xc82   :  { %8140 = vrot.lane.b32.xlu1 %v16635_v13, %s11790_s18  ;;  %8050 = vrot.lane.b32.xlu0 %v16635_v13, %s11787_s13 }
 0xc86   :  { %8046 = vrot.lane.b32.xlu1 %v16696_v10, %s11787_s13  ;;  %8078 = vrot.lane.b32.xlu0 %v16678_v50, %s11788_s14 }
 0xc89   :  { %v7945_v0 = vpop.permute.xlu0 %7944  ;;  %v7915_v12 = vpop.permute.xlu1 %7914 }
 0xc8a   :  { %8106 = vrot.lane.b32.xlu1 %v16696_v10, %s11789_s15  ;;  %8110 = vrot.lane.b32.xlu0 %v16635_v13, %s11789_s15 }
 0xc8d   :  { %v8005_v51 = vpop.permute.xlu0 %8004  ;;  %v7975_v4 = vpop.permute.xlu1 %7974 }
 0xc8e   :  { %8008 = vrot.lane.b32.xlu0 %v16660_v2, %s11786_s8 }
 0xc91   :  { %v16732_v45 = vpop.permute.xlu0 %7916  ;;  %v16743_v61 = vpop.permute.xlu1 %7946 }
 0xc92   :  { %8138 = vrot.lane.b32.xlu0 %v16678_v50, %s11790_s18  ;;  %v7930_v56 = vsel %vm425_vm1, %v7915_v12, %v16732_v45  ;;  %v7960_v47 = vsel %vm666_vm2, %v7945_v0, %v16743_v61 }
 0xc93   :  { %8266 = vmatprep.subr.bf16.mxu1 %v7930_v56 }
 0xc95   :  { %v16745_v14 = vpop.permute.xlu1 %8006  ;;  %v16756_v9 = vpop.permute.xlu0 %7976 }
 0xc96   :  { %8076 = vrot.lane.b32.xlu0 %v16696_v10, %s11788_s14  ;;  %v7990_v44 = vsel %vm907_vm3, %v7975_v4, %v16756_v9  ;;  %v8020_v57 = vsel %vm1148_vm4, %v8005_v51, %v16745_v14 }
 0xc9a   :  { %8136 = vrot.lane.b32.xlu0 %v16696_v10, %s11790_s18 }
 0xcae   :  { %v7925_v32 = vpop.permute.xlu1 %7924 }
 0xcaf   :  { %v7931_v39 = vsel %vm425_vm1, %v7925_v32, %v7915_v12 }
 0xcb0   :  { %8267 = vmatpush1.bf16.msra.mxu1 %v7931_v39 }
 0xcb1   :  { %8268 = vmatprep.subr.bf16.mxu1 %v7960_v47 }
 0xcb2   :  { %v8043_v62 = vpop.permute.xlu1 %8042 }
 0xcb6   :  { %v16752_v15 = vpop.permute.xlu1 %7984 }
 0xcb7   :  { %v7991_v35 = vsel %vm907_vm3, %v16752_v15, %v7975_v4 }
 0xcba   :  { %v16754_v18 = vpop.permute.xlu1 %8040 }
 0xcbb   :  { %v8056_v49 = vsel %vm1485_vm5, %v16754_v18, %v8043_v62 }
 0xcc0   :  { %v16758_v37 = vpop.permute.xlu0 %8044  ;;  %v16760_v54 = vpop.permute.xlu1 %8074 }
 0xcc1   :  { %v8055_v16 = vsel %vm1485_vm5, %v8043_v62, %v16758_v37 }
 0xcc4   :  { %v7955_v23 = vpop.permute.xlu0 %7954  ;;  %v8103_v42 = vpop.permute.xlu1 %8102 }
 0xcc5   :  { %v7961_v11 = vsel %vm666_vm2, %v7955_v23, %v7945_v0 }
 0xcc6   :  { %8269 = vmatpush1.bf16.msra.mxu1 %v7961_v11 }
 0xcc7   :  { %8270 = vmatprep.subr.bf16.mxu1 %v7990_v44 }
 0xcc8   :  { %v8073_v8 = vpop.permute.xlu0 %8072  ;;  %v16767_v28 = vpop.permute.xlu1 %8100 }
 0xcca   :  { %8271 = vmatpush1.bf16.msra.mxu1 %v7991_v35 }
 0xccb   :  { %8272 = vmatprep.subr.bf16.mxu1 %v8020_v57 }
 0xccc   :  { %v8015_v5 = vpop.permute.xlu0 %8014  ;;  %v16775_v58 = vpop.permute.xlu1 %8134 }
 0xccd   :  { %v8021_v48 = vsel %vm1148_vm4, %v8015_v5, %v8005_v51  ;;  %v8116_v51 = vsel %vm1967_vm7, %v16767_v28, %v8103_v42 }
 0xcce   :  { %8273 = vmatpush1.bf16.msra.mxu1 %v8021_v48 }
 0xccf   :  { %8274 = vmatprep.subr.bf16.mxu1 %v16595_v27  ;;  %v8085_v27 = vsel %vm1726_vm6, %v8073_v8, %v16760_v54 }
 0xcd0   :  { %v16780_v59 = vpop.permute.xlu0 %8070  ;;  %v7923_v34 = vpop.permute.xlu1 %7922 }
 0xcd1   :  { %v8086_v3 = vsel %vm1726_vm6, %v16780_v59, %v8073_v8 }
 0xcd2   :  { %8275 = vmatpush1.bf16.msra.mxu1 %v16580_v63 }
 0xcd3   :  { %8276 = vmatprep.subr.bf16.mxu1 %v8055_v16 }
 0xcd4   :  { %v16786_v36 = vpop.permute.xlu0 %8104  ;;  %v7953_v19 = vpop.permute.xlu1 %7952 }
 0xcd5   :  { %v8115_v24 = vsel %vm1967_vm7, %v8103_v42, %v16786_v36  ;;  %v7926_v42 = vsel %vm425_vm1, %v7923_v34, %v7925_v32  ;;  %v7956_v35 = vsel %vm666_vm2, %v7953_v19, %v7955_v23 }
 0xcd6   :  { %8277 = vmatpush1.bf16.msra.mxu1 %v8056_v49 }
 0xcd7   :  { %8278 = vmatprep.subr.bf16.mxu1 %v8085_v27 }
 0xcd8   :  { %v8133_v60 = vpop.permute.xlu0 %8132  ;;  %v7983_v63 = vpop.permute.xlu1 %7982 }
 0xcd9   :  { %v8145_v12 = vsel %vm2208_vm8, %v8133_v60, %v16775_v58 }
 0xcda   :  { %8279 = vmatpush1.bf16.msra.mxu1 %v8086_v3 }
 0xcdb   :  { %8280 = vmatprep.subr.bf16.mxu1 %v8115_v24 }
 0xcdc   :  { %v16800_v22 = vpop.permute.xlu0 %8130  ;;  %v8013_v0 = vpop.permute.xlu1 %8012 }
 0xcdd   :  { %v8146_v39 = vsel %vm2208_vm8, %v16800_v22, %v8133_v60 }
 0xcde   :  { %8281 = vmatpush1.bf16.msra.mxu1 %v8116_v51 }
 0xcdf   :  { %8282 = vmatprep.subr.bf16.mxu1 %v8145_v12 }
 0xce0   :  { %v7921_v56 = vpop.permute.xlu0 %7920  ;;  %v7919_v4 = vpop.permute.xlu1 %7918 }
 0xce1   :  { %v7928_v47 = vsel %vm425_vm1, %v7919_v4, %v7921_v56  ;;  %v7929_v62 = vsel %vm425_vm1, %v16732_v45, %v7919_v4  ;;  %v7927_v44 = vsel %vm425_vm1, %v7921_v56, %v7923_v34  ;;  %v11769_v34 = vld [vmem:[%s17729_s2 + $0x4] ss:$8 sps:$4 sm:$0xff]  }
 0xce2   :  { %8283 = vmatpush1.bf16.msra.mxu1 %v8146_v39  ;;  %8319 = vmatprep.subr.bf16.mxu0 %v7928_v47 }
 0xce3   :  { %8320 = vmatpush1.bf16.msra.mxu0 %v7929_v62  ;;  %8372 = vmatprep.subr.bf16.mxu1 %v7926_v42  ;;  %v11771_v42 = vld [vmem:[%s17729_s2 + $0x14] ss:$8 sps:$4 sm:$0xff]  }
 0xce4   :  { %v7951_v11 = vpop.permute.xlu0 %7950  ;;  %v16821_v8 = vpop.permute.xlu1 %8048 }
 0xce5   :  { %8299 = vmatmul.mubr.bf16.vlgmr.msra.gmra.mrb[56].mxu1 %v16427_v52  ;;  %v7957_v32 = vsel %vm666_vm2, %v7951_v11, %v7953_v19  ;;  %v7986_v52 = vsel %vm907_vm3, %v7983_v63, %v16752_v15 }
 0xce6   :  { %8373 = vmatpush1.bf16.msra.mxu1 %v7927_v44  ;;  %10339 = vmatprep.mubr.msk.bf16.mxu1 %vm2831_vm0, %v16434_v29  ;;  %v8016_v29 = vsel %vm1148_vm4, %v8013_v0, %v8015_v5 }
 0xce7   :  { %8374 = vmatprep.subr.bf16.mxu1 %v7956_v35  ;;  %v11772_v35 = vld [vmem:[%s17729_s2 + $0x10] ss:$8 sps:$4 sm:$0xff]  }
 0xce8   :  { %v7981_v45 = vpop.permute.xlu0 %7980  ;;  %v7979_v57 = vpop.permute.xlu1 %7978 }
 0xce9   :  { %v7987_v23 = vsel %vm907_vm3, %v7981_v45, %v7983_v63  ;;  %v7988_v5 = vsel %vm907_vm3, %v7979_v57, %v7981_v45 }
 0xcea   :  { %8375 = vmatpush1.bf16.msra.mxu1 %v7957_v32 }
 0xceb   :  { %8376 = vmatprep.subr.bf16.mxu1 %v7986_v52 }
 0xcec   :  { %v8011_v48 = vpop.permute.xlu0 %8010  ;;  %v8081_v49 = vpop.permute.xlu1 %8080 }
 0xced   :  { %8309 = vmatmul.mubr.bf16.gmra.mrb[60].mxu1 %v16450_v55  ;;  %v8017_v55 = vsel %vm1148_vm4, %v8011_v48, %v8013_v0  ;;  %v8087_v24 = vsel %vm1726_vm6, %v8081_v49, %v16780_v59 }
 0xcee   :  { %8377 = vmatpush1.bf16.msra.mxu1 %v7987_v23  ;;  %10342 = vmatprep.mubr.msk.bf16.mxu1 %vm2831_vm0, %v11769_v34 }
 0xcef   :  { %8378 = vmatprep.subr.bf16.mxu1 %v8016_v29 }
 0xcf0   :  { %v7949_v15 = vpop.permute.xlu0 %7948  ;;  %v8109_v63 = vpop.permute.xlu1 %8108 }
 0xcf1   :  { %v7958_v16 = vsel %vm666_vm2, %v7949_v15, %v7951_v11  ;;  %v7959_v19 = vsel %vm666_vm2, %v16743_v61, %v7949_v15  ;;  %v7989_v61 = vsel %vm907_vm3, %v16756_v9, %v7979_v57 }
 0xcf2   :  { %8321 = vmatprep.subr.bf16.mxu0 %v7958_v16  ;;  %8379 = vmatpush1.bf16.msra.mxu1 %v8017_v55 }
 0xcf3   :  { %8322 = vmatpush1.bf16.msra.mxu0 %v7959_v19  ;;  %8380 = vmatprep.subr.bf16.mxu1 %v16635_v13 }
 0xcf4   :  { %v8051_v27 = vpop.permute.xlu0 %8050  ;;  %8323 = vmatprep.subr.bf16.mxu0 %v7988_v5  ;;  %v8141_v0 = vpop.permute.xlu1 %8140 }
 0xcf5   :  { %v8057_v60 = vsel %vm1485_vm5, %v8051_v27, %v16754_v18  ;;  %v8052_v13 = vsel %vm1485_vm5, %v16821_v8, %v8051_v27 }
 0xcf6   :  { %8381 = vmatpush1.bf16.msra.mxu1 %v16678_v50 }
 0xcf7   :  { %8324 = vmatpush1.bf16.msra.mxu0 %v7989_v61  ;;  %8382 = vmatprep.subr.bf16.mxu1 %v8057_v60 }
 0xcf8   :  { %v8079_v3 = vpop.permute.xlu0 %8078  ;;  %v8047_v4 = vpop.permute.xlu1 %8046 }
 0xcf9   :  { %v8082_v50 = vsel %vm1726_vm6, %v8079_v3, %v8081_v49 }
 0xcfa   :  { %8383 = vmatpush1.bf16.msra.mxu1 %v8052_v13 }
 0xcfb   :  { %8384 = vmatprep.subr.bf16.mxu1 %v8087_v24 }
 0xcfc   :  { %v8111_v18 = vpop.permute.xlu0 %8110  ;;  %v8107_v11 = vpop.permute.xlu1 %8106 }
 0xcfd   :  { %v8117_v9 = vsel %vm1967_vm7, %v8111_v18, %v16767_v28  ;;  %v8112_v56 = vsel %vm1967_vm7, %v8109_v63, %v8111_v18  ;;  %v8147_v28 = vsel %vm2208_vm8, %v8141_v0, %v16800_v22  ;;  %v11770_v22 = vld [vmem:[%s17729_s2] ss:$8 sps:$4 sm:$0xff]   ;;  %v8114_v45 = vsel %vm1967_vm7, %v16786_v36, %v8107_v11 }
 0xcfe   :  { %8385 = vmatpush1.bf16.msra.mxu1 %v8082_v50 }
 0xcff   :  { %8386 = vmatprep.subr.bf16.mxu1 %v8117_v9 }
 0xd00   :  { %v8009_v51 = vpop.permute.xlu0 %8008 }
 0xd01   :  { %v8018_v12 = vsel %vm1148_vm4, %v8009_v51, %v8011_v48  ;;  %v8019_v59 = vsel %vm1148_vm4, %v16745_v14, %v8009_v51  ;;  %v8053_v14 = vsel %vm1485_vm5, %v8047_v4, %v16821_v8 }
 0xd02   :  { %8325 = vmatprep.subr.bf16.mxu0 %v8018_v12  ;;  %8387 = vmatpush1.bf16.msra.mxu1 %v8112_v56 }
 0xd03   :  { %8326 = vmatpush1.bf16.msra.mxu0 %v8019_v59  ;;  %8388 = vmatprep.subr.bf16.mxu1 %v8147_v28 }
 0xd04   :  { %v8139_v39 = vpop.permute.xlu0 %8138  ;;  %8327 = vmatprep.subr.bf16.mxu0 %v16696_v10  ;;  %v8054_v10 = vsel %vm1485_vm5, %v16758_v37, %v8047_v4  ;;  %v8113_v37 = vsel %vm1967_vm7, %v8107_v11, %v8109_v63 }
 0xd05   :  { %v8142_v47 = vsel %vm2208_vm8, %v8139_v39, %v8141_v0 }
 0xd06   :  { %8389 = vmatpush1.bf16.msra.mxu1 %v8142_v47 }
 0xd07   :  { %8328 = vmatpush1.bf16.msra.mxu0 %v16660_v2 }
 0xd08   :  { %v8077_v62 = vpop.permute.xlu0 %8076  ;;  %8329 = vmatprep.subr.bf16.mxu0 %v8053_v14 }
 0xd09   :  { %8405 = vmatmul.mubr.bf16.vlgmr.msra.gmra.mrb[64].mxu1 %v11770_v22  ;;  %v8083_v2 = vsel %vm1726_vm6, %v8077_v62, %v8079_v3  ;;  %v8084_v44 = vsel %vm1726_vm6, %v16760_v54, %v8077_v62 }
 0xd0a   :  { %10343 = vmatprep.mubr.msk.bf16.mxu1 %vm2831_vm0, %v11771_v42 }
 0xd0b   :  { %8330 = vmatpush1.bf16.msra.mxu0 %v8054_v10 }
 0xd0c   :  { %8331 = vmatprep.subr.bf16.mxu0 %v8083_v2  ;;  %v8137_v8 = vpop.permute.xlu0 %8136 }
 0xd0d   :  { %v8143_v32 = vsel %vm2208_vm8, %v8137_v8, %v8139_v39  ;;  %v8144_v54 = vsel %vm2208_vm8, %v16775_v58, %v8137_v8 }
 0xd0f   :  { %8332 = vmatpush1.bf16.msra.mxu0 %v8084_v44 }
 0xd10   :  { %8333 = vmatprep.subr.bf16.mxu0 %v8113_v37 }
 0xd11   :  { %8415 = vmatmul.mubr.bf16.gmra.mrb[68].mxu1 %v11772_v35 }
 0xd13   :  { %8334 = vmatpush1.bf16.msra.mxu0 %v8114_v45 }
 0xd14   :  { %8335 = vmatprep.subr.bf16.mxu0 %v8143_v32 }
 0xd17   :  { %8336 = vmatpush1.bf16.msra.mxu0 %v8144_v54 }
 0xd1a   :  { %8352 = vmatmul.mubr.bf16.vlgmr.msra.gmra.mrb[64].mxu0 %v11770_v22 }
 0xd1b   :  { %10341 = vmatprep.mubr.msk.bf16.mxu0 %vm2831_vm0, %v11771_v42 }
 0xd22   :  { %8362 = vmatmul.mubr.bf16.gmra.mrb[68].mxu0 %v11772_v35 }
 0xdb8   :  { %v8300_v52 = vpop.f32.mrb[56].mxu1 }
 0xdb9   :  { %v10580_v57 = vadd.f32 %v8300_v52, %v15041_v17  ;;  %v8302_v48 = vpop.f32.mrb[57].mxu1 }
 0xdba   :  { %v10581_v36 = vadd.f32 %v8302_v48, %v15041_v17  ;;  %v8304_v23 = vpop.f32.mrb[58].mxu1 }
 0xdbb   :  { %v10344_v29 = vmul.f32 -1.442695, %v10580_v57  ;;  %v10582_v34 = vadd.f32 %v8304_v23, %v15043_v41  ;;  %v8306_v15 = vpop.f32.mrb[59].mxu1 }
 0xdbc   :  { %v10345_v16 = vmul.f32 -1.442695, %v10581_v36  ;;  %v10583_v55 = vadd.f32 %v8306_v15, %v15043_v41 }
 0xdbd   :  { %11446 = vpow2.f32 %v10344_v29  ;;  %v10350_v58 = vmul.f32 -1.442695, %v10582_v34 }
 0xdbe   :  { %11448 = vpow2.f32 %v10345_v16  ;;  %v10351_v19 = vmul.f32 -1.442695, %v10583_v55 }
 0xdbf   :  { %11450 = vpow2.f32 %v10350_v58 }
 0xdc0   :  { %11452 = vpow2.f32 %v10351_v19  ;;  %v8310_v49 = vpop.f32.mrb[60].mxu1 }
 0xdc1   :  { %v8312_v5 = vpop.f32.mrb[61].mxu1  ;;  %v10584_v27 = vadd.f32 %v8310_v49, %v15049_v20 }
 0xdc2   :  { %v8314_v60 = vpop.f32.mrb[62].mxu1  ;;  %v10585_v61 = vadd.f32 %v8312_v5, %v15049_v20 }
 0xdc3   :  { %v10586_v63 = vadd.f32 %v8314_v60, %v15051_v1  ;;  %v8316_v3 = vpop.f32.mrb[63].mxu1  ;;  %11454 = vtanh.f32 %v10584_v27 }
 0xdc4   :  { %v10587_v13 = vadd.f32 %v8316_v3, %v15051_v1  ;;  %11456 = vtanh.f32 %v10585_v61 }
 0xdc5   :  { %v10356_v24 = vmul.f32 -1.442695, %v10586_v63 }
 0xdc6   :  { %v10357_v18 = vmul.f32 -1.442695, %v10587_v13 }
 0xdc7   :  { %v11447_v50 = vpop.eup %11446  ;;  %11458 = vpow2.f32 %v10356_v24 }
 0xdc8   :  { %v11449_v9 = vpop.eup %11448  ;;  %v8443_v0 = vadd.f32 1.0, %v11447_v50  ;;  %11460 = vpow2.f32 %v10357_v18 }
 0xdc9   :  { %v11451_v51 = vpop.eup %11450  ;;  %v8444_v12 = vadd.f32 1.0, %v11449_v9 }
 0xdca   :  { %v11453_v56 = vpop.eup %11452  ;;  %11462 = vrcp.f32 %v8443_v0  ;;  %v8479_v59 = vadd.f32 1.0, %v11451_v51 }
 0xdcb   :  { %11464 = vrcp.f32 %v8444_v12  ;;  %v8480_v28 = vadd.f32 1.0, %v11453_v56 }
 0xdcc   :  { %11466 = vrcp.f32 %v8479_v59 }
 0xdcd   :  { %11468 = vrcp.f32 %v8480_v28  ;;  %v11455_v4 = vpop.eup %11454 }
 0xdce   :  { %v11457_v39 = vpop.eup %11456 }
 0xdd1   :  { %v11459_v47 = vpop.eup %11458 }
 0xdd2   :  { %v11461_v14 = vpop.eup %11460  ;;  %v8521_v42 = vadd.f32 1.0, %v11459_v47 }
 0xdd3   :  { %v8522_v44 = vadd.f32 1.0, %v11461_v14 }
 0xdd4   :  { %v11463_v62 = vpop.eup %11462  ;;  %11470 = vrcp.f32 %v8521_v42 }
 0xdd5   :  { %v11465_v22 = vpop.eup %11464  ;;  %v8551_v10 = vmul.f32 %v11463_v62, %v11455_v4  ;;  %11472 = vrcp.f32 %v8522_v44 }
 0xdd6   :  { %v11467_v2 = vpop.eup %11466  ;;  %v8552_v11 = vmul.f32 %v11465_v22, %v11457_v39 }
 0xdd7   :  { %v11469_v37 = vpop.eup %11468  ;;  %v8545_v8 = vmul.f32 %v11467_v2, %v16547_v38 }
 0xdd8   :  { %v8546_v35 = vmul.f32 %v11469_v37, %v16549_v31 }
 0xdd9   :  { %v16925_v45 = vadd.f32 %v8551_v10, %v8545_v8 }
 0xdda   :  { %v16927_v32 = vadd.f32 %v8552_v11, %v8546_v35 }
 0xddb   :  { %11474 = vtanh.f32 %v16925_v45 }
 0xddc   :  { %11476 = vtanh.f32 %v16927_v32  ;;  %v8406_v54 = vpop.f32.mrb[64].mxu1 }
 0xddd   :  { %v10596_v52 = vadd.f32 %v8406_v54, %v15041_v17  ;;  %v8408_v57 = vpop.f32.mrb[65].mxu1 }
 0xdde   :  { %v10597_v48 = vadd.f32 %v8408_v57, %v15041_v17  ;;  %v8410_v36 = vpop.f32.mrb[66].mxu1  ;;  %v11471_v55 = vpop.eup %11470 }
 0xddf   :  { %v10348_v38 = vmul.f32 -1.442695, %v10596_v52  ;;  %v10598_v31 = vadd.f32 %v8410_v36, %v15043_v41  ;;  %v8412_v23 = vpop.f32.mrb[67].mxu1  ;;  %v11473_v58 = vpop.eup %11472 }
 0xde0   :  { %v10349_v29 = vmul.f32 -1.442695, %v10597_v48  ;;  %v10599_v34 = vadd.f32 %v8412_v23, %v15043_v41 }
 0xde1   :  { %11478 = vpow2.f32 %v10348_v38  ;;  %v10354_v15 = vmul.f32 -1.442695, %v10598_v31 }
 0xde2   :  { %11480 = vpow2.f32 %v10349_v29  ;;  %v10355_v16 = vmul.f32 -1.442695, %v10599_v34 }
 0xde3   :  { %11482 = vpow2.f32 %v10354_v15 }
 0xde4   :  { %11484 = vpow2.f32 %v10355_v16  ;;  %v8416_v19 = vpop.f32.mrb[68].mxu1 }
 0xde5   :  { %v11475_v49 = vpop.eup %11474  ;;  %v8418_v5 = vpop.f32.mrb[69].mxu1  ;;  %v10600_v61 = vadd.f32 %v8416_v19, %v15049_v20 }
 0xde6   :  { %v11477_v27 = vpop.eup %11476  ;;  %v8569_v60 = vmul.f32 %v11475_v49, %v11471_v55  ;;  %v8420_v63 = vpop.f32.mrb[70].mxu1  ;;  %v10601_v0 = vadd.f32 %v8418_v5, %v15049_v20 }
 0xde7   :  { %v8570_v3 = vmul.f32 %v11477_v27, %v11473_v58  ;;  %v10602_v13 = vadd.f32 %v8420_v63, %v15051_v1  ;;  %v8422_v24 = vpop.f32.mrb[71].mxu1  ;;  %11486 = vtanh.f32 %v10600_v61 }
 0xde8   :  { %v8575_v18 = vmul.f32 %v16562_v33, %v8569_v60  ;;  %v10603_v50 = vadd.f32 %v8422_v24, %v15051_v1 }
 0xde9   :  { %v8576_v9 = vmul.f32 %v16569_v21, %v8570_v3  ;;  %v10360_v51 = vmul.f32 -1.442695, %v10602_v13 }
 0xdea   :  { %v8581_v12 = vpack.c.bf16 %v8575_v18, %v8575_v18  ;;  %v10361_v56 = vmul.f32 -1.442695, %v10603_v50 }
 0xdeb   :  { %v11479_v59 = vpop.eup %11478  ;;  %v8582_v28 = vpack.c.bf16 %v8576_v9, %v8576_v9  ;;  %v10451_v4 = vpack.c.bf16 %v8576_v9, %v8575_v18  ;;  %11488 = vpow2.f32 %v10360_v51 }
 0xdec   :  { %v11481_v39 = vpop.eup %11480  ;;  %8593 = vst [vmem:[#allocation5] sm:$0xf] %v8581_v12  ;;  %v8447_v47 = vadd.f32 1.0, %v11479_v59  ;;  %11490 = vpow2.f32 %v10361_v56 }
 0xded   :  { %v11483_v14 = vpop.eup %11482  ;;  %8594 = vst [vmem:[#allocation5 + $0x8] sm:$0xf] %v8582_v28  ;;  %10365 = vst [vmem:[%s17732_s5 + $0x78] sm:$0xff] %v10451_v4  ;;  %v8448_v33 = vadd.f32 1.0, %v11481_v39  ;;  %11492 = vtanh.f32 %v10601_v0  ;;  %v8353_v21 = vpop.f32.mrb[64].mxu0 }
 0xdee   :  { %v11485_v62 = vpop.eup %11484  ;;  %11494 = vrcp.f32 %v8447_v47  ;;  %v8483_v22 = vadd.f32 1.0, %v11483_v14  ;;  %v10588_v10 = vadd.f32 %v8353_v21, %v15041_v17  ;;  %v8355_v42 = vpop.f32.mrb[65].mxu0 }
 0xdef   :  { %11496 = vrcp.f32 %v8448_v33  ;;  %v8484_v2 = vadd.f32 1.0, %v11485_v62  ;;  %v10589_v11 = vadd.f32 %v8355_v42, %v15041_v17  ;;  %v8357_v44 = vpop.f32.mrb[66].mxu0 }
 0xdf0   :  { %11498 = vrcp.f32 %v8483_v22  ;;  %v10346_v37 = vmul.f32 -1.442695, %v10588_v10  ;;  %v10590_v8 = vadd.f32 %v8357_v44, %v15043_v41  ;;  %v8359_v35 = vpop.f32.mrb[67].mxu0 }
 0xdf1   :  { %11500 = vrcp.f32 %v8484_v2  ;;  %v10347_v54 = vmul.f32 -1.442695, %v10589_v11  ;;  %v10591_v52 = vadd.f32 %v8359_v35, %v15043_v41  ;;  %v11487_v38 = vpop.eup %11486 }
 0xdf2   :  { %11502 = vpow2.f32 %v10346_v37  ;;  %v10352_v57 = vmul.f32 -1.442695, %v10590_v8 }
 0xdf3   :  { %11504 = vpow2.f32 %v10347_v54  ;;  %v10353_v48 = vmul.f32 -1.442695, %v10591_v52  ;;  %v16948_v36 = vld [vmem:[#allocation5] sm:$0xff] }
 0xdf4   :  { %11506 = vpow2.f32 %v10352_v57  ;;  %8663 = vrot.lane.b32.xlu0 %v16948_v36, %s11784_s30  ;;  %8633 = vrot.lane.b32.xlu1 %v16948_v36, %s11783_s29  ;;  %v16963_v51 = vld [vmem:[#allocation5 + $0x8] sm:$0xff] }
 0xdf5   :  { %v11489_v31 = vpop.eup %11488  ;;  %11508 = vpow2.f32 %v10353_v48  ;;  %v8363_v23 = vpop.f32.mrb[68].mxu0 }
 0xdf6   :  { %v11491_v29 = vpop.eup %11490  ;;  %v8525_v34 = vadd.f32 1.0, %v11489_v31  ;;  %v8365_v15 = vpop.f32.mrb[69].mxu0  ;;  %v10592_v58 = vadd.f32 %v8363_v23, %v15049_v20 }
 0xdf7   :  { %v11493_v16 = vpop.eup %11492  ;;  %v8526_v55 = vadd.f32 1.0, %v11491_v29  ;;  %v8367_v19 = vpop.f32.mrb[70].mxu0  ;;  %v10593_v5 = vadd.f32 %v8365_v15, %v15049_v20 }
 0xdf8   :  { %v11495_v49 = vpop.eup %11494  ;;  %v10594_v27 = vadd.f32 %v8367_v19, %v15051_v1  ;;  %8723 = vrot.lane.b32.xlu0 %v16948_v36, %s11786_s8  ;;  %8693 = vrot.lane.b32.xlu1 %v16948_v36, %s11785_s7  ;;  %v8369_v60 = vpop.f32.mrb[71].mxu0  ;;  %11510 = vrcp.f32 %v8525_v34 }
 0xdf9   :  { %v11497_v61 = vpop.eup %11496  ;;  %v8555_v63 = vmul.f32 %v11495_v49, %v11487_v38  ;;  %v10595_v3 = vadd.f32 %v8369_v60, %v15051_v1  ;;  %11512 = vrcp.f32 %v8526_v55 }
 0xdfa   :  { %v11499_v13 = vpop.eup %11498  ;;  %v8556_v24 = vmul.f32 %v11497_v61, %v11493_v16  ;;  %v10358_v18 = vmul.f32 -1.442695, %v10594_v27  ;;  %11514 = vtanh.f32 %v10592_v58 }
 0xdfb   :  { %v11501_v50 = vpop.eup %11500  ;;  %v8549_v9 = vmul.f32 %v11499_v13, %v16602_v40  ;;  %v10359_v0 = vmul.f32 -1.442695, %v10595_v3  ;;  %11516 = vtanh.f32 %v10593_v5 }
 0xdfc   :  { %v11503_v12 = vpop.eup %11502  ;;  %v8550_v56 = vmul.f32 %v11501_v50, %v16604_v6  ;;  %8635 = vrot.lane.b32.xlu0 %v16963_v51, %s11783_s29  ;;  %8665 = vrot.lane.b32.xlu1 %v16963_v51, %s11784_s30  ;;  %11518 = vpow2.f32 %v10358_v18 }
 0xdfd   :  { %v11505_v59 = vpop.eup %11504  ;;  %v16970_v28 = vadd.f32 %v8555_v63, %v8549_v9  ;;  %v8445_v4 = vadd.f32 1.0, %v11503_v12  ;;  %11520 = vpow2.f32 %v10359_v0 }
 0xdfe   :  { %v11507_v40 = vpop.eup %11506  ;;  %v16972_v39 = vadd.f32 %v8556_v24, %v8550_v56  ;;  %v8446_v47 = vadd.f32 1.0, %v11505_v59 }
 0xdff   :  { %v11509_v14 = vpop.eup %11508  ;;  %11522 = vtanh.f32 %v16970_v28  ;;  %v8481_v6 = vadd.f32 1.0, %v11507_v40 }
 0xe00   :  { %11524 = vtanh.f32 %v16972_v39  ;;  %v8482_v33 = vadd.f32 1.0, %v11509_v14  ;;  %8695 = vrot.lane.b32.xlu0 %v16963_v51, %s11785_s7  ;;  %8725 = vrot.lane.b32.xlu1 %v16963_v51, %s11786_s8 }
 0xe01   :  { %11526 = vrcp.f32 %v8445_v4 }
 0xe02   :  { %11528 = vrcp.f32 %v8446_v47  ;;  %v11511_v21 = vpop.eup %11510 }
 0xe03   :  { %11530 = vrcp.f32 %v8481_v6  ;;  %v11513_v62 = vpop.eup %11512 }
 0xe04   :  { %11532 = vrcp.f32 %v8482_v33  ;;  %v11515_v22 = vpop.eup %11514 }
 0xe05   :  { %v11517_v10 = vpop.eup %11516 }
 0xe06   :  { %v11519_v42 = vpop.eup %11518 }
 0xe07   :  { %v11521_v2 = vpop.eup %11520  ;;  %v8523_v48 = vadd.f32 1.0, %v11519_v42 }
 0xe08   :  { %v8524_v29 = vadd.f32 1.0, %v11521_v2 }
 0xe09   :  { %v11523_v11 = vpop.eup %11522  ;;  %11534 = vrcp.f32 %v8523_v48 }
 0xe0a   :  { %v11525_v44 = vpop.eup %11524  ;;  %v8573_v37 = vmul.f32 %v11523_v11, %v11511_v21  ;;  %11536 = vrcp.f32 %v8524_v29 }
 0xe0b   :  { %v11527_v8 = vpop.eup %11526  ;;  %v8574_v35 = vmul.f32 %v11525_v44, %v11513_v62 }
 0xe0c   :  { %v11529_v54 = vpop.eup %11528  ;;  %v8579_v52 = vmul.f32 %v16615_v43, %v8573_v37  ;;  %v8553_v57 = vmul.f32 %v11527_v8, %v11515_v22 }
 0xe0d   :  { %v11531_v38 = vpop.eup %11530  ;;  %v8580_v31 = vmul.f32 %v16621_v30, %v8574_v35  ;;  %v8554_v23 = vmul.f32 %v11529_v54, %v11517_v10 }
 0xe0e   :  { %v11533_v34 = vpop.eup %11532  ;;  %v8585_v15 = vpack.c.bf16 %v8579_v52, %v8579_v52  ;;  %v8547_v16 = vmul.f32 %v11531_v38, %v16626_v46 }
 0xe0f   :  { %v8586_v55 = vpack.c.bf16 %v8580_v31, %v8580_v31  ;;  %v10453_v58 = vpack.c.bf16 %v8580_v31, %v8579_v52  ;;  %v8548_v19 = vmul.f32 %v11533_v34, %v16631_v7 }
 0xe10   :  { %8597 = vst [vmem:[#allocation5 + $0x20] sm:$0xf] %v8585_v15  ;;  %v16984_v49 = vadd.f32 %v8553_v57, %v8547_v16 }
 0xe11   :  { %8598 = vst [vmem:[#allocation5 + $0x28] sm:$0xf] %v8586_v55  ;;  %10367 = vst [vmem:[%s17732_s5 + $0x88] sm:$0xff] %v10453_v58  ;;  %v16989_v43 = vadd.f32 %v8554_v23, %v8548_v19 }
 0xe12   :  { %11538 = vtanh.f32 %v16984_v49 }
 0xe13   :  { %11540 = vtanh.f32 %v16989_v43  ;;  %v11535_v46 = vpop.eup %11534 }
 0xe14   :  { %v11537_v7 = vpop.eup %11536 }
 0xe18   :  { %v16993_v30 = vld [vmem:[#allocation5 + $0x28] sm:$0xff] }
 0xe19   :  { %8643 = vrot.lane.b32.xlu1 %v16993_v30, %s11783_s29 }
 0xe1c   :  { %v11539_v5 = vpop.eup %11538 }
 0xe1d   :  { %v11541_v27 = vpop.eup %11540  ;;  %v8571_v60 = vmul.f32 %v11539_v5, %v11535_v46  ;;  %8761 = vrot.lane.b32.xlu1 %v16963_v51, %s11787_s13 }
 0xe1e   :  { %v8572_v61 = vmul.f32 %v11541_v27, %v11537_v7 }
 0xe1f   :  { %v8577_v63 = vmul.f32 %v16644_v53, %v8571_v60  ;;  %v17026_v53 = vld [vmem:[#allocation5 + $0x20] sm:$0xff] }
 0xe20   :  { %v8578_v3 = vmul.f32 %v16650_v25, %v8572_v61  ;;  %v17039_v25 = vld [vmem:[%s17729_s2 + $0x4] ss:$8 sps:$4 sm:$0xff]  }
 0xe21   :  { %v8583_v13 = vpack.c.bf16 %v8577_v63, %v8577_v63  ;;  %8703 = vrot.lane.b32.xlu1 %v16993_v30, %s11785_s7  ;;  %10372 = vmatprep.mubr.msk.bf16.mxu0 %vm2831_vm0, %v17039_v25 }
 0xe22   :  { %v8584_v24 = vpack.c.bf16 %v8578_v3, %v8578_v3  ;;  %v10452_v18 = vpack.c.bf16 %v8578_v3, %v8577_v63  ;;  %10374 = vmatprep.mubr.msk.bf16.mxu1 %vm2831_vm0, %v17039_v25 }
 0xe23   :  { %8595 = vst [vmem:[#allocation5 + $0x10] sm:$0xf] %v8583_v13 }
 0xe24   :  { %8596 = vst [vmem:[#allocation5 + $0x18] sm:$0xf] %v8584_v24  ;;  %10366 = vst [vmem:[%s17732_s5 + $0x80] sm:$0xff] %v10452_v18 }
 0xe25   :  { %8759 = vrot.lane.b32.xlu1 %v16948_v36, %s11787_s13 }
 0xe2a   :  { %v17008_v50 = vld [vmem:[#allocation5 + $0x10] sm:$0xff] }
 0xe2b   :  { %8793 = vrot.lane.b32.xlu1 %v17008_v50, %s11788_s14  ;;  %8763 = vrot.lane.b32.xlu0 %v17008_v50, %s11787_s13  ;;  %v17053_v9 = vld [vmem:[#allocation5 + $0x18] sm:$0xff] }
 0xe2f   :  { %8821 = vrot.lane.b32.xlu1 %v16963_v51, %s11789_s15  ;;  %8673 = vrot.lane.b32.xlu0 %v16993_v30, %s11784_s30 }
 0xe33   :  { %8819 = vrot.lane.b32.xlu1 %v16948_v36, %s11789_s15  ;;  %8791 = vrot.lane.b32.xlu0 %v16963_v51, %s11788_s14 }
 0xe37   :  { %8853 = vrot.lane.b32.xlu1 %v17008_v50, %s11790_s18  ;;  %8733 = vrot.lane.b32.xlu0 %v16993_v30, %s11786_s8 }
 0xe3b   :  { %8641 = vrot.lane.b32.xlu1 %v17026_v53, %s11783_s29  ;;  %8789 = vrot.lane.b32.xlu0 %v16948_v36, %s11788_s14 }
 0xe3f   :  { %8671 = vrot.lane.b32.xlu1 %v17026_v53, %s11784_s30  ;;  %8823 = vrot.lane.b32.xlu0 %v17008_v50, %s11789_s15 }
 0xe43   :  { %8701 = vrot.lane.b32.xlu1 %v17026_v53, %s11785_s7  ;;  %8851 = vrot.lane.b32.xlu0 %v16963_v51, %s11790_s18 }
 0xe47   :  { %8731 = vrot.lane.b32.xlu1 %v17026_v53, %s11786_s8  ;;  %8849 = vrot.lane.b32.xlu0 %v16948_v36, %s11790_s18 }
 0xe4b   :  { %8637 = vrot.lane.b32.xlu1 %v17008_v50, %s11783_s29  ;;  %8639 = vrot.lane.b32.xlu0 %v17053_v9, %s11783_s29 }
 0xe4f   :  { %8767 = vrot.lane.b32.xlu1 %v17026_v53, %s11787_s13  ;;  %8669 = vrot.lane.b32.xlu0 %v17053_v9, %s11784_s30 }
 0xe53   :  { %8697 = vrot.lane.b32.xlu1 %v17008_v50, %s11785_s7  ;;  %8699 = vrot.lane.b32.xlu0 %v17053_v9, %s11785_s7 }
 0xe57   :  { %8799 = vrot.lane.b32.xlu1 %v16993_v30, %s11788_s14  ;;  %8729 = vrot.lane.b32.xlu0 %v17053_v9, %s11786_s8 }
 0xe5b   :  { %8827 = vrot.lane.b32.xlu1 %v17026_v53, %s11789_s15  ;;  %8667 = vrot.lane.b32.xlu0 %v17008_v50, %s11784_s30 }
 0xe5f   :  { %8859 = vrot.lane.b32.xlu1 %v16993_v30, %s11790_s18  ;;  %8769 = vrot.lane.b32.xlu0 %v16993_v30, %s11787_s13 }
 0xe63   :  { %8765 = vrot.lane.b32.xlu1 %v17053_v9, %s11787_s13  ;;  %8797 = vrot.lane.b32.xlu0 %v17026_v53, %s11788_s14 }
 0xe66   :  { %v8664_v0 = vpop.permute.xlu0 %8663  ;;  %v8634_v56 = vpop.permute.xlu1 %8633 }
 0xe67   :  { %8825 = vrot.lane.b32.xlu1 %v17053_v9, %s11789_s15  ;;  %8829 = vrot.lane.b32.xlu0 %v16993_v30, %s11789_s15 }
 0xe6a   :  { %v8724_v12 = vpop.permute.xlu0 %8723  ;;  %v8694_v40 = vpop.permute.xlu1 %8693 }
 0xe6b   :  { %8727 = vrot.lane.b32.xlu0 %v17008_v50, %s11786_s8 }
 0xe6e   :  { %v17089_v59 = vpop.permute.xlu0 %8635  ;;  %v17100_v47 = vpop.permute.xlu1 %8665 }
 0xe6f   :  { %8857 = vrot.lane.b32.xlu0 %v17026_v53, %s11790_s18  ;;  %v8649_v4 = vsel %vm425_vm1, %v8634_v56, %v17089_v59  ;;  %v8679_v21 = vsel %vm666_vm2, %v8664_v0, %v17100_v47 }
 0xe70   :  { %8985 = vmatprep.subr.bf16.mxu0 %v8649_v4 }
 0xe72   :  { %v17102_v14 = vpop.permute.xlu1 %8725  ;;  %v17113_v42 = vpop.permute.xlu0 %8695 }
 0xe73   :  { %8795 = vrot.lane.b32.xlu0 %v17053_v9, %s11788_s14  ;;  %v8709_v35 = vsel %vm907_vm3, %v8694_v40, %v17113_v42  ;;  %v8739_v48 = vsel %vm1148_vm4, %v8724_v12, %v17102_v14 }
 0xe77   :  { %8855 = vrot.lane.b32.xlu0 %v17053_v9, %s11790_s18 }
 0xe8b   :  { %v8644_v6 = vpop.permute.xlu1 %8643 }
 0xe8c   :  { %v8650_v33 = vsel %vm425_vm1, %v8644_v6, %v8634_v56  ;;  %v17183_v56 = vld [vmem:[%s17729_s2 + $0x14] ss:$8 sps:$4 sm:$0xff]  }
 0xe8d   :  { %8986 = vmatpush1.bf16.msra.mxu0 %v8650_v33 }
 0xe8e   :  { %8987 = vmatprep.subr.bf16.mxu0 %v8679_v21 }
 0xe8f   :  { %v8762_v62 = vpop.permute.xlu1 %8761 }
 0xe93   :  { %v17109_v22 = vpop.permute.xlu1 %8703 }
 0xe94   :  { %v8710_v57 = vsel %vm907_vm3, %v17109_v22, %v8694_v40 }
 0xe97   :  { %v17111_v10 = vpop.permute.xlu1 %8759 }
 0xe98   :  { %v8775_v58 = vsel %vm1485_vm5, %v17111_v10, %v8762_v62 }
 0xe9d   :  { %v17115_v2 = vpop.permute.xlu0 %8763  ;;  %v17117_v11 = vpop.permute.xlu1 %8793 }
 0xe9e   :  { %v8774_v15 = vsel %vm1485_vm5, %v8762_v62, %v17115_v2  ;;  %v17199_v62 = vld [vmem:[%s17729_s2 + $0x10] ss:$8 sps:$4 sm:$0xff]  }
 0xea1   :  { %v8674_v44 = vpop.permute.xlu0 %8673  ;;  %v8822_v37 = vpop.permute.xlu1 %8821 }
 0xea2   :  { %v8680_v8 = vsel %vm666_vm2, %v8674_v44, %v8664_v0  ;;  %v17176_v0 = vld [vmem:[%s17729_s2] ss:$8 sps:$4 sm:$0xff]  }
 0xea3   :  { %8988 = vmatpush1.bf16.msra.mxu0 %v8680_v8 }
 0xea4   :  { %8989 = vmatprep.subr.bf16.mxu0 %v8709_v35 }
 0xea5   :  { %v8792_v54 = vpop.permute.xlu0 %8791  ;;  %v17124_v52 = vpop.permute.xlu1 %8819 }
 0xea6   :  { %v8835_v60 = vsel %vm1967_vm7, %v17124_v52, %v8822_v37 }
 0xea7   :  { %8990 = vmatpush1.bf16.msra.mxu0 %v8710_v57 }
 0xea8   :  { %8991 = vmatprep.subr.bf16.mxu0 %v8739_v48 }
 0xea9   :  { %v8734_v38 = vpop.permute.xlu0 %8733  ;;  %v17132_v31 = vpop.permute.xlu1 %8853 }
 0xeaa   :  { %v8740_v23 = vsel %vm1148_vm4, %v8734_v38, %v8724_v12 }
 0xeab   :  { %8992 = vmatpush1.bf16.msra.mxu0 %v8740_v23 }
 0xeac   :  { %8993 = vmatprep.subr.bf16.mxu0 %v16963_v51  ;;  %v8804_v51 = vsel %vm1726_vm6, %v8792_v54, %v17117_v11 }
 0xead   :  { %v17137_v29 = vpop.permute.xlu0 %8789  ;;  %v8642_v34 = vpop.permute.xlu1 %8641 }
 0xeae   :  { %v8805_v46 = vsel %vm1726_vm6, %v17137_v29, %v8792_v54  ;;  %v8645_v12 = vsel %vm425_vm1, %v8642_v34, %v8644_v6 }
 0xeaf   :  { %8994 = vmatpush1.bf16.msra.mxu0 %v16948_v36 }
 0xeb0   :  { %8995 = vmatprep.subr.bf16.mxu0 %v8774_v15 }
 0xeb1   :  { %v17143_v16 = vpop.permute.xlu0 %8823  ;;  %v8672_v55 = vpop.permute.xlu1 %8671 }
 0xeb2   :  { %v8834_v7 = vsel %vm1967_vm7, %v8822_v37, %v17143_v16  ;;  %v8675_v33 = vsel %vm666_vm2, %v8672_v55, %v8674_v44 }
 0xeb3   :  { %8996 = vmatpush1.bf16.msra.mxu0 %v8775_v58 }
 0xeb4   :  { %8997 = vmatprep.subr.bf16.mxu0 %v8804_v51 }
 0xeb5   :  { %v8852_v19 = vpop.permute.xlu0 %8851  ;;  %v8702_v36 = vpop.permute.xlu1 %8701 }
 0xeb6   :  { %v8864_v61 = vsel %vm2208_vm8, %v8852_v19, %v17132_v31  ;;  %v8705_v37 = vsel %vm907_vm3, %v8702_v36, %v17109_v22 }
 0xeb7   :  { %8998 = vmatpush1.bf16.msra.mxu0 %v8805_v46 }
 0xeb8   :  { %8999 = vmatprep.subr.bf16.mxu0 %v8834_v7 }
 0xeb9   :  { %v17157_v5 = vpop.permute.xlu0 %8849  ;;  %v8732_v27 = vpop.permute.xlu1 %8731 }
 0xeba   :  { %v8865_v13 = vsel %vm2208_vm8, %v17157_v5, %v8852_v19  ;;  %v8735_v54 = vsel %vm1148_vm4, %v8732_v27, %v8734_v38 }
 0xebb   :  { %9000 = vmatpush1.bf16.msra.mxu0 %v8835_v60 }
 0xebc   :  { %9001 = vmatprep.subr.bf16.mxu0 %v8864_v61 }
 0xebd   :  { %v8640_v63 = vpop.permute.xlu0 %8639  ;;  %v8638_v3 = vpop.permute.xlu1 %8637 }
 0xebe   :  { %v8648_v24 = vsel %vm425_vm1, %v17089_v59, %v8638_v3  ;;  %v8647_v18 = vsel %vm425_vm1, %v8638_v3, %v8640_v63  ;;  %v8646_v4 = vsel %vm425_vm1, %v8640_v63, %v8642_v34 }
 0xebf   :  { %9002 = vmatpush1.bf16.msra.mxu0 %v8865_v13  ;;  %9038 = vmatprep.subr.bf16.mxu1 %v8647_v18 }
 0xec0   :  { %9039 = vmatpush1.bf16.msra.mxu1 %v8648_v24  ;;  %9091 = vmatprep.subr.bf16.mxu0 %v8645_v12 }
 0xec1   :  { %v8670_v59 = vpop.permute.xlu0 %8669  ;;  %v17188_v40 = vpop.permute.xlu1 %8767 }
 0xec2   :  { %9018 = vmatmul.mubr.bf16.vlgmr.msra.gmra.mrb[72].mxu0 %v17176_v0  ;;  %v8676_v21 = vsel %vm666_vm2, %v8670_v59, %v8672_v55 }
 0xec3   :  { %9092 = vmatpush1.bf16.msra.mxu0 %v8646_v4  ;;  %10373 = vmatprep.mubr.msk.bf16.mxu0 %vm2831_vm0, %v17183_v56 }
 0xec4   :  { %9093 = vmatprep.subr.bf16.mxu0 %v8675_v33 }
 0xec5   :  { %v8700_v6 = vpop.permute.xlu0 %8699  ;;  %v8698_v44 = vpop.permute.xlu1 %8697 }
 0xec6   :  { %v8706_v35 = vsel %vm907_vm3, %v8700_v6, %v8702_v36  ;;  %v8707_v38 = vsel %vm907_vm3, %v8698_v44, %v8700_v6 }
 0xec7   :  { %9094 = vmatpush1.bf16.msra.mxu0 %v8676_v21 }
 0xec8   :  { %9095 = vmatprep.subr.bf16.mxu0 %v8705_v37 }
 0xec9   :  { %v8730_v8 = vpop.permute.xlu0 %8729  ;;  %v8800_v34 = vpop.permute.xlu1 %8799 }
 0xeca   :  { %9028 = vmatmul.mubr.bf16.gmra.mrb[76].mxu0 %v17199_v62  ;;  %v8736_v22 = vsel %vm1148_vm4, %v8730_v8, %v8732_v27  ;;  %v8806_v19 = vsel %vm1726_vm6, %v8800_v34, %v17137_v29 }
 0xecb   :  { %9096 = vmatpush1.bf16.msra.mxu0 %v8706_v35  ;;  %10376 = vmatprep.mubr.msk.bf16.mxu0 %vm2831_vm0, %v17039_v25 }
 0xecc   :  { %9097 = vmatprep.subr.bf16.mxu0 %v8735_v54 }
 0xecd   :  { %v8668_v57 = vpop.permute.xlu0 %8667  ;;  %v8828_v58 = vpop.permute.xlu1 %8827 }
 0xece   :  { %v8678_v48 = vsel %vm666_vm2, %v17100_v47, %v8668_v57  ;;  %v8677_v23 = vsel %vm666_vm2, %v8668_v57, %v8670_v59  ;;  %v8708_v47 = vsel %vm907_vm3, %v17113_v42, %v8698_v44 }
 0xecf   :  { %9040 = vmatprep.subr.bf16.mxu1 %v8677_v23  ;;  %9098 = vmatpush1.bf16.msra.mxu0 %v8736_v22 }
 0xed0   :  { %9041 = vmatpush1.bf16.msra.mxu1 %v8678_v48  ;;  %9099 = vmatprep.subr.bf16.mxu0 %v16993_v30 }
 0xed1   :  { %v8770_v15 = vpop.permute.xlu0 %8769  ;;  %9042 = vmatprep.subr.bf16.mxu1 %v8707_v38  ;;  %v8860_v36 = vpop.permute.xlu1 %8859 }
 0xed2   :  { %v8776_v55 = vsel %vm1485_vm5, %v8770_v15, %v17111_v10  ;;  %v8771_v30 = vsel %vm1485_vm5, %v17188_v40, %v8770_v15 }
 0xed3   :  { %9100 = vmatpush1.bf16.msra.mxu0 %v17026_v53 }
 0xed4   :  { %9043 = vmatpush1.bf16.msra.mxu1 %v8708_v47  ;;  %9101 = vmatprep.subr.bf16.mxu0 %v8776_v55 }
 0xed5   :  { %v8798_v51 = vpop.permute.xlu0 %8797  ;;  %v8766_v60 = vpop.permute.xlu1 %8765 }
 0xed6   :  { %v8801_v42 = vsel %vm1726_vm6, %v8798_v51, %v8800_v34 }
 0xed7   :  { %9102 = vmatpush1.bf16.msra.mxu0 %v8771_v30 }
 0xed8   :  { %9103 = vmatprep.subr.bf16.mxu0 %v8806_v19 }
 0xed9   :  { %v8830_v10 = vpop.permute.xlu0 %8829 }
 0xeda   :  { %v8836_v53 = vsel %vm1967_vm7, %v8830_v10, %v17124_v52  ;;  %v8831_v7 = vsel %vm1967_vm7, %v8828_v58, %v8830_v10  ;;  %v8866_v52 = vsel %vm2208_vm8, %v8860_v36, %v17157_v5  ;;  %v8773_v5 = vsel %vm1485_vm5, %v17115_v2, %v8766_v60 }
 0xedb   :  { %9104 = vmatpush1.bf16.msra.mxu0 %v8801_v42 }
 0xedc   :  { %9105 = vmatprep.subr.bf16.mxu0 %v8836_v53 }
 0xedd   :  { %v8728_v46 = vpop.permute.xlu0 %8727 }
 0xede   :  { %v8738_v29 = vsel %vm1148_vm4, %v17102_v14, %v8728_v46  ;;  %v8737_v27 = vsel %vm1148_vm4, %v8728_v46, %v8730_v8  ;;  %v8772_v14 = vsel %vm1485_vm5, %v8766_v60, %v17188_v40 }
 0xedf   :  { %9044 = vmatprep.subr.bf16.mxu1 %v8737_v27  ;;  %9106 = vmatpush1.bf16.msra.mxu0 %v8831_v7 }
 0xee0   :  { %9045 = vmatpush1.bf16.msra.mxu1 %v8738_v29  ;;  %9107 = vmatprep.subr.bf16.mxu0 %v8866_v52 }
 0xee1   :  { %v8858_v61 = vpop.permute.xlu0 %8857  ;;  %9046 = vmatprep.subr.bf16.mxu1 %v17053_v9 }
 0xee2   :  { %v8861_v63 = vsel %vm2208_vm8, %v8858_v61, %v8860_v36 }
 0xee3   :  { %9108 = vmatpush1.bf16.msra.mxu0 %v8861_v63 }
 0xee4   :  { %9047 = vmatpush1.bf16.msra.mxu1 %v17008_v50  ;;  %v8826_v50 = vpop.permute.xlu1 %8825 }
 0xee5   :  { %v8796_v3 = vpop.permute.xlu0 %8795  ;;  %9048 = vmatprep.subr.bf16.mxu1 %v8772_v14  ;;  %v8832_v24 = vsel %vm1967_vm7, %v8826_v50, %v8828_v58  ;;  %v8833_v2 = vsel %vm1967_vm7, %v17143_v16, %v8826_v50 }
 0xee6   :  { %9124 = vmatmul.mubr.bf16.vlgmr.msra.gmra.mrb[80].mxu0 %v17176_v0  ;;  %v8802_v9 = vsel %vm1726_vm6, %v8796_v3, %v8798_v51  ;;  %v8803_v13 = vsel %vm1726_vm6, %v17117_v11, %v8796_v3 }
 0xee7   :  { %10377 = vmatprep.mubr.msk.bf16.mxu0 %vm2831_vm0, %v17183_v56 }
 0xee8   :  { %9049 = vmatpush1.bf16.msra.mxu1 %v8773_v5 }
 0xee9   :  { %9050 = vmatprep.subr.bf16.mxu1 %v8802_v9  ;;  %v8856_v18 = vpop.permute.xlu0 %8855 }
 0xeea   :  { %v8862_v12 = vsel %vm2208_vm8, %v8856_v18, %v8858_v61  ;;  %v8863_v11 = vsel %vm2208_vm8, %v17132_v31, %v8856_v18 }
 0xeec   :  { %9051 = vmatpush1.bf16.msra.mxu1 %v8803_v13 }
 0xeed   :  { %9052 = vmatprep.subr.bf16.mxu1 %v8832_v24 }
 0xeee   :  { %9134 = vmatmul.mubr.bf16.gmra.mrb[84].mxu0 %v17199_v62 }
 0xeef   :  { %10408 = vmatprep.mubr.msk.bf16.mxu0 %vm2831_vm0, %v17039_v25 }
 0xef0   :  { %9053 = vmatpush1.bf16.msra.mxu1 %v8833_v2 }
 0xef1   :  { %9054 = vmatprep.subr.bf16.mxu1 %v8862_v12 }
 0xef4   :  { %9055 = vmatpush1.bf16.msra.mxu1 %v8863_v11 }
 0xef7   :  { %9071 = vmatmul.mubr.bf16.vlgmr.msra.gmra.mrb[72].mxu1 %v17176_v0 }
 0xef8   :  { %10375 = vmatprep.mubr.msk.bf16.mxu1 %vm2831_vm0, %v17183_v56 }
 0xeff   :  { %9081 = vmatmul.mubr.bf16.gmra.mrb[76].mxu1 %v17199_v62 }
 0xf00   :  { %10406 = vmatprep.mubr.msk.bf16.mxu1 %vm2831_vm0, %v17039_v25 }
 0xf95   :  { %v9019_v16 = vpop.f32.mrb[72].mxu0 }
 0xf96   :  { %v10604_v59 = vadd.f32 %v9019_v16, %v15041_v17  ;;  %v9021_v4 = vpop.f32.mrb[73].mxu0 }
 0xf97   :  { %v10605_v40 = vadd.f32 %v9021_v4, %v15041_v17  ;;  %v9023_v33 = vpop.f32.mrb[74].mxu0 }
 0xf98   :  { %v10378_v6 = vmul.f32 -1.442695, %v10604_v59  ;;  %v10606_v31 = vadd.f32 %v9023_v33, %v15043_v41  ;;  %v9025_v21 = vpop.f32.mrb[75].mxu0 }
 0xf99   :  { %v10379_v37 = vmul.f32 -1.442695, %v10605_v40  ;;  %v10607_v44 = vadd.f32 %v9025_v21, %v15043_v41 }
 0xf9a   :  { %11542 = vpow2.f32 %v10378_v6  ;;  %v10384_v8 = vmul.f32 -1.442695, %v10606_v31 }
 0xf9b   :  { %11544 = vpow2.f32 %v10379_v37  ;;  %v10385_v35 = vmul.f32 -1.442695, %v10607_v44 }
 0xf9c   :  { %11546 = vpow2.f32 %v10384_v8 }
 0xf9d   :  { %11548 = vpow2.f32 %v10385_v35  ;;  %v9029_v25 = vpop.f32.mrb[76].mxu0 }
 0xf9e   :  { %v9031_v54 = vpop.f32.mrb[77].mxu0  ;;  %v10608_v57 = vadd.f32 %v9029_v25, %v15049_v20 }
 0xf9f   :  { %v9033_v22 = vpop.f32.mrb[78].mxu0  ;;  %v10609_v48 = vadd.f32 %v9031_v54, %v15049_v20 }
 0xfa0   :  { %v10610_v23 = vadd.f32 %v9033_v22, %v15051_v1  ;;  %v9035_v34 = vpop.f32.mrb[79].mxu0  ;;  %11550 = vtanh.f32 %v10608_v57 }
 0xfa1   :  { %v10611_v38 = vadd.f32 %v9035_v34, %v15051_v1  ;;  %11552 = vtanh.f32 %v10609_v48  ;;  %v17311_v34 = vld [vmem:[%s17731_s4] sm:$0xff] }
 0xfa2   :  { %v10390_v15 = vmul.f32 -1.442695, %v10610_v23 }
 0xfa3   :  { %v10391_v55 = vmul.f32 -1.442695, %v10611_v38 }
 0xfa4   :  { %v11543_v47 = vpop.eup %11542  ;;  %11554 = vpow2.f32 %v10390_v15 }
 0xfa5   :  { %v11545_v58 = vpop.eup %11544  ;;  %v9162_v51 = vadd.f32 1.0, %v11543_v47  ;;  %11556 = vpow2.f32 %v10391_v55  ;;  %v17318_v55 = vld [vmem:[%s17731_s4 + $0x8] sm:$0xff] }
 0xfa6   :  { %v11547_v30 = vpop.eup %11546  ;;  %v9163_v19 = vadd.f32 1.0, %v11545_v58 }
 0xfa7   :  { %v11549_v10 = vpop.eup %11548  ;;  %11558 = vrcp.f32 %v9162_v51  ;;  %v9198_v42 = vadd.f32 1.0, %v11547_v30 }
 0xfa8   :  { %11560 = vrcp.f32 %v9163_v19  ;;  %v9199_v53 = vadd.f32 1.0, %v11549_v10 }
 0xfa9   :  { %11562 = vrcp.f32 %v9198_v42 }
 0xfaa   :  { %11564 = vrcp.f32 %v9199_v53  ;;  %v11551_v36 = vpop.eup %11550 }
 0xfab   :  { %v11553_v46 = vpop.eup %11552 }
 0xfae   :  { %v11555_v7 = vpop.eup %11554 }
 0xfaf   :  { %v11557_v29 = vpop.eup %11556  ;;  %v9240_v61 = vadd.f32 1.0, %v11555_v7 }
 0xfb0   :  { %v9241_v3 = vadd.f32 1.0, %v11557_v29 }
 0xfb1   :  { %v11559_v27 = vpop.eup %11558  ;;  %11566 = vrcp.f32 %v9240_v61 }
 0xfb2   :  { %v11561_v52 = vpop.eup %11560  ;;  %v9270_v60 = vmul.f32 %v11559_v27, %v11551_v36  ;;  %11568 = vrcp.f32 %v9241_v3 }
 0xfb3   :  { %v11563_v63 = vpop.eup %11562  ;;  %v9271_v14 = vmul.f32 %v11561_v52, %v11553_v46 }
 0xfb4   :  { %v11565_v5 = vpop.eup %11564  ;;  %v9264_v9 = vmul.f32 %v11563_v63, %v16925_v45 }
 0xfb5   :  { %v9265_v50 = vmul.f32 %v11565_v5, %v16927_v32 }
 0xfb6   :  { %v17296_v13 = vadd.f32 %v9270_v60, %v9264_v9 }
 0xfb7   :  { %v17298_v24 = vadd.f32 %v9271_v14, %v9265_v50 }
 0xfb8   :  { %11570 = vtanh.f32 %v17296_v13 }
 0xfb9   :  { %11572 = vtanh.f32 %v17298_v24  ;;  %v9125_v18 = vpop.f32.mrb[80].mxu0 }
 0xfba   :  { %v10620_v2 = vadd.f32 %v9125_v18, %v15041_v17  ;;  %v9127_v12 = vpop.f32.mrb[81].mxu0 }
 0xfbb   :  { %v10621_v11 = vadd.f32 %v9127_v12, %v15041_v17  ;;  %v9129_v16 = vpop.f32.mrb[82].mxu0  ;;  %v11567_v31 = vpop.eup %11566 }
 0xfbc   :  { %v10382_v45 = vmul.f32 -1.442695, %v10620_v2  ;;  %v10622_v32 = vadd.f32 %v9129_v16, %v15043_v41  ;;  %v9131_v59 = vpop.f32.mrb[83].mxu0  ;;  %v11569_v21 = vpop.eup %11568 }
 0xfbd   :  { %v10383_v4 = vmul.f32 -1.442695, %v10621_v11  ;;  %v10623_v40 = vadd.f32 %v9131_v59, %v15043_v41 }
 0xfbe   :  { %11574 = vpow2.f32 %v10382_v45  ;;  %v10388_v33 = vmul.f32 -1.442695, %v10622_v32 }
 0xfbf   :  { %11576 = vpow2.f32 %v10383_v4  ;;  %v10389_v6 = vmul.f32 -1.442695, %v10623_v40 }
 0xfc0   :  { %11578 = vpow2.f32 %v10388_v33 }
 0xfc1   :  { %11580 = vpow2.f32 %v10389_v6  ;;  %v9135_v37 = vpop.f32.mrb[84].mxu0 }
 0xfc2   :  { %v11571_v44 = vpop.eup %11570  ;;  %v9137_v8 = vpop.f32.mrb[85].mxu0  ;;  %v10624_v54 = vadd.f32 %v9135_v37, %v15049_v20 }
 0xfc3   :  { %v11573_v35 = vpop.eup %11572  ;;  %v9288_v25 = vmul.f32 %v11571_v44, %v11567_v31  ;;  %v9139_v57 = vpop.f32.mrb[86].mxu0  ;;  %v10625_v58 = vadd.f32 %v9137_v8, %v15049_v20 }
 0xfc4   :  { %v9289_v22 = vmul.f32 %v11573_v35, %v11569_v21  ;;  %v10626_v48 = vadd.f32 %v9139_v57, %v15051_v1  ;;  %v9141_v23 = vpop.f32.mrb[87].mxu0  ;;  %11582 = vtanh.f32 %v10624_v54 }
 0xfc5   :  { %v9294_v38 = vmul.f32 %v17311_v34, %v9288_v25  ;;  %v10627_v15 = vadd.f32 %v9141_v23, %v15051_v1 }
 0xfc6   :  { %v9295_v47 = vmul.f32 %v17318_v55, %v9289_v22  ;;  %v10394_v51 = vmul.f32 -1.442695, %v10626_v48 }
 0xfc7   :  { %v9300_v30 = vpack.c.bf16 %v9294_v38, %v9294_v38  ;;  %v10395_v19 = vmul.f32 -1.442695, %v10627_v15 }
 0xfc8   :  { %v11575_v10 = vpop.eup %11574  ;;  %v9301_v42 = vpack.c.bf16 %v9295_v47, %v9295_v47  ;;  %v10454_v53 = vpack.c.bf16 %v9295_v47, %v9294_v38  ;;  %11584 = vpow2.f32 %v10394_v51 }
 0xfc9   :  { %v11577_v36 = vpop.eup %11576  ;;  %9312 = vst [vmem:[#allocation5] sm:$0xf] %v9300_v30  ;;  %v9166_v46 = vadd.f32 1.0, %v11575_v10  ;;  %11586 = vpow2.f32 %v10395_v19 }
 0xfca   :  { %v11579_v7 = vpop.eup %11578  ;;  %10399 = vst [vmem:[%s17732_s5 + $0x90] sm:$0xff] %v10454_v53  ;;  %9313 = vst [vmem:[#allocation5 + $0x8] sm:$0xf] %v9301_v42  ;;  %v9167_v29 = vadd.f32 1.0, %v11577_v36  ;;  %11588 = vtanh.f32 %v10625_v58  ;;  %v9072_v27 = vpop.f32.mrb[72].mxu1 }
 0xfcb   :  { %v11581_v52 = vpop.eup %11580  ;;  %11590 = vrcp.f32 %v9166_v46  ;;  %v9202_v60 = vadd.f32 1.0, %v11579_v7  ;;  %v10612_v61 = vadd.f32 %v9072_v27, %v15041_v17  ;;  %v9074_v63 = vpop.f32.mrb[73].mxu1 }
 0xfcc   :  { %11592 = vrcp.f32 %v9167_v29  ;;  %v9203_v14 = vadd.f32 1.0, %v11581_v52  ;;  %v10613_v3 = vadd.f32 %v9074_v63, %v15041_v17  ;;  %v9076_v5 = vpop.f32.mrb[74].mxu1 }
 0xfcd   :  { %11594 = vrcp.f32 %v9202_v60  ;;  %v10380_v9 = vmul.f32 -1.442695, %v10612_v61  ;;  %v10614_v50 = vadd.f32 %v9076_v5, %v15043_v41  ;;  %v9078_v18 = vpop.f32.mrb[75].mxu1 }
 0xfce   :  { %11596 = vrcp.f32 %v9203_v14  ;;  %v10381_v2 = vmul.f32 -1.442695, %v10613_v3  ;;  %v10615_v12 = vadd.f32 %v9078_v18, %v15043_v41  ;;  %v11583_v32 = vpop.eup %11582 }
 0xfcf   :  { %11598 = vpow2.f32 %v10380_v9  ;;  %v10386_v11 = vmul.f32 -1.442695, %v10614_v50 }
 0xfd0   :  { %11600 = vpow2.f32 %v10381_v2  ;;  %v10387_v16 = vmul.f32 -1.442695, %v10615_v12  ;;  %v17329_v45 = vld [vmem:[#allocation5] sm:$0xff] }
 0xfd1   :  { %11602 = vpow2.f32 %v10386_v11  ;;  %9352 = vrot.lane.b32.xlu1 %v17329_v45, %s11783_s29  ;;  %v17348_v27 = vld [vmem:[#allocation5 + $0x8] sm:$0xff]  ;;  %v17360_v11 = vld [vmem:[%s17731_s4 + $0x20] sm:$0xff] }
 0xfd2   :  { %v11585_v59 = vpop.eup %11584  ;;  %11604 = vpow2.f32 %v10387_v16  ;;  %v9082_v4 = vpop.f32.mrb[76].mxu1 }
 0xfd3   :  { %v11587_v40 = vpop.eup %11586  ;;  %v9244_v33 = vadd.f32 1.0, %v11585_v59  ;;  %v9084_v6 = vpop.f32.mrb[77].mxu1  ;;  %v10616_v37 = vadd.f32 %v9082_v4, %v15049_v20 }
 0xfd4   :  { %v11589_v31 = vpop.eup %11588  ;;  %v9245_v21 = vadd.f32 1.0, %v11587_v40  ;;  %v9086_v44 = vpop.f32.mrb[78].mxu1  ;;  %v10617_v35 = vadd.f32 %v9084_v6, %v15049_v20  ;;  %v17366_v40 = vld [vmem:[%s17731_s4 + $0x28] sm:$0xff] }
 0xfd5   :  { %v11591_v8 = vpop.eup %11590  ;;  %v10618_v25 = vadd.f32 %v9086_v44, %v15051_v1  ;;  %9412 = vrot.lane.b32.xlu1 %v17329_v45, %s11785_s7  ;;  %v9088_v54 = vpop.f32.mrb[79].mxu1  ;;  %11606 = vrcp.f32 %v9244_v33 }
 0xfd6   :  { %v11593_v57 = vpop.eup %11592  ;;  %v9274_v22 = vmul.f32 %v11591_v8, %v11583_v32  ;;  %v10619_v48 = vadd.f32 %v9088_v54, %v15051_v1  ;;  %11608 = vrcp.f32 %v9245_v21 }
 0xfd7   :  { %v11595_v23 = vpop.eup %11594  ;;  %v9275_v38 = vmul.f32 %v11593_v57, %v11589_v31  ;;  %v10392_v15 = vmul.f32 -1.442695, %v10618_v25  ;;  %11610 = vtanh.f32 %v10616_v37 }
 0xfd8   :  { %v11597_v47 = vpop.eup %11596  ;;  %v9268_v58 = vmul.f32 %v11595_v23, %v16970_v28  ;;  %v10393_v51 = vmul.f32 -1.442695, %v10619_v48  ;;  %11612 = vtanh.f32 %v10617_v35 }
 0xfd9   :  { %v11599_v30 = vpop.eup %11598  ;;  %v9269_v19 = vmul.f32 %v11597_v47, %v16972_v39  ;;  %9478 = vrot.lane.b32.xlu1 %v17329_v45, %s11787_s13  ;;  %11614 = vpow2.f32 %v10392_v15  ;;  %v17387_v47 = vld [vmem:[%s17731_s4 + $0x10] sm:$0xff] }
 0xfda   :  { %v11601_v10 = vpop.eup %11600  ;;  %v17343_v42 = vadd.f32 %v9274_v22, %v9268_v58  ;;  %v9164_v53 = vadd.f32 1.0, %v11599_v30  ;;  %11616 = vpow2.f32 %v10393_v51  ;;  %v17393_v51 = vld [vmem:[%s17731_s4 + $0x18] sm:$0xff] }
 0xfdb   :  { %v11603_v36 = vpop.eup %11602  ;;  %v17345_v46 = vadd.f32 %v9275_v38, %v9269_v19  ;;  %v9165_v7 = vadd.f32 1.0, %v11601_v10 }
 0xfdc   :  { %v11605_v28 = vpop.eup %11604  ;;  %11618 = vtanh.f32 %v17343_v42  ;;  %v9200_v29 = vadd.f32 1.0, %v11603_v36 }
 0xfdd   :  { %11620 = vtanh.f32 %v17345_v46  ;;  %v9201_v39 = vadd.f32 1.0, %v11605_v28  ;;  %9384 = vrot.lane.b32.xlu1 %v17348_v27, %s11784_s30 }
 0xfde   :  { %11622 = vrcp.f32 %v9164_v53 }
 0xfdf   :  { %11624 = vrcp.f32 %v9165_v7  ;;  %v11607_v52 = vpop.eup %11606 }
 0xfe0   :  { %11626 = vrcp.f32 %v9200_v29  ;;  %v11609_v60 = vpop.eup %11608 }
 0xfe1   :  { %11628 = vrcp.f32 %v9201_v39  ;;  %9444 = vrot.lane.b32.xlu1 %v17348_v27, %s11786_s8  ;;  %v11611_v61 = vpop.eup %11610 }
 0xfe2   :  { %v11613_v63 = vpop.eup %11612 }
 0xfe3   :  { %v11615_v14 = vpop.eup %11614 }
 0xfe4   :  { %v11617_v3 = vpop.eup %11616  ;;  %v9242_v59 = vadd.f32 1.0, %v11615_v14 }
 0xfe5   :  { %9480 = vrot.lane.b32.xlu1 %v17348_v27, %s11787_s13  ;;  %v9243_v31 = vadd.f32 1.0, %v11617_v3 }
 0xfe6   :  { %v11619_v5 = vpop.eup %11618  ;;  %11630 = vrcp.f32 %v9242_v59 }
 0xfe7   :  { %v11621_v9 = vpop.eup %11620  ;;  %v9292_v50 = vmul.f32 %v11619_v5, %v11607_v52  ;;  %11632 = vrcp.f32 %v9243_v31 }
 0xfe8   :  { %v11623_v18 = vpop.eup %11622  ;;  %v9293_v2 = vmul.f32 %v11621_v9, %v11609_v60 }
 0xfe9   :  { %v11625_v12 = vpop.eup %11624  ;;  %v9298_v16 = vmul.f32 %v17360_v11, %v9292_v50  ;;  %v9272_v32 = vmul.f32 %v11623_v18, %v11611_v61 }
 0xfea   :  { %v11627_v4 = vpop.eup %11626  ;;  %v9299_v33 = vmul.f32 %v17366_v40, %v9293_v2  ;;  %v9273_v6 = vmul.f32 %v11625_v12, %v11613_v63 }
 0xfeb   :  { %v11629_v21 = vpop.eup %11628  ;;  %v9304_v37 = vpack.c.bf16 %v9298_v16, %v9298_v16  ;;  %v9266_v44 = vmul.f32 %v11627_v4, %v16984_v49 }
 0xfec   :  { %v9305_v8 = vpack.c.bf16 %v9299_v33, %v9299_v33  ;;  %v10456_v35 = vpack.c.bf16 %v9299_v33, %v9298_v16  ;;  %v9267_v25 = vmul.f32 %v11629_v21, %v16989_v43 }
 0xfed   :  { %9316 = vst [vmem:[#allocation5 + $0x20] sm:$0xf] %v9304_v37  ;;  %v17371_v54 = vadd.f32 %v9272_v32, %v9266_v44 }
 0xfee   :  { %10401 = vst [vmem:[%s17732_s5 + $0xa0] sm:$0xff] %v10456_v35  ;;  %9317 = vst [vmem:[#allocation5 + $0x28] sm:$0xf] %v9305_v8  ;;  %v17376_v57 = vadd.f32 %v9273_v6, %v9267_v25 }
 0xfef   :  { %11634 = vtanh.f32 %v17371_v54 }
 0xff0   :  { %11636 = vtanh.f32 %v17376_v57  ;;  %v11631_v43 = vpop.eup %11630 }
 0xff1   :  { %v11633_v22 = vpop.eup %11632 }
 0xff4   :  { %v17425_v7 = vld [vmem:[#allocation5 + $0x20] sm:$0xff] }
 0xff5   :  { %v17380_v49 = vld [vmem:[#allocation5 + $0x28] sm:$0xff] }
 0xff6   :  { %9362 = vrot.lane.b32.xlu1 %v17380_v49, %s11783_s29 }
 0xff9   :  { %v11635_v48 = vpop.eup %11634 }
 0xffa   :  { %v11637_v23 = vpop.eup %11636  ;;  %v9290_v38 = vmul.f32 %v11635_v48, %v11631_v43 }
 0xffb   :  { %v9291_v15 = vmul.f32 %v11637_v23, %v11633_v22 }
 0xffc   :  { %v9296_v58 = vmul.f32 %v17387_v47, %v9290_v38 }
 0xffd   :  { %v9297_v30 = vmul.f32 %v17393_v51, %v9291_v15 }
 0xffe   :  { %v9302_v19 = vpack.c.bf16 %v9296_v58, %v9296_v58 }
 0xfff   :  { %v9303_v10 = vpack.c.bf16 %v9297_v30, %v9297_v30  ;;  %v10455_v53 = vpack.c.bf16 %v9297_v30, %v9296_v58 }
0x1000   :  { %9314 = vst [vmem:[#allocation5 + $0x10] sm:$0xf] %v9302_v19 }
0x1001   :  { %10400 = vst [vmem:[%s17732_s5 + $0x98] sm:$0xff] %v10455_v53  ;;  %9315 = vst [vmem:[#allocation5 + $0x18] sm:$0xf] %v9303_v10 }
0x1007   :  { %v17399_v36 = vld [vmem:[#allocation5 + $0x10] sm:$0xff] }
0x1008   :  { %9512 = vrot.lane.b32.xlu1 %v17399_v36, %s11788_s14  ;;  %9482 = vrot.lane.b32.xlu0 %v17399_v36, %s11787_s13  ;;  %v17431_v28 = vld [vmem:[#allocation5 + $0x18] sm:$0xff] }
0x100c   :  { %9422 = vrot.lane.b32.xlu1 %v17380_v49, %s11785_s7  ;;  %9382 = vrot.lane.b32.xlu0 %v17329_v45, %s11784_s30 }
0x1010   :  { %9540 = vrot.lane.b32.xlu1 %v17348_v27, %s11789_s15  ;;  %9442 = vrot.lane.b32.xlu0 %v17329_v45, %s11786_s8 }
0x1014   :  { %9538 = vrot.lane.b32.xlu1 %v17329_v45, %s11789_s15  ;;  %9354 = vrot.lane.b32.xlu0 %v17348_v27, %s11783_s29 }
0x1018   :  { %9572 = vrot.lane.b32.xlu1 %v17399_v36, %s11790_s18  ;;  %9414 = vrot.lane.b32.xlu0 %v17348_v27, %s11785_s7 }
0x101c   :  { %9356 = vrot.lane.b32.xlu1 %v17399_v36, %s11783_s29  ;;  %9510 = vrot.lane.b32.xlu0 %v17348_v27, %s11788_s14 }
0x1020   :  { %9360 = vrot.lane.b32.xlu1 %v17425_v7, %s11783_s29  ;;  %9508 = vrot.lane.b32.xlu0 %v17329_v45, %s11788_s14 }
0x1024   :  { %9388 = vrot.lane.b32.xlu1 %v17431_v28, %s11784_s30  ;;  %9392 = vrot.lane.b32.xlu0 %v17380_v49, %s11784_s30 }
0x1028   :  { %9416 = vrot.lane.b32.xlu1 %v17399_v36, %s11785_s7  ;;  %9542 = vrot.lane.b32.xlu0 %v17399_v36, %s11789_s15 }
0x102c   :  { %9420 = vrot.lane.b32.xlu1 %v17425_v7, %s11785_s7  ;;  %9452 = vrot.lane.b32.xlu0 %v17380_v49, %s11786_s8 }
0x1030   :  { %9448 = vrot.lane.b32.xlu1 %v17431_v28, %s11786_s8  ;;  %9570 = vrot.lane.b32.xlu0 %v17348_v27, %s11790_s18 }
0x1034   :  { %9484 = vrot.lane.b32.xlu1 %v17431_v28, %s11787_s13  ;;  %9568 = vrot.lane.b32.xlu0 %v17329_v45, %s11790_s18 }
0x1038   :  { %9516 = vrot.lane.b32.xlu1 %v17425_v7, %s11788_s14  ;;  %9358 = vrot.lane.b32.xlu0 %v17431_v28, %s11783_s29 }
0x103c   :  { %9488 = vrot.lane.b32.xlu1 %v17380_v49, %s11787_s13  ;;  %9386 = vrot.lane.b32.xlu0 %v17399_v36, %s11784_s30 }
0x1040   :  { %9544 = vrot.lane.b32.xlu1 %v17431_v28, %s11789_s15  ;;  %9390 = vrot.lane.b32.xlu0 %v17425_v7, %s11784_s30 }
0x1043   :  { %v9353_v29 = vpop.permute.xlu1 %9352 }
0x1044   :  { %9548 = vrot.lane.b32.xlu1 %v17380_v49, %s11789_s15  ;;  %9418 = vrot.lane.b32.xlu0 %v17431_v28, %s11785_s7 }
0x1047   :  { %v9413_v39 = vpop.permute.xlu1 %9412 }
0x1048   :  { %9576 = vrot.lane.b32.xlu1 %v17425_v7, %s11790_s18  ;;  %9446 = vrot.lane.b32.xlu0 %v17399_v36, %s11786_s8 }
0x104b   :  { %v17483_v52 = vpop.permute.xlu1 %9478 }
0x104c   :  { %9450 = vrot.lane.b32.xlu0 %v17425_v7, %s11786_s8 }
0x104f   :  { %v17489_v60 = vpop.permute.xlu1 %9384 }
0x1050   :  { %9486 = vrot.lane.b32.xlu0 %v17425_v7, %s11787_s13 }
0x1053   :  { %v17491_v61 = vpop.permute.xlu1 %9444 }
0x1054   :  { %9514 = vrot.lane.b32.xlu0 %v17431_v28, %s11788_s14 }
0x1057   :  { %v9481_v63 = vpop.permute.xlu1 %9480 }
0x1058   :  { %9546 = vrot.lane.b32.xlu0 %v17425_v7, %s11789_s15  ;;  %v9494_v53 = vsel %vm1485_vm5, %v17483_v52, %v9481_v63 }
0x105c   :  { %9518 = vrot.lane.b32.xlu0 %v17380_v49, %s11788_s14 }
0x1060   :  { %9574 = vrot.lane.b32.xlu0 %v17431_v28, %s11790_s18 }
0x1064   :  { %9578 = vrot.lane.b32.xlu0 %v17380_v49, %s11790_s18 }
0x1068   :  { %v17493_v14 = vpop.permute.xlu1 %9362 }
0x1069   :  { %v9369_v59 = vsel %vm425_vm1, %v17493_v14, %v9353_v29 }
0x107a   :  { %v17495_v3 = vpop.permute.xlu0 %9482  ;;  %v17497_v5 = vpop.permute.xlu1 %9512 }
0x107b   :  { %v9493_v19 = vsel %vm1485_vm5, %v9481_v63, %v17495_v3 }
0x107e   :  { %v9383_v9 = vpop.permute.xlu0 %9382  ;;  %v17499_v50 = vpop.permute.xlu1 %9422 }
0x107f   :  { %v9398_v4 = vsel %vm666_vm2, %v9383_v9, %v17489_v60  ;;  %v9429_v22 = vsel %vm907_vm3, %v17499_v50, %v9413_v39 }
0x1082   :  { %v9443_v18 = vpop.permute.xlu0 %9442  ;;  %v9541_v2 = vpop.permute.xlu1 %9540 }
0x1083   :  { %v9458_v23 = vsel %vm1148_vm4, %v9443_v18, %v17491_v61 }
0x1086   :  { %v9355_v12 = vpop.permute.xlu0 %9354  ;;  %v17501_v16 = vpop.permute.xlu1 %9538 }
0x1087   :  { %v9368_v32 = vsel %vm425_vm1, %v9353_v29, %v9355_v12 }
0x1088   :  { %9704 = vmatprep.subr.bf16.mxu1 %v9368_v32 }
0x1089   :  { %9705 = vmatpush1.bf16.msra.mxu1 %v9369_v59 }
0x108a   :  { %v17511_v33 = vpop.permute.xlu0 %9414  ;;  %9706 = vmatprep.subr.bf16.mxu1 %v9398_v4  ;;  %v17513_v6 = vpop.permute.xlu1 %9572  ;;  %v9554_v4 = vsel %vm1967_vm7, %v17501_v16, %v9541_v2 }
0x108b   :  { %v9428_v25 = vsel %vm907_vm3, %v9413_v39, %v17511_v33 }
0x108e   :  { %v9511_v31 = vpop.permute.xlu0 %9510  ;;  %v9357_v21 = vpop.permute.xlu1 %9356 }
0x1092   :  { %v17515_v37 = vpop.permute.xlu0 %9508  ;;  %v9361_v44 = vpop.permute.xlu1 %9360 }
0x1096   :  { %v9393_v8 = vpop.permute.xlu0 %9392  ;;  %v9389_v48 = vpop.permute.xlu1 %9388 }
0x1097   :  { %v9399_v35 = vsel %vm666_vm2, %v9393_v8, %v9383_v9 }
0x1098   :  { %9707 = vmatpush1.bf16.msra.mxu1 %v9399_v35 }
0x1099   :  { %9708 = vmatprep.subr.bf16.mxu1 %v9428_v25 }
0x109a   :  { %v17522_v43 = vpop.permute.xlu0 %9542  ;;  %v9417_v58 = vpop.permute.xlu1 %9416 }
0x109b   :  { %v9553_v63 = vsel %vm1967_vm7, %v9541_v2, %v17522_v43 }
0x109c   :  { %9709 = vmatpush1.bf16.msra.mxu1 %v9429_v22 }
0x109d   :  { %9710 = vmatprep.subr.bf16.mxu1 %v9458_v23 }
0x109e   :  { %v17530_v38 = vpop.permute.xlu0 %9452  ;;  %v9421_v29 = vpop.permute.xlu1 %9420 }
0x109f   :  { %v9459_v15 = vsel %vm1148_vm4, %v17530_v38, %v9443_v18  ;;  %v9367_v18 = vsel %vm425_vm1, %v9355_v12, %v9357_v21 }
0x10a0   :  { %9711 = vmatpush1.bf16.msra.mxu1 %v9459_v15 }
0x10a1   :  { %9712 = vmatprep.subr.bf16.mxu1 %v17348_v27  ;;  %v9523_v27 = vsel %vm1726_vm6, %v9511_v31, %v17497_v5 }
0x10a2   :  { %v9571_v30 = vpop.permute.xlu0 %9570  ;;  %v9449_v32 = vpop.permute.xlu1 %9448 }
0x10a4   :  { %9713 = vmatpush1.bf16.msra.mxu1 %v17329_v45  ;;  %v9524_v45 = vsel %vm1726_vm6, %v17515_v37, %v9511_v31 }
0x10a5   :  { %9714 = vmatprep.subr.bf16.mxu1 %v9493_v19 }
0x10a6   :  { %v17540_v10 = vpop.permute.xlu0 %9568  ;;  %v9485_v25 = vpop.permute.xlu1 %9484 }
0x10a7   :  { %v9584_v2 = vsel %vm2208_vm8, %v17540_v10, %v9571_v30 }
0x10a8   :  { %9715 = vmatpush1.bf16.msra.mxu1 %v9494_v53 }
0x10a9   :  { %9716 = vmatprep.subr.bf16.mxu1 %v9523_v27 }
0x10aa   :  { %v9359_v39 = vpop.permute.xlu0 %9358 }
0x10ab   :  { %v9366_v9 = vsel %vm425_vm1, %v9357_v21, %v9359_v39  ;;  %v9583_v21 = vsel %vm2208_vm8, %v9571_v30, %v17513_v6  ;;  %v9365_v23 = vsel %vm425_vm1, %v9359_v39, %v9361_v44  ;;  %v9427_v30 = vsel %vm907_vm3, %v17511_v33, %v9417_v58 }
0x10ac   :  { %9717 = vmatpush1.bf16.msra.mxu1 %v9524_v45  ;;  %9757 = vmatprep.subr.bf16.mxu0 %v9366_v9 }
0x10ad   :  { %9718 = vmatprep.subr.bf16.mxu1 %v9553_v63  ;;  %9758 = vmatpush1.bf16.msra.mxu0 %v9367_v18 }
0x10ae   :  { %v9387_v59 = vpop.permute.xlu0 %9386 }
0x10af   :  { %v9397_v31 = vsel %vm666_vm2, %v17489_v60, %v9387_v59  ;;  %v9396_v12 = vsel %vm666_vm2, %v9387_v59, %v9389_v48  ;;  %v9364_v60 = vsel %vm425_vm1, %v9361_v44, %v17493_v14  ;;  %v9517_v14 = vpop.permute.xlu1 %9516 }
0x10b0   :  { %9719 = vmatpush1.bf16.msra.mxu1 %v9554_v4  ;;  %9759 = vmatprep.subr.bf16.mxu0 %v9396_v12 }
0x10b1   :  { %9720 = vmatprep.subr.bf16.mxu1 %v9583_v21  ;;  %9760 = vmatpush1.bf16.msra.mxu0 %v9397_v31 }
0x10b2   :  { %v9391_v35 = vpop.permute.xlu0 %9390 }
0x10b3   :  { %v9394_v19 = vsel %vm666_vm2, %v9391_v35, %v9393_v8  ;;  %v9424_v8 = vsel %vm907_vm3, %v9421_v29, %v17499_v50  ;;  %v11779_v50 = vld [vmem:[%s17729_s2 + $0x4] ss:$8 sps:$4 sm:$0xff]  }
0x10b4   :  { %9721 = vmatpush1.bf16.msra.mxu1 %v9584_v2  ;;  %v11781_v2 = vld [vmem:[%s17729_s2 + $0x14] ss:$8 sps:$4 sm:$0xff]  }
0x10b5   :  { %9810 = vmatprep.subr.bf16.mxu1 %v9364_v60 }
0x10b6   :  { %v9419_v22 = vpop.permute.xlu0 %9418 }
0x10b7   :  { %9737 = vmatmul.mubr.bf16.vlgmr.msra.gmra.mrb[80].mxu1 %v17176_v0  ;;  %v9426_v15 = vsel %vm907_vm3, %v9417_v58, %v9419_v22  ;;  %v9395_v0 = vsel %vm666_vm2, %v9389_v48, %v9391_v35  ;;  %v9489_v48 = vpop.permute.xlu1 %9488 }
0x10b8   :  { %9761 = vmatprep.subr.bf16.mxu0 %v9426_v15  ;;  %9811 = vmatpush1.bf16.msra.mxu1 %v9365_v23 }
0x10b9   :  { %9762 = vmatpush1.bf16.msra.mxu0 %v9427_v30  ;;  %9812 = vmatprep.subr.bf16.mxu1 %v9394_v19 }
0x10ba   :  { %v9447_v53 = vpop.permute.xlu0 %9446  ;;  %10407 = vmatprep.mubr.msk.bf16.mxu1 %vm2831_vm0, %v17183_v56  ;;  %v9425_v56 = vsel %vm907_vm3, %v9419_v22, %v9421_v29 }
0x10bb   :  { %v9457_v44 = vsel %vm1148_vm4, %v17491_v61, %v9447_v53  ;;  %v9456_v33 = vsel %vm1148_vm4, %v9447_v53, %v9449_v32  ;;  %v9545_v27 = vpop.permute.xlu1 %9544 }
0x10bc   :  { %9763 = vmatprep.subr.bf16.mxu0 %v9456_v33  ;;  %9813 = vmatpush1.bf16.msra.mxu1 %v9395_v0 }
0x10bd   :  { %9764 = vmatpush1.bf16.msra.mxu0 %v9457_v44  ;;  %9814 = vmatprep.subr.bf16.mxu1 %v9424_v8 }
0x10be   :  { %v9451_v58 = vpop.permute.xlu0 %9450  ;;  %9765 = vmatprep.subr.bf16.mxu0 %v17431_v28 }
0x10bf   :  { %9747 = vmatmul.mubr.bf16.gmra.mrb[84].mxu1 %v17199_v62  ;;  %v9454_v61 = vsel %vm1148_vm4, %v9451_v58, %v17530_v38  ;;  %v9455_v29 = vsel %vm1148_vm4, %v9449_v32, %v9451_v58  ;;  %v9492_v38 = vsel %vm1485_vm5, %v17495_v3, %v9485_v25  ;;  %v9495_v3 = vsel %vm1485_vm5, %v9489_v48, %v17483_v52  ;;  %v9549_v63 = vpop.permute.xlu1 %9548 }
0x10c0   :  { %9815 = vmatpush1.bf16.msra.mxu1 %v9425_v56  ;;  %10410 = vmatprep.mubr.msk.bf16.mxu1 %vm2831_vm0, %v11779_v50  ;;  %v9555_v59 = vsel %vm1967_vm7, %v9549_v63, %v17501_v16 }
0x10c1   :  { %9766 = vmatpush1.bf16.msra.mxu0 %v17399_v36  ;;  %9816 = vmatprep.subr.bf16.mxu1 %v9454_v61 }
0x10c2   :  { %v9487_v28 = vpop.permute.xlu0 %9486 }
0x10c3   :  { %v9491_v62 = vsel %vm1485_vm5, %v9485_v25, %v9487_v28  ;;  %v9577_v4 = vpop.permute.xlu1 %9576 }
0x10c4   :  { %9767 = vmatprep.subr.bf16.mxu0 %v9491_v62  ;;  %9817 = vmatpush1.bf16.msra.mxu1 %v9455_v29 }
0x10c5   :  { %9768 = vmatpush1.bf16.msra.mxu0 %v9492_v38  ;;  %9818 = vmatprep.subr.bf16.mxu1 %v17380_v49  ;;  %v9490_v49 = vsel %vm1485_vm5, %v9487_v28, %v9489_v48 }
0x10c6   :  { %v9515_v39 = vpop.permute.xlu0 %9514 }
0x10c7   :  { %v9522_v36 = vsel %vm1726_vm6, %v17497_v5, %v9515_v39  ;;  %v9521_v45 = vsel %vm1726_vm6, %v9515_v39, %v9517_v14  ;;  %v9552_v5 = vsel %vm1967_vm7, %v17522_v43, %v9545_v27 }
0x10c8   :  { %9769 = vmatprep.subr.bf16.mxu0 %v9521_v45  ;;  %9819 = vmatpush1.bf16.msra.mxu1 %v17425_v7 }
0x10c9   :  { %9770 = vmatpush1.bf16.msra.mxu0 %v9522_v36  ;;  %9820 = vmatprep.subr.bf16.mxu1 %v9495_v3 }
0x10ca   :  { %v9547_v9 = vpop.permute.xlu0 %9546 }
0x10cb   :  { %v9551_v18 = vsel %vm1967_vm7, %v9545_v27, %v9547_v9  ;;  %v9550_v21 = vsel %vm1967_vm7, %v9547_v9, %v9549_v63 }
0x10cc   :  { %9771 = vmatprep.subr.bf16.mxu0 %v9551_v18  ;;  %9821 = vmatpush1.bf16.msra.mxu1 %v9490_v49 }
0x10cd   :  { %9772 = vmatpush1.bf16.msra.mxu0 %v9552_v5 }
0x10ce   :  { %v9519_v7 = vpop.permute.xlu0 %9518 }
0x10cf   :  { %v9520_v52 = vsel %vm1726_vm6, %v9517_v14, %v9519_v7  ;;  %v9525_v32 = vsel %vm1726_vm6, %v9519_v7, %v17515_v37 }
0x10d0   :  { %9822 = vmatprep.subr.bf16.mxu1 %v9525_v32 }
0x10d1   :  { %9823 = vmatpush1.bf16.msra.mxu1 %v9520_v52 }
0x10d2   :  { %v9575_v43 = vpop.permute.xlu0 %9574  ;;  %9824 = vmatprep.subr.bf16.mxu1 %v9555_v59 }
0x10d3   :  { %v9582_v31 = vsel %vm2208_vm8, %v17513_v6, %v9575_v43  ;;  %v9581_v12 = vsel %vm2208_vm8, %v9575_v43, %v9577_v4  ;;  %v11780_v6 = vld [vmem:[%s17729_s2] ss:$8 sps:$4 sm:$0xff]  }
0x10d4   :  { %9773 = vmatprep.subr.bf16.mxu0 %v9581_v12 }
0x10d5   :  { %9774 = vmatpush1.bf16.msra.mxu0 %v9582_v31  ;;  %9825 = vmatpush1.bf16.msra.mxu1 %v9550_v21 }
0x10d6   :  { %v9579_v37 = vpop.permute.xlu0 %9578 }
0x10d7   :  { %v9580_v16 = vsel %vm2208_vm8, %v9577_v4, %v9579_v37  ;;  %v9585_v35 = vsel %vm2208_vm8, %v9579_v37, %v17540_v10 }
0x10d8   :  { %9790 = vmatmul.mubr.bf16.vlgmr.msra.gmra.mrb[88].mxu0 %v11780_v6  ;;  %9826 = vmatprep.subr.bf16.mxu1 %v9585_v35 }
0x10d9   :  { %9827 = vmatpush1.bf16.msra.mxu1 %v9580_v16  ;;  %10409 = vmatprep.mubr.msk.bf16.mxu0 %vm2831_vm0, %v11781_v2 }
0x10dc   :  { %9843 = vmatmul.mubr.bf16.vlgmr.msra.gmra.mrb[88].mxu1 %v11780_v6 }
0x10dd   :  { %10411 = vmatprep.mubr.msk.bf16.mxu1 %vm2831_vm0, %v11781_v2 }
0x10e0   :  { %9800 = vmatmul.mubr.bf16.gmra.mrb[92].mxu0 %v11782_v26 }
0x10e4   :  { %9853 = vmatmul.mubr.bf16.gmra.mrb[92].mxu1 %v11782_v26 }
0x118a   :  { %v9738_v10 = vpop.f32.mrb[80].mxu1 }
0x118b   :  { %v10628_v25 = vadd.f32 %v9738_v10, %v15041_v17  ;;  %v9740_v60 = vpop.f32.mrb[81].mxu1 }
0x118c   :  { %v10629_v22 = vadd.f32 %v9740_v60, %v15041_v17  ;;  %v9742_v23 = vpop.f32.mrb[82].mxu1 }
0x118d   :  { %v10412_v15 = vmul.f32 -1.442695, %v10628_v25  ;;  %v10630_v30 = vadd.f32 %v9742_v23, %v15043_v41  ;;  %v9744_v19 = vpop.f32.mrb[83].mxu1 }
0x118e   :  { %v10413_v14 = vmul.f32 -1.442695, %v10629_v22  ;;  %v10631_v53 = vadd.f32 %v9744_v19, %v15043_v41 }
0x118f   :  { %11638 = vpow2.f32 %v10412_v15  ;;  %v10418_v0 = vmul.f32 -1.442695, %v10630_v30 }
0x1190   :  { %11640 = vpow2.f32 %v10413_v14  ;;  %v10419_v44 = vmul.f32 -1.442695, %v10631_v53 }
0x1191   :  { %11642 = vpow2.f32 %v10418_v0 }
0x1192   :  { %11644 = vpow2.f32 %v10419_v44  ;;  %v9748_v33 = vpop.f32.mrb[84].mxu1 }
0x1193   :  { %v9750_v8 = vpop.f32.mrb[85].mxu1  ;;  %v10632_v58 = vadd.f32 %v9748_v33, %v15049_v20 }
0x1194   :  { %v9752_v56 = vpop.f32.mrb[86].mxu1  ;;  %v10633_v61 = vadd.f32 %v9750_v8, %v15049_v20 }
0x1195   :  { %v10634_v48 = vadd.f32 %v9752_v56, %v15051_v1  ;;  %v9754_v50 = vpop.f32.mrb[87].mxu1  ;;  %11646 = vtanh.f32 %v10632_v58 }
0x1196   :  { %v10635_v28 = vadd.f32 %v9754_v50, %v15051_v1  ;;  %11648 = vtanh.f32 %v10633_v61 }
0x1197   :  { %v10424_v29 = vmul.f32 -1.442695, %v10634_v48 }
0x1198   :  { %v10425_v62 = vmul.f32 -1.442695, %v10635_v28 }
0x1199   :  { %v11639_v38 = vpop.eup %11638  ;;  %11650 = vpow2.f32 %v10424_v29 }
0x119a   :  { %v11641_v27 = vpop.eup %11640  ;;  %v9881_v39 = vadd.f32 1.0, %v11639_v38  ;;  %11652 = vpow2.f32 %v10425_v62 }
0x119b   :  { %v11643_v36 = vpop.eup %11642  ;;  %v9882_v45 = vadd.f32 1.0, %v11641_v27 }
0x119c   :  { %v11645_v3 = vpop.eup %11644  ;;  %11654 = vrcp.f32 %v9881_v39  ;;  %v9917_v9 = vadd.f32 1.0, %v11643_v36 }
0x119d   :  { %11656 = vrcp.f32 %v9882_v45  ;;  %v9918_v49 = vadd.f32 1.0, %v11645_v3 }
0x119e   :  { %11658 = vrcp.f32 %v9917_v9 }
0x119f   :  { %11660 = vrcp.f32 %v9918_v49  ;;  %v11647_v18 = vpop.eup %11646 }
0x11a0   :  { %v11649_v5 = vpop.eup %11648 }
0x11a3   :  { %v11651_v63 = vpop.eup %11650 }
0x11a4   :  { %v11653_v7 = vpop.eup %11652  ;;  %v9959_v4 = vadd.f32 1.0, %v11651_v63 }
0x11a5   :  { %v9960_v12 = vadd.f32 1.0, %v11653_v7 }
0x11a6   :  { %v11655_v52 = vpop.eup %11654  ;;  %11662 = vrcp.f32 %v9959_v4 }
0x11a7   :  { %v11657_v32 = vpop.eup %11656  ;;  %v9989_v59 = vmul.f32 %v11655_v52, %v11647_v18  ;;  %11664 = vrcp.f32 %v9960_v12 }
0x11a8   :  { %v11659_v43 = vpop.eup %11658  ;;  %v9990_v31 = vmul.f32 %v11657_v32, %v11649_v5 }
0x11a9   :  { %v11661_v21 = vpop.eup %11660  ;;  %v9983_v37 = vmul.f32 %v11659_v43, %v17296_v13 }
0x11aa   :  { %v9984_v16 = vmul.f32 %v11661_v21, %v17298_v24 }
0x11ab   :  { %v9995_v35 = vadd.f32 %v9989_v59, %v9983_v37  ;;  %v9791_v6 = vpop.f32.mrb[88].mxu0 }
0x11ac   :  { %v9996_v2 = vadd.f32 %v9990_v31, %v9984_v16  ;;  %v10636_v26 = vadd.f32 %v9791_v6, %v15041_v17  ;;  %v9793_v10 = vpop.f32.mrb[89].mxu0 }
0x11ad   :  { %11666 = vtanh.f32 %v9995_v35  ;;  %10025 = vst [vmem:[%s17733_s6] sm:$0xff] %v9995_v35  ;;  %v10637_v25 = vadd.f32 %v9793_v10, %v15041_v17  ;;  %v9795_v60 = vpop.f32.mrb[90].mxu0 }
0x11ae   :  { %11668 = vtanh.f32 %v9996_v2  ;;  %10026 = vst [vmem:[%s17733_s6 + $0x8] sm:$0xff] %v9996_v2  ;;  %v10414_v13 = vmul.f32 -1.442695, %v10636_v26  ;;  %v10638_v24 = vadd.f32 %v9795_v60, %v15043_v41  ;;  %v9797_v22 = vpop.f32.mrb[91].mxu0 }
0x11af   :  { %v10415_v23 = vmul.f32 -1.442695, %v10637_v25  ;;  %v10639_v15 = vadd.f32 %v9797_v22, %v15043_v41  ;;  %v9844_v30 = vpop.f32.mrb[88].mxu1 }
0x11b0   :  { %11670 = vpow2.f32 %v10414_v13  ;;  %v10420_v19 = vmul.f32 -1.442695, %v10638_v24  ;;  %v10644_v14 = vadd.f32 %v9844_v30, %v15041_v17  ;;  %v9846_v53 = vpop.f32.mrb[89].mxu1  ;;  %v11663_v38 = vpop.eup %11662 }
0x11b1   :  { %11672 = vpow2.f32 %v10415_v23  ;;  %v10421_v0 = vmul.f32 -1.442695, %v10639_v15  ;;  %v10645_v44 = vadd.f32 %v9846_v53, %v15041_v17  ;;  %v9848_v33 = vpop.f32.mrb[90].mxu1  ;;  %v11665_v36 = vpop.eup %11664 }
0x11b2   :  { %11674 = vpow2.f32 %v10420_v19  ;;  %v10416_v8 = vmul.f32 -1.442695, %v10644_v14  ;;  %v10646_v58 = vadd.f32 %v9848_v33, %v15043_v41  ;;  %v9850_v56 = vpop.f32.mrb[91].mxu1 }
0x11b3   :  { %11676 = vpow2.f32 %v10421_v0  ;;  %v10417_v61 = vmul.f32 -1.442695, %v10645_v44  ;;  %v10647_v48 = vadd.f32 %v9850_v56, %v15043_v41  ;;  %v9801_v50 = vpop.f32.mrb[92].mxu0 }
0x11b4   :  { %11678 = vpow2.f32 %v10416_v8  ;;  %v10422_v28 = vmul.f32 -1.442695, %v10646_v58  ;;  %v10640_v29 = vadd.f32 %v9801_v50, %v15049_v20  ;;  %v9803_v62 = vpop.f32.mrb[93].mxu0 }
0x11b5   :  { %11680 = vpow2.f32 %v10417_v61  ;;  %v10423_v27 = vmul.f32 -1.442695, %v10647_v48  ;;  %v10641_v17 = vadd.f32 %v9803_v62, %v15049_v20  ;;  %v9805_v39 = vpop.f32.mrb[94].mxu0 }
0x11b6   :  { %11682 = vpow2.f32 %v10422_v28  ;;  %v10642_v45 = vadd.f32 %v9805_v39, %v15051_v1  ;;  %v9807_v3 = vpop.f32.mrb[95].mxu0 }
0x11b7   :  { %v11667_v9 = vpop.eup %11666  ;;  %11684 = vpow2.f32 %v10423_v27  ;;  %v10643_v41 = vadd.f32 %v9807_v3, %v15051_v1  ;;  %v9854_v49 = vpop.f32.mrb[92].mxu1 }
0x11b8   :  { %v11669_v18 = vpop.eup %11668  ;;  %v10007_v5 = vmul.f32 %v11667_v9, %v11663_v38  ;;  %11686 = vtanh.f32 %v10640_v29  ;;  %v10426_v63 = vmul.f32 -1.442695, %v10642_v45  ;;  %v10648_v7 = vadd.f32 %v9854_v49, %v15049_v20  ;;  %v9856_v52 = vpop.f32.mrb[93].mxu1 }
0x11b9   :  { %v10008_v32 = vmul.f32 %v11669_v18, %v11665_v36  ;;  %11688 = vtanh.f32 %v10641_v17  ;;  %v10427_v59 = vmul.f32 -1.442695, %v10643_v41  ;;  %v9858_v4 = vpop.f32.mrb[94].mxu1  ;;  %v10649_v14 = vadd.f32 %v9856_v52, %v15049_v20 }
0x11ba   :  { %v11671_v43 = vpop.eup %11670  ;;  %v10013_v31 = vmul.f32 %v17311_v34, %v10007_v5  ;;  %11690 = vpow2.f32 %v10426_v63  ;;  %v9860_v12 = vpop.f32.mrb[95].mxu1  ;;  %v10650_v24 = vadd.f32 %v9858_v4, %v15051_v1 }
0x11bb   :  { %v11673_v21 = vpop.eup %11672  ;;  %v10014_v37 = vmul.f32 %v17318_v55, %v10008_v32  ;;  %v9883_v16 = vadd.f32 1.0, %v11671_v43  ;;  %11692 = vpow2.f32 %v10427_v59  ;;  %v10651_v53 = vadd.f32 %v9860_v12, %v15051_v1 }
0x11bc   :  { %v11675_v35 = vpop.eup %11674  ;;  %v10019_v6 = vpack.c.bf16 %v10013_v31, %v10013_v31  ;;  %v9884_v2 = vadd.f32 1.0, %v11673_v21  ;;  %11694 = vtanh.f32 %v10648_v7  ;;  %v10428_v33 = vmul.f32 -1.442695, %v10650_v24 }
0x11bd   :  { %v11677_v26 = vpop.eup %11676  ;;  %v10020_v10 = vpack.c.bf16 %v10014_v37, %v10014_v37  ;;  %v10457_v25 = vpack.c.bf16 %v10014_v37, %v10013_v31  ;;  %11696 = vrcp.f32 %v9883_v16  ;;  %v9919_v60 = vadd.f32 1.0, %v11675_v35 }
0x11be   :  { %v11679_v13 = vpop.eup %11678  ;;  %10031 = vst [vmem:[#allocation5] sm:$0xf] %v10019_v6  ;;  %11698 = vrcp.f32 %v9884_v2  ;;  %v9920_v34 = vadd.f32 1.0, %v11677_v26  ;;  %v10429_v61 = vmul.f32 -1.442695, %v10651_v53 }
0x11bf   :  { %v11681_v22 = vpop.eup %11680  ;;  %10032 = vst [vmem:[#allocation5 + $0x8] sm:$0xf] %v10020_v10  ;;  %10433 = vst [vmem:[%s17732_s5 + $0xa8] sm:$0xff] %v10457_v25  ;;  %11700 = vrcp.f32 %v9919_v60  ;;  %v9885_v55 = vadd.f32 1.0, %v11679_v13 }
0x11c0   :  { %v11683_v23 = vpop.eup %11682  ;;  %11702 = vrcp.f32 %v9920_v34  ;;  %v9886_v15 = vadd.f32 1.0, %v11681_v22 }
0x11c1   :  { %v11685_v30 = vpop.eup %11684  ;;  %11704 = vrcp.f32 %v9885_v55  ;;  %v9921_v19 = vadd.f32 1.0, %v11683_v23 }
0x11c2   :  { %v11687_v0 = vpop.eup %11686  ;;  %11706 = vrcp.f32 %v9886_v15  ;;  %v9922_v44 = vadd.f32 1.0, %v11685_v30 }
0x11c3   :  { %v11689_v8 = vpop.eup %11688  ;;  %11708 = vrcp.f32 %v9921_v19 }
0x11c4   :  { %v11691_v58 = vpop.eup %11690  ;;  %11710 = vrcp.f32 %v9922_v44 }
0x11c5   :  { %v11693_v56 = vpop.eup %11692  ;;  %11712 = vtanh.f32 %v10649_v14  ;;  %v9961_v62 = vadd.f32 1.0, %v11691_v58 }
0x11c6   :  { %v11695_v48 = vpop.eup %11694  ;;  %11714 = vpow2.f32 %v10428_v33  ;;  %v9962_v1 = vadd.f32 1.0, %v11693_v56 }
0x11c7   :  { %v11697_v50 = vpop.eup %11696  ;;  %11716 = vpow2.f32 %v10429_v61 }
0x11c8   :  { %v11699_v28 = vpop.eup %11698  ;;  %v9991_v29 = vmul.f32 %v11697_v50, %v11687_v0  ;;  %11718 = vrcp.f32 %v9961_v62 }
0x11c9   :  { %v11701_v20 = vpop.eup %11700  ;;  %v9992_v38 = vmul.f32 %v11699_v28, %v11689_v8  ;;  %11720 = vrcp.f32 %v9962_v1 }
0x11ca   :  { %v11703_v27 = vpop.eup %11702  ;;  %v9985_v17 = vmul.f32 %v11701_v20, %v17371_v54 }
0x11cb   :  { %v11705_v39 = vpop.eup %11704  ;;  %v9986_v36 = vmul.f32 %v11703_v27, %v17376_v57 }
0x11cc   :  { %v11707_v45 = vpop.eup %11706  ;;  %v9997_v3 = vadd.f32 %v9991_v29, %v9985_v17  ;;  %v9993_v9 = vmul.f32 %v11705_v39, %v11695_v48 }
0x11cd   :  { %v11709_v41 = vpop.eup %11708  ;;  %v9998_v49 = vadd.f32 %v9992_v38, %v9986_v36 }
0x11ce   :  { %v11711_v18 = vpop.eup %11710  ;;  %v9987_v5 = vmul.f32 %v11709_v41, %v17343_v42  ;;  %11722 = vtanh.f32 %v9997_v3  ;;  %10027 = vst [vmem:[%s17733_s6 + $0x10] sm:$0xff] %v9997_v3 }
0x11cf   :  { %v11713_v63 = vpop.eup %11712  ;;  %v9988_v54 = vmul.f32 %v11711_v18, %v17345_v46  ;;  %11724 = vtanh.f32 %v9998_v49  ;;  %10028 = vst [vmem:[%s17733_s6 + $0x18] sm:$0xff] %v9998_v49 }
0x11d0   :  { %v11715_v57 = vpop.eup %11714  ;;  %v9999_v7 = vadd.f32 %v9993_v9, %v9987_v5  ;;  %v9994_v52 = vmul.f32 %v11713_v63, %v11707_v45 }
0x11d1   :  { %v9963_v32 = vadd.f32 1.0, %v11715_v57  ;;  %v11717_v59 = vpop.eup %11716 }
0x11d2   :  { %11726 = vtanh.f32 %v9999_v7  ;;  %10029 = vst [vmem:[%s17733_s6 + $0x20] sm:$0xff] %v9999_v7  ;;  %v10000_v42 = vadd.f32 %v9994_v52, %v9988_v54  ;;  %v9964_v46 = vadd.f32 1.0, %v11717_v59  ;;  %v11719_v4 = vpop.eup %11718 }
0x11d3   :  { %11728 = vrcp.f32 %v9963_v32  ;;  %v11721_v43 = vpop.eup %11720 }
0x11d4   :  { %11730 = vtanh.f32 %v10000_v42  ;;  %10030 = vst [vmem:[%s17733_s6 + $0x28] sm:$0xff] %v10000_v42 }
0x11d5   :  { %11732 = vrcp.f32 %v9964_v46 }
0x11d8   :  { %v11723_v31 = vpop.eup %11722 }
0x11d9   :  { %v11725_v12 = vpop.eup %11724  ;;  %v10009_v21 = vmul.f32 %v11723_v31, %v11719_v4 }
0x11da   :  { %v10010_v37 = vmul.f32 %v11725_v12, %v11721_v43 }
0x11db   :  { %v10015_v16 = vmul.f32 %v17387_v47, %v10009_v21 }
0x11dc   :  { %v11727_v35 = vpop.eup %11726  ;;  %v10016_v6 = vmul.f32 %v17393_v51, %v10010_v37 }
0x11dd   :  { %v11729_v2 = vpop.eup %11728  ;;  %v10021_v26 = vpack.c.bf16 %v10015_v16, %v10015_v16 }
0x11de   :  { %v11731_v10 = vpop.eup %11730  ;;  %v10022_v25 = vpack.c.bf16 %v10016_v6, %v10016_v6  ;;  %v10458_v60 = vpack.c.bf16 %v10016_v6, %v10015_v16  ;;  %v10011_v13 = vmul.f32 %v11729_v2, %v11727_v35 }
0x11df   :  { %10033 = vst [vmem:[#allocation5 + $0x10] sm:$0xf] %v10021_v26  ;;  %v11733_v34 = vpop.eup %11732 }
0x11e0   :  { %10034 = vst [vmem:[#allocation5 + $0x18] sm:$0xf] %v10022_v25  ;;  %10434 = vst [vmem:[%s17732_s5 + $0xb0] sm:$0xff] %v10458_v60  ;;  %v10017_v24 = vmul.f32 %v17360_v11, %v10011_v13  ;;  %v10012_v22 = vmul.f32 %v11733_v34, %v11731_v10 }
0x11e2   :  { %v10023_v47 = vpack.c.bf16 %v10017_v24, %v10017_v24  ;;  %v10018_v55 = vmul.f32 %v17366_v40, %v10012_v22 }
0x11e4   :  { %10035 = vst [vmem:[#allocation5 + $0x20] sm:$0xf] %v10023_v47  ;;  %v10024_v51 = vpack.c.bf16 %v10018_v55, %v10018_v55  ;;  %v10459_v23 = vpack.c.bf16 %v10018_v55, %v10017_v24 }
0x11e6   :  { %10036 = vst [vmem:[#allocation5 + $0x28] sm:$0xf] %v10024_v51  ;;  %10435 = vst [vmem:[%s17732_s5 + $0xb8] sm:$0xff] %v10459_v23 }

</bundles_post_ra>
